<compile_context>
chip_gen: v7x
topology: tpu7x:2x2x1
jax: 0.10.0
libtpu: 0.0.40
codegen_flags: <defaults>
</compile_context>

<pallas_src>
import functools
import math

import numpy as np
import jax
import jax.numpy as jnp
from jax.experimental import pallas as pl
from jax.experimental.pallas import tpu as pltpu


# ----------------------------------------------------------------------------
# Trace-time (numpy) constant spatial operators
# ----------------------------------------------------------------------------
def _cubic_w(t, A=-0.75):
    t = abs(t)
    if t <= 1.0:
        return ((A + 2.0) * t - (A + 3.0)) * t * t + 1.0
    if t < 2.0:
        return A * (((t - 5.0) * t + 8.0) * t - 4.0)
    return 0.0


def bicubic_matrix(in_size, out_size):
    """F.interpolate(mode='bicubic', align_corners=False) as an (out,in) matrix."""
    M = np.zeros((out_size, in_size), np.float64)
    sc = in_size / out_size
    for i in range(out_size):
        src = (i + 0.5) * sc - 0.5
        fl = int(math.floor(src))
        t = src - fl
        idxs = [fl - 1, fl, fl + 1, fl + 2]
        wts = [_cubic_w(t + 1.0), _cubic_w(t), _cubic_w(1.0 - t), _cubic_w(2.0 - t)]
        for j, wgt in zip(idxs, wts):
            M[i, min(max(j, 0), in_size - 1)] += wgt
    return M


def avgpool_matrix(in_size, k, s):
    out = (in_size - k) // s + 1
    M = np.zeros((out, in_size), np.float64)
    for i in range(out):
        M[i, i * s:i * s + k] = 1.0 / k
    return M


def conv3x3_tap_operator(H, W):
    """(HW, 9*HW): column block k is the shift operator S_k for 3x3/s1/pad1."""
    HW = H * W
    op = np.zeros((HW, 9 * HW), np.float32)
    for ky in range(3):
        for kx in range(3):
            k = ky * 3 + kx
            for i in range(H):
                si = i + ky - 1
                if si < 0 or si >= H:
                    continue
                for j in range(W):
                    sj = j + kx - 1
                    if sj < 0 or sj >= W:
                        continue
                    op[si * W + sj, k * HW + i * W + j] = 1.0
    return op


def conv3x3_s2_tap_operator(H, W, np_pad):
    """(HW, 9*np_pad) tap operator for 3x3/stride-2/pad-0 (ESA conv2).

    Padded output columns (q >= Ho*Wo) replicate output 0 so that a max over
    the full padded width equals the max over the real outputs."""
    Ho = (H - 3) // 2 + 1
    Wo = (W - 3) // 2 + 1
    HW = H * W
    op = np.zeros((HW, 9 * np_pad), np.float32)
    for ky in range(3):
        for kx in range(3):
            k = ky * 3 + kx
            for i in range(Ho):
                for j in range(Wo):
                    op[(2 * i + ky) * W + (2 * j + kx), k * np_pad + i * Wo + j] = 1.0
            for q in range(Ho * Wo, np_pad):
                op[ky * W + kx, k * np_pad + q] = 1.0
    return op, Ho, Wo


# Order in which packed weights are passed to the kernel (all 2-D arrays).
WEIGHT_KEYS = (
    "b_conv1_w", "b_conv1_b", "b_conv2_w", "b_conv2_b",
    "h_conv3_w", "h_conv3_b", "h_updown_w", "h_updown_b",
    "h_pa_w", "h_pa_b", "h_sca_w", "h_sca_b",
    "h_conv1_w", "h_conv1_b", "h_conv3l_w", "h_conv3l_b",
    "l_fc1_w", "l_fc1_b", "l_dw_w", "l_dw_b",
    "fc_w_hi", "fc_w_lo", "fc_b",
    "esa_conv1_w", "esa_conv1_b", "esa_conv2_w", "esa_conv2_b",
    "esa_convmax_w", "esa_convmax_b", "esa_conv3_w", "esa_conv3_b",
    "esa_conv3p_w", "esa_conv3p_b", "esa_convf_w", "esa_convf_b",
    "esa_conv4_w", "esa_conv4_b",
)


# ----------------------------------------------------------------------------
# In-kernel helpers (VMEM-resident values, channels-first (C, M))
# ----------------------------------------------------------------------------
def _cmix(w_oi, x, b=None, act=None):
    """1x1 conv as VPU broadcast-MACs.  w_oi: (Cout, Cin), x: (Cin, M)."""
    cin, m = x.shape
    cout = w_oi.shape[0]
    acc = jnp.zeros((cout, m), jnp.float32)
    for ci in range(cin):
        acc = acc + w_oi[:, ci:ci + 1] * x[ci:ci + 1, :]   # (Cout,1)*(1,M)
    if b is not None:
        acc = acc + b
    if act == "sigmoid":
        acc = jax.nn.sigmoid(acc)
    elif act == "relu":
        acc = jnp.maximum(acc, 0.0)
    return acc


def _conv_from_taps(taps, w_o_9i, b_col, cin, hw):
    """Combine 9 gathered taps with the packed 3x3 weights.

    taps: (Cin, 9*hw), w_o_9i: (Cout, 9*Cin) with column index k*Cin+ci."""
    cout = w_o_9i.shape[0]
    acc = jnp.zeros((cout, hw), jnp.float32) + b_col
    for k in range(9):
        tk = taps[:, k * hw:(k + 1) * hw]
        for ci in range(cin):
            col = k * cin + ci
            acc = acc + w_o_9i[:, col:col + 1] * tk[ci:ci + 1, :]
    return acc


def _dw_from_taps(taps, w_c9, b_col, hw):
    """Depthwise 3x3.  taps: (C, 9*hw), w_c9: (C, 9)."""
    c = w_c9.shape[0]
    acc = jnp.zeros((c, hw), jnp.float32) + b_col
    for k in range(9):
        acc = acc + w_c9[:, k:k + 1] * taps[:, k * hw:(k + 1) * hw]
    return acc


# ----------------------------------------------------------------------------
# The single fused kernel
# ----------------------------------------------------------------------------
def _make_block_kernel(HW, NP, c, f):
    n_const = 4
    n_in = n_const + len(WEIGHT_KEYS)

    def kernel(*refs):
        x_ref, taps_ref, taps2_ref, khw_ref = refs[0], refs[1], refs[2], refs[3]
        w = {k: refs[n_const + i][...] for i, k in enumerate(WEIGHT_KEYS)}
        out_ref = refs[n_in]

        x = x_ref[...]                    # (C, HW)  one image, channels-first
        taps_op = taps_ref[...]           # (HW, 9*HW)   3x3/s1/pad1 tap gather
        taps2_op = taps2_ref[...]         # (HW, 9*NP)   3x3/s2/pad0 tap gather
        khw = khw_ref[...]                # (HW, HW)     bicubic-up + avgpool

        # ---- channel split ----
        x1 = _cmix(w["b_conv1_w"], x, w["b_conv1_b"])
        x2 = _cmix(w["b_conv2_w"], x, w["b_conv2_b"])

        # ---- high branch ----
        t1 = jnp.dot(x1, taps_op, preferred_element_type=jnp.float32)
        out_h = _conv_from_taps(t1, w["h_conv3_w"], w["h_conv3_b"], c, HW)
        dn = jnp.dot(x1, khw, preferred_element_type=jnp.float32)     # up+avgpool
        dn = _cmix(w["h_updown_w"], dn, w["h_updown_b"])              # 1x1 commutes
        hi = x1 - dn
        # TODO(synk): atten.PA / atten.SCA not provided -> standard definitions.
        pa = hi * _cmix(w["h_pa_w"], hi, w["h_pa_b"], act="sigmoid")
        g = _cmix(w["h_sca_w"], jnp.mean(hi, axis=-1, keepdims=True), w["h_sca_b"])
        att = _cmix(w["h_conv1_w"], pa + hi * g, w["h_conv1_b"], act="sigmoid")
        gated = att * out_h
        tg = jnp.dot(gated, taps_op, preferred_element_type=jnp.float32)
        high_out = _conv_from_taps(tg, w["h_conv3l_w"], w["h_conv3l_b"], c, HW)

        # ---- low branch ----
        y2 = _cmix(w["l_fc1_w"], x2, w["l_fc1_b"])
        ty = jnp.dot(y2, taps_op, preferred_element_type=jnp.float32)
        low_out = _dw_from_taps(ty, w["l_dw_w"], w["l_dw_b"], HW)

        # ---- fc on concat([high, low]): concat folded into two 1x1 mixes ----
        xfc = (_cmix(w["fc_w_hi"], high_out)
               + _cmix(w["fc_w_lo"], low_out) + w["fc_b"])

        # ---- ESA ----  TODO(synk): atten.ESA not provided -> RFDN/RLFN ESA.
        c1_ = _cmix(w["esa_conv1_w"], xfc, w["esa_conv1_b"])            # (f, HW)
        t2 = jnp.dot(c1_, taps2_op, preferred_element_type=jnp.float32)
        c1s = _conv_from_taps(t2, w["esa_conv2_w"], w["esa_conv2_b"], f, NP)
        # max_pool2d(k=7, s=3) on the 7x7 stride-2 map covers it -> global max.
        v_max = jnp.max(c1s, axis=-1, keepdims=True)                    # (f, 1)
        # conv_max / conv3 / conv3_ act on a 1x1 map: with pad=1 only the centre
        # tap contributes, so they reduce to 1x1 convs (centre-tap weights).
        v_range = _cmix(w["esa_convmax_w"], v_max, w["esa_convmax_b"], act="relu")
        c3 = _cmix(w["esa_conv3_w"], v_range, w["esa_conv3_b"], act="relu")
        c3 = _cmix(w["esa_conv3p_w"], c3, w["esa_conv3p_b"])            # (f, 1)
        # bilinear upsample of a 1x1 map to HxW == broadcast (implicit below).
        cf = _cmix(w["esa_convf_w"], c1_, w["esa_convf_b"])             # (f, HW)
        m = _cmix(w["esa_conv4_w"], cf + c3, w["esa_conv4_b"], act="sigmoid")

        # ESA gate + residual, single lane-dense store.
        out_ref[...] = (xfc * m + x).astype(out_ref.dtype)

    return kernel


# ----------------------------------------------------------------------------
# Wrapper: NCHW in / NCHW out, weight packing, constant operators, pallas_call
# ----------------------------------------------------------------------------
def block_forward(x_nchw, params, scale):
    if isinstance(scale, (tuple, list)):
        scale = scale[0]
    N, C, H, W = x_nchw.shape
    assert C % 4 == 0
    c = C // 2
    f = C // 4
    HW = H * W
    NP = 128                              # padded (lane-aligned) ESA conv2 width
    assert HW % 128 == 0, "pixel axis must be lane-dense (multiple of 128)"

    # --- trace-time constants -------------------------------------------------
    taps_np = conv3x3_tap_operator(H, W)
    taps2_np, Ho, Wo = conv3x3_s2_tap_operator(H, W, NP)
    # TODO(synk): the ESA 7x7/stride-3 max-pool is lowered as a global max,
    # exact only when the pooled map is 7x7 (i.e. H == W == 16).
    assert Ho == 7 and Wo == 7
    Mdh = avgpool_matrix(H * scale, scale, scale) @ bicubic_matrix(H, H * scale)
    Mdw = avgpool_matrix(W * scale, scale, scale) @ bicubic_matrix(W, W * scale)
    khw_np = np.kron(Mdh, Mdw).T.astype(np.float32)                 # (HW, HW)

    taps_op = jnp.asarray(taps_np)
    taps2_op = jnp.asarray(taps2_np)
    khw = jnp.asarray(khw_np)

    # --- pack weights (all 2-D, channels-first friendly) -----------------------
    def f32(a):
        return jnp.asarray(a, jnp.float32)

    def w1x1(wt):                       # (Cout, Cin)
        return f32(wt)

    def bcol(b):                        # (Cout, 1)
        return f32(b).reshape(-1, 1)

    def w3x3(wt):                       # (Cout, Cin, 3, 3) -> (Cout, 9*Cin)
        co, ci = wt.shape[0], wt.shape[1]
        return f32(wt).transpose(0, 2, 3, 1).reshape(co, 9 * ci)

    def wdw(wt):                        # (C, 1, 3, 3) -> (C, 9)
        return f32(wt).reshape(wt.shape[0], 9)

    def wcenter(wt):                    # centre tap of a 3x3 -> (Cout, Cin)
        return f32(wt[:, :, 1, 1])

    p = params
    prep = {
        "b_conv1_w": w1x1(p["b_conv1_w"]), "b_conv1_b": bcol(p["b_conv1_b"]),
        "b_conv2_w": w1x1(p["b_conv2_w"]), "b_conv2_b": bcol(p["b_conv2_b"]),
        "h_conv3_w": w3x3(p["h_conv3_w"]), "h_conv3_b": bcol(p["h_conv3_b"]),
        "h_updown_w": w1x1(p["h_updown_w"]), "h_updown_b": bcol(p["h_updown_b"]),
        "h_pa_w": w1x1(p["h_pa_w"]), "h_pa_b": bcol(p["h_pa_b"]),
        "h_sca_w": w1x1(p["h_sca_w"]), "h_sca_b": bcol(p["h_sca_b"]),
        "h_conv1_w": w1x1(p["h_conv1_w"]), "h_conv1_b": bcol(p["h_conv1_b"]),
        "h_conv3l_w": w3x3(p["h_conv3l_w"]), "h_conv3l_b": bcol(p["h_conv3l_b"]),
        "l_fc1_w": w1x1(p["l_fc1_w"]), "l_fc1_b": bcol(p["l_fc1_b"]),
        "l_dw_w": wdw(p["l_dw_w"]), "l_dw_b": bcol(p["l_dw_b"]),
        "fc_w_hi": w1x1(p["fc_w"][:, :c]),
        "fc_w_lo": w1x1(p["fc_w"][:, c:]),
        "fc_b": bcol(p["fc_b"]),
        "esa_conv1_w": w1x1(p["esa_conv1_w"]), "esa_conv1_b": bcol(p["esa_conv1_b"]),
        "esa_conv2_w": w3x3(p["esa_conv2_w"]), "esa_conv2_b": bcol(p["esa_conv2_b"]),
        "esa_convmax_w": wcenter(p["esa_convmax_w"]),
        "esa_convmax_b": bcol(p["esa_convmax_b"]),
        "esa_conv3_w": wcenter(p["esa_conv3_w"]),
        "esa_conv3_b": bcol(p["esa_conv3_b"]),
        "esa_conv3p_w": wcenter(p["esa_conv3p_w"]),
        "esa_conv3p_b": bcol(p["esa_conv3p_b"]),
        "esa_convf_w": w1x1(p["esa_convf_w"]), "esa_convf_b": bcol(p["esa_convf_b"]),
        "esa_conv4_w": w1x1(p["esa_conv4_w"]), "esa_conv4_b": bcol(p["esa_conv4_b"]),
    }

    # --- channels-first, lane-dense kernel input --------------------------------
    x_cm = jnp.transpose(x_nchw, (1, 0, 2, 3)).reshape(C, N * HW).astype(jnp.float32)

    def _full_spec(arr):
        shape = tuple(int(s) for s in arr.shape)
        zeros = (0,) * len(shape)
        return pl.BlockSpec(shape, lambda n, _z=zeros: _z)

    in_specs = [pl.BlockSpec((C, HW), lambda n: (0, n)),   # x : one image per step
                _full_spec(taps_op), _full_spec(taps2_op), _full_spec(khw)]
    in_specs += [_full_spec(prep[k]) for k in WEIGHT_KEYS]

    y = pl.pallas_call(
        _make_block_kernel(HW, NP, c, f),
        grid=(N,),
        in_specs=in_specs,
        out_specs=pl.BlockSpec((C, HW), lambda n: (0, n)),
        out_shape=jax.ShapeDtypeStruct((C, N * HW), jnp.float32),
        compiler_params=pltpu.CompilerParams(
            dimension_semantics=("parallel",),
            vmem_limit_bytes=32 * 1024 * 1024),
    )(x_cm, taps_op, taps2_op, khw, *[prep[k] for k in WEIGHT_KEYS])

    return jnp.transpose(y.reshape(C, N, H, W), (1, 0, 2, 3))     # -> NCHW


# ----------------------------------------------------------------------------
# Deterministic synthetic parameters (PyTorch-style shapes)
# ----------------------------------------------------------------------------
def make_params(in_channel):
    C = in_channel
    c = C // 2
    f = C // 4
    key = [jax.random.PRNGKey(0)]

    def nxt(shape, s=0.1):
        key[0], sub = jax.random.split(key[0])
        return jax.random.normal(sub, shape, jnp.float32) * s

    p = {}
    p["b_conv1_w"] = nxt((c, C)); p["b_conv1_b"] = nxt((c,))
    p["b_conv2_w"] = nxt((c, C)); p["b_conv2_b"] = nxt((c,))
    p["h_updown_w"] = nxt((c, c)); p["h_updown_b"] = nxt((c,))
    p["h_sca_w"] = nxt((c, c)); p["h_sca_b"] = nxt((c,))
    p["h_pa_w"] = nxt((c, c)); p["h_pa_b"] = nxt((c,))
    p["h_conv1_w"] = nxt((c, c)); p["h_conv1_b"] = nxt((c,))
    p["h_conv3_w"] = nxt((c, c, 3, 3)); p["h_conv3_b"] = nxt((c,))
    p["h_conv3l_w"] = nxt((c, c, 3, 3)); p["h_conv3l_b"] = nxt((c,))
    p["l_fc1_w"] = nxt((c, c)); p["l_fc1_b"] = nxt((c,))
    p["l_dw_w"] = nxt((c, 1, 3, 3)); p["l_dw_b"] = nxt((c,))
    p["fc_w"] = nxt((C, C)); p["fc_b"] = nxt((C,))
    p["esa_conv1_w"] = nxt((f, C)); p["esa_conv1_b"] = nxt((f,))
    p["esa_convf_w"] = nxt((f, f)); p["esa_convf_b"] = nxt((f,))
    p["esa_conv2_w"] = nxt((f, f, 3, 3)); p["esa_conv2_b"] = nxt((f,))
    p["esa_convmax_w"] = nxt((f, f, 3, 3)); p["esa_convmax_b"] = nxt((f,))
    p["esa_conv3_w"] = nxt((f, f, 3, 3)); p["esa_conv3_b"] = nxt((f,))
    p["esa_conv3p_w"] = nxt((f, f, 3, 3)); p["esa_conv3p_b"] = nxt((f,))
    p["esa_conv4_w"] = nxt((C, f)); p["esa_conv4_b"] = nxt((C,))
    return p


# ----------------------------------------------------------------------------
if __name__ == "__main__":
    N, C, H, W = 2, 8, 16, 16        # in_channel = 8 -> branch channels 4
    scale = 2                        # args.scale[0] == scale == 2
    x = jax.random.normal(jax.random.PRNGKey(0), (N, C, H, W), jnp.float32)
    params = make_params(C)

    fwd = jax.jit(functools.partial(block_forward, scale=scale))
    out = jax.block_until_ready(fwd(x, params))
    assert out.shape == (N, C, H, W) and out.dtype == jnp.float32
    assert bool(jnp.all(jnp.isfinite(out)))
    print("KERNEL_OK")
</pallas_src>

<mosaic_0001>
module attributes {stable_mosaic.version = 11 : i64} {
  func.func @kernel(%arg0: i32, %arg1: memref<8x256xf32, #tpu.memory_space<vmem>>, %arg2: memref<256x2304xf32, #tpu.memory_space<vmem>>, %arg3: memref<256x1152xf32, #tpu.memory_space<vmem>>, %arg4: memref<256x256xf32, #tpu.memory_space<vmem>>, %arg5: memref<4x8xf32, #tpu.memory_space<vmem>>, %arg6: memref<4x1xf32, #tpu.memory_space<vmem>>, %arg7: memref<4x8xf32, #tpu.memory_space<vmem>>, %arg8: memref<4x1xf32, #tpu.memory_space<vmem>>, %arg9: memref<4x36xf32, #tpu.memory_space<vmem>>, %arg10: memref<4x1xf32, #tpu.memory_space<vmem>>, %arg11: memref<4x4xf32, #tpu.memory_space<vmem>>, %arg12: memref<4x1xf32, #tpu.memory_space<vmem>>, %arg13: memref<4x4xf32, #tpu.memory_space<vmem>>, %arg14: memref<4x1xf32, #tpu.memory_space<vmem>>, %arg15: memref<4x4xf32, #tpu.memory_space<vmem>>, %arg16: memref<4x1xf32, #tpu.memory_space<vmem>>, %arg17: memref<4x4xf32, #tpu.memory_space<vmem>>, %arg18: memref<4x1xf32, #tpu.memory_space<vmem>>, %arg19: memref<4x36xf32, #tpu.memory_space<vmem>>, %arg20: memref<4x1xf32, #tpu.memory_space<vmem>>, %arg21: memref<4x4xf32, #tpu.memory_space<vmem>>, %arg22: memref<4x1xf32, #tpu.memory_space<vmem>>, %arg23: memref<4x9xf32, #tpu.memory_space<vmem>>, %arg24: memref<4x1xf32, #tpu.memory_space<vmem>>, %arg25: memref<8x4xf32, #tpu.memory_space<vmem>>, %arg26: memref<8x4xf32, #tpu.memory_space<vmem>>, %arg27: memref<8x1xf32, #tpu.memory_space<vmem>>, %arg28: memref<2x8xf32, #tpu.memory_space<vmem>>, %arg29: memref<2x1xf32, #tpu.memory_space<vmem>>, %arg30: memref<2x18xf32, #tpu.memory_space<vmem>>, %arg31: memref<2x1xf32, #tpu.memory_space<vmem>>, %arg32: memref<2x2xf32, #tpu.memory_space<vmem>>, %arg33: memref<2x1xf32, #tpu.memory_space<vmem>>, %arg34: memref<2x2xf32, #tpu.memory_space<vmem>>, %arg35: memref<2x1xf32, #tpu.memory_space<vmem>>, %arg36: memref<2x2xf32, #tpu.memory_space<vmem>>, %arg37: memref<2x1xf32, #tpu.memory_space<vmem>>, %arg38: memref<2x2xf32, #tpu.memory_space<vmem>>, %arg39: memref<2x1xf32, #tpu.memory_space<vmem>>, %arg40: memref<8x2xf32, #tpu.memory_space<vmem>>, %arg41: memref<8x1xf32, #tpu.memory_space<vmem>>, %arg42: memref<8x256xf32, #tpu.memory_space<vmem>>) attributes {dimension_semantics = [#tpu.dimension_semantics<parallel>], iteration_bounds = array<i64: 2>, scalar_prefetch = 0 : i64, scratch_operands = 0 : i64, tpu.core_type = #tpu.core_type<tc>, window_params = [{transform_indices = @transform_0, window_bounds = array<i64: 8, 256>}, {pipeline_mode = #tpu.pipeline_mode<synchronous>, transform_indices = @transform_1, window_bounds = array<i64: 256, 2304>}, {pipeline_mode = #tpu.pipeline_mode<synchronous>, transform_indices = @transform_2, window_bounds = array<i64: 256, 1152>}, {pipeline_mode = #tpu.pipeline_mode<synchronous>, transform_indices = @transform_3, window_bounds = array<i64: 256, 256>}, {pipeline_mode = #tpu.pipeline_mode<synchronous>, transform_indices = @transform_4, window_bounds = array<i64: 4, 8>}, {pipeline_mode = #tpu.pipeline_mode<synchronous>, transform_indices = @transform_5, window_bounds = array<i64: 4, 1>}, {pipeline_mode = #tpu.pipeline_mode<synchronous>, transform_indices = @transform_6, window_bounds = array<i64: 4, 8>}, {pipeline_mode = #tpu.pipeline_mode<synchronous>, transform_indices = @transform_7, window_bounds = array<i64: 4, 1>}, {pipeline_mode = #tpu.pipeline_mode<synchronous>, transform_indices = @transform_8, window_bounds = array<i64: 4, 36>}, {pipeline_mode = #tpu.pipeline_mode<synchronous>, transform_indices = @transform_9, window_bounds = array<i64: 4, 1>}, {pipeline_mode = #tpu.pipeline_mode<synchronous>, transform_indices = @transform_10, window_bounds = array<i64: 4, 4>}, {pipeline_mode = #tpu.pipeline_mode<synchronous>, transform_indices = @transform_11, window_bounds = array<i64: 4, 1>}, {pipeline_mode = #tpu.pipeline_mode<synchronous>, transform_indices = @transform_12, window_bounds = array<i64: 4, 4>}, {pipeline_mode = #tpu.pipeline_mode<synchronous>, transform_indices = @transform_13, window_bounds = array<i64: 4, 1>}, {pipeline_mode = #tpu.pipeline_mode<synchronous>, transform_indices = @transform_14, window_bounds = array<i64: 4, 4>}, {pipeline_mode = #tpu.pipeline_mode<synchronous>, transform_indices = @transform_15, window_bounds = array<i64: 4, 1>}, {pipeline_mode = #tpu.pipeline_mode<synchronous>, transform_indices = @transform_16, window_bounds = array<i64: 4, 4>}, {pipeline_mode = #tpu.pipeline_mode<synchronous>, transform_indices = @transform_17, window_bounds = array<i64: 4, 1>}, {pipeline_mode = #tpu.pipeline_mode<synchronous>, transform_indices = @transform_18, window_bounds = array<i64: 4, 36>}, {pipeline_mode = #tpu.pipeline_mode<synchronous>, transform_indices = @transform_19, window_bounds = array<i64: 4, 1>}, {pipeline_mode = #tpu.pipeline_mode<synchronous>, transform_indices = @transform_20, window_bounds = array<i64: 4, 4>}, {pipeline_mode = #tpu.pipeline_mode<synchronous>, transform_indices = @transform_21, window_bounds = array<i64: 4, 1>}, {pipeline_mode = #tpu.pipeline_mode<synchronous>, transform_indices = @transform_22, window_bounds = array<i64: 4, 9>}, {pipeline_mode = #tpu.pipeline_mode<synchronous>, transform_indices = @transform_23, window_bounds = array<i64: 4, 1>}, {pipeline_mode = #tpu.pipeline_mode<synchronous>, transform_indices = @transform_24, window_bounds = array<i64: 8, 4>}, {pipeline_mode = #tpu.pipeline_mode<synchronous>, transform_indices = @transform_25, window_bounds = array<i64: 8, 4>}, {pipeline_mode = #tpu.pipeline_mode<synchronous>, transform_indices = @transform_26, window_bounds = array<i64: 8, 1>}, {pipeline_mode = #tpu.pipeline_mode<synchronous>, transform_indices = @transform_27, window_bounds = array<i64: 2, 8>}, {pipeline_mode = #tpu.pipeline_mode<synchronous>, transform_indices = @transform_28, window_bounds = array<i64: 2, 1>}, {pipeline_mode = #tpu.pipeline_mode<synchronous>, transform_indices = @transform_29, window_bounds = array<i64: 2, 18>}, {pipeline_mode = #tpu.pipeline_mode<synchronous>, transform_indices = @transform_30, window_bounds = array<i64: 2, 1>}, {pipeline_mode = #tpu.pipeline_mode<synchronous>, transform_indices = @transform_31, window_bounds = array<i64: 2, 2>}, {pipeline_mode = #tpu.pipeline_mode<synchronous>, transform_indices = @transform_32, window_bounds = array<i64: 2, 1>}, {pipeline_mode = #tpu.pipeline_mode<synchronous>, transform_indices = @transform_33, window_bounds = array<i64: 2, 2>}, {pipeline_mode = #tpu.pipeline_mode<synchronous>, transform_indices = @transform_34, window_bounds = array<i64: 2, 1>}, {pipeline_mode = #tpu.pipeline_mode<synchronous>, transform_indices = @transform_35, window_bounds = array<i64: 2, 2>}, {pipeline_mode = #tpu.pipeline_mode<synchronous>, transform_indices = @transform_36, window_bounds = array<i64: 2, 1>}, {pipeline_mode = #tpu.pipeline_mode<synchronous>, transform_indices = @transform_37, window_bounds = array<i64: 2, 2>}, {pipeline_mode = #tpu.pipeline_mode<synchronous>, transform_indices = @transform_38, window_bounds = array<i64: 2, 1>}, {pipeline_mode = #tpu.pipeline_mode<synchronous>, transform_indices = @transform_39, window_bounds = array<i64: 8, 2>}, {pipeline_mode = #tpu.pipeline_mode<synchronous>, transform_indices = @transform_40, window_bounds = array<i64: 8, 1>}, {transform_indices = @transform_41, window_bounds = array<i64: 8, 256>}]} {
    %c0 = arith.constant 0 : index
    %c0_0 = arith.constant 0 : index
    %0 = vector.load %arg5[%c0, %c0_0] : memref<4x8xf32, #tpu.memory_space<vmem>>, vector<4x8xf32>
    %c0_1 = arith.constant 0 : index
    %c0_2 = arith.constant 0 : index
    %1 = vector.load %arg6[%c0_1, %c0_2] : memref<4x1xf32, #tpu.memory_space<vmem>>, vector<4x1xf32>
    %c0_3 = arith.constant 0 : index
    %c0_4 = arith.constant 0 : index
    %2 = vector.load %arg7[%c0_3, %c0_4] : memref<4x8xf32, #tpu.memory_space<vmem>>, vector<4x8xf32>
    %c0_5 = arith.constant 0 : index
    %c0_6 = arith.constant 0 : index
    %3 = vector.load %arg8[%c0_5, %c0_6] : memref<4x1xf32, #tpu.memory_space<vmem>>, vector<4x1xf32>
    %c0_7 = arith.constant 0 : index
    %c0_8 = arith.constant 0 : index
    %4 = vector.load %arg9[%c0_7, %c0_8] : memref<4x36xf32, #tpu.memory_space<vmem>>, vector<4x36xf32>
    %c0_9 = arith.constant 0 : index
    %c0_10 = arith.constant 0 : index
    %5 = vector.load %arg10[%c0_9, %c0_10] : memref<4x1xf32, #tpu.memory_space<vmem>>, vector<4x1xf32>
    %c0_11 = arith.constant 0 : index
    %c0_12 = arith.constant 0 : index
    %6 = vector.load %arg11[%c0_11, %c0_12] : memref<4x4xf32, #tpu.memory_space<vmem>>, vector<4x4xf32>
    %c0_13 = arith.constant 0 : index
    %c0_14 = arith.constant 0 : index
    %7 = vector.load %arg12[%c0_13, %c0_14] : memref<4x1xf32, #tpu.memory_space<vmem>>, vector<4x1xf32>
    %c0_15 = arith.constant 0 : index
    %c0_16 = arith.constant 0 : index
    %8 = vector.load %arg13[%c0_15, %c0_16] : memref<4x4xf32, #tpu.memory_space<vmem>>, vector<4x4xf32>
    %c0_17 = arith.constant 0 : index
    %c0_18 = arith.constant 0 : index
    %9 = vector.load %arg14[%c0_17, %c0_18] : memref<4x1xf32, #tpu.memory_space<vmem>>, vector<4x1xf32>
    %c0_19 = arith.constant 0 : index
    %c0_20 = arith.constant 0 : index
    %10 = vector.load %arg15[%c0_19, %c0_20] : memref<4x4xf32, #tpu.memory_space<vmem>>, vector<4x4xf32>
    %c0_21 = arith.constant 0 : index
    %c0_22 = arith.constant 0 : index
    %11 = vector.load %arg16[%c0_21, %c0_22] : memref<4x1xf32, #tpu.memory_space<vmem>>, vector<4x1xf32>
    %c0_23 = arith.constant 0 : index
    %c0_24 = arith.constant 0 : index
    %12 = vector.load %arg17[%c0_23, %c0_24] : memref<4x4xf32, #tpu.memory_space<vmem>>, vector<4x4xf32>
    %c0_25 = arith.constant 0 : index
    %c0_26 = arith.constant 0 : index
    %13 = vector.load %arg18[%c0_25, %c0_26] : memref<4x1xf32, #tpu.memory_space<vmem>>, vector<4x1xf32>
    %c0_27 = arith.constant 0 : index
    %c0_28 = arith.constant 0 : index
    %14 = vector.load %arg19[%c0_27, %c0_28] : memref<4x36xf32, #tpu.memory_space<vmem>>, vector<4x36xf32>
    %c0_29 = arith.constant 0 : index
    %c0_30 = arith.constant 0 : index
    %15 = vector.load %arg20[%c0_29, %c0_30] : memref<4x1xf32, #tpu.memory_space<vmem>>, vector<4x1xf32>
    %c0_31 = arith.constant 0 : index
    %c0_32 = arith.constant 0 : index
    %16 = vector.load %arg21[%c0_31, %c0_32] : memref<4x4xf32, #tpu.memory_space<vmem>>, vector<4x4xf32>
    %c0_33 = arith.constant 0 : index
    %c0_34 = arith.constant 0 : index
    %17 = vector.load %arg22[%c0_33, %c0_34] : memref<4x1xf32, #tpu.memory_space<vmem>>, vector<4x1xf32>
    %c0_35 = arith.constant 0 : index
    %c0_36 = arith.constant 0 : index
    %18 = vector.load %arg23[%c0_35, %c0_36] : memref<4x9xf32, #tpu.memory_space<vmem>>, vector<4x9xf32>
    %c0_37 = arith.constant 0 : index
    %c0_38 = arith.constant 0 : index
    %19 = vector.load %arg24[%c0_37, %c0_38] : memref<4x1xf32, #tpu.memory_space<vmem>>, vector<4x1xf32>
    %c0_39 = arith.constant 0 : index
    %c0_40 = arith.constant 0 : index
    %20 = vector.load %arg25[%c0_39, %c0_40] : memref<8x4xf32, #tpu.memory_space<vmem>>, vector<8x4xf32>
    %c0_41 = arith.constant 0 : index
    %c0_42 = arith.constant 0 : index
    %21 = vector.load %arg26[%c0_41, %c0_42] : memref<8x4xf32, #tpu.memory_space<vmem>>, vector<8x4xf32>
    %c0_43 = arith.constant 0 : index
    %c0_44 = arith.constant 0 : index
    %22 = vector.load %arg27[%c0_43, %c0_44] : memref<8x1xf32, #tpu.memory_space<vmem>>, vector<8x1xf32>
    %c0_45 = arith.constant 0 : index
    %c0_46 = arith.constant 0 : index
    %23 = vector.load %arg28[%c0_45, %c0_46] : memref<2x8xf32, #tpu.memory_space<vmem>>, vector<2x8xf32>
    %c0_47 = arith.constant 0 : index
    %c0_48 = arith.constant 0 : index
    %24 = vector.load %arg29[%c0_47, %c0_48] : memref<2x1xf32, #tpu.memory_space<vmem>>, vector<2x1xf32>
    %c0_49 = arith.constant 0 : index
    %c0_50 = arith.constant 0 : index
    %25 = vector.load %arg30[%c0_49, %c0_50] : memref<2x18xf32, #tpu.memory_space<vmem>>, vector<2x18xf32>
    %c0_51 = arith.constant 0 : index
    %c0_52 = arith.constant 0 : index
    %26 = vector.load %arg31[%c0_51, %c0_52] : memref<2x1xf32, #tpu.memory_space<vmem>>, vector<2x1xf32>
    %c0_53 = arith.constant 0 : index
    %c0_54 = arith.constant 0 : index
    %27 = vector.load %arg32[%c0_53, %c0_54] : memref<2x2xf32, #tpu.memory_space<vmem>>, vector<2x2xf32>
    %c0_55 = arith.constant 0 : index
    %c0_56 = arith.constant 0 : index
    %28 = vector.load %arg33[%c0_55, %c0_56] : memref<2x1xf32, #tpu.memory_space<vmem>>, vector<2x1xf32>
    %c0_57 = arith.constant 0 : index
    %c0_58 = arith.constant 0 : index
    %29 = vector.load %arg34[%c0_57, %c0_58] : memref<2x2xf32, #tpu.memory_space<vmem>>, vector<2x2xf32>
    %c0_59 = arith.constant 0 : index
    %c0_60 = arith.constant 0 : index
    %30 = vector.load %arg35[%c0_59, %c0_60] : memref<2x1xf32, #tpu.memory_space<vmem>>, vector<2x1xf32>
    %c0_61 = arith.constant 0 : index
    %c0_62 = arith.constant 0 : index
    %31 = vector.load %arg36[%c0_61, %c0_62] : memref<2x2xf32, #tpu.memory_space<vmem>>, vector<2x2xf32>
    %c0_63 = arith.constant 0 : index
    %c0_64 = arith.constant 0 : index
    %32 = vector.load %arg37[%c0_63, %c0_64] : memref<2x1xf32, #tpu.memory_space<vmem>>, vector<2x1xf32>
    %c0_65 = arith.constant 0 : index
    %c0_66 = arith.constant 0 : index
    %33 = vector.load %arg38[%c0_65, %c0_66] : memref<2x2xf32, #tpu.memory_space<vmem>>, vector<2x2xf32>
    %c0_67 = arith.constant 0 : index
    %c0_68 = arith.constant 0 : index
    %34 = vector.load %arg39[%c0_67, %c0_68] : memref<2x1xf32, #tpu.memory_space<vmem>>, vector<2x1xf32>
    %c0_69 = arith.constant 0 : index
    %c0_70 = arith.constant 0 : index
    %35 = vector.load %arg40[%c0_69, %c0_70] : memref<8x2xf32, #tpu.memory_space<vmem>>, vector<8x2xf32>
    %c0_71 = arith.constant 0 : index
    %c0_72 = arith.constant 0 : index
    %36 = vector.load %arg41[%c0_71, %c0_72] : memref<8x1xf32, #tpu.memory_space<vmem>>, vector<8x1xf32>
    %c0_73 = arith.constant 0 : index
    %c0_74 = arith.constant 0 : index
    %37 = vector.load %arg1[%c0_73, %c0_74] : memref<8x256xf32, #tpu.memory_space<vmem>>, vector<8x256xf32>
    %c0_75 = arith.constant 0 : index
    %c0_76 = arith.constant 0 : index
    %38 = vector.load %arg2[%c0_75, %c0_76] : memref<256x2304xf32, #tpu.memory_space<vmem>>, vector<256x2304xf32>
    %c0_77 = arith.constant 0 : index
    %c0_78 = arith.constant 0 : index
    %39 = vector.load %arg3[%c0_77, %c0_78] : memref<256x1152xf32, #tpu.memory_space<vmem>>, vector<256x1152xf32>
    %c0_79 = arith.constant 0 : index
    %c0_80 = arith.constant 0 : index
    %40 = vector.load %arg4[%c0_79, %c0_80] : memref<256x256xf32, #tpu.memory_space<vmem>>, vector<256x256xf32>
    %cst = arith.constant 0.000000e+00 : f32
    %41 = vector.broadcast %cst : f32 to vector<4x256xf32>
    %42 = vector.extract_strided_slice %0 {offsets = [0, 0], sizes = [4, 1], strides = [1, 1]} : vector<4x8xf32> to vector<4x1xf32>
    %43 = vector.extract_strided_slice %37 {offsets = [0, 0], sizes = [1, 256], strides = [1, 1]} : vector<8x256xf32> to vector<1x256xf32>
    %44 = vector.broadcast %42 : vector<4x1xf32> to vector<4x256xf32>
    %45 = vector.broadcast %43 : vector<1x256xf32> to vector<4x256xf32>
    %46 = arith.mulf %44, %45 : vector<4x256xf32>
    %47 = arith.addf %41, %46 : vector<4x256xf32>
    %48 = vector.extract_strided_slice %0 {offsets = [0, 1], sizes = [4, 1], strides = [1, 1]} : vector<4x8xf32> to vector<4x1xf32>
    %49 = vector.extract_strided_slice %37 {offsets = [1, 0], sizes = [1, 256], strides = [1, 1]} : vector<8x256xf32> to vector<1x256xf32>
    %50 = vector.broadcast %48 : vector<4x1xf32> to vector<4x256xf32>
    %51 = vector.broadcast %49 : vector<1x256xf32> to vector<4x256xf32>
    %52 = arith.mulf %50, %51 : vector<4x256xf32>
    %53 = arith.addf %47, %52 : vector<4x256xf32>
    %54 = vector.extract_strided_slice %0 {offsets = [0, 2], sizes = [4, 1], strides = [1, 1]} : vector<4x8xf32> to vector<4x1xf32>
    %55 = vector.extract_strided_slice %37 {offsets = [2, 0], sizes = [1, 256], strides = [1, 1]} : vector<8x256xf32> to vector<1x256xf32>
    %56 = vector.broadcast %54 : vector<4x1xf32> to vector<4x256xf32>
    %57 = vector.broadcast %55 : vector<1x256xf32> to vector<4x256xf32>
    %58 = arith.mulf %56, %57 : vector<4x256xf32>
    %59 = arith.addf %53, %58 : vector<4x256xf32>
    %60 = vector.extract_strided_slice %0 {offsets = [0, 3], sizes = [4, 1], strides = [1, 1]} : vector<4x8xf32> to vector<4x1xf32>
    %61 = vector.extract_strided_slice %37 {offsets = [3, 0], sizes = [1, 256], strides = [1, 1]} : vector<8x256xf32> to vector<1x256xf32>
    %62 = vector.broadcast %60 : vector<4x1xf32> to vector<4x256xf32>
    %63 = vector.broadcast %61 : vector<1x256xf32> to vector<4x256xf32>
    %64 = arith.mulf %62, %63 : vector<4x256xf32>
    %65 = arith.addf %59, %64 : vector<4x256xf32>
    %66 = vector.extract_strided_slice %0 {offsets = [0, 4], sizes = [4, 1], strides = [1, 1]} : vector<4x8xf32> to vector<4x1xf32>
    %67 = vector.extract_strided_slice %37 {offsets = [4, 0], sizes = [1, 256], strides = [1, 1]} : vector<8x256xf32> to vector<1x256xf32>
    %68 = vector.broadcast %66 : vector<4x1xf32> to vector<4x256xf32>
    %69 = vector.broadcast %67 : vector<1x256xf32> to vector<4x256xf32>
    %70 = arith.mulf %68, %69 : vector<4x256xf32>
    %71 = arith.addf %65, %70 : vector<4x256xf32>
    %72 = vector.extract_strided_slice %0 {offsets = [0, 5], sizes = [4, 1], strides = [1, 1]} : vector<4x8xf32> to vector<4x1xf32>
    %73 = vector.extract_strided_slice %37 {offsets = [5, 0], sizes = [1, 256], strides = [1, 1]} : vector<8x256xf32> to vector<1x256xf32>
    %74 = vector.broadcast %72 : vector<4x1xf32> to vector<4x256xf32>
    %75 = vector.broadcast %73 : vector<1x256xf32> to vector<4x256xf32>
    %76 = arith.mulf %74, %75 : vector<4x256xf32>
    %77 = arith.addf %71, %76 : vector<4x256xf32>
    %78 = vector.extract_strided_slice %0 {offsets = [0, 6], sizes = [4, 1], strides = [1, 1]} : vector<4x8xf32> to vector<4x1xf32>
    %79 = vector.extract_strided_slice %37 {offsets = [6, 0], sizes = [1, 256], strides = [1, 1]} : vector<8x256xf32> to vector<1x256xf32>
    %80 = vector.broadcast %78 : vector<4x1xf32> to vector<4x256xf32>
    %81 = vector.broadcast %79 : vector<1x256xf32> to vector<4x256xf32>
    %82 = arith.mulf %80, %81 : vector<4x256xf32>
    %83 = arith.addf %77, %82 : vector<4x256xf32>
    %84 = vector.extract_strided_slice %0 {offsets = [0, 7], sizes = [4, 1], strides = [1, 1]} : vector<4x8xf32> to vector<4x1xf32>
    %85 = vector.extract_strided_slice %37 {offsets = [7, 0], sizes = [1, 256], strides = [1, 1]} : vector<8x256xf32> to vector<1x256xf32>
    %86 = vector.broadcast %84 : vector<4x1xf32> to vector<4x256xf32>
    %87 = vector.broadcast %85 : vector<1x256xf32> to vector<4x256xf32>
    %88 = arith.mulf %86, %87 : vector<4x256xf32>
    %89 = arith.addf %83, %88 : vector<4x256xf32>
    %90 = vector.broadcast %1 : vector<4x1xf32> to vector<4x256xf32>
    %91 = arith.addf %89, %90 : vector<4x256xf32>
    %cst_81 = arith.constant 0.000000e+00 : f32
    %92 = vector.broadcast %cst_81 : f32 to vector<4x256xf32>
    %93 = vector.extract_strided_slice %2 {offsets = [0, 0], sizes = [4, 1], strides = [1, 1]} : vector<4x8xf32> to vector<4x1xf32>
    %94 = vector.extract_strided_slice %37 {offsets = [0, 0], sizes = [1, 256], strides = [1, 1]} : vector<8x256xf32> to vector<1x256xf32>
    %95 = vector.broadcast %93 : vector<4x1xf32> to vector<4x256xf32>
    %96 = vector.broadcast %94 : vector<1x256xf32> to vector<4x256xf32>
    %97 = arith.mulf %95, %96 : vector<4x256xf32>
    %98 = arith.addf %92, %97 : vector<4x256xf32>
    %99 = vector.extract_strided_slice %2 {offsets = [0, 1], sizes = [4, 1], strides = [1, 1]} : vector<4x8xf32> to vector<4x1xf32>
    %100 = vector.extract_strided_slice %37 {offsets = [1, 0], sizes = [1, 256], strides = [1, 1]} : vector<8x256xf32> to vector<1x256xf32>
    %101 = vector.broadcast %99 : vector<4x1xf32> to vector<4x256xf32>
    %102 = vector.broadcast %100 : vector<1x256xf32> to vector<4x256xf32>
    %103 = arith.mulf %101, %102 : vector<4x256xf32>
    %104 = arith.addf %98, %103 : vector<4x256xf32>
    %105 = vector.extract_strided_slice %2 {offsets = [0, 2], sizes = [4, 1], strides = [1, 1]} : vector<4x8xf32> to vector<4x1xf32>
    %106 = vector.extract_strided_slice %37 {offsets = [2, 0], sizes = [1, 256], strides = [1, 1]} : vector<8x256xf32> to vector<1x256xf32>
    %107 = vector.broadcast %105 : vector<4x1xf32> to vector<4x256xf32>
    %108 = vector.broadcast %106 : vector<1x256xf32> to vector<4x256xf32>
    %109 = arith.mulf %107, %108 : vector<4x256xf32>
    %110 = arith.addf %104, %109 : vector<4x256xf32>
    %111 = vector.extract_strided_slice %2 {offsets = [0, 3], sizes = [4, 1], strides = [1, 1]} : vector<4x8xf32> to vector<4x1xf32>
    %112 = vector.extract_strided_slice %37 {offsets = [3, 0], sizes = [1, 256], strides = [1, 1]} : vector<8x256xf32> to vector<1x256xf32>
    %113 = vector.broadcast %111 : vector<4x1xf32> to vector<4x256xf32>
    %114 = vector.broadcast %112 : vector<1x256xf32> to vector<4x256xf32>
    %115 = arith.mulf %113, %114 : vector<4x256xf32>
    %116 = arith.addf %110, %115 : vector<4x256xf32>
    %117 = vector.extract_strided_slice %2 {offsets = [0, 4], sizes = [4, 1], strides = [1, 1]} : vector<4x8xf32> to vector<4x1xf32>
    %118 = vector.extract_strided_slice %37 {offsets = [4, 0], sizes = [1, 256], strides = [1, 1]} : vector<8x256xf32> to vector<1x256xf32>
    %119 = vector.broadcast %117 : vector<4x1xf32> to vector<4x256xf32>
    %120 = vector.broadcast %118 : vector<1x256xf32> to vector<4x256xf32>
    %121 = arith.mulf %119, %120 : vector<4x256xf32>
    %122 = arith.addf %116, %121 : vector<4x256xf32>
    %123 = vector.extract_strided_slice %2 {offsets = [0, 5], sizes = [4, 1], strides = [1, 1]} : vector<4x8xf32> to vector<4x1xf32>
    %124 = vector.extract_strided_slice %37 {offsets = [5, 0], sizes = [1, 256], strides = [1, 1]} : vector<8x256xf32> to vector<1x256xf32>
    %125 = vector.broadcast %123 : vector<4x1xf32> to vector<4x256xf32>
    %126 = vector.broadcast %124 : vector<1x256xf32> to vector<4x256xf32>
    %127 = arith.mulf %125, %126 : vector<4x256xf32>
    %128 = arith.addf %122, %127 : vector<4x256xf32>
    %129 = vector.extract_strided_slice %2 {offsets = [0, 6], sizes = [4, 1], strides = [1, 1]} : vector<4x8xf32> to vector<4x1xf32>
    %130 = vector.extract_strided_slice %37 {offsets = [6, 0], sizes = [1, 256], strides = [1, 1]} : vector<8x256xf32> to vector<1x256xf32>
    %131 = vector.broadcast %129 : vector<4x1xf32> to vector<4x256xf32>
    %132 = vector.broadcast %130 : vector<1x256xf32> to vector<4x256xf32>
    %133 = arith.mulf %131, %132 : vector<4x256xf32>
    %134 = arith.addf %128, %133 : vector<4x256xf32>
    %135 = vector.extract_strided_slice %2 {offsets = [0, 7], sizes = [4, 1], strides = [1, 1]} : vector<4x8xf32> to vector<4x1xf32>
    %136 = vector.extract_strided_slice %37 {offsets = [7, 0], sizes = [1, 256], strides = [1, 1]} : vector<8x256xf32> to vector<1x256xf32>
    %137 = vector.broadcast %135 : vector<4x1xf32> to vector<4x256xf32>
    %138 = vector.broadcast %136 : vector<1x256xf32> to vector<4x256xf32>
    %139 = arith.mulf %137, %138 : vector<4x256xf32>
    %140 = arith.addf %134, %139 : vector<4x256xf32>
    %141 = vector.broadcast %3 : vector<4x1xf32> to vector<4x256xf32>
    %142 = arith.addf %140, %141 : vector<4x256xf32>
    %cst_82 = arith.constant dense<0.000000e+00> : vector<4x2304xf32>
    %143 = tpu.matmul %91, %38, %cst_82 {dimension_numbers = #tpu.dot_dimension_numbers<[1], [0], [0], [1], [0, 0, 1, 1], [], []>} : vector<4x256xf32>, vector<256x2304xf32>, vector<4x2304xf32> -> vector<4x2304xf32>
    %cst_83 = arith.constant 0.000000e+00 : f32
    %144 = vector.broadcast %cst_83 : f32 to vector<4x256xf32>
    %145 = vector.broadcast %5 : vector<4x1xf32> to vector<4x256xf32>
    %146 = arith.addf %144, %145 : vector<4x256xf32>
    %147 = vector.extract_strided_slice %143 {offsets = [0, 0], sizes = [4, 256], strides = [1, 1]} : vector<4x2304xf32> to vector<4x256xf32>
    %148 = vector.extract_strided_slice %4 {offsets = [0, 0], sizes = [4, 1], strides = [1, 1]} : vector<4x36xf32> to vector<4x1xf32>
    %149 = vector.extract_strided_slice %147 {offsets = [0, 0], sizes = [1, 256], strides = [1, 1]} : vector<4x256xf32> to vector<1x256xf32>
    %150 = vector.broadcast %148 : vector<4x1xf32> to vector<4x256xf32>
    %151 = vector.broadcast %149 : vector<1x256xf32> to vector<4x256xf32>
    %152 = arith.mulf %150, %151 : vector<4x256xf32>
    %153 = arith.addf %146, %152 : vector<4x256xf32>
    %154 = vector.extract_strided_slice %4 {offsets = [0, 1], sizes = [4, 1], strides = [1, 1]} : vector<4x36xf32> to vector<4x1xf32>
    %155 = vector.extract_strided_slice %147 {offsets = [1, 0], sizes = [1, 256], strides = [1, 1]} : vector<4x256xf32> to vector<1x256xf32>
    %156 = vector.broadcast %154 : vector<4x1xf32> to vector<4x256xf32>
    %157 = vector.broadcast %155 : vector<1x256xf32> to vector<4x256xf32>
    %158 = arith.mulf %156, %157 : vector<4x256xf32>
    %159 = arith.addf %153, %158 : vector<4x256xf32>
    %160 = vector.extract_strided_slice %4 {offsets = [0, 2], sizes = [4, 1], strides = [1, 1]} : vector<4x36xf32> to vector<4x1xf32>
    %161 = vector.extract_strided_slice %147 {offsets = [2, 0], sizes = [1, 256], strides = [1, 1]} : vector<4x256xf32> to vector<1x256xf32>
    %162 = vector.broadcast %160 : vector<4x1xf32> to vector<4x256xf32>
    %163 = vector.broadcast %161 : vector<1x256xf32> to vector<4x256xf32>
    %164 = arith.mulf %162, %163 : vector<4x256xf32>
    %165 = arith.addf %159, %164 : vector<4x256xf32>
    %166 = vector.extract_strided_slice %4 {offsets = [0, 3], sizes = [4, 1], strides = [1, 1]} : vector<4x36xf32> to vector<4x1xf32>
    %167 = vector.extract_strided_slice %147 {offsets = [3, 0], sizes = [1, 256], strides = [1, 1]} : vector<4x256xf32> to vector<1x256xf32>
    %168 = vector.broadcast %166 : vector<4x1xf32> to vector<4x256xf32>
    %169 = vector.broadcast %167 : vector<1x256xf32> to vector<4x256xf32>
    %170 = arith.mulf %168, %169 : vector<4x256xf32>
    %171 = arith.addf %165, %170 : vector<4x256xf32>
    %172 = vector.extract_strided_slice %143 {offsets = [0, 256], sizes = [4, 256], strides = [1, 1]} : vector<4x2304xf32> to vector<4x256xf32>
    %173 = vector.extract_strided_slice %4 {offsets = [0, 4], sizes = [4, 1], strides = [1, 1]} : vector<4x36xf32> to vector<4x1xf32>
    %174 = vector.extract_strided_slice %172 {offsets = [0, 0], sizes = [1, 256], strides = [1, 1]} : vector<4x256xf32> to vector<1x256xf32>
    %175 = vector.broadcast %173 : vector<4x1xf32> to vector<4x256xf32>
    %176 = vector.broadcast %174 : vector<1x256xf32> to vector<4x256xf32>
    %177 = arith.mulf %175, %176 : vector<4x256xf32>
    %178 = arith.addf %171, %177 : vector<4x256xf32>
    %179 = vector.extract_strided_slice %4 {offsets = [0, 5], sizes = [4, 1], strides = [1, 1]} : vector<4x36xf32> to vector<4x1xf32>
    %180 = vector.extract_strided_slice %172 {offsets = [1, 0], sizes = [1, 256], strides = [1, 1]} : vector<4x256xf32> to vector<1x256xf32>
    %181 = vector.broadcast %179 : vector<4x1xf32> to vector<4x256xf32>
    %182 = vector.broadcast %180 : vector<1x256xf32> to vector<4x256xf32>
    %183 = arith.mulf %181, %182 : vector<4x256xf32>
    %184 = arith.addf %178, %183 : vector<4x256xf32>
    %185 = vector.extract_strided_slice %4 {offsets = [0, 6], sizes = [4, 1], strides = [1, 1]} : vector<4x36xf32> to vector<4x1xf32>
    %186 = vector.extract_strided_slice %172 {offsets = [2, 0], sizes = [1, 256], strides = [1, 1]} : vector<4x256xf32> to vector<1x256xf32>
    %187 = vector.broadcast %185 : vector<4x1xf32> to vector<4x256xf32>
    %188 = vector.broadcast %186 : vector<1x256xf32> to vector<4x256xf32>
    %189 = arith.mulf %187, %188 : vector<4x256xf32>
    %190 = arith.addf %184, %189 : vector<4x256xf32>
    %191 = vector.extract_strided_slice %4 {offsets = [0, 7], sizes = [4, 1], strides = [1, 1]} : vector<4x36xf32> to vector<4x1xf32>
    %192 = vector.extract_strided_slice %172 {offsets = [3, 0], sizes = [1, 256], strides = [1, 1]} : vector<4x256xf32> to vector<1x256xf32>
    %193 = vector.broadcast %191 : vector<4x1xf32> to vector<4x256xf32>
    %194 = vector.broadcast %192 : vector<1x256xf32> to vector<4x256xf32>
    %195 = arith.mulf %193, %194 : vector<4x256xf32>
    %196 = arith.addf %190, %195 : vector<4x256xf32>
    %197 = vector.extract_strided_slice %143 {offsets = [0, 512], sizes = [4, 256], strides = [1, 1]} : vector<4x2304xf32> to vector<4x256xf32>
    %198 = vector.extract_strided_slice %4 {offsets = [0, 8], sizes = [4, 1], strides = [1, 1]} : vector<4x36xf32> to vector<4x1xf32>
    %199 = vector.extract_strided_slice %197 {offsets = [0, 0], sizes = [1, 256], strides = [1, 1]} : vector<4x256xf32> to vector<1x256xf32>
    %200 = vector.broadcast %198 : vector<4x1xf32> to vector<4x256xf32>
    %201 = vector.broadcast %199 : vector<1x256xf32> to vector<4x256xf32>
    %202 = arith.mulf %200, %201 : vector<4x256xf32>
    %203 = arith.addf %196, %202 : vector<4x256xf32>
    %204 = vector.extract_strided_slice %4 {offsets = [0, 9], sizes = [4, 1], strides = [1, 1]} : vector<4x36xf32> to vector<4x1xf32>
    %205 = vector.extract_strided_slice %197 {offsets = [1, 0], sizes = [1, 256], strides = [1, 1]} : vector<4x256xf32> to vector<1x256xf32>
    %206 = vector.broadcast %204 : vector<4x1xf32> to vector<4x256xf32>
    %207 = vector.broadcast %205 : vector<1x256xf32> to vector<4x256xf32>
    %208 = arith.mulf %206, %207 : vector<4x256xf32>
    %209 = arith.addf %203, %208 : vector<4x256xf32>
    %210 = vector.extract_strided_slice %4 {offsets = [0, 10], sizes = [4, 1], strides = [1, 1]} : vector<4x36xf32> to vector<4x1xf32>
    %211 = vector.extract_strided_slice %197 {offsets = [2, 0], sizes = [1, 256], strides = [1, 1]} : vector<4x256xf32> to vector<1x256xf32>
    %212 = vector.broadcast %210 : vector<4x1xf32> to vector<4x256xf32>
    %213 = vector.broadcast %211 : vector<1x256xf32> to vector<4x256xf32>
    %214 = arith.mulf %212, %213 : vector<4x256xf32>
    %215 = arith.addf %209, %214 : vector<4x256xf32>
    %216 = vector.extract_strided_slice %4 {offsets = [0, 11], sizes = [4, 1], strides = [1, 1]} : vector<4x36xf32> to vector<4x1xf32>
    %217 = vector.extract_strided_slice %197 {offsets = [3, 0], sizes = [1, 256], strides = [1, 1]} : vector<4x256xf32> to vector<1x256xf32>
    %218 = vector.broadcast %216 : vector<4x1xf32> to vector<4x256xf32>
    %219 = vector.broadcast %217 : vector<1x256xf32> to vector<4x256xf32>
    %220 = arith.mulf %218, %219 : vector<4x256xf32>
    %221 = arith.addf %215, %220 : vector<4x256xf32>
    %222 = vector.extract_strided_slice %143 {offsets = [0, 768], sizes = [4, 256], strides = [1, 1]} : vector<4x2304xf32> to vector<4x256xf32>
    %223 = vector.extract_strided_slice %4 {offsets = [0, 12], sizes = [4, 1], strides = [1, 1]} : vector<4x36xf32> to vector<4x1xf32>
    %224 = vector.extract_strided_slice %222 {offsets = [0, 0], sizes = [1, 256], strides = [1, 1]} : vector<4x256xf32> to vector<1x256xf32>
    %225 = vector.broadcast %223 : vector<4x1xf32> to vector<4x256xf32>
    %226 = vector.broadcast %224 : vector<1x256xf32> to vector<4x256xf32>
    %227 = arith.mulf %225, %226 : vector<4x256xf32>
    %228 = arith.addf %221, %227 : vector<4x256xf32>
    %229 = vector.extract_strided_slice %4 {offsets = [0, 13], sizes = [4, 1], strides = [1, 1]} : vector<4x36xf32> to vector<4x1xf32>
    %230 = vector.extract_strided_slice %222 {offsets = [1, 0], sizes = [1, 256], strides = [1, 1]} : vector<4x256xf32> to vector<1x256xf32>
    %231 = vector.broadcast %229 : vector<4x1xf32> to vector<4x256xf32>
    %232 = vector.broadcast %230 : vector<1x256xf32> to vector<4x256xf32>
    %233 = arith.mulf %231, %232 : vector<4x256xf32>
    %234 = arith.addf %228, %233 : vector<4x256xf32>
    %235 = vector.extract_strided_slice %4 {offsets = [0, 14], sizes = [4, 1], strides = [1, 1]} : vector<4x36xf32> to vector<4x1xf32>
    %236 = vector.extract_strided_slice %222 {offsets = [2, 0], sizes = [1, 256], strides = [1, 1]} : vector<4x256xf32> to vector<1x256xf32>
    %237 = vector.broadcast %235 : vector<4x1xf32> to vector<4x256xf32>
    %238 = vector.broadcast %236 : vector<1x256xf32> to vector<4x256xf32>
    %239 = arith.mulf %237, %238 : vector<4x256xf32>
    %240 = arith.addf %234, %239 : vector<4x256xf32>
    %241 = vector.extract_strided_slice %4 {offsets = [0, 15], sizes = [4, 1], strides = [1, 1]} : vector<4x36xf32> to vector<4x1xf32>
    %242 = vector.extract_strided_slice %222 {offsets = [3, 0], sizes = [1, 256], strides = [1, 1]} : vector<4x256xf32> to vector<1x256xf32>
    %243 = vector.broadcast %241 : vector<4x1xf32> to vector<4x256xf32>
    %244 = vector.broadcast %242 : vector<1x256xf32> to vector<4x256xf32>
    %245 = arith.mulf %243, %244 : vector<4x256xf32>
    %246 = arith.addf %240, %245 : vector<4x256xf32>
    %247 = vector.extract_strided_slice %143 {offsets = [0, 1024], sizes = [4, 256], strides = [1, 1]} : vector<4x2304xf32> to vector<4x256xf32>
    %248 = vector.extract_strided_slice %4 {offsets = [0, 16], sizes = [4, 1], strides = [1, 1]} : vector<4x36xf32> to vector<4x1xf32>
    %249 = vector.extract_strided_slice %247 {offsets = [0, 0], sizes = [1, 256], strides = [1, 1]} : vector<4x256xf32> to vector<1x256xf32>
    %250 = vector.broadcast %248 : vector<4x1xf32> to vector<4x256xf32>
    %251 = vector.broadcast %249 : vector<1x256xf32> to vector<4x256xf32>
    %252 = arith.mulf %250, %251 : vector<4x256xf32>
    %253 = arith.addf %246, %252 : vector<4x256xf32>
    %254 = vector.extract_strided_slice %4 {offsets = [0, 17], sizes = [4, 1], strides = [1, 1]} : vector<4x36xf32> to vector<4x1xf32>
    %255 = vector.extract_strided_slice %247 {offsets = [1, 0], sizes = [1, 256], strides = [1, 1]} : vector<4x256xf32> to vector<1x256xf32>
    %256 = vector.broadcast %254 : vector<4x1xf32> to vector<4x256xf32>
    %257 = vector.broadcast %255 : vector<1x256xf32> to vector<4x256xf32>
    %258 = arith.mulf %256, %257 : vector<4x256xf32>
    %259 = arith.addf %253, %258 : vector<4x256xf32>
    %260 = vector.extract_strided_slice %4 {offsets = [0, 18], sizes = [4, 1], strides = [1, 1]} : vector<4x36xf32> to vector<4x1xf32>
    %261 = vector.extract_strided_slice %247 {offsets = [2, 0], sizes = [1, 256], strides = [1, 1]} : vector<4x256xf32> to vector<1x256xf32>
    %262 = vector.broadcast %260 : vector<4x1xf32> to vector<4x256xf32>
    %263 = vector.broadcast %261 : vector<1x256xf32> to vector<4x256xf32>
    %264 = arith.mulf %262, %263 : vector<4x256xf32>
    %265 = arith.addf %259, %264 : vector<4x256xf32>
    %266 = vector.extract_strided_slice %4 {offsets = [0, 19], sizes = [4, 1], strides = [1, 1]} : vector<4x36xf32> to vector<4x1xf32>
    %267 = vector.extract_strided_slice %247 {offsets = [3, 0], sizes = [1, 256], strides = [1, 1]} : vector<4x256xf32> to vector<1x256xf32>
    %268 = vector.broadcast %266 : vector<4x1xf32> to vector<4x256xf32>
    %269 = vector.broadcast %267 : vector<1x256xf32> to vector<4x256xf32>
    %270 = arith.mulf %268, %269 : vector<4x256xf32>
    %271 = arith.addf %265, %270 : vector<4x256xf32>
    %272 = vector.extract_strided_slice %143 {offsets = [0, 1280], sizes = [4, 256], strides = [1, 1]} : vector<4x2304xf32> to vector<4x256xf32>
    %273 = vector.extract_strided_slice %4 {offsets = [0, 20], sizes = [4, 1], strides = [1, 1]} : vector<4x36xf32> to vector<4x1xf32>
    %274 = vector.extract_strided_slice %272 {offsets = [0, 0], sizes = [1, 256], strides = [1, 1]} : vector<4x256xf32> to vector<1x256xf32>
    %275 = vector.broadcast %273 : vector<4x1xf32> to vector<4x256xf32>
    %276 = vector.broadcast %274 : vector<1x256xf32> to vector<4x256xf32>
    %277 = arith.mulf %275, %276 : vector<4x256xf32>
    %278 = arith.addf %271, %277 : vector<4x256xf32>
    %279 = vector.extract_strided_slice %4 {offsets = [0, 21], sizes = [4, 1], strides = [1, 1]} : vector<4x36xf32> to vector<4x1xf32>
    %280 = vector.extract_strided_slice %272 {offsets = [1, 0], sizes = [1, 256], strides = [1, 1]} : vector<4x256xf32> to vector<1x256xf32>
    %281 = vector.broadcast %279 : vector<4x1xf32> to vector<4x256xf32>
    %282 = vector.broadcast %280 : vector<1x256xf32> to vector<4x256xf32>
    %283 = arith.mulf %281, %282 : vector<4x256xf32>
    %284 = arith.addf %278, %283 : vector<4x256xf32>
    %285 = vector.extract_strided_slice %4 {offsets = [0, 22], sizes = [4, 1], strides = [1, 1]} : vector<4x36xf32> to vector<4x1xf32>
    %286 = vector.extract_strided_slice %272 {offsets = [2, 0], sizes = [1, 256], strides = [1, 1]} : vector<4x256xf32> to vector<1x256xf32>
    %287 = vector.broadcast %285 : vector<4x1xf32> to vector<4x256xf32>
    %288 = vector.broadcast %286 : vector<1x256xf32> to vector<4x256xf32>
    %289 = arith.mulf %287, %288 : vector<4x256xf32>
    %290 = arith.addf %284, %289 : vector<4x256xf32>
    %291 = vector.extract_strided_slice %4 {offsets = [0, 23], sizes = [4, 1], strides = [1, 1]} : vector<4x36xf32> to vector<4x1xf32>
    %292 = vector.extract_strided_slice %272 {offsets = [3, 0], sizes = [1, 256], strides = [1, 1]} : vector<4x256xf32> to vector<1x256xf32>
    %293 = vector.broadcast %291 : vector<4x1xf32> to vector<4x256xf32>
    %294 = vector.broadcast %292 : vector<1x256xf32> to vector<4x256xf32>
    %295 = arith.mulf %293, %294 : vector<4x256xf32>
    %296 = arith.addf %290, %295 : vector<4x256xf32>
    %297 = vector.extract_strided_slice %143 {offsets = [0, 1536], sizes = [4, 256], strides = [1, 1]} : vector<4x2304xf32> to vector<4x256xf32>
    %298 = vector.extract_strided_slice %4 {offsets = [0, 24], sizes = [4, 1], strides = [1, 1]} : vector<4x36xf32> to vector<4x1xf32>
    %299 = vector.extract_strided_slice %297 {offsets = [0, 0], sizes = [1, 256], strides = [1, 1]} : vector<4x256xf32> to vector<1x256xf32>
    %300 = vector.broadcast %298 : vector<4x1xf32> to vector<4x256xf32>
    %301 = vector.broadcast %299 : vector<1x256xf32> to vector<4x256xf32>
    %302 = arith.mulf %300, %301 : vector<4x256xf32>
    %303 = arith.addf %296, %302 : vector<4x256xf32>
    %304 = vector.extract_strided_slice %4 {offsets = [0, 25], sizes = [4, 1], strides = [1, 1]} : vector<4x36xf32> to vector<4x1xf32>
    %305 = vector.extract_strided_slice %297 {offsets = [1, 0], sizes = [1, 256], strides = [1, 1]} : vector<4x256xf32> to vector<1x256xf32>
    %306 = vector.broadcast %304 : vector<4x1xf32> to vector<4x256xf32>
    %307 = vector.broadcast %305 : vector<1x256xf32> to vector<4x256xf32>
    %308 = arith.mulf %306, %307 : vector<4x256xf32>
    %309 = arith.addf %303, %308 : vector<4x256xf32>
    %310 = vector.extract_strided_slice %4 {offsets = [0, 26], sizes = [4, 1], strides = [1, 1]} : vector<4x36xf32> to vector<4x1xf32>
    %311 = vector.extract_strided_slice %297 {offsets = [2, 0], sizes = [1, 256], strides = [1, 1]} : vector<4x256xf32> to vector<1x256xf32>
    %312 = vector.broadcast %310 : vector<4x1xf32> to vector<4x256xf32>
    %313 = vector.broadcast %311 : vector<1x256xf32> to vector<4x256xf32>
    %314 = arith.mulf %312, %313 : vector<4x256xf32>
    %315 = arith.addf %309, %314 : vector<4x256xf32>
    %316 = vector.extract_strided_slice %4 {offsets = [0, 27], sizes = [4, 1], strides = [1, 1]} : vector<4x36xf32> to vector<4x1xf32>
    %317 = vector.extract_strided_slice %297 {offsets = [3, 0], sizes = [1, 256], strides = [1, 1]} : vector<4x256xf32> to vector<1x256xf32>
    %318 = vector.broadcast %316 : vector<4x1xf32> to vector<4x256xf32>
    %319 = vector.broadcast %317 : vector<1x256xf32> to vector<4x256xf32>
    %320 = arith.mulf %318, %319 : vector<4x256xf32>
    %321 = arith.addf %315, %320 : vector<4x256xf32>
    %322 = vector.extract_strided_slice %143 {offsets = [0, 1792], sizes = [4, 256], strides = [1, 1]} : vector<4x2304xf32> to vector<4x256xf32>
    %323 = vector.extract_strided_slice %4 {offsets = [0, 28], sizes = [4, 1], strides = [1, 1]} : vector<4x36xf32> to vector<4x1xf32>
    %324 = vector.extract_strided_slice %322 {offsets = [0, 0], sizes = [1, 256], strides = [1, 1]} : vector<4x256xf32> to vector<1x256xf32>
    %325 = vector.broadcast %323 : vector<4x1xf32> to vector<4x256xf32>
    %326 = vector.broadcast %324 : vector<1x256xf32> to vector<4x256xf32>
    %327 = arith.mulf %325, %326 : vector<4x256xf32>
    %328 = arith.addf %321, %327 : vector<4x256xf32>
    %329 = vector.extract_strided_slice %4 {offsets = [0, 29], sizes = [4, 1], strides = [1, 1]} : vector<4x36xf32> to vector<4x1xf32>
    %330 = vector.extract_strided_slice %322 {offsets = [1, 0], sizes = [1, 256], strides = [1, 1]} : vector<4x256xf32> to vector<1x256xf32>
    %331 = vector.broadcast %329 : vector<4x1xf32> to vector<4x256xf32>
    %332 = vector.broadcast %330 : vector<1x256xf32> to vector<4x256xf32>
    %333 = arith.mulf %331, %332 : vector<4x256xf32>
    %334 = arith.addf %328, %333 : vector<4x256xf32>
    %335 = vector.extract_strided_slice %4 {offsets = [0, 30], sizes = [4, 1], strides = [1, 1]} : vector<4x36xf32> to vector<4x1xf32>
    %336 = vector.extract_strided_slice %322 {offsets = [2, 0], sizes = [1, 256], strides = [1, 1]} : vector<4x256xf32> to vector<1x256xf32>
    %337 = vector.broadcast %335 : vector<4x1xf32> to vector<4x256xf32>
    %338 = vector.broadcast %336 : vector<1x256xf32> to vector<4x256xf32>
    %339 = arith.mulf %337, %338 : vector<4x256xf32>
    %340 = arith.addf %334, %339 : vector<4x256xf32>
    %341 = vector.extract_strided_slice %4 {offsets = [0, 31], sizes = [4, 1], strides = [1, 1]} : vector<4x36xf32> to vector<4x1xf32>
    %342 = vector.extract_strided_slice %322 {offsets = [3, 0], sizes = [1, 256], strides = [1, 1]} : vector<4x256xf32> to vector<1x256xf32>
    %343 = vector.broadcast %341 : vector<4x1xf32> to vector<4x256xf32>
    %344 = vector.broadcast %342 : vector<1x256xf32> to vector<4x256xf32>
    %345 = arith.mulf %343, %344 : vector<4x256xf32>
    %346 = arith.addf %340, %345 : vector<4x256xf32>
    %347 = vector.extract_strided_slice %143 {offsets = [0, 2048], sizes = [4, 256], strides = [1, 1]} : vector<4x2304xf32> to vector<4x256xf32>
    %348 = vector.extract_strided_slice %4 {offsets = [0, 32], sizes = [4, 1], strides = [1, 1]} : vector<4x36xf32> to vector<4x1xf32>
    %349 = vector.extract_strided_slice %347 {offsets = [0, 0], sizes = [1, 256], strides = [1, 1]} : vector<4x256xf32> to vector<1x256xf32>
    %350 = vector.broadcast %348 : vector<4x1xf32> to vector<4x256xf32>
    %351 = vector.broadcast %349 : vector<1x256xf32> to vector<4x256xf32>
    %352 = arith.mulf %350, %351 : vector<4x256xf32>
    %353 = arith.addf %346, %352 : vector<4x256xf32>
    %354 = vector.extract_strided_slice %4 {offsets = [0, 33], sizes = [4, 1], strides = [1, 1]} : vector<4x36xf32> to vector<4x1xf32>
    %355 = vector.extract_strided_slice %347 {offsets = [1, 0], sizes = [1, 256], strides = [1, 1]} : vector<4x256xf32> to vector<1x256xf32>
    %356 = vector.broadcast %354 : vector<4x1xf32> to vector<4x256xf32>
    %357 = vector.broadcast %355 : vector<1x256xf32> to vector<4x256xf32>
    %358 = arith.mulf %356, %357 : vector<4x256xf32>
    %359 = arith.addf %353, %358 : vector<4x256xf32>
    %360 = vector.extract_strided_slice %4 {offsets = [0, 34], sizes = [4, 1], strides = [1, 1]} : vector<4x36xf32> to vector<4x1xf32>
    %361 = vector.extract_strided_slice %347 {offsets = [2, 0], sizes = [1, 256], strides = [1, 1]} : vector<4x256xf32> to vector<1x256xf32>
    %362 = vector.broadcast %360 : vector<4x1xf32> to vector<4x256xf32>
    %363 = vector.broadcast %361 : vector<1x256xf32> to vector<4x256xf32>
    %364 = arith.mulf %362, %363 : vector<4x256xf32>
    %365 = arith.addf %359, %364 : vector<4x256xf32>
    %366 = vector.extract_strided_slice %4 {offsets = [0, 35], sizes = [4, 1], strides = [1, 1]} : vector<4x36xf32> to vector<4x1xf32>
    %367 = vector.extract_strided_slice %347 {offsets = [3, 0], sizes = [1, 256], strides = [1, 1]} : vector<4x256xf32> to vector<1x256xf32>
    %368 = vector.broadcast %366 : vector<4x1xf32> to vector<4x256xf32>
    %369 = vector.broadcast %367 : vector<1x256xf32> to vector<4x256xf32>
    %370 = arith.mulf %368, %369 : vector<4x256xf32>
    %371 = arith.addf %365, %370 : vector<4x256xf32>
    %cst_84 = arith.constant dense<0.000000e+00> : vector<4x256xf32>
    %372 = tpu.matmul %91, %40, %cst_84 {dimension_numbers = #tpu.dot_dimension_numbers<[1], [0], [0], [1], [0, 0, 1, 1], [], []>} : vector<4x256xf32>, vector<256x256xf32>, vector<4x256xf32> -> vector<4x256xf32>
    %cst_85 = arith.constant 0.000000e+00 : f32
    %373 = vector.broadcast %cst_85 : f32 to vector<4x256xf32>
    %374 = vector.extract_strided_slice %6 {offsets = [0, 0], sizes = [4, 1], strides = [1, 1]} : vector<4x4xf32> to vector<4x1xf32>
    %375 = vector.extract_strided_slice %372 {offsets = [0, 0], sizes = [1, 256], strides = [1, 1]} : vector<4x256xf32> to vector<1x256xf32>
    %376 = vector.broadcast %374 : vector<4x1xf32> to vector<4x256xf32>
    %377 = vector.broadcast %375 : vector<1x256xf32> to vector<4x256xf32>
    %378 = arith.mulf %376, %377 : vector<4x256xf32>
    %379 = arith.addf %373, %378 : vector<4x256xf32>
    %380 = vector.extract_strided_slice %6 {offsets = [0, 1], sizes = [4, 1], strides = [1, 1]} : vector<4x4xf32> to vector<4x1xf32>
    %381 = vector.extract_strided_slice %372 {offsets = [1, 0], sizes = [1, 256], strides = [1, 1]} : vector<4x256xf32> to vector<1x256xf32>
    %382 = vector.broadcast %380 : vector<4x1xf32> to vector<4x256xf32>
    %383 = vector.broadcast %381 : vector<1x256xf32> to vector<4x256xf32>
    %384 = arith.mulf %382, %383 : vector<4x256xf32>
    %385 = arith.addf %379, %384 : vector<4x256xf32>
    %386 = vector.extract_strided_slice %6 {offsets = [0, 2], sizes = [4, 1], strides = [1, 1]} : vector<4x4xf32> to vector<4x1xf32>
    %387 = vector.extract_strided_slice %372 {offsets = [2, 0], sizes = [1, 256], strides = [1, 1]} : vector<4x256xf32> to vector<1x256xf32>
    %388 = vector.broadcast %386 : vector<4x1xf32> to vector<4x256xf32>
    %389 = vector.broadcast %387 : vector<1x256xf32> to vector<4x256xf32>
    %390 = arith.mulf %388, %389 : vector<4x256xf32>
    %391 = arith.addf %385, %390 : vector<4x256xf32>
    %392 = vector.extract_strided_slice %6 {offsets = [0, 3], sizes = [4, 1], strides = [1, 1]} : vector<4x4xf32> to vector<4x1xf32>
    %393 = vector.extract_strided_slice %372 {offsets = [3, 0], sizes = [1, 256], strides = [1, 1]} : vector<4x256xf32> to vector<1x256xf32>
    %394 = vector.broadcast %392 : vector<4x1xf32> to vector<4x256xf32>
    %395 = vector.broadcast %393 : vector<1x256xf32> to vector<4x256xf32>
    %396 = arith.mulf %394, %395 : vector<4x256xf32>
    %397 = arith.addf %391, %396 : vector<4x256xf32>
    %398 = vector.broadcast %7 : vector<4x1xf32> to vector<4x256xf32>
    %399 = arith.addf %397, %398 : vector<4x256xf32>
    %400 = arith.subf %91, %399 : vector<4x256xf32>
    %cst_86 = arith.constant 0.000000e+00 : f32
    %401 = vector.broadcast %cst_86 : f32 to vector<4x256xf32>
    %402 = vector.extract_strided_slice %8 {offsets = [0, 0], sizes = [4, 1], strides = [1, 1]} : vector<4x4xf32> to vector<4x1xf32>
    %403 = vector.extract_strided_slice %400 {offsets = [0, 0], sizes = [1, 256], strides = [1, 1]} : vector<4x256xf32> to vector<1x256xf32>
    %404 = vector.broadcast %402 : vector<4x1xf32> to vector<4x256xf32>
    %405 = vector.broadcast %403 : vector<1x256xf32> to vector<4x256xf32>
    %406 = arith.mulf %404, %405 : vector<4x256xf32>
    %407 = arith.addf %401, %406 : vector<4x256xf32>
    %408 = vector.extract_strided_slice %8 {offsets = [0, 1], sizes = [4, 1], strides = [1, 1]} : vector<4x4xf32> to vector<4x1xf32>
    %409 = vector.extract_strided_slice %400 {offsets = [1, 0], sizes = [1, 256], strides = [1, 1]} : vector<4x256xf32> to vector<1x256xf32>
    %410 = vector.broadcast %408 : vector<4x1xf32> to vector<4x256xf32>
    %411 = vector.broadcast %409 : vector<1x256xf32> to vector<4x256xf32>
    %412 = arith.mulf %410, %411 : vector<4x256xf32>
    %413 = arith.addf %407, %412 : vector<4x256xf32>
    %414 = vector.extract_strided_slice %8 {offsets = [0, 2], sizes = [4, 1], strides = [1, 1]} : vector<4x4xf32> to vector<4x1xf32>
    %415 = vector.extract_strided_slice %400 {offsets = [2, 0], sizes = [1, 256], strides = [1, 1]} : vector<4x256xf32> to vector<1x256xf32>
    %416 = vector.broadcast %414 : vector<4x1xf32> to vector<4x256xf32>
    %417 = vector.broadcast %415 : vector<1x256xf32> to vector<4x256xf32>
    %418 = arith.mulf %416, %417 : vector<4x256xf32>
    %419 = arith.addf %413, %418 : vector<4x256xf32>
    %420 = vector.extract_strided_slice %8 {offsets = [0, 3], sizes = [4, 1], strides = [1, 1]} : vector<4x4xf32> to vector<4x1xf32>
    %421 = vector.extract_strided_slice %400 {offsets = [3, 0], sizes = [1, 256], strides = [1, 1]} : vector<4x256xf32> to vector<1x256xf32>
    %422 = vector.broadcast %420 : vector<4x1xf32> to vector<4x256xf32>
    %423 = vector.broadcast %421 : vector<1x256xf32> to vector<4x256xf32>
    %424 = arith.mulf %422, %423 : vector<4x256xf32>
    %425 = arith.addf %419, %424 : vector<4x256xf32>
    %426 = vector.broadcast %9 : vector<4x1xf32> to vector<4x256xf32>
    %427 = arith.addf %425, %426 : vector<4x256xf32>
    %428 = arith.negf %427 : vector<4x256xf32>
    %429 = math.exp %428 : vector<4x256xf32>
    %cst_87 = arith.constant 1.000000e+00 : f32
    %430 = vector.broadcast %cst_87 : f32 to vector<4x256xf32>
    %431 = arith.addf %430, %429 : vector<4x256xf32>
    %432 = arith.divf %430, %431 : vector<4x256xf32>
    %433 = arith.mulf %400, %432 : vector<4x256xf32>
    %cst_88 = arith.constant dense<0.000000e+00> : vector<4xf32>
    %434 = vector.multi_reduction <add>, %400, %cst_88 [1] : vector<4x256xf32> to vector<4xf32>
    %435 = vector.shape_cast %434 : vector<4xf32> to vector<4x1xf32>
    %cst_89 = arith.constant 2.560000e+02 : f32
    %436 = vector.broadcast %cst_89 : f32 to vector<4x1xf32>
    %437 = arith.divf %435, %436 : vector<4x1xf32>
    %cst_90 = arith.constant 0.000000e+00 : f32
    %438 = vector.broadcast %cst_90 : f32 to vector<4x1xf32>
    %439 = vector.extract_strided_slice %10 {offsets = [0, 0], sizes = [4, 1], strides = [1, 1]} : vector<4x4xf32> to vector<4x1xf32>
    %440 = vector.extract_strided_slice %437 {offsets = [0, 0], sizes = [1, 1], strides = [1, 1]} : vector<4x1xf32> to vector<1x1xf32>
    %441 = vector.broadcast %440 : vector<1x1xf32> to vector<4x1xf32>
    %442 = arith.mulf %439, %441 : vector<4x1xf32>
    %443 = arith.addf %438, %442 : vector<4x1xf32>
    %444 = vector.extract_strided_slice %10 {offsets = [0, 1], sizes = [4, 1], strides = [1, 1]} : vector<4x4xf32> to vector<4x1xf32>
    %445 = vector.extract_strided_slice %437 {offsets = [1, 0], sizes = [1, 1], strides = [1, 1]} : vector<4x1xf32> to vector<1x1xf32>
    %446 = vector.broadcast %445 : vector<1x1xf32> to vector<4x1xf32>
    %447 = arith.mulf %444, %446 : vector<4x1xf32>
    %448 = arith.addf %443, %447 : vector<4x1xf32>
    %449 = vector.extract_strided_slice %10 {offsets = [0, 2], sizes = [4, 1], strides = [1, 1]} : vector<4x4xf32> to vector<4x1xf32>
    %450 = vector.extract_strided_slice %437 {offsets = [2, 0], sizes = [1, 1], strides = [1, 1]} : vector<4x1xf32> to vector<1x1xf32>
    %451 = vector.broadcast %450 : vector<1x1xf32> to vector<4x1xf32>
    %452 = arith.mulf %449, %451 : vector<4x1xf32>
    %453 = arith.addf %448, %452 : vector<4x1xf32>
    %454 = vector.extract_strided_slice %10 {offsets = [0, 3], sizes = [4, 1], strides = [1, 1]} : vector<4x4xf32> to vector<4x1xf32>
    %455 = vector.extract_strided_slice %437 {offsets = [3, 0], sizes = [1, 1], strides = [1, 1]} : vector<4x1xf32> to vector<1x1xf32>
    %456 = vector.broadcast %455 : vector<1x1xf32> to vector<4x1xf32>
    %457 = arith.mulf %454, %456 : vector<4x1xf32>
    %458 = arith.addf %453, %457 : vector<4x1xf32>
    %459 = arith.addf %458, %11 : vector<4x1xf32>
    %460 = vector.broadcast %459 : vector<4x1xf32> to vector<4x256xf32>
    %461 = arith.mulf %400, %460 : vector<4x256xf32>
    %462 = arith.addf %433, %461 : vector<4x256xf32>
    %cst_91 = arith.constant 0.000000e+00 : f32
    %463 = vector.broadcast %cst_91 : f32 to vector<4x256xf32>
    %464 = vector.extract_strided_slice %12 {offsets = [0, 0], sizes = [4, 1], strides = [1, 1]} : vector<4x4xf32> to vector<4x1xf32>
    %465 = vector.extract_strided_slice %462 {offsets = [0, 0], sizes = [1, 256], strides = [1, 1]} : vector<4x256xf32> to vector<1x256xf32>
    %466 = vector.broadcast %464 : vector<4x1xf32> to vector<4x256xf32>
    %467 = vector.broadcast %465 : vector<1x256xf32> to vector<4x256xf32>
    %468 = arith.mulf %466, %467 : vector<4x256xf32>
    %469 = arith.addf %463, %468 : vector<4x256xf32>
    %470 = vector.extract_strided_slice %12 {offsets = [0, 1], sizes = [4, 1], strides = [1, 1]} : vector<4x4xf32> to vector<4x1xf32>
    %471 = vector.extract_strided_slice %462 {offsets = [1, 0], sizes = [1, 256], strides = [1, 1]} : vector<4x256xf32> to vector<1x256xf32>
    %472 = vector.broadcast %470 : vector<4x1xf32> to vector<4x256xf32>
    %473 = vector.broadcast %471 : vector<1x256xf32> to vector<4x256xf32>
    %474 = arith.mulf %472, %473 : vector<4x256xf32>
    %475 = arith.addf %469, %474 : vector<4x256xf32>
    %476 = vector.extract_strided_slice %12 {offsets = [0, 2], sizes = [4, 1], strides = [1, 1]} : vector<4x4xf32> to vector<4x1xf32>
    %477 = vector.extract_strided_slice %462 {offsets = [2, 0], sizes = [1, 256], strides = [1, 1]} : vector<4x256xf32> to vector<1x256xf32>
    %478 = vector.broadcast %476 : vector<4x1xf32> to vector<4x256xf32>
    %479 = vector.broadcast %477 : vector<1x256xf32> to vector<4x256xf32>
    %480 = arith.mulf %478, %479 : vector<4x256xf32>
    %481 = arith.addf %475, %480 : vector<4x256xf32>
    %482 = vector.extract_strided_slice %12 {offsets = [0, 3], sizes = [4, 1], strides = [1, 1]} : vector<4x4xf32> to vector<4x1xf32>
    %483 = vector.extract_strided_slice %462 {offsets = [3, 0], sizes = [1, 256], strides = [1, 1]} : vector<4x256xf32> to vector<1x256xf32>
    %484 = vector.broadcast %482 : vector<4x1xf32> to vector<4x256xf32>
    %485 = vector.broadcast %483 : vector<1x256xf32> to vector<4x256xf32>
    %486 = arith.mulf %484, %485 : vector<4x256xf32>
    %487 = arith.addf %481, %486 : vector<4x256xf32>
    %488 = vector.broadcast %13 : vector<4x1xf32> to vector<4x256xf32>
    %489 = arith.addf %487, %488 : vector<4x256xf32>
    %490 = arith.negf %489 : vector<4x256xf32>
    %491 = math.exp %490 : vector<4x256xf32>
    %cst_92 = arith.constant 1.000000e+00 : f32
    %492 = vector.broadcast %cst_92 : f32 to vector<4x256xf32>
    %493 = arith.addf %492, %491 : vector<4x256xf32>
    %494 = arith.divf %492, %493 : vector<4x256xf32>
    %495 = arith.mulf %494, %371 : vector<4x256xf32>
    %cst_93 = arith.constant dense<0.000000e+00> : vector<4x2304xf32>
    %496 = tpu.matmul %495, %38, %cst_93 {dimension_numbers = #tpu.dot_dimension_numbers<[1], [0], [0], [1], [0, 0, 1, 1], [], []>} : vector<4x256xf32>, vector<256x2304xf32>, vector<4x2304xf32> -> vector<4x2304xf32>
    %cst_94 = arith.constant 0.000000e+00 : f32
    %497 = vector.broadcast %cst_94 : f32 to vector<4x256xf32>
    %498 = vector.broadcast %15 : vector<4x1xf32> to vector<4x256xf32>
    %499 = arith.addf %497, %498 : vector<4x256xf32>
    %500 = vector.extract_strided_slice %496 {offsets = [0, 0], sizes = [4, 256], strides = [1, 1]} : vector<4x2304xf32> to vector<4x256xf32>
    %501 = vector.extract_strided_slice %14 {offsets = [0, 0], sizes = [4, 1], strides = [1, 1]} : vector<4x36xf32> to vector<4x1xf32>
    %502 = vector.extract_strided_slice %500 {offsets = [0, 0], sizes = [1, 256], strides = [1, 1]} : vector<4x256xf32> to vector<1x256xf32>
    %503 = vector.broadcast %501 : vector<4x1xf32> to vector<4x256xf32>
    %504 = vector.broadcast %502 : vector<1x256xf32> to vector<4x256xf32>
    %505 = arith.mulf %503, %504 : vector<4x256xf32>
    %506 = arith.addf %499, %505 : vector<4x256xf32>
    %507 = vector.extract_strided_slice %14 {offsets = [0, 1], sizes = [4, 1], strides = [1, 1]} : vector<4x36xf32> to vector<4x1xf32>
    %508 = vector.extract_strided_slice %500 {offsets = [1, 0], sizes = [1, 256], strides = [1, 1]} : vector<4x256xf32> to vector<1x256xf32>
    %509 = vector.broadcast %507 : vector<4x1xf32> to vector<4x256xf32>
    %510 = vector.broadcast %508 : vector<1x256xf32> to vector<4x256xf32>
    %511 = arith.mulf %509, %510 : vector<4x256xf32>
    %512 = arith.addf %506, %511 : vector<4x256xf32>
    %513 = vector.extract_strided_slice %14 {offsets = [0, 2], sizes = [4, 1], strides = [1, 1]} : vector<4x36xf32> to vector<4x1xf32>
    %514 = vector.extract_strided_slice %500 {offsets = [2, 0], sizes = [1, 256], strides = [1, 1]} : vector<4x256xf32> to vector<1x256xf32>
    %515 = vector.broadcast %513 : vector<4x1xf32> to vector<4x256xf32>
    %516 = vector.broadcast %514 : vector<1x256xf32> to vector<4x256xf32>
    %517 = arith.mulf %515, %516 : vector<4x256xf32>
    %518 = arith.addf %512, %517 : vector<4x256xf32>
    %519 = vector.extract_strided_slice %14 {offsets = [0, 3], sizes = [4, 1], strides = [1, 1]} : vector<4x36xf32> to vector<4x1xf32>
    %520 = vector.extract_strided_slice %500 {offsets = [3, 0], sizes = [1, 256], strides = [1, 1]} : vector<4x256xf32> to vector<1x256xf32>
    %521 = vector.broadcast %519 : vector<4x1xf32> to vector<4x256xf32>
    %522 = vector.broadcast %520 : vector<1x256xf32> to vector<4x256xf32>
    %523 = arith.mulf %521, %522 : vector<4x256xf32>
    %524 = arith.addf %518, %523 : vector<4x256xf32>
    %525 = vector.extract_strided_slice %496 {offsets = [0, 256], sizes = [4, 256], strides = [1, 1]} : vector<4x2304xf32> to vector<4x256xf32>
    %526 = vector.extract_strided_slice %14 {offsets = [0, 4], sizes = [4, 1], strides = [1, 1]} : vector<4x36xf32> to vector<4x1xf32>
    %527 = vector.extract_strided_slice %525 {offsets = [0, 0], sizes = [1, 256], strides = [1, 1]} : vector<4x256xf32> to vector<1x256xf32>
    %528 = vector.broadcast %526 : vector<4x1xf32> to vector<4x256xf32>
    %529 = vector.broadcast %527 : vector<1x256xf32> to vector<4x256xf32>
    %530 = arith.mulf %528, %529 : vector<4x256xf32>
    %531 = arith.addf %524, %530 : vector<4x256xf32>
    %532 = vector.extract_strided_slice %14 {offsets = [0, 5], sizes = [4, 1], strides = [1, 1]} : vector<4x36xf32> to vector<4x1xf32>
    %533 = vector.extract_strided_slice %525 {offsets = [1, 0], sizes = [1, 256], strides = [1, 1]} : vector<4x256xf32> to vector<1x256xf32>
    %534 = vector.broadcast %532 : vector<4x1xf32> to vector<4x256xf32>
    %535 = vector.broadcast %533 : vector<1x256xf32> to vector<4x256xf32>
    %536 = arith.mulf %534, %535 : vector<4x256xf32>
    %537 = arith.addf %531, %536 : vector<4x256xf32>
    %538 = vector.extract_strided_slice %14 {offsets = [0, 6], sizes = [4, 1], strides = [1, 1]} : vector<4x36xf32> to vector<4x1xf32>
    %539 = vector.extract_strided_slice %525 {offsets = [2, 0], sizes = [1, 256], strides = [1, 1]} : vector<4x256xf32> to vector<1x256xf32>
    %540 = vector.broadcast %538 : vector<4x1xf32> to vector<4x256xf32>
    %541 = vector.broadcast %539 : vector<1x256xf32> to vector<4x256xf32>
    %542 = arith.mulf %540, %541 : vector<4x256xf32>
    %543 = arith.addf %537, %542 : vector<4x256xf32>
    %544 = vector.extract_strided_slice %14 {offsets = [0, 7], sizes = [4, 1], strides = [1, 1]} : vector<4x36xf32> to vector<4x1xf32>
    %545 = vector.extract_strided_slice %525 {offsets = [3, 0], sizes = [1, 256], strides = [1, 1]} : vector<4x256xf32> to vector<1x256xf32>
    %546 = vector.broadcast %544 : vector<4x1xf32> to vector<4x256xf32>
    %547 = vector.broadcast %545 : vector<1x256xf32> to vector<4x256xf32>
    %548 = arith.mulf %546, %547 : vector<4x256xf32>
    %549 = arith.addf %543, %548 : vector<4x256xf32>
    %550 = vector.extract_strided_slice %496 {offsets = [0, 512], sizes = [4, 256], strides = [1, 1]} : vector<4x2304xf32> to vector<4x256xf32>
    %551 = vector.extract_strided_slice %14 {offsets = [0, 8], sizes = [4, 1], strides = [1, 1]} : vector<4x36xf32> to vector<4x1xf32>
    %552 = vector.extract_strided_slice %550 {offsets = [0, 0], sizes = [1, 256], strides = [1, 1]} : vector<4x256xf32> to vector<1x256xf32>
    %553 = vector.broadcast %551 : vector<4x1xf32> to vector<4x256xf32>
    %554 = vector.broadcast %552 : vector<1x256xf32> to vector<4x256xf32>
    %555 = arith.mulf %553, %554 : vector<4x256xf32>
    %556 = arith.addf %549, %555 : vector<4x256xf32>
    %557 = vector.extract_strided_slice %14 {offsets = [0, 9], sizes = [4, 1], strides = [1, 1]} : vector<4x36xf32> to vector<4x1xf32>
    %558 = vector.extract_strided_slice %550 {offsets = [1, 0], sizes = [1, 256], strides = [1, 1]} : vector<4x256xf32> to vector<1x256xf32>
    %559 = vector.broadcast %557 : vector<4x1xf32> to vector<4x256xf32>
    %560 = vector.broadcast %558 : vector<1x256xf32> to vector<4x256xf32>
    %561 = arith.mulf %559, %560 : vector<4x256xf32>
    %562 = arith.addf %556, %561 : vector<4x256xf32>
    %563 = vector.extract_strided_slice %14 {offsets = [0, 10], sizes = [4, 1], strides = [1, 1]} : vector<4x36xf32> to vector<4x1xf32>
    %564 = vector.extract_strided_slice %550 {offsets = [2, 0], sizes = [1, 256], strides = [1, 1]} : vector<4x256xf32> to vector<1x256xf32>
    %565 = vector.broadcast %563 : vector<4x1xf32> to vector<4x256xf32>
    %566 = vector.broadcast %564 : vector<1x256xf32> to vector<4x256xf32>
    %567 = arith.mulf %565, %566 : vector<4x256xf32>
    %568 = arith.addf %562, %567 : vector<4x256xf32>
    %569 = vector.extract_strided_slice %14 {offsets = [0, 11], sizes = [4, 1], strides = [1, 1]} : vector<4x36xf32> to vector<4x1xf32>
    %570 = vector.extract_strided_slice %550 {offsets = [3, 0], sizes = [1, 256], strides = [1, 1]} : vector<4x256xf32> to vector<1x256xf32>
    %571 = vector.broadcast %569 : vector<4x1xf32> to vector<4x256xf32>
    %572 = vector.broadcast %570 : vector<1x256xf32> to vector<4x256xf32>
    %573 = arith.mulf %571, %572 : vector<4x256xf32>
    %574 = arith.addf %568, %573 : vector<4x256xf32>
    %575 = vector.extract_strided_slice %496 {offsets = [0, 768], sizes = [4, 256], strides = [1, 1]} : vector<4x2304xf32> to vector<4x256xf32>
    %576 = vector.extract_strided_slice %14 {offsets = [0, 12], sizes = [4, 1], strides = [1, 1]} : vector<4x36xf32> to vector<4x1xf32>
    %577 = vector.extract_strided_slice %575 {offsets = [0, 0], sizes = [1, 256], strides = [1, 1]} : vector<4x256xf32> to vector<1x256xf32>
    %578 = vector.broadcast %576 : vector<4x1xf32> to vector<4x256xf32>
    %579 = vector.broadcast %577 : vector<1x256xf32> to vector<4x256xf32>
    %580 = arith.mulf %578, %579 : vector<4x256xf32>
    %581 = arith.addf %574, %580 : vector<4x256xf32>
    %582 = vector.extract_strided_slice %14 {offsets = [0, 13], sizes = [4, 1], strides = [1, 1]} : vector<4x36xf32> to vector<4x1xf32>
    %583 = vector.extract_strided_slice %575 {offsets = [1, 0], sizes = [1, 256], strides = [1, 1]} : vector<4x256xf32> to vector<1x256xf32>
    %584 = vector.broadcast %582 : vector<4x1xf32> to vector<4x256xf32>
    %585 = vector.broadcast %583 : vector<1x256xf32> to vector<4x256xf32>
    %586 = arith.mulf %584, %585 : vector<4x256xf32>
    %587 = arith.addf %581, %586 : vector<4x256xf32>
    %588 = vector.extract_strided_slice %14 {offsets = [0, 14], sizes = [4, 1], strides = [1, 1]} : vector<4x36xf32> to vector<4x1xf32>
    %589 = vector.extract_strided_slice %575 {offsets = [2, 0], sizes = [1, 256], strides = [1, 1]} : vector<4x256xf32> to vector<1x256xf32>
    %590 = vector.broadcast %588 : vector<4x1xf32> to vector<4x256xf32>
    %591 = vector.broadcast %589 : vector<1x256xf32> to vector<4x256xf32>
    %592 = arith.mulf %590, %591 : vector<4x256xf32>
    %593 = arith.addf %587, %592 : vector<4x256xf32>
    %594 = vector.extract_strided_slice %14 {offsets = [0, 15], sizes = [4, 1], strides = [1, 1]} : vector<4x36xf32> to vector<4x1xf32>
    %595 = vector.extract_strided_slice %575 {offsets = [3, 0], sizes = [1, 256], strides = [1, 1]} : vector<4x256xf32> to vector<1x256xf32>
    %596 = vector.broadcast %594 : vector<4x1xf32> to vector<4x256xf32>
    %597 = vector.broadcast %595 : vector<1x256xf32> to vector<4x256xf32>
    %598 = arith.mulf %596, %597 : vector<4x256xf32>
    %599 = arith.addf %593, %598 : vector<4x256xf32>
    %600 = vector.extract_strided_slice %496 {offsets = [0, 1024], sizes = [4, 256], strides = [1, 1]} : vector<4x2304xf32> to vector<4x256xf32>
    %601 = vector.extract_strided_slice %14 {offsets = [0, 16], sizes = [4, 1], strides = [1, 1]} : vector<4x36xf32> to vector<4x1xf32>
    %602 = vector.extract_strided_slice %600 {offsets = [0, 0], sizes = [1, 256], strides = [1, 1]} : vector<4x256xf32> to vector<1x256xf32>
    %603 = vector.broadcast %601 : vector<4x1xf32> to vector<4x256xf32>
    %604 = vector.broadcast %602 : vector<1x256xf32> to vector<4x256xf32>
    %605 = arith.mulf %603, %604 : vector<4x256xf32>
    %606 = arith.addf %599, %605 : vector<4x256xf32>
    %607 = vector.extract_strided_slice %14 {offsets = [0, 17], sizes = [4, 1], strides = [1, 1]} : vector<4x36xf32> to vector<4x1xf32>
    %608 = vector.extract_strided_slice %600 {offsets = [1, 0], sizes = [1, 256], strides = [1, 1]} : vector<4x256xf32> to vector<1x256xf32>
    %609 = vector.broadcast %607 : vector<4x1xf32> to vector<4x256xf32>
    %610 = vector.broadcast %608 : vector<1x256xf32> to vector<4x256xf32>
    %611 = arith.mulf %609, %610 : vector<4x256xf32>
    %612 = arith.addf %606, %611 : vector<4x256xf32>
    %613 = vector.extract_strided_slice %14 {offsets = [0, 18], sizes = [4, 1], strides = [1, 1]} : vector<4x36xf32> to vector<4x1xf32>
    %614 = vector.extract_strided_slice %600 {offsets = [2, 0], sizes = [1, 256], strides = [1, 1]} : vector<4x256xf32> to vector<1x256xf32>
    %615 = vector.broadcast %613 : vector<4x1xf32> to vector<4x256xf32>
    %616 = vector.broadcast %614 : vector<1x256xf32> to vector<4x256xf32>
    %617 = arith.mulf %615, %616 : vector<4x256xf32>
    %618 = arith.addf %612, %617 : vector<4x256xf32>
    %619 = vector.extract_strided_slice %14 {offsets = [0, 19], sizes = [4, 1], strides = [1, 1]} : vector<4x36xf32> to vector<4x1xf32>
    %620 = vector.extract_strided_slice %600 {offsets = [3, 0], sizes = [1, 256], strides = [1, 1]} : vector<4x256xf32> to vector<1x256xf32>
    %621 = vector.broadcast %619 : vector<4x1xf32> to vector<4x256xf32>
    %622 = vector.broadcast %620 : vector<1x256xf32> to vector<4x256xf32>
    %623 = arith.mulf %621, %622 : vector<4x256xf32>
    %624 = arith.addf %618, %623 : vector<4x256xf32>
    %625 = vector.extract_strided_slice %496 {offsets = [0, 1280], sizes = [4, 256], strides = [1, 1]} : vector<4x2304xf32> to vector<4x256xf32>
    %626 = vector.extract_strided_slice %14 {offsets = [0, 20], sizes = [4, 1], strides = [1, 1]} : vector<4x36xf32> to vector<4x1xf32>
    %627 = vector.extract_strided_slice %625 {offsets = [0, 0], sizes = [1, 256], strides = [1, 1]} : vector<4x256xf32> to vector<1x256xf32>
    %628 = vector.broadcast %626 : vector<4x1xf32> to vector<4x256xf32>
    %629 = vector.broadcast %627 : vector<1x256xf32> to vector<4x256xf32>
    %630 = arith.mulf %628, %629 : vector<4x256xf32>
    %631 = arith.addf %624, %630 : vector<4x256xf32>
    %632 = vector.extract_strided_slice %14 {offsets = [0, 21], sizes = [4, 1], strides = [1, 1]} : vector<4x36xf32> to vector<4x1xf32>
    %633 = vector.extract_strided_slice %625 {offsets = [1, 0], sizes = [1, 256], strides = [1, 1]} : vector<4x256xf32> to vector<1x256xf32>
    %634 = vector.broadcast %632 : vector<4x1xf32> to vector<4x256xf32>
    %635 = vector.broadcast %633 : vector<1x256xf32> to vector<4x256xf32>
    %636 = arith.mulf %634, %635 : vector<4x256xf32>
    %637 = arith.addf %631, %636 : vector<4x256xf32>
    %638 = vector.extract_strided_slice %14 {offsets = [0, 22], sizes = [4, 1], strides = [1, 1]} : vector<4x36xf32> to vector<4x1xf32>
    %639 = vector.extract_strided_slice %625 {offsets = [2, 0], sizes = [1, 256], strides = [1, 1]} : vector<4x256xf32> to vector<1x256xf32>
    %640 = vector.broadcast %638 : vector<4x1xf32> to vector<4x256xf32>
    %641 = vector.broadcast %639 : vector<1x256xf32> to vector<4x256xf32>
    %642 = arith.mulf %640, %641 : vector<4x256xf32>
    %643 = arith.addf %637, %642 : vector<4x256xf32>
    %644 = vector.extract_strided_slice %14 {offsets = [0, 23], sizes = [4, 1], strides = [1, 1]} : vector<4x36xf32> to vector<4x1xf32>
    %645 = vector.extract_strided_slice %625 {offsets = [3, 0], sizes = [1, 256], strides = [1, 1]} : vector<4x256xf32> to vector<1x256xf32>
    %646 = vector.broadcast %644 : vector<4x1xf32> to vector<4x256xf32>
    %647 = vector.broadcast %645 : vector<1x256xf32> to vector<4x256xf32>
    %648 = arith.mulf %646, %647 : vector<4x256xf32>
    %649 = arith.addf %643, %648 : vector<4x256xf32>
    %650 = vector.extract_strided_slice %496 {offsets = [0, 1536], sizes = [4, 256], strides = [1, 1]} : vector<4x2304xf32> to vector<4x256xf32>
    %651 = vector.extract_strided_slice %14 {offsets = [0, 24], sizes = [4, 1], strides = [1, 1]} : vector<4x36xf32> to vector<4x1xf32>
    %652 = vector.extract_strided_slice %650 {offsets = [0, 0], sizes = [1, 256], strides = [1, 1]} : vector<4x256xf32> to vector<1x256xf32>
    %653 = vector.broadcast %651 : vector<4x1xf32> to vector<4x256xf32>
    %654 = vector.broadcast %652 : vector<1x256xf32> to vector<4x256xf32>
    %655 = arith.mulf %653, %654 : vector<4x256xf32>
    %656 = arith.addf %649, %655 : vector<4x256xf32>
    %657 = vector.extract_strided_slice %14 {offsets = [0, 25], sizes = [4, 1], strides = [1, 1]} : vector<4x36xf32> to vector<4x1xf32>
    %658 = vector.extract_strided_slice %650 {offsets = [1, 0], sizes = [1, 256], strides = [1, 1]} : vector<4x256xf32> to vector<1x256xf32>
    %659 = vector.broadcast %657 : vector<4x1xf32> to vector<4x256xf32>
    %660 = vector.broadcast %658 : vector<1x256xf32> to vector<4x256xf32>
    %661 = arith.mulf %659, %660 : vector<4x256xf32>
    %662 = arith.addf %656, %661 : vector<4x256xf32>
    %663 = vector.extract_strided_slice %14 {offsets = [0, 26], sizes = [4, 1], strides = [1, 1]} : vector<4x36xf32> to vector<4x1xf32>
    %664 = vector.extract_strided_slice %650 {offsets = [2, 0], sizes = [1, 256], strides = [1, 1]} : vector<4x256xf32> to vector<1x256xf32>
    %665 = vector.broadcast %663 : vector<4x1xf32> to vector<4x256xf32>
    %666 = vector.broadcast %664 : vector<1x256xf32> to vector<4x256xf32>
    %667 = arith.mulf %665, %666 : vector<4x256xf32>
    %668 = arith.addf %662, %667 : vector<4x256xf32>
    %669 = vector.extract_strided_slice %14 {offsets = [0, 27], sizes = [4, 1], strides = [1, 1]} : vector<4x36xf32> to vector<4x1xf32>
    %670 = vector.extract_strided_slice %650 {offsets = [3, 0], sizes = [1, 256], strides = [1, 1]} : vector<4x256xf32> to vector<1x256xf32>
    %671 = vector.broadcast %669 : vector<4x1xf32> to vector<4x256xf32>
    %672 = vector.broadcast %670 : vector<1x256xf32> to vector<4x256xf32>
    %673 = arith.mulf %671, %672 : vector<4x256xf32>
    %674 = arith.addf %668, %673 : vector<4x256xf32>
    %675 = vector.extract_strided_slice %496 {offsets = [0, 1792], sizes = [4, 256], strides = [1, 1]} : vector<4x2304xf32> to vector<4x256xf32>
    %676 = vector.extract_strided_slice %14 {offsets = [0, 28], sizes = [4, 1], strides = [1, 1]} : vector<4x36xf32> to vector<4x1xf32>
    %677 = vector.extract_strided_slice %675 {offsets = [0, 0], sizes = [1, 256], strides = [1, 1]} : vector<4x256xf32> to vector<1x256xf32>
    %678 = vector.broadcast %676 : vector<4x1xf32> to vector<4x256xf32>
    %679 = vector.broadcast %677 : vector<1x256xf32> to vector<4x256xf32>
    %680 = arith.mulf %678, %679 : vector<4x256xf32>
    %681 = arith.addf %674, %680 : vector<4x256xf32>
    %682 = vector.extract_strided_slice %14 {offsets = [0, 29], sizes = [4, 1], strides = [1, 1]} : vector<4x36xf32> to vector<4x1xf32>
    %683 = vector.extract_strided_slice %675 {offsets = [1, 0], sizes = [1, 256], strides = [1, 1]} : vector<4x256xf32> to vector<1x256xf32>
    %684 = vector.broadcast %682 : vector<4x1xf32> to vector<4x256xf32>
    %685 = vector.broadcast %683 : vector<1x256xf32> to vector<4x256xf32>
    %686 = arith.mulf %684, %685 : vector<4x256xf32>
    %687 = arith.addf %681, %686 : vector<4x256xf32>
    %688 = vector.extract_strided_slice %14 {offsets = [0, 30], sizes = [4, 1], strides = [1, 1]} : vector<4x36xf32> to vector<4x1xf32>
    %689 = vector.extract_strided_slice %675 {offsets = [2, 0], sizes = [1, 256], strides = [1, 1]} : vector<4x256xf32> to vector<1x256xf32>
    %690 = vector.broadcast %688 : vector<4x1xf32> to vector<4x256xf32>
    %691 = vector.broadcast %689 : vector<1x256xf32> to vector<4x256xf32>
    %692 = arith.mulf %690, %691 : vector<4x256xf32>
    %693 = arith.addf %687, %692 : vector<4x256xf32>
    %694 = vector.extract_strided_slice %14 {offsets = [0, 31], sizes = [4, 1], strides = [1, 1]} : vector<4x36xf32> to vector<4x1xf32>
    %695 = vector.extract_strided_slice %675 {offsets = [3, 0], sizes = [1, 256], strides = [1, 1]} : vector<4x256xf32> to vector<1x256xf32>
    %696 = vector.broadcast %694 : vector<4x1xf32> to vector<4x256xf32>
    %697 = vector.broadcast %695 : vector<1x256xf32> to vector<4x256xf32>
    %698 = arith.mulf %696, %697 : vector<4x256xf32>
    %699 = arith.addf %693, %698 : vector<4x256xf32>
    %700 = vector.extract_strided_slice %496 {offsets = [0, 2048], sizes = [4, 256], strides = [1, 1]} : vector<4x2304xf32> to vector<4x256xf32>
    %701 = vector.extract_strided_slice %14 {offsets = [0, 32], sizes = [4, 1], strides = [1, 1]} : vector<4x36xf32> to vector<4x1xf32>
    %702 = vector.extract_strided_slice %700 {offsets = [0, 0], sizes = [1, 256], strides = [1, 1]} : vector<4x256xf32> to vector<1x256xf32>
    %703 = vector.broadcast %701 : vector<4x1xf32> to vector<4x256xf32>
    %704 = vector.broadcast %702 : vector<1x256xf32> to vector<4x256xf32>
    %705 = arith.mulf %703, %704 : vector<4x256xf32>
    %706 = arith.addf %699, %705 : vector<4x256xf32>
    %707 = vector.extract_strided_slice %14 {offsets = [0, 33], sizes = [4, 1], strides = [1, 1]} : vector<4x36xf32> to vector<4x1xf32>
    %708 = vector.extract_strided_slice %700 {offsets = [1, 0], sizes = [1, 256], strides = [1, 1]} : vector<4x256xf32> to vector<1x256xf32>
    %709 = vector.broadcast %707 : vector<4x1xf32> to vector<4x256xf32>
    %710 = vector.broadcast %708 : vector<1x256xf32> to vector<4x256xf32>
    %711 = arith.mulf %709, %710 : vector<4x256xf32>
    %712 = arith.addf %706, %711 : vector<4x256xf32>
    %713 = vector.extract_strided_slice %14 {offsets = [0, 34], sizes = [4, 1], strides = [1, 1]} : vector<4x36xf32> to vector<4x1xf32>
    %714 = vector.extract_strided_slice %700 {offsets = [2, 0], sizes = [1, 256], strides = [1, 1]} : vector<4x256xf32> to vector<1x256xf32>
    %715 = vector.broadcast %713 : vector<4x1xf32> to vector<4x256xf32>
    %716 = vector.broadcast %714 : vector<1x256xf32> to vector<4x256xf32>
    %717 = arith.mulf %715, %716 : vector<4x256xf32>
    %718 = arith.addf %712, %717 : vector<4x256xf32>
    %719 = vector.extract_strided_slice %14 {offsets = [0, 35], sizes = [4, 1], strides = [1, 1]} : vector<4x36xf32> to vector<4x1xf32>
    %720 = vector.extract_strided_slice %700 {offsets = [3, 0], sizes = [1, 256], strides = [1, 1]} : vector<4x256xf32> to vector<1x256xf32>
    %721 = vector.broadcast %719 : vector<4x1xf32> to vector<4x256xf32>
    %722 = vector.broadcast %720 : vector<1x256xf32> to vector<4x256xf32>
    %723 = arith.mulf %721, %722 : vector<4x256xf32>
    %724 = arith.addf %718, %723 : vector<4x256xf32>
    %cst_95 = arith.constant 0.000000e+00 : f32
    %725 = vector.broadcast %cst_95 : f32 to vector<4x256xf32>
    %726 = vector.extract_strided_slice %16 {offsets = [0, 0], sizes = [4, 1], strides = [1, 1]} : vector<4x4xf32> to vector<4x1xf32>
    %727 = vector.extract_strided_slice %142 {offsets = [0, 0], sizes = [1, 256], strides = [1, 1]} : vector<4x256xf32> to vector<1x256xf32>
    %728 = vector.broadcast %726 : vector<4x1xf32> to vector<4x256xf32>
    %729 = vector.broadcast %727 : vector<1x256xf32> to vector<4x256xf32>
    %730 = arith.mulf %728, %729 : vector<4x256xf32>
    %731 = arith.addf %725, %730 : vector<4x256xf32>
    %732 = vector.extract_strided_slice %16 {offsets = [0, 1], sizes = [4, 1], strides = [1, 1]} : vector<4x4xf32> to vector<4x1xf32>
    %733 = vector.extract_strided_slice %142 {offsets = [1, 0], sizes = [1, 256], strides = [1, 1]} : vector<4x256xf32> to vector<1x256xf32>
    %734 = vector.broadcast %732 : vector<4x1xf32> to vector<4x256xf32>
    %735 = vector.broadcast %733 : vector<1x256xf32> to vector<4x256xf32>
    %736 = arith.mulf %734, %735 : vector<4x256xf32>
    %737 = arith.addf %731, %736 : vector<4x256xf32>
    %738 = vector.extract_strided_slice %16 {offsets = [0, 2], sizes = [4, 1], strides = [1, 1]} : vector<4x4xf32> to vector<4x1xf32>
    %739 = vector.extract_strided_slice %142 {offsets = [2, 0], sizes = [1, 256], strides = [1, 1]} : vector<4x256xf32> to vector<1x256xf32>
    %740 = vector.broadcast %738 : vector<4x1xf32> to vector<4x256xf32>
    %741 = vector.broadcast %739 : vector<1x256xf32> to vector<4x256xf32>
    %742 = arith.mulf %740, %741 : vector<4x256xf32>
    %743 = arith.addf %737, %742 : vector<4x256xf32>
    %744 = vector.extract_strided_slice %16 {offsets = [0, 3], sizes = [4, 1], strides = [1, 1]} : vector<4x4xf32> to vector<4x1xf32>
    %745 = vector.extract_strided_slice %142 {offsets = [3, 0], sizes = [1, 256], strides = [1, 1]} : vector<4x256xf32> to vector<1x256xf32>
    %746 = vector.broadcast %744 : vector<4x1xf32> to vector<4x256xf32>
    %747 = vector.broadcast %745 : vector<1x256xf32> to vector<4x256xf32>
    %748 = arith.mulf %746, %747 : vector<4x256xf32>
    %749 = arith.addf %743, %748 : vector<4x256xf32>
    %750 = vector.broadcast %17 : vector<4x1xf32> to vector<4x256xf32>
    %751 = arith.addf %749, %750 : vector<4x256xf32>
    %cst_96 = arith.constant dense<0.000000e+00> : vector<4x2304xf32>
    %752 = tpu.matmul %751, %38, %cst_96 {dimension_numbers = #tpu.dot_dimension_numbers<[1], [0], [0], [1], [0, 0, 1, 1], [], []>} : vector<4x256xf32>, vector<256x2304xf32>, vector<4x2304xf32> -> vector<4x2304xf32>
    %cst_97 = arith.constant 0.000000e+00 : f32
    %753 = vector.broadcast %cst_97 : f32 to vector<4x256xf32>
    %754 = vector.broadcast %19 : vector<4x1xf32> to vector<4x256xf32>
    %755 = arith.addf %753, %754 : vector<4x256xf32>
    %756 = vector.extract_strided_slice %18 {offsets = [0, 0], sizes = [4, 1], strides = [1, 1]} : vector<4x9xf32> to vector<4x1xf32>
    %757 = vector.extract_strided_slice %752 {offsets = [0, 0], sizes = [4, 256], strides = [1, 1]} : vector<4x2304xf32> to vector<4x256xf32>
    %758 = vector.broadcast %756 : vector<4x1xf32> to vector<4x256xf32>
    %759 = arith.mulf %758, %757 : vector<4x256xf32>
    %760 = arith.addf %755, %759 : vector<4x256xf32>
    %761 = vector.extract_strided_slice %18 {offsets = [0, 1], sizes = [4, 1], strides = [1, 1]} : vector<4x9xf32> to vector<4x1xf32>
    %762 = vector.extract_strided_slice %752 {offsets = [0, 256], sizes = [4, 256], strides = [1, 1]} : vector<4x2304xf32> to vector<4x256xf32>
    %763 = vector.broadcast %761 : vector<4x1xf32> to vector<4x256xf32>
    %764 = arith.mulf %763, %762 : vector<4x256xf32>
    %765 = arith.addf %760, %764 : vector<4x256xf32>
    %766 = vector.extract_strided_slice %18 {offsets = [0, 2], sizes = [4, 1], strides = [1, 1]} : vector<4x9xf32> to vector<4x1xf32>
    %767 = vector.extract_strided_slice %752 {offsets = [0, 512], sizes = [4, 256], strides = [1, 1]} : vector<4x2304xf32> to vector<4x256xf32>
    %768 = vector.broadcast %766 : vector<4x1xf32> to vector<4x256xf32>
    %769 = arith.mulf %768, %767 : vector<4x256xf32>
    %770 = arith.addf %765, %769 : vector<4x256xf32>
    %771 = vector.extract_strided_slice %18 {offsets = [0, 3], sizes = [4, 1], strides = [1, 1]} : vector<4x9xf32> to vector<4x1xf32>
    %772 = vector.extract_strided_slice %752 {offsets = [0, 768], sizes = [4, 256], strides = [1, 1]} : vector<4x2304xf32> to vector<4x256xf32>
    %773 = vector.broadcast %771 : vector<4x1xf32> to vector<4x256xf32>
    %774 = arith.mulf %773, %772 : vector<4x256xf32>
    %775 = arith.addf %770, %774 : vector<4x256xf32>
    %776 = vector.extract_strided_slice %18 {offsets = [0, 4], sizes = [4, 1], strides = [1, 1]} : vector<4x9xf32> to vector<4x1xf32>
    %777 = vector.extract_strided_slice %752 {offsets = [0, 1024], sizes = [4, 256], strides = [1, 1]} : vector<4x2304xf32> to vector<4x256xf32>
    %778 = vector.broadcast %776 : vector<4x1xf32> to vector<4x256xf32>
    %779 = arith.mulf %778, %777 : vector<4x256xf32>
    %780 = arith.addf %775, %779 : vector<4x256xf32>
    %781 = vector.extract_strided_slice %18 {offsets = [0, 5], sizes = [4, 1], strides = [1, 1]} : vector<4x9xf32> to vector<4x1xf32>
    %782 = vector.extract_strided_slice %752 {offsets = [0, 1280], sizes = [4, 256], strides = [1, 1]} : vector<4x2304xf32> to vector<4x256xf32>
    %783 = vector.broadcast %781 : vector<4x1xf32> to vector<4x256xf32>
    %784 = arith.mulf %783, %782 : vector<4x256xf32>
    %785 = arith.addf %780, %784 : vector<4x256xf32>
    %786 = vector.extract_strided_slice %18 {offsets = [0, 6], sizes = [4, 1], strides = [1, 1]} : vector<4x9xf32> to vector<4x1xf32>
    %787 = vector.extract_strided_slice %752 {offsets = [0, 1536], sizes = [4, 256], strides = [1, 1]} : vector<4x2304xf32> to vector<4x256xf32>
    %788 = vector.broadcast %786 : vector<4x1xf32> to vector<4x256xf32>
    %789 = arith.mulf %788, %787 : vector<4x256xf32>
    %790 = arith.addf %785, %789 : vector<4x256xf32>
    %791 = vector.extract_strided_slice %18 {offsets = [0, 7], sizes = [4, 1], strides = [1, 1]} : vector<4x9xf32> to vector<4x1xf32>
    %792 = vector.extract_strided_slice %752 {offsets = [0, 1792], sizes = [4, 256], strides = [1, 1]} : vector<4x2304xf32> to vector<4x256xf32>
    %793 = vector.broadcast %791 : vector<4x1xf32> to vector<4x256xf32>
    %794 = arith.mulf %793, %792 : vector<4x256xf32>
    %795 = arith.addf %790, %794 : vector<4x256xf32>
    %796 = vector.extract_strided_slice %18 {offsets = [0, 8], sizes = [4, 1], strides = [1, 1]} : vector<4x9xf32> to vector<4x1xf32>
    %797 = vector.extract_strided_slice %752 {offsets = [0, 2048], sizes = [4, 256], strides = [1, 1]} : vector<4x2304xf32> to vector<4x256xf32>
    %798 = vector.broadcast %796 : vector<4x1xf32> to vector<4x256xf32>
    %799 = arith.mulf %798, %797 : vector<4x256xf32>
    %800 = arith.addf %795, %799 : vector<4x256xf32>
    %cst_98 = arith.constant 0.000000e+00 : f32
    %801 = vector.broadcast %cst_98 : f32 to vector<8x256xf32>
    %802 = vector.extract_strided_slice %20 {offsets = [0, 0], sizes = [8, 1], strides = [1, 1]} : vector<8x4xf32> to vector<8x1xf32>
    %803 = vector.extract_strided_slice %724 {offsets = [0, 0], sizes = [1, 256], strides = [1, 1]} : vector<4x256xf32> to vector<1x256xf32>
    %804 = vector.broadcast %802 : vector<8x1xf32> to vector<8x256xf32>
    %805 = vector.broadcast %803 : vector<1x256xf32> to vector<8x256xf32>
    %806 = arith.mulf %804, %805 : vector<8x256xf32>
    %807 = arith.addf %801, %806 : vector<8x256xf32>
    %808 = vector.extract_strided_slice %20 {offsets = [0, 1], sizes = [8, 1], strides = [1, 1]} : vector<8x4xf32> to vector<8x1xf32>
    %809 = vector.extract_strided_slice %724 {offsets = [1, 0], sizes = [1, 256], strides = [1, 1]} : vector<4x256xf32> to vector<1x256xf32>
    %810 = vector.broadcast %808 : vector<8x1xf32> to vector<8x256xf32>
    %811 = vector.broadcast %809 : vector<1x256xf32> to vector<8x256xf32>
    %812 = arith.mulf %810, %811 : vector<8x256xf32>
    %813 = arith.addf %807, %812 : vector<8x256xf32>
    %814 = vector.extract_strided_slice %20 {offsets = [0, 2], sizes = [8, 1], strides = [1, 1]} : vector<8x4xf32> to vector<8x1xf32>
    %815 = vector.extract_strided_slice %724 {offsets = [2, 0], sizes = [1, 256], strides = [1, 1]} : vector<4x256xf32> to vector<1x256xf32>
    %816 = vector.broadcast %814 : vector<8x1xf32> to vector<8x256xf32>
    %817 = vector.broadcast %815 : vector<1x256xf32> to vector<8x256xf32>
    %818 = arith.mulf %816, %817 : vector<8x256xf32>
    %819 = arith.addf %813, %818 : vector<8x256xf32>
    %820 = vector.extract_strided_slice %20 {offsets = [0, 3], sizes = [8, 1], strides = [1, 1]} : vector<8x4xf32> to vector<8x1xf32>
    %821 = vector.extract_strided_slice %724 {offsets = [3, 0], sizes = [1, 256], strides = [1, 1]} : vector<4x256xf32> to vector<1x256xf32>
    %822 = vector.broadcast %820 : vector<8x1xf32> to vector<8x256xf32>
    %823 = vector.broadcast %821 : vector<1x256xf32> to vector<8x256xf32>
    %824 = arith.mulf %822, %823 : vector<8x256xf32>
    %825 = arith.addf %819, %824 : vector<8x256xf32>
    %cst_99 = arith.constant 0.000000e+00 : f32
    %826 = vector.broadcast %cst_99 : f32 to vector<8x256xf32>
    %827 = vector.extract_strided_slice %21 {offsets = [0, 0], sizes = [8, 1], strides = [1, 1]} : vector<8x4xf32> to vector<8x1xf32>
    %828 = vector.extract_strided_slice %800 {offsets = [0, 0], sizes = [1, 256], strides = [1, 1]} : vector<4x256xf32> to vector<1x256xf32>
    %829 = vector.broadcast %827 : vector<8x1xf32> to vector<8x256xf32>
    %830 = vector.broadcast %828 : vector<1x256xf32> to vector<8x256xf32>
    %831 = arith.mulf %829, %830 : vector<8x256xf32>
    %832 = arith.addf %826, %831 : vector<8x256xf32>
    %833 = vector.extract_strided_slice %21 {offsets = [0, 1], sizes = [8, 1], strides = [1, 1]} : vector<8x4xf32> to vector<8x1xf32>
    %834 = vector.extract_strided_slice %800 {offsets = [1, 0], sizes = [1, 256], strides = [1, 1]} : vector<4x256xf32> to vector<1x256xf32>
    %835 = vector.broadcast %833 : vector<8x1xf32> to vector<8x256xf32>
    %836 = vector.broadcast %834 : vector<1x256xf32> to vector<8x256xf32>
    %837 = arith.mulf %835, %836 : vector<8x256xf32>
    %838 = arith.addf %832, %837 : vector<8x256xf32>
    %839 = vector.extract_strided_slice %21 {offsets = [0, 2], sizes = [8, 1], strides = [1, 1]} : vector<8x4xf32> to vector<8x1xf32>
    %840 = vector.extract_strided_slice %800 {offsets = [2, 0], sizes = [1, 256], strides = [1, 1]} : vector<4x256xf32> to vector<1x256xf32>
    %841 = vector.broadcast %839 : vector<8x1xf32> to vector<8x256xf32>
    %842 = vector.broadcast %840 : vector<1x256xf32> to vector<8x256xf32>
    %843 = arith.mulf %841, %842 : vector<8x256xf32>
    %844 = arith.addf %838, %843 : vector<8x256xf32>
    %845 = vector.extract_strided_slice %21 {offsets = [0, 3], sizes = [8, 1], strides = [1, 1]} : vector<8x4xf32> to vector<8x1xf32>
    %846 = vector.extract_strided_slice %800 {offsets = [3, 0], sizes = [1, 256], strides = [1, 1]} : vector<4x256xf32> to vector<1x256xf32>
    %847 = vector.broadcast %845 : vector<8x1xf32> to vector<8x256xf32>
    %848 = vector.broadcast %846 : vector<1x256xf32> to vector<8x256xf32>
    %849 = arith.mulf %847, %848 : vector<8x256xf32>
    %850 = arith.addf %844, %849 : vector<8x256xf32>
    %851 = arith.addf %825, %850 : vector<8x256xf32>
    %852 = vector.broadcast %22 : vector<8x1xf32> to vector<8x256xf32>
    %853 = arith.addf %851, %852 : vector<8x256xf32>
    %cst_100 = arith.constant 0.000000e+00 : f32
    %854 = vector.broadcast %cst_100 : f32 to vector<2x256xf32>
    %855 = vector.extract_strided_slice %23 {offsets = [0, 0], sizes = [2, 1], strides = [1, 1]} : vector<2x8xf32> to vector<2x1xf32>
    %856 = vector.extract_strided_slice %853 {offsets = [0, 0], sizes = [1, 256], strides = [1, 1]} : vector<8x256xf32> to vector<1x256xf32>
    %857 = vector.broadcast %855 : vector<2x1xf32> to vector<2x256xf32>
    %858 = vector.broadcast %856 : vector<1x256xf32> to vector<2x256xf32>
    %859 = arith.mulf %857, %858 : vector<2x256xf32>
    %860 = arith.addf %854, %859 : vector<2x256xf32>
    %861 = vector.extract_strided_slice %23 {offsets = [0, 1], sizes = [2, 1], strides = [1, 1]} : vector<2x8xf32> to vector<2x1xf32>
    %862 = vector.extract_strided_slice %853 {offsets = [1, 0], sizes = [1, 256], strides = [1, 1]} : vector<8x256xf32> to vector<1x256xf32>
    %863 = vector.broadcast %861 : vector<2x1xf32> to vector<2x256xf32>
    %864 = vector.broadcast %862 : vector<1x256xf32> to vector<2x256xf32>
    %865 = arith.mulf %863, %864 : vector<2x256xf32>
    %866 = arith.addf %860, %865 : vector<2x256xf32>
    %867 = vector.extract_strided_slice %23 {offsets = [0, 2], sizes = [2, 1], strides = [1, 1]} : vector<2x8xf32> to vector<2x1xf32>
    %868 = vector.extract_strided_slice %853 {offsets = [2, 0], sizes = [1, 256], strides = [1, 1]} : vector<8x256xf32> to vector<1x256xf32>
    %869 = vector.broadcast %867 : vector<2x1xf32> to vector<2x256xf32>
    %870 = vector.broadcast %868 : vector<1x256xf32> to vector<2x256xf32>
    %871 = arith.mulf %869, %870 : vector<2x256xf32>
    %872 = arith.addf %866, %871 : vector<2x256xf32>
    %873 = vector.extract_strided_slice %23 {offsets = [0, 3], sizes = [2, 1], strides = [1, 1]} : vector<2x8xf32> to vector<2x1xf32>
    %874 = vector.extract_strided_slice %853 {offsets = [3, 0], sizes = [1, 256], strides = [1, 1]} : vector<8x256xf32> to vector<1x256xf32>
    %875 = vector.broadcast %873 : vector<2x1xf32> to vector<2x256xf32>
    %876 = vector.broadcast %874 : vector<1x256xf32> to vector<2x256xf32>
    %877 = arith.mulf %875, %876 : vector<2x256xf32>
    %878 = arith.addf %872, %877 : vector<2x256xf32>
    %879 = vector.extract_strided_slice %23 {offsets = [0, 4], sizes = [2, 1], strides = [1, 1]} : vector<2x8xf32> to vector<2x1xf32>
    %880 = vector.extract_strided_slice %853 {offsets = [4, 0], sizes = [1, 256], strides = [1, 1]} : vector<8x256xf32> to vector<1x256xf32>
    %881 = vector.broadcast %879 : vector<2x1xf32> to vector<2x256xf32>
    %882 = vector.broadcast %880 : vector<1x256xf32> to vector<2x256xf32>
    %883 = arith.mulf %881, %882 : vector<2x256xf32>
    %884 = arith.addf %878, %883 : vector<2x256xf32>
    %885 = vector.extract_strided_slice %23 {offsets = [0, 5], sizes = [2, 1], strides = [1, 1]} : vector<2x8xf32> to vector<2x1xf32>
    %886 = vector.extract_strided_slice %853 {offsets = [5, 0], sizes = [1, 256], strides = [1, 1]} : vector<8x256xf32> to vector<1x256xf32>
    %887 = vector.broadcast %885 : vector<2x1xf32> to vector<2x256xf32>
    %888 = vector.broadcast %886 : vector<1x256xf32> to vector<2x256xf32>
    %889 = arith.mulf %887, %888 : vector<2x256xf32>
    %890 = arith.addf %884, %889 : vector<2x256xf32>
    %891 = vector.extract_strided_slice %23 {offsets = [0, 6], sizes = [2, 1], strides = [1, 1]} : vector<2x8xf32> to vector<2x1xf32>
    %892 = vector.extract_strided_slice %853 {offsets = [6, 0], sizes = [1, 256], strides = [1, 1]} : vector<8x256xf32> to vector<1x256xf32>
    %893 = vector.broadcast %891 : vector<2x1xf32> to vector<2x256xf32>
    %894 = vector.broadcast %892 : vector<1x256xf32> to vector<2x256xf32>
    %895 = arith.mulf %893, %894 : vector<2x256xf32>
    %896 = arith.addf %890, %895 : vector<2x256xf32>
    %897 = vector.extract_strided_slice %23 {offsets = [0, 7], sizes = [2, 1], strides = [1, 1]} : vector<2x8xf32> to vector<2x1xf32>
    %898 = vector.extract_strided_slice %853 {offsets = [7, 0], sizes = [1, 256], strides = [1, 1]} : vector<8x256xf32> to vector<1x256xf32>
    %899 = vector.broadcast %897 : vector<2x1xf32> to vector<2x256xf32>
    %900 = vector.broadcast %898 : vector<1x256xf32> to vector<2x256xf32>
    %901 = arith.mulf %899, %900 : vector<2x256xf32>
    %902 = arith.addf %896, %901 : vector<2x256xf32>
    %903 = vector.broadcast %24 : vector<2x1xf32> to vector<2x256xf32>
    %904 = arith.addf %902, %903 : vector<2x256xf32>
    %cst_101 = arith.constant dense<0.000000e+00> : vector<2x1152xf32>
    %905 = tpu.matmul %904, %39, %cst_101 {dimension_numbers = #tpu.dot_dimension_numbers<[1], [0], [0], [1], [0, 0, 1, 1], [], []>} : vector<2x256xf32>, vector<256x1152xf32>, vector<2x1152xf32> -> vector<2x1152xf32>
    %cst_102 = arith.constant 0.000000e+00 : f32
    %906 = vector.broadcast %cst_102 : f32 to vector<2x128xf32>
    %907 = vector.broadcast %26 : vector<2x1xf32> to vector<2x128xf32>
    %908 = arith.addf %906, %907 : vector<2x128xf32>
    %909 = vector.extract_strided_slice %905 {offsets = [0, 0], sizes = [2, 128], strides = [1, 1]} : vector<2x1152xf32> to vector<2x128xf32>
    %910 = vector.extract_strided_slice %25 {offsets = [0, 0], sizes = [2, 1], strides = [1, 1]} : vector<2x18xf32> to vector<2x1xf32>
    %911 = vector.extract_strided_slice %909 {offsets = [0, 0], sizes = [1, 128], strides = [1, 1]} : vector<2x128xf32> to vector<1x128xf32>
    %912 = vector.broadcast %910 : vector<2x1xf32> to vector<2x128xf32>
    %913 = vector.broadcast %911 : vector<1x128xf32> to vector<2x128xf32>
    %914 = arith.mulf %912, %913 : vector<2x128xf32>
    %915 = arith.addf %908, %914 : vector<2x128xf32>
    %916 = vector.extract_strided_slice %25 {offsets = [0, 1], sizes = [2, 1], strides = [1, 1]} : vector<2x18xf32> to vector<2x1xf32>
    %917 = vector.extract_strided_slice %909 {offsets = [1, 0], sizes = [1, 128], strides = [1, 1]} : vector<2x128xf32> to vector<1x128xf32>
    %918 = vector.broadcast %916 : vector<2x1xf32> to vector<2x128xf32>
    %919 = vector.broadcast %917 : vector<1x128xf32> to vector<2x128xf32>
    %920 = arith.mulf %918, %919 : vector<2x128xf32>
    %921 = arith.addf %915, %920 : vector<2x128xf32>
    %922 = vector.extract_strided_slice %905 {offsets = [0, 128], sizes = [2, 128], strides = [1, 1]} : vector<2x1152xf32> to vector<2x128xf32>
    %923 = vector.extract_strided_slice %25 {offsets = [0, 2], sizes = [2, 1], strides = [1, 1]} : vector<2x18xf32> to vector<2x1xf32>
    %924 = vector.extract_strided_slice %922 {offsets = [0, 0], sizes = [1, 128], strides = [1, 1]} : vector<2x128xf32> to vector<1x128xf32>
    %925 = vector.broadcast %923 : vector<2x1xf32> to vector<2x128xf32>
    %926 = vector.broadcast %924 : vector<1x128xf32> to vector<2x128xf32>
    %927 = arith.mulf %925, %926 : vector<2x128xf32>
    %928 = arith.addf %921, %927 : vector<2x128xf32>
    %929 = vector.extract_strided_slice %25 {offsets = [0, 3], sizes = [2, 1], strides = [1, 1]} : vector<2x18xf32> to vector<2x1xf32>
    %930 = vector.extract_strided_slice %922 {offsets = [1, 0], sizes = [1, 128], strides = [1, 1]} : vector<2x128xf32> to vector<1x128xf32>
    %931 = vector.broadcast %929 : vector<2x1xf32> to vector<2x128xf32>
    %932 = vector.broadcast %930 : vector<1x128xf32> to vector<2x128xf32>
    %933 = arith.mulf %931, %932 : vector<2x128xf32>
    %934 = arith.addf %928, %933 : vector<2x128xf32>
    %935 = vector.extract_strided_slice %905 {offsets = [0, 256], sizes = [2, 128], strides = [1, 1]} : vector<2x1152xf32> to vector<2x128xf32>
    %936 = vector.extract_strided_slice %25 {offsets = [0, 4], sizes = [2, 1], strides = [1, 1]} : vector<2x18xf32> to vector<2x1xf32>
    %937 = vector.extract_strided_slice %935 {offsets = [0, 0], sizes = [1, 128], strides = [1, 1]} : vector<2x128xf32> to vector<1x128xf32>
    %938 = vector.broadcast %936 : vector<2x1xf32> to vector<2x128xf32>
    %939 = vector.broadcast %937 : vector<1x128xf32> to vector<2x128xf32>
    %940 = arith.mulf %938, %939 : vector<2x128xf32>
    %941 = arith.addf %934, %940 : vector<2x128xf32>
    %942 = vector.extract_strided_slice %25 {offsets = [0, 5], sizes = [2, 1], strides = [1, 1]} : vector<2x18xf32> to vector<2x1xf32>
    %943 = vector.extract_strided_slice %935 {offsets = [1, 0], sizes = [1, 128], strides = [1, 1]} : vector<2x128xf32> to vector<1x128xf32>
    %944 = vector.broadcast %942 : vector<2x1xf32> to vector<2x128xf32>
    %945 = vector.broadcast %943 : vector<1x128xf32> to vector<2x128xf32>
    %946 = arith.mulf %944, %945 : vector<2x128xf32>
    %947 = arith.addf %941, %946 : vector<2x128xf32>
    %948 = vector.extract_strided_slice %905 {offsets = [0, 384], sizes = [2, 128], strides = [1, 1]} : vector<2x1152xf32> to vector<2x128xf32>
    %949 = vector.extract_strided_slice %25 {offsets = [0, 6], sizes = [2, 1], strides = [1, 1]} : vector<2x18xf32> to vector<2x1xf32>
    %950 = vector.extract_strided_slice %948 {offsets = [0, 0], sizes = [1, 128], strides = [1, 1]} : vector<2x128xf32> to vector<1x128xf32>
    %951 = vector.broadcast %949 : vector<2x1xf32> to vector<2x128xf32>
    %952 = vector.broadcast %950 : vector<1x128xf32> to vector<2x128xf32>
    %953 = arith.mulf %951, %952 : vector<2x128xf32>
    %954 = arith.addf %947, %953 : vector<2x128xf32>
    %955 = vector.extract_strided_slice %25 {offsets = [0, 7], sizes = [2, 1], strides = [1, 1]} : vector<2x18xf32> to vector<2x1xf32>
    %956 = vector.extract_strided_slice %948 {offsets = [1, 0], sizes = [1, 128], strides = [1, 1]} : vector<2x128xf32> to vector<1x128xf32>
    %957 = vector.broadcast %955 : vector<2x1xf32> to vector<2x128xf32>
    %958 = vector.broadcast %956 : vector<1x128xf32> to vector<2x128xf32>
    %959 = arith.mulf %957, %958 : vector<2x128xf32>
    %960 = arith.addf %954, %959 : vector<2x128xf32>
    %961 = vector.extract_strided_slice %905 {offsets = [0, 512], sizes = [2, 128], strides = [1, 1]} : vector<2x1152xf32> to vector<2x128xf32>
    %962 = vector.extract_strided_slice %25 {offsets = [0, 8], sizes = [2, 1], strides = [1, 1]} : vector<2x18xf32> to vector<2x1xf32>
    %963 = vector.extract_strided_slice %961 {offsets = [0, 0], sizes = [1, 128], strides = [1, 1]} : vector<2x128xf32> to vector<1x128xf32>
    %964 = vector.broadcast %962 : vector<2x1xf32> to vector<2x128xf32>
    %965 = vector.broadcast %963 : vector<1x128xf32> to vector<2x128xf32>
    %966 = arith.mulf %964, %965 : vector<2x128xf32>
    %967 = arith.addf %960, %966 : vector<2x128xf32>
    %968 = vector.extract_strided_slice %25 {offsets = [0, 9], sizes = [2, 1], strides = [1, 1]} : vector<2x18xf32> to vector<2x1xf32>
    %969 = vector.extract_strided_slice %961 {offsets = [1, 0], sizes = [1, 128], strides = [1, 1]} : vector<2x128xf32> to vector<1x128xf32>
    %970 = vector.broadcast %968 : vector<2x1xf32> to vector<2x128xf32>
    %971 = vector.broadcast %969 : vector<1x128xf32> to vector<2x128xf32>
    %972 = arith.mulf %970, %971 : vector<2x128xf32>
    %973 = arith.addf %967, %972 : vector<2x128xf32>
    %974 = vector.extract_strided_slice %905 {offsets = [0, 640], sizes = [2, 128], strides = [1, 1]} : vector<2x1152xf32> to vector<2x128xf32>
    %975 = vector.extract_strided_slice %25 {offsets = [0, 10], sizes = [2, 1], strides = [1, 1]} : vector<2x18xf32> to vector<2x1xf32>
    %976 = vector.extract_strided_slice %974 {offsets = [0, 0], sizes = [1, 128], strides = [1, 1]} : vector<2x128xf32> to vector<1x128xf32>
    %977 = vector.broadcast %975 : vector<2x1xf32> to vector<2x128xf32>
    %978 = vector.broadcast %976 : vector<1x128xf32> to vector<2x128xf32>
    %979 = arith.mulf %977, %978 : vector<2x128xf32>
    %980 = arith.addf %973, %979 : vector<2x128xf32>
    %981 = vector.extract_strided_slice %25 {offsets = [0, 11], sizes = [2, 1], strides = [1, 1]} : vector<2x18xf32> to vector<2x1xf32>
    %982 = vector.extract_strided_slice %974 {offsets = [1, 0], sizes = [1, 128], strides = [1, 1]} : vector<2x128xf32> to vector<1x128xf32>
    %983 = vector.broadcast %981 : vector<2x1xf32> to vector<2x128xf32>
    %984 = vector.broadcast %982 : vector<1x128xf32> to vector<2x128xf32>
    %985 = arith.mulf %983, %984 : vector<2x128xf32>
    %986 = arith.addf %980, %985 : vector<2x128xf32>
    %987 = vector.extract_strided_slice %905 {offsets = [0, 768], sizes = [2, 128], strides = [1, 1]} : vector<2x1152xf32> to vector<2x128xf32>
    %988 = vector.extract_strided_slice %25 {offsets = [0, 12], sizes = [2, 1], strides = [1, 1]} : vector<2x18xf32> to vector<2x1xf32>
    %989 = vector.extract_strided_slice %987 {offsets = [0, 0], sizes = [1, 128], strides = [1, 1]} : vector<2x128xf32> to vector<1x128xf32>
    %990 = vector.broadcast %988 : vector<2x1xf32> to vector<2x128xf32>
    %991 = vector.broadcast %989 : vector<1x128xf32> to vector<2x128xf32>
    %992 = arith.mulf %990, %991 : vector<2x128xf32>
    %993 = arith.addf %986, %992 : vector<2x128xf32>
    %994 = vector.extract_strided_slice %25 {offsets = [0, 13], sizes = [2, 1], strides = [1, 1]} : vector<2x18xf32> to vector<2x1xf32>
    %995 = vector.extract_strided_slice %987 {offsets = [1, 0], sizes = [1, 128], strides = [1, 1]} : vector<2x128xf32> to vector<1x128xf32>
    %996 = vector.broadcast %994 : vector<2x1xf32> to vector<2x128xf32>
    %997 = vector.broadcast %995 : vector<1x128xf32> to vector<2x128xf32>
    %998 = arith.mulf %996, %997 : vector<2x128xf32>
    %999 = arith.addf %993, %998 : vector<2x128xf32>
    %1000 = vector.extract_strided_slice %905 {offsets = [0, 896], sizes = [2, 128], strides = [1, 1]} : vector<2x1152xf32> to vector<2x128xf32>
    %1001 = vector.extract_strided_slice %25 {offsets = [0, 14], sizes = [2, 1], strides = [1, 1]} : vector<2x18xf32> to vector<2x1xf32>
    %1002 = vector.extract_strided_slice %1000 {offsets = [0, 0], sizes = [1, 128], strides = [1, 1]} : vector<2x128xf32> to vector<1x128xf32>
    %1003 = vector.broadcast %1001 : vector<2x1xf32> to vector<2x128xf32>
    %1004 = vector.broadcast %1002 : vector<1x128xf32> to vector<2x128xf32>
    %1005 = arith.mulf %1003, %1004 : vector<2x128xf32>
    %1006 = arith.addf %999, %1005 : vector<2x128xf32>
    %1007 = vector.extract_strided_slice %25 {offsets = [0, 15], sizes = [2, 1], strides = [1, 1]} : vector<2x18xf32> to vector<2x1xf32>
    %1008 = vector.extract_strided_slice %1000 {offsets = [1, 0], sizes = [1, 128], strides = [1, 1]} : vector<2x128xf32> to vector<1x128xf32>
    %1009 = vector.broadcast %1007 : vector<2x1xf32> to vector<2x128xf32>
    %1010 = vector.broadcast %1008 : vector<1x128xf32> to vector<2x128xf32>
    %1011 = arith.mulf %1009, %1010 : vector<2x128xf32>
    %1012 = arith.addf %1006, %1011 : vector<2x128xf32>
    %1013 = vector.extract_strided_slice %905 {offsets = [0, 1024], sizes = [2, 128], strides = [1, 1]} : vector<2x1152xf32> to vector<2x128xf32>
    %1014 = vector.extract_strided_slice %25 {offsets = [0, 16], sizes = [2, 1], strides = [1, 1]} : vector<2x18xf32> to vector<2x1xf32>
    %1015 = vector.extract_strided_slice %1013 {offsets = [0, 0], sizes = [1, 128], strides = [1, 1]} : vector<2x128xf32> to vector<1x128xf32>
    %1016 = vector.broadcast %1014 : vector<2x1xf32> to vector<2x128xf32>
    %1017 = vector.broadcast %1015 : vector<1x128xf32> to vector<2x128xf32>
    %1018 = arith.mulf %1016, %1017 : vector<2x128xf32>
    %1019 = arith.addf %1012, %1018 : vector<2x128xf32>
    %1020 = vector.extract_strided_slice %25 {offsets = [0, 17], sizes = [2, 1], strides = [1, 1]} : vector<2x18xf32> to vector<2x1xf32>
    %1021 = vector.extract_strided_slice %1013 {offsets = [1, 0], sizes = [1, 128], strides = [1, 1]} : vector<2x128xf32> to vector<1x128xf32>
    %1022 = vector.broadcast %1020 : vector<2x1xf32> to vector<2x128xf32>
    %1023 = vector.broadcast %1021 : vector<1x128xf32> to vector<2x128xf32>
    %1024 = arith.mulf %1022, %1023 : vector<2x128xf32>
    %1025 = arith.addf %1019, %1024 : vector<2x128xf32>
    %cst_103 = arith.constant dense<0xFF800000> : vector<2xf32>
    %1026 = vector.multi_reduction <maximumf>, %1025, %cst_103 [1] : vector<2x128xf32> to vector<2xf32>
    %1027 = vector.shape_cast %1026 : vector<2xf32> to vector<2x1xf32>
    %cst_104 = arith.constant 0.000000e+00 : f32
    %1028 = vector.broadcast %cst_104 : f32 to vector<2x1xf32>
    %1029 = vector.extract_strided_slice %27 {offsets = [0, 0], sizes = [2, 1], strides = [1, 1]} : vector<2x2xf32> to vector<2x1xf32>
    %1030 = vector.extract_strided_slice %1027 {offsets = [0, 0], sizes = [1, 1], strides = [1, 1]} : vector<2x1xf32> to vector<1x1xf32>
    %1031 = vector.broadcast %1030 : vector<1x1xf32> to vector<2x1xf32>
    %1032 = arith.mulf %1029, %1031 : vector<2x1xf32>
    %1033 = arith.addf %1028, %1032 : vector<2x1xf32>
    %1034 = vector.extract_strided_slice %27 {offsets = [0, 1], sizes = [2, 1], strides = [1, 1]} : vector<2x2xf32> to vector<2x1xf32>
    %1035 = vector.extract_strided_slice %1027 {offsets = [1, 0], sizes = [1, 1], strides = [1, 1]} : vector<2x1xf32> to vector<1x1xf32>
    %1036 = vector.broadcast %1035 : vector<1x1xf32> to vector<2x1xf32>
    %1037 = arith.mulf %1034, %1036 : vector<2x1xf32>
    %1038 = arith.addf %1033, %1037 : vector<2x1xf32>
    %1039 = arith.addf %1038, %28 : vector<2x1xf32>
    %cst_105 = arith.constant 0.000000e+00 : f32
    %1040 = vector.broadcast %cst_105 : f32 to vector<2x1xf32>
    %1041 = arith.maximumf %1039, %1040 : vector<2x1xf32>
    %cst_106 = arith.constant 0.000000e+00 : f32
    %1042 = vector.broadcast %cst_106 : f32 to vector<2x1xf32>
    %1043 = vector.extract_strided_slice %29 {offsets = [0, 0], sizes = [2, 1], strides = [1, 1]} : vector<2x2xf32> to vector<2x1xf32>
    %1044 = vector.extract_strided_slice %1041 {offsets = [0, 0], sizes = [1, 1], strides = [1, 1]} : vector<2x1xf32> to vector<1x1xf32>
    %1045 = vector.broadcast %1044 : vector<1x1xf32> to vector<2x1xf32>
    %1046 = arith.mulf %1043, %1045 : vector<2x1xf32>
    %1047 = arith.addf %1042, %1046 : vector<2x1xf32>
    %1048 = vector.extract_strided_slice %29 {offsets = [0, 1], sizes = [2, 1], strides = [1, 1]} : vector<2x2xf32> to vector<2x1xf32>
    %1049 = vector.extract_strided_slice %1041 {offsets = [1, 0], sizes = [1, 1], strides = [1, 1]} : vector<2x1xf32> to vector<1x1xf32>
    %1050 = vector.broadcast %1049 : vector<1x1xf32> to vector<2x1xf32>
    %1051 = arith.mulf %1048, %1050 : vector<2x1xf32>
    %1052 = arith.addf %1047, %1051 : vector<2x1xf32>
    %1053 = arith.addf %1052, %30 : vector<2x1xf32>
    %cst_107 = arith.constant 0.000000e+00 : f32
    %1054 = vector.broadcast %cst_107 : f32 to vector<2x1xf32>
    %1055 = arith.maximumf %1053, %1054 : vector<2x1xf32>
    %cst_108 = arith.constant 0.000000e+00 : f32
    %1056 = vector.broadcast %cst_108 : f32 to vector<2x1xf32>
    %1057 = vector.extract_strided_slice %31 {offsets = [0, 0], sizes = [2, 1], strides = [1, 1]} : vector<2x2xf32> to vector<2x1xf32>
    %1058 = vector.extract_strided_slice %1055 {offsets = [0, 0], sizes = [1, 1], strides = [1, 1]} : vector<2x1xf32> to vector<1x1xf32>
    %1059 = vector.broadcast %1058 : vector<1x1xf32> to vector<2x1xf32>
    %1060 = arith.mulf %1057, %1059 : vector<2x1xf32>
    %1061 = arith.addf %1056, %1060 : vector<2x1xf32>
    %1062 = vector.extract_strided_slice %31 {offsets = [0, 1], sizes = [2, 1], strides = [1, 1]} : vector<2x2xf32> to vector<2x1xf32>
    %1063 = vector.extract_strided_slice %1055 {offsets = [1, 0], sizes = [1, 1], strides = [1, 1]} : vector<2x1xf32> to vector<1x1xf32>
    %1064 = vector.broadcast %1063 : vector<1x1xf32> to vector<2x1xf32>
    %1065 = arith.mulf %1062, %1064 : vector<2x1xf32>
    %1066 = arith.addf %1061, %1065 : vector<2x1xf32>
    %1067 = arith.addf %1066, %32 : vector<2x1xf32>
    %cst_109 = arith.constant 0.000000e+00 : f32
    %1068 = vector.broadcast %cst_109 : f32 to vector<2x256xf32>
    %1069 = vector.extract_strided_slice %33 {offsets = [0, 0], sizes = [2, 1], strides = [1, 1]} : vector<2x2xf32> to vector<2x1xf32>
    %1070 = vector.extract_strided_slice %904 {offsets = [0, 0], sizes = [1, 256], strides = [1, 1]} : vector<2x256xf32> to vector<1x256xf32>
    %1071 = vector.broadcast %1069 : vector<2x1xf32> to vector<2x256xf32>
    %1072 = vector.broadcast %1070 : vector<1x256xf32> to vector<2x256xf32>
    %1073 = arith.mulf %1071, %1072 : vector<2x256xf32>
    %1074 = arith.addf %1068, %1073 : vector<2x256xf32>
    %1075 = vector.extract_strided_slice %33 {offsets = [0, 1], sizes = [2, 1], strides = [1, 1]} : vector<2x2xf32> to vector<2x1xf32>
    %1076 = vector.extract_strided_slice %904 {offsets = [1, 0], sizes = [1, 256], strides = [1, 1]} : vector<2x256xf32> to vector<1x256xf32>
    %1077 = vector.broadcast %1075 : vector<2x1xf32> to vector<2x256xf32>
    %1078 = vector.broadcast %1076 : vector<1x256xf32> to vector<2x256xf32>
    %1079 = arith.mulf %1077, %1078 : vector<2x256xf32>
    %1080 = arith.addf %1074, %1079 : vector<2x256xf32>
    %1081 = vector.broadcast %34 : vector<2x1xf32> to vector<2x256xf32>
    %1082 = arith.addf %1080, %1081 : vector<2x256xf32>
    %1083 = vector.broadcast %1067 : vector<2x1xf32> to vector<2x256xf32>
    %1084 = arith.addf %1082, %1083 : vector<2x256xf32>
    %cst_110 = arith.constant 0.000000e+00 : f32
    %1085 = vector.broadcast %cst_110 : f32 to vector<8x256xf32>
    %1086 = vector.extract_strided_slice %35 {offsets = [0, 0], sizes = [8, 1], strides = [1, 1]} : vector<8x2xf32> to vector<8x1xf32>
    %1087 = vector.extract_strided_slice %1084 {offsets = [0, 0], sizes = [1, 256], strides = [1, 1]} : vector<2x256xf32> to vector<1x256xf32>
    %1088 = vector.broadcast %1086 : vector<8x1xf32> to vector<8x256xf32>
    %1089 = vector.broadcast %1087 : vector<1x256xf32> to vector<8x256xf32>
    %1090 = arith.mulf %1088, %1089 : vector<8x256xf32>
    %1091 = arith.addf %1085, %1090 : vector<8x256xf32>
    %1092 = vector.extract_strided_slice %35 {offsets = [0, 1], sizes = [8, 1], strides = [1, 1]} : vector<8x2xf32> to vector<8x1xf32>
    %1093 = vector.extract_strided_slice %1084 {offsets = [1, 0], sizes = [1, 256], strides = [1, 1]} : vector<2x256xf32> to vector<1x256xf32>
    %1094 = vector.broadcast %1092 : vector<8x1xf32> to vector<8x256xf32>
    %1095 = vector.broadcast %1093 : vector<1x256xf32> to vector<8x256xf32>
    %1096 = arith.mulf %1094, %1095 : vector<8x256xf32>
    %1097 = arith.addf %1091, %1096 : vector<8x256xf32>
    %1098 = vector.broadcast %36 : vector<8x1xf32> to vector<8x256xf32>
    %1099 = arith.addf %1097, %1098 : vector<8x256xf32>
    %1100 = arith.negf %1099 : vector<8x256xf32>
    %1101 = math.exp %1100 : vector<8x256xf32>
    %cst_111 = arith.constant 1.000000e+00 : f32
    %1102 = vector.broadcast %cst_111 : f32 to vector<8x256xf32>
    %1103 = arith.addf %1102, %1101 : vector<8x256xf32>
    %1104 = arith.divf %1102, %1103 : vector<8x256xf32>
    %1105 = arith.mulf %853, %1104 : vector<8x256xf32>
    %1106 = arith.addf %1105, %37 : vector<8x256xf32>
    %c0_112 = arith.constant 0 : index
    %c0_113 = arith.constant 0 : index
    %1107 = vector.load %arg42[%c0_112, %c0_113] : memref<8x256xf32, #tpu.memory_space<vmem>>, vector<8x256xf32>
    tpu.vector_store %arg42[%c0_112, %c0_113], %1106 {strides = array<i32>} : memref<8x256xf32, #tpu.memory_space<vmem>>, vector<8x256xf32>,
    return
  }
  func.func @transform_0(%arg0: i32) -> (i32, i32) {
    %c0_i32 = arith.constant 0 : i32
    %c0_i32_0 = arith.constant 0 : i32
    return %c0_i32, %arg0 : i32, i32
  }
  func.func @transform_1(%arg0: i32) -> (i32, i32) {
    %c0_i32 = arith.constant 0 : i32
    %c0_i32_0 = arith.constant 0 : i32
    %c0_i32_1 = arith.constant 0 : i32
    return %c0_i32, %c0_i32_0 : i32, i32
  }
  func.func @transform_2(%arg0: i32) -> (i32, i32) {
    %c0_i32 = arith.constant 0 : i32
    %c0_i32_0 = arith.constant 0 : i32
    %c0_i32_1 = arith.constant 0 : i32
    return %c0_i32, %c0_i32_0 : i32, i32
  }
  func.func @transform_3(%arg0: i32) -> (i32, i32) {
    %c0_i32 = arith.constant 0 : i32
    %c0_i32_0 = arith.constant 0 : i32
    %c0_i32_1 = arith.constant 0 : i32
    return %c0_i32, %c0_i32_0 : i32, i32
  }
  func.func @transform_4(%arg0: i32) -> (i32, i32) {
    %c0_i32 = arith.constant 0 : i32
    %c0_i32_0 = arith.constant 0 : i32
    %c0_i32_1 = arith.constant 0 : i32
    return %c0_i32, %c0_i32_0 : i32, i32
  }
  func.func @transform_5(%arg0: i32) -> (i32, i32) {
    %c0_i32 = arith.constant 0 : i32
    %c0_i32_0 = arith.constant 0 : i32
    %c0_i32_1 = arith.constant 0 : i32
    return %c0_i32, %c0_i32_0 : i32, i32
  }
  func.func @transform_6(%arg0: i32) -> (i32, i32) {
    %c0_i32 = arith.constant 0 : i32
    %c0_i32_0 = arith.constant 0 : i32
    %c0_i32_1 = arith.constant 0 : i32
    return %c0_i32, %c0_i32_0 : i32, i32
  }
  func.func @transform_7(%arg0: i32) -> (i32, i32) {
    %c0_i32 = arith.constant 0 : i32
    %c0_i32_0 = arith.constant 0 : i32
    %c0_i32_1 = arith.constant 0 : i32
    return %c0_i32, %c0_i32_0 : i32, i32
  }
  func.func @transform_8(%arg0: i32) -> (i32, i32) {
    %c0_i32 = arith.constant 0 : i32
    %c0_i32_0 = arith.constant 0 : i32
    %c0_i32_1 = arith.constant 0 : i32
    return %c0_i32, %c0_i32_0 : i32, i32
  }
  func.func @transform_9(%arg0: i32) -> (i32, i32) {
    %c0_i32 = arith.constant 0 : i32
    %c0_i32_0 = arith.constant 0 : i32
    %c0_i32_1 = arith.constant 0 : i32
    return %c0_i32, %c0_i32_0 : i32, i32
  }
  func.func @transform_10(%arg0: i32) -> (i32, i32) {
    %c0_i32 = arith.constant 0 : i32
    %c0_i32_0 = arith.constant 0 : i32
    %c0_i32_1 = arith.constant 0 : i32
    return %c0_i32, %c0_i32_0 : i32, i32
  }
  func.func @transform_11(%arg0: i32) -> (i32, i32) {
    %c0_i32 = arith.constant 0 : i32
    %c0_i32_0 = arith.constant 0 : i32
    %c0_i32_1 = arith.constant 0 : i32
    return %c0_i32, %c0_i32_0 : i32, i32
  }
  func.func @transform_12(%arg0: i32) -> (i32, i32) {
    %c0_i32 = arith.constant 0 : i32
    %c0_i32_0 = arith.constant 0 : i32
    %c0_i32_1 = arith.constant 0 : i32
    return %c0_i32, %c0_i32_0 : i32, i32
  }
  func.func @transform_13(%arg0: i32) -> (i32, i32) {
    %c0_i32 = arith.constant 0 : i32
    %c0_i32_0 = arith.constant 0 : i32
    %c0_i32_1 = arith.constant 0 : i32
    return %c0_i32, %c0_i32_0 : i32, i32
  }
  func.func @transform_14(%arg0: i32) -> (i32, i32) {
    %c0_i32 = arith.constant 0 : i32
    %c0_i32_0 = arith.constant 0 : i32
    %c0_i32_1 = arith.constant 0 : i32
    return %c0_i32, %c0_i32_0 : i32, i32
  }
  func.func @transform_15(%arg0: i32) -> (i32, i32) {
    %c0_i32 = arith.constant 0 : i32
    %c0_i32_0 = arith.constant 0 : i32
    %c0_i32_1 = arith.constant 0 : i32
    return %c0_i32, %c0_i32_0 : i32, i32
  }
  func.func @transform_16(%arg0: i32) -> (i32, i32) {
    %c0_i32 = arith.constant 0 : i32
    %c0_i32_0 = arith.constant 0 : i32
    %c0_i32_1 = arith.constant 0 : i32
    return %c0_i32, %c0_i32_0 : i32, i32
  }
  func.func @transform_17(%arg0: i32) -> (i32, i32) {
    %c0_i32 = arith.constant 0 : i32
    %c0_i32_0 = arith.constant 0 : i32
    %c0_i32_1 = arith.constant 0 : i32
    return %c0_i32, %c0_i32_0 : i32, i32
  }
  func.func @transform_18(%arg0: i32) -> (i32, i32) {
    %c0_i32 = arith.constant 0 : i32
    %c0_i32_0 = arith.constant 0 : i32
    %c0_i32_1 = arith.constant 0 : i32
    return %c0_i32, %c0_i32_0 : i32, i32
  }
  func.func @transform_19(%arg0: i32) -> (i32, i32) {
    %c0_i32 = arith.constant 0 : i32
    %c0_i32_0 = arith.constant 0 : i32
    %c0_i32_1 = arith.constant 0 : i32
    return %c0_i32, %c0_i32_0 : i32, i32
  }
  func.func @transform_20(%arg0: i32) -> (i32, i32) {
    %c0_i32 = arith.constant 0 : i32
    %c0_i32_0 = arith.constant 0 : i32
    %c0_i32_1 = arith.constant 0 : i32
    return %c0_i32, %c0_i32_0 : i32, i32
  }
  func.func @transform_21(%arg0: i32) -> (i32, i32) {
    %c0_i32 = arith.constant 0 : i32
    %c0_i32_0 = arith.constant 0 : i32
    %c0_i32_1 = arith.constant 0 : i32
    return %c0_i32, %c0_i32_0 : i32, i32
  }
  func.func @transform_22(%arg0: i32) -> (i32, i32) {
    %c0_i32 = arith.constant 0 : i32
    %c0_i32_0 = arith.constant 0 : i32
    %c0_i32_1 = arith.constant 0 : i32
    return %c0_i32, %c0_i32_0 : i32, i32
  }
  func.func @transform_23(%arg0: i32) -> (i32, i32) {
    %c0_i32 = arith.constant 0 : i32
    %c0_i32_0 = arith.constant 0 : i32
    %c0_i32_1 = arith.constant 0 : i32
    return %c0_i32, %c0_i32_0 : i32, i32
  }
  func.func @transform_24(%arg0: i32) -> (i32, i32) {
    %c0_i32 = arith.constant 0 : i32
    %c0_i32_0 = arith.constant 0 : i32
    %c0_i32_1 = arith.constant 0 : i32
    return %c0_i32, %c0_i32_0 : i32, i32
  }
  func.func @transform_25(%arg0: i32) -> (i32, i32) {
    %c0_i32 = arith.constant 0 : i32
    %c0_i32_0 = arith.constant 0 : i32
    %c0_i32_1 = arith.constant 0 : i32
    return %c0_i32, %c0_i32_0 : i32, i32
  }
  func.func @transform_26(%arg0: i32) -> (i32, i32) {
    %c0_i32 = arith.constant 0 : i32
    %c0_i32_0 = arith.constant 0 : i32
    %c0_i32_1 = arith.constant 0 : i32
    return %c0_i32, %c0_i32_0 : i32, i32
  }
  func.func @transform_27(%arg0: i32) -> (i32, i32) {
    %c0_i32 = arith.constant 0 : i32
    %c0_i32_0 = arith.constant 0 : i32
    %c0_i32_1 = arith.constant 0 : i32
    return %c0_i32, %c0_i32_0 : i32, i32
  }
  func.func @transform_28(%arg0: i32) -> (i32, i32) {
    %c0_i32 = arith.constant 0 : i32
    %c0_i32_0 = arith.constant 0 : i32
    %c0_i32_1 = arith.constant 0 : i32
    return %c0_i32, %c0_i32_0 : i32, i32
  }
  func.func @transform_29(%arg0: i32) -> (i32, i32) {
    %c0_i32 = arith.constant 0 : i32
    %c0_i32_0 = arith.constant 0 : i32
    %c0_i32_1 = arith.constant 0 : i32
    return %c0_i32, %c0_i32_0 : i32, i32
  }
  func.func @transform_30(%arg0: i32) -> (i32, i32) {
    %c0_i32 = arith.constant 0 : i32
    %c0_i32_0 = arith.constant 0 : i32
    %c0_i32_1 = arith.constant 0 : i32
    return %c0_i32, %c0_i32_0 : i32, i32
  }
  func.func @transform_31(%arg0: i32) -> (i32, i32) {
    %c0_i32 = arith.constant 0 : i32
    %c0_i32_0 = arith.constant 0 : i32
    %c0_i32_1 = arith.constant 0 : i32
    return %c0_i32, %c0_i32_0 : i32, i32
  }
  func.func @transform_32(%arg0: i32) -> (i32, i32) {
    %c0_i32 = arith.constant 0 : i32
    %c0_i32_0 = arith.constant 0 : i32
    %c0_i32_1 = arith.constant 0 : i32
    return %c0_i32, %c0_i32_0 : i32, i32
  }
  func.func @transform_33(%arg0: i32) -> (i32, i32) {
    %c0_i32 = arith.constant 0 : i32
    %c0_i32_0 = arith.constant 0 : i32
    %c0_i32_1 = arith.constant 0 : i32
    return %c0_i32, %c0_i32_0 : i32, i32
  }
  func.func @transform_34(%arg0: i32) -> (i32, i32) {
    %c0_i32 = arith.constant 0 : i32
    %c0_i32_0 = arith.constant 0 : i32
    %c0_i32_1 = arith.constant 0 : i32
    return %c0_i32, %c0_i32_0 : i32, i32
  }
  func.func @transform_35(%arg0: i32) -> (i32, i32) {
    %c0_i32 = arith.constant 0 : i32
    %c0_i32_0 = arith.constant 0 : i32
    %c0_i32_1 = arith.constant 0 : i32
    return %c0_i32, %c0_i32_0 : i32, i32
  }
  func.func @transform_36(%arg0: i32) -> (i32, i32) {
    %c0_i32 = arith.constant 0 : i32
    %c0_i32_0 = arith.constant 0 : i32
    %c0_i32_1 = arith.constant 0 : i32
    return %c0_i32, %c0_i32_0 : i32, i32
  }
  func.func @transform_37(%arg0: i32) -> (i32, i32) {
    %c0_i32 = arith.constant 0 : i32
    %c0_i32_0 = arith.constant 0 : i32
    %c0_i32_1 = arith.constant 0 : i32
    return %c0_i32, %c0_i32_0 : i32, i32
  }
  func.func @transform_38(%arg0: i32) -> (i32, i32) {
    %c0_i32 = arith.constant 0 : i32
    %c0_i32_0 = arith.constant 0 : i32
    %c0_i32_1 = arith.constant 0 : i32
    return %c0_i32, %c0_i32_0 : i32, i32
  }
  func.func @transform_39(%arg0: i32) -> (i32, i32) {
    %c0_i32 = arith.constant 0 : i32
    %c0_i32_0 = arith.constant 0 : i32
    %c0_i32_1 = arith.constant 0 : i32
    return %c0_i32, %c0_i32_0 : i32, i32
  }
  func.func @transform_40(%arg0: i32) -> (i32, i32) {
    %c0_i32 = arith.constant 0 : i32
    %c0_i32_0 = arith.constant 0 : i32
    %c0_i32_1 = arith.constant 0 : i32
    return %c0_i32, %c0_i32_0 : i32, i32
  }
  func.func @transform_41(%arg0: i32) -> (i32, i32) {
    %c0_i32 = arith.constant 0 : i32
    %c0_i32_0 = arith.constant 0 : i32
    return %c0_i32, %arg0 : i32, i32
  }
}

</mosaic_0001>

<bundles_post_ra>
// kernel: block_forward.1
= control target key start
LH: loop header
LB: loop body
LE: loop exit
PB: predicated region body
PF: predicated region fallthrough
CT: control target
= control target key end

     0   :  { %s10310_s6 = smov 1   ;;  %s10311_s10 = smov 2   ;;  %s13455_s0 = inlined_call_operand.smem [shape: u32[42], index: -1, kind: input, shape index: {}] }
   0x1   :  { %s10417_s5 = sld [smem:[%s13455_s0]]   ;;  %s10312_s14 = smov 3  }
   0x2   :  { %s10422_s9 = sld [smem:[%s13455_s0 + %s10310_s6]]   ;;  %s10313_s18 = smov 4  }
   0x3   :  { %s10427_s13 = sld [smem:[%s13455_s0 + %s10311_s10]]   ;;  %s10314_s22 = smov 5  }
   0x4   :  { %s10432_s17 = sld [smem:[%s13455_s0 + %s10312_s14]]   ;;  %s10315_s26 = smov 6  }
   0x5   :  { %s10437_s21 = sld [smem:[%s13455_s0 + %s10313_s18]]   ;;  %s10316_s30 = smov 7  }
   0x6   :  { %s10442_s25 = sld [smem:[%s13455_s0 + %s10314_s22]]   ;;  %s10317_s4 = smov 8  }
   0x7   :  { %14086 = sst [smem:[#allocation28_spill]] %s10417_s5  ;;  %s10318_s10 = smov 9  }
   0x8   :  { %14087 = sst [smem:[#allocation29_spill]] %s10422_s9  ;;  %s10319_s15 = smov 10  }
   0x9   :  { %s10447_s29 = sld [smem:[%s13455_s0 + %s10315_s26]]   ;;  %s10320_s20 = smov 11  }
   0xa   :  { %s10452_s3 = sld [smem:[%s13455_s0 + %s10316_s30]]   ;;  %s10321_s26 = smov 12  }
   0xb   :  { %s10457_s8 = sld [smem:[%s13455_s0 + %s10317_s4]]   ;;  %s10322_s1 = smov 13  }
   0xc   :  { %s10462_s14 = sld [smem:[%s13455_s0 + %s10318_s10]]   ;;  %s10323_s7 = smov 14  }
   0xd   :  { %s10467_s19 = sld [smem:[%s13455_s0 + %s10319_s15]]   ;;  %s10324_s15 = smov 15  }
   0xe   :  { %s10472_s24 = sld [smem:[%s13455_s0 + %s10320_s20]]   ;;  %s10325_s22 = smov 16  }
   0xf   :  { %s10477_s30 = sld [smem:[%s13455_s0 + %s10321_s26]]   ;;  %s10326_s28 = smov 17  }
  0x10   :  { %14088 = sst [smem:[#allocation30_spill]] %s10452_s3 }
  0x11   :  { %14089 = sst [smem:[#allocation31_spill]] %s10457_s8 }
  0x12   :  { %14090 = sst [smem:[#allocation32_spill]] %s10462_s14 }
  0x13   :  { %s10482_s6 = sld [smem:[%s13455_s0 + %s10322_s1]]  }
  0x14   :  { %s10487_s12 = sld [smem:[%s13455_s0 + %s10323_s7]]   ;;  %s10327_s7 = smov 18  }
  0x15   :  { %s10492_s20 = sld [smem:[%s13455_s0 + %s10324_s15]]   ;;  %s10328_s15 = smov 19  }
  0x16   :  { %s10497_s27 = sld [smem:[%s13455_s0 + %s10325_s22]]   ;;  %s10329_s22 = smov 20  }
  0x17   :  { %s10502_s4 = sld [smem:[%s13455_s0 + %s10326_s28]]   ;;  %s10330_s28 = smov 21  }
  0x18   :  { %s10507_s3 = sld [smem:[%s13455_s0 + %s10327_s7]]   ;;  %s10331_s7 = smov 22  }
  0x19   :  { %14091 = sst [smem:[#allocation33_spill]] %s10482_s6 }
  0x1a   :  { %s10517_s14 = sld [smem:[%s13455_s0 + %s10329_s22]]   ;;  %s10333_s22 = smov 24  }
  0x1b   :  { %14092 = sst [smem:[#allocation34_spill]] %s10492_s20 }
  0x1c   :  { %s10512_s20 = sld [smem:[%s13455_s0 + %s10328_s15]]   ;;  %s10332_s15 = smov 23  }
  0x1d   :  { %14093 = sst [smem:[#allocation35_spill]] %s10502_s4 }
  0x1e   :  { %14094 = sst [smem:[#allocation36_spill]] %s10507_s3 }
  0x1f   :  { %s10522_s4 = sld [smem:[%s13455_s0 + %s10330_s28]]   ;;  %s10334_s28 = smov 25  }
  0x20   :  { %s10527_s3 = sld [smem:[%s13455_s0 + %s10331_s7]]   ;;  %s10335_s7 = smov 26  }
  0x21   :  { %s10537_s5 = sld [smem:[%s13455_s0 + %s10333_s22]]   ;;  %s10337_s22 = smov 28  }
  0x22   :  { %14095 = sst [smem:[#allocation37_spill]] %s10512_s20 }
  0x23   :  { %s10532_s20 = sld [smem:[%s13455_s0 + %s10332_s15]]   ;;  %s10336_s15 = smov 27  }
  0x25   :  { %14096 = sst [smem:[#allocation38_spill]] %s10522_s4 }
  0x26   :  { %14097 = sst [smem:[#allocation39_spill]] %s10527_s3 }
  0x27   :  { %14099 = sst [smem:[#allocation41_spill]] %s10537_s5 }
  0x28   :  { %s10542_s4 = sld [smem:[%s13455_s0 + %s10334_s28]]   ;;  %s10338_s28 = smov 29  }
  0x29   :  { %14098 = sst [smem:[#allocation40_spill]] %s10532_s20 }
  0x2a   :  { %s10547_s3 = sld [smem:[%s13455_s0 + %s10335_s7]]   ;;  %s10339_s7 = smov 30  }
  0x2b   :  { %s10552_s20 = sld [smem:[%s13455_s0 + %s10336_s15]]   ;;  %s10340_s15 = smov 31  }
  0x2c   :  { %s10557_s5 = sld [smem:[%s13455_s0 + %s10337_s22]]   ;;  %s10341_s22 = smov 32  }
  0x2d   :  { %s10572_s6 = sld [smem:[%s13455_s0 + %s10340_s15]]   ;;  %s10344_s15 = smov 35  }
  0x2e   :  { %14100 = sst [smem:[#allocation42_spill]] %s10542_s4 }
  0x2f   :  { %s10562_s4 = sld [smem:[%s13455_s0 + %s10338_s28]]   ;;  %s10342_s28 = smov 33  }
  0x30   :  { %14101 = sst [smem:[#allocation43_spill]] %s10547_s3 }
  0x31   :  { %s10567_s3 = sld [smem:[%s13455_s0 + %s10339_s7]]   ;;  %s10343_s7 = smov 34  }
  0x32   :  { %14102 = sst [smem:[#allocation44_spill]] %s10557_s5 }
  0x33   :  { %14105 = sst [smem:[#allocation47_spill]] %s10572_s6 }
  0x34   :  { %s10577_s5 = sld [smem:[%s13455_s0 + %s10341_s22]]   ;;  %s10345_s22 = smov 36  }
  0x35   :  { %14103 = sst [smem:[#allocation45_spill]] %s10562_s4 }
  0x36   :  { %s10582_s4 = sld [smem:[%s13455_s0 + %s10342_s28]]   ;;  %s10346_s28 = smov 37  }
  0x37   :  { %14104 = sst [smem:[#allocation46_spill]] %s10567_s3 }
  0x38   :  { %s10587_s3 = sld [smem:[%s13455_s0 + %s10343_s7]]   ;;  %s10347_s7 = smov 38  }
  0x39   :  { %s10592_s6 = sld [smem:[%s13455_s0 + %s10344_s15]]   ;;  %s10348_s15 = smov 39  }
  0x3a   :  { %14106 = sst [smem:[#allocation48_spill]] %s10577_s5 }
  0x3b   :  { %s10597_s5 = sld [smem:[%s13455_s0 + %s10345_s22]]   ;;  %s10349_s22 = smov 40  }
  0x3c   :  { %14107 = sst [smem:[#allocation49_spill]] %s10582_s4 }
  0x3d   :  { %s10602_s4 = sld [smem:[%s13455_s0 + %s10346_s28]]   ;;  %s10350_s28 = smov 41  }
  0x3e   :  { %14108 = sst [smem:[#allocation50_spill]] %s10587_s3 }
  0x3f   :  { %14109 = sst [smem:[#allocation51_spill]] %s10592_s6 }
  0x40   :  { %s10607_s3 = sld [smem:[%s13455_s0 + %s10347_s7]]  }
  0x41   :  { %14110 = sst [smem:[#allocation52_spill]] %s10597_s5 }
  0x42   :  { %s10612_s6 = sld [smem:[%s13455_s0 + %s10348_s15]]  }
  0x43   :  { %s10617_s5 = sld [smem:[%s13455_s0 + %s10349_s22]]  }
  0x44   :  { %s10622_s8 = sld [smem:[%s13455_s0 + %s10350_s28]]  }
  0x45   :  { %88 = vsyncpa [#allocation3], 0 }
  0x46   :  { %89 = vsyncpa [#allocation5], 0 }
  0x47   :  { %90 = vsyncpa [#allocation8], 0 }
  0x48   :  { %91 = vsyncpa [#allocation11], 0 }
  0x49   :  { %92 = vsyncpa [#allocation14], 0 }
  0x4a   :  { %93 = vsyncpa [#allocation17], 0 }
  0x4b   :  { %94 = vsyncpa [#allocation20], 0  ;;  %s10624_s7 = smov 0  }
  0x4c LB: > { %s14111_s9 = sld [smem:[#allocation29_spill]]  ;;  %s10351_s0 = smov [#allocation4]   ;;  %s10308_s7 = sphi %s10624_s7, %s100_s7  }
  0x4d   : > { %s1022_s10 = sshll.u32 %s10351_s0, 4  ;;  %s13460_s11 = sadd.s32 4294967295, %s10308_s7   ;;  %s10638_s10 = int_to_ptr.vmem [resolvable:$true] %s1022_s10 }
  0x4e   : > { %p7381_p0 = scmp.ge.s32.totalorder %s10308_s7, 1  ;;  %p997_p1 = scmp.lt.s32.totalorder %s10308_s7, 3 }
  0x4f   : > { %p10634_p2 = scmp.eq.s32.totalorder %s13460_s11, 0  ;;  %s10352_s18 = smov [#allocation7]  }
  0x50   : > { %p10640_p3 = pnand %p7381_p0, %p997_p1  ;;  %s1049_s22 = sshll.u32 %s10352_s18, 4  ;;  %s10646_s22 = int_to_ptr.vmem [resolvable:$true] %s1049_s22 }
  0x51   : > { %s14112_s15 = scalar_select %p10634_p2, 1, 0 }
  0x52   : > { %s14113_s16 = scalar_select %p10640_p3, 1, 0 }
  0x53   : > { %p9583_p4 = pneg %p10640_p3  ;;  %s10353_s26 = smov [#allocation10]  }
  0x54   : > { %s1083_s28 = sshll.u32 %s10353_s26, 4  ;;  %s10354_s1 = smov [#allocation13]   ;;  %s10654_s28 = int_to_ptr.vmem [resolvable:$true] %s1083_s28 }
  0x55   : > { %p10650_p5 = pnand %p10634_p2, %p9583_p4  ;;  %s10656_s2 = sshll.u32 %s10354_s1, 4  ;;  %s1112_s2 = int_to_ptr.vmem [resolvable:$true] %s10656_s2 }
  0x56   : > { %s9938_s0 = scalar_lea.hbm %s10427_s13, 36864 }
  0x57   : > { %p9939_p6 = scmp.ne.s32.totalorder %s10427_s13, %s9938_s0  ;;  %p10662_p7 = pneg %p10650_p5 }
  0x58   : > { %p9945_p10 = scmp.lt.u32.totalorder %s9938_s0, %s10427_s13 }
  0x59   : > { %p9941_p8 = pnand %p10662_p7, %p9939_p6 }
  0x5b   : > { %p9942_p9 = pneg %p9941_p8 }
  0x5d   : > { %p9947_p11 = pnand %p9945_p10, %p9942_p9 }
  0x5f   : > { %9950 = shalt.err (!%p9947_p11)
}
  0x60   : > { %s9951_s26 = scalar_lea.vmem %s10638_s10, 36864  ;;  %p9959_p1 = scmp.lt.s32.totalorder %s10638_s10, %s10638_s10 }
  0x61   : > { %p9952_p12 = scmp.ne.s32.totalorder %s10638_s10, %s9951_s26  ;;  %p9960_p4 = scmp.lt.s32.totalorder %s9951_s26, %s9951_s26 }
  0x63   : > { %p9954_p13 = pnand %p9952_p12, %p10662_p7  ;;  %p9961_p2 = por %p9960_p4, %p9959_p1 }
  0x65   : > { %p9955_p0 = pneg %p9954_p13 }
  0x67   : > { %p9962_p3 = pnand %p9961_p2, %p9955_p0 }
  0x69   : > { %9965 = shalt.err (!%p9962_p3)
}
  0x6a   : > { %s10355_s1 = smov 1152   ;;  %s10356_s0 = smov 72  }
  0x6b   : > { %9589 = dma.hbm_to_vmem [thread:$0]  (!%p10650_p5), %s10427_s13, 36864, %s10638_s10, [#allocation5], %s10355_s1, %s10355_s1, %s10356_s0  }
  0x6c   : > { %s9966_s11 = scalar_lea.hbm %s10437_s21, 64 }
  0x6d   : > { %p9967_p6 = scmp.ne.s32.totalorder %s10437_s21, %s9966_s11  ;;  %p9973_p10 = scmp.lt.u32.totalorder %s9966_s11, %s10437_s21 }
  0x6f   : > { %p9969_p8 = pnand %p9967_p6, %p10662_p7 }
  0x71   : > { %p9970_p9 = pneg %p9969_p8 }
  0x73   : > { %p9975_p11 = pnand %p9973_p10, %p9970_p9 }
  0x75   : > { %9978 = shalt.err (!%p9975_p11)
}
  0x76   : > { %s9979_s26 = scalar_lea.vmem %s10646_s22, 64  ;;  %p9987_p13 = scmp.lt.s32.totalorder %s10646_s22, %s10646_s22 }
  0x77   : > { %p9980_p2 = scmp.ne.s32.totalorder %s10646_s22, %s9979_s26  ;;  %p9988_p0 = scmp.lt.s32.totalorder %s9979_s26, %s9979_s26 }
  0x79   : > { %p9982_p3 = pnand %p9980_p2, %p10662_p7  ;;  %p9989_p1 = por %p9988_p0, %p9987_p13 }
  0x7b   : > { %p9983_p12 = pneg %p9982_p3 }
  0x7d   : > { %p9990_p4 = pnand %p9989_p1, %p9983_p12 }
  0x7f   : > { %9993 = shalt.err (!%p9990_p4)
}
  0x80   : > { %9595 = dma.hbm_to_vmem [thread:$0]  (!%p10650_p5), %s10437_s21, 64, %s10646_s22, [#allocation8]  }
  0x81   : > { %s9994_s10 = scalar_lea.hbm %s10467_s19, 64 }
  0x82   : > { %p9995_p6 = scmp.ne.s32.totalorder %s10467_s19, %s9994_s10  ;;  %p10001_p10 = scmp.lt.u32.totalorder %s9994_s10, %s10467_s19 }
  0x84   : > { %p9997_p8 = pnand %p9995_p6, %p10662_p7 }
  0x86   : > { %p9998_p9 = pneg %p9997_p8 }
  0x88   : > { %p10003_p11 = pnand %p10001_p10, %p9998_p9 }
  0x8a   : > { %10006 = shalt.err (!%p10003_p11)
}
  0x8b   : > { %s10007_s11 = scalar_lea.vmem %s10654_s28, 64  ;;  %p10015_p13 = scmp.lt.s32.totalorder %s10654_s28, %s10654_s28 }
  0x8c   : > { %p10008_p2 = scmp.ne.s32.totalorder %s10654_s28, %s10007_s11  ;;  %p10016_p0 = scmp.lt.s32.totalorder %s10007_s11, %s10007_s11 }
  0x8e   : > { %p10010_p3 = pnand %p10008_p2, %p10662_p7  ;;  %p10017_p1 = por %p10016_p0, %p10015_p13 }
  0x90   : > { %p10011_p12 = pneg %p10010_p3 }
  0x92   : > { %p10018_p4 = pnand %p10017_p1, %p10011_p12 }
  0x94   : > { %10021 = shalt.err (!%p10018_p4)
}
  0x95   : > { %9601 = dma.hbm_to_vmem [thread:$0]  (!%p10650_p5), %s10467_s19, 64, %s10654_s28, [#allocation11]  }
  0x96   : > { %s10022_s22 = scalar_lea.hbm %s10487_s12, 64 }
  0x97   : > { %p10023_p6 = scmp.ne.s32.totalorder %s10487_s12, %s10022_s22  ;;  %p10029_p10 = scmp.lt.u32.totalorder %s10022_s22, %s10487_s12 }
  0x99   : > { %p10025_p8 = pnand %p10023_p6, %p10662_p7 }
  0x9b   : > { %p10026_p9 = pneg %p10025_p8 }
  0x9d   : > { %p10031_p11 = pnand %p10029_p10, %p10026_p9 }
  0x9f   : > { %10034 = shalt.err (!%p10031_p11)
}
  0xa0   : > { %s10035_s1 = scalar_lea.vmem %s1112_s2, 64  ;;  %p10043_p13 = scmp.lt.s32.totalorder %s1112_s2, %s1112_s2 }
  0xa1   : > { %p10036_p2 = scmp.ne.s32.totalorder %s1112_s2, %s10035_s1  ;;  %p10044_p0 = scmp.lt.s32.totalorder %s10035_s1, %s10035_s1 }
  0xa3   : > { %p10038_p3 = pnand %p10036_p2, %p10662_p7  ;;  %p10045_p1 = por %p10044_p0, %p10043_p13 }
  0xa5   : > { %p10039_p12 = pneg %p10038_p3 }
  0xa7   : > { %p10046_p4 = pnand %p10045_p1, %p10039_p12 }
  0xa9   : > { %10049 = shalt.err (!%p10046_p4)
}
  0xaa   : > { %9607 = dma.hbm_to_vmem [thread:$0]  (!%p10650_p5), %s10487_s12, 64, %s1112_s2, [#allocation14]  }
  0xab   : > { %s10357_s28 = smov [#allocation16]   ;;  %s10358_s26 = smov [#allocation2]  }
  0xac   : > { %s1145_s0 = sshll.u32 %s10357_s28, 4  ;;  %s1009_s10 = sshll.u32 %s10358_s26, 4  ;;  %s1146_s0 = int_to_ptr.vmem [resolvable:$true] %s1145_s0  ;;  %s1010_s10 = int_to_ptr.vmem [resolvable:$true] %s1009_s10 }
  0xad   : > { %s10050_s11 = scalar_lea.hbm %s10517_s14, 64 }
  0xae   : > { %p10051_p6 = scmp.ne.s32.totalorder %s10517_s14, %s10050_s11  ;;  %p10057_p10 = scmp.lt.u32.totalorder %s10050_s11, %s10517_s14 }
  0xb0   : > { %p10053_p8 = pnand %p10051_p6, %p10662_p7 }
  0xb2   : > { %p10054_p9 = pneg %p10053_p8 }
  0xb4   : > { %p10059_p11 = pnand %p10057_p10, %p10054_p9 }
  0xb6   : > { %10062 = shalt.err (!%p10059_p11)
}
  0xb7   : > { %s10063_s22 = scalar_lea.vmem %s1146_s0, 64  ;;  %p10071_p13 = scmp.lt.s32.totalorder %s1146_s0, %s1146_s0 }
  0xb8   : > { %p10064_p2 = scmp.ne.s32.totalorder %s1146_s0, %s10063_s22  ;;  %p10072_p0 = scmp.lt.s32.totalorder %s10063_s22, %s10063_s22 }
  0xba   : > { %p10066_p3 = pnand %p10064_p2, %p10662_p7  ;;  %p10073_p1 = por %p10072_p0, %p10071_p13 }
  0xbc   : > { %p10067_p12 = pneg %p10066_p3 }
  0xbe   : > { %p10074_p4 = pnand %p10073_p1, %p10067_p12 }
  0xc0   : > { %10077 = shalt.err (!%p10074_p4)
}
  0xc1   : > { %9613 = dma.hbm_to_vmem [thread:$0]  (!%p10650_p5), %s10517_s14, 64, %s1146_s0, [#allocation17]  }
  0xc2   : > { %s10078_s2 = scalar_lea.hbm %s14111_s9, 73728 }
  0xc3   : > { %p10079_p6 = scmp.ne.s32.totalorder %s14111_s9, %s10078_s2  ;;  %p10085_p10 = scmp.lt.u32.totalorder %s10078_s2, %s14111_s9 }
  0xc5   : > { %p10081_p8 = pnand %p10079_p6, %p10662_p7 }
  0xc7   : > { %p10082_p9 = pneg %p10081_p8 }
  0xc9   : > { %p10087_p11 = pnand %p10085_p10, %p10082_p9 }
  0xcb   : > { %10090 = shalt.err (!%p10087_p11)
}
  0xcc   : > { %s10091_s1 = scalar_lea.vmem %s1010_s10, 73728  ;;  %p10099_p13 = scmp.lt.s32.totalorder %s1010_s10, %s1010_s10 }
  0xcd   : > { %p10092_p2 = scmp.ne.s32.totalorder %s1010_s10, %s10091_s1  ;;  %p10100_p0 = scmp.lt.s32.totalorder %s10091_s1, %s10091_s1 }
  0xcf   : > { %p10094_p3 = pnand %p10092_p2, %p10662_p7  ;;  %p10101_p1 = por %p10100_p0, %p10099_p13 }
  0xd1   : > { %p10095_p12 = pneg %p10094_p3 }
  0xd3   : > { %p10102_p4 = pnand %p10101_p1, %p10095_p12 }
  0xd5   : > { %10105 = shalt.err (!%p10102_p4)
}
  0xd6   : > { %s10359_s28 = smov 2304   ;;  %s10360_s0 = smov 144  }
  0xd7   : > { %9586 = dma.hbm_to_vmem [thread:$0]  (!%p10650_p5), %s14111_s9, 73728, %s1010_s10, [#allocation3], %s10359_s28, %s10359_s28, %s10360_s0  }
  0xd8   : > { %s10361_s26 = smov [#allocation6]   ;;  %s10106_s22 = scalar_lea.hbm %s10432_s17, 8192 }
  0xd9   : > { %s1035_s11 = sshll.u32 %s10361_s26, 4  ;;  %p10107_p6 = scmp.ne.s32.totalorder %s10432_s17, %s10106_s22  ;;  %s1036_s11 = int_to_ptr.vmem [resolvable:$true] %s1035_s11 }
  0xda   : > { %p10113_p10 = scmp.lt.u32.totalorder %s10106_s22, %s10432_s17 }
  0xdb   : > { %p10109_p8 = pnand %p10107_p6, %p10662_p7 }
  0xdd   : > { %p10110_p9 = pneg %p10109_p8 }
  0xdf   : > { %p10115_p11 = pnand %p10113_p10, %p10110_p9 }
  0xe1   : > { %10118 = shalt.err (!%p10115_p11)
}
  0xe2   : > { %s10119_s2 = scalar_lea.vmem %s1036_s11, 8192  ;;  %p10127_p13 = scmp.lt.s32.totalorder %s1036_s11, %s1036_s11 }
  0xe3   : > { %p10120_p2 = scmp.ne.s32.totalorder %s1036_s11, %s10119_s2  ;;  %p10128_p0 = scmp.lt.s32.totalorder %s10119_s2, %s10119_s2 }
  0xe5   : > { %p10122_p3 = pnand %p10120_p2, %p10662_p7  ;;  %p10129_p1 = por %p10128_p0, %p10127_p13 }
  0xe7   : > { %p10123_p12 = pneg %p10122_p3 }
  0xe9   : > { %p10130_p4 = pnand %p10129_p1, %p10123_p12 }
  0xeb   : > { %10133 = shalt.err (!%p10130_p4)
}
  0xec   : > { %s10362_s10 = smov 256   ;;  %s10363_s1 = smov 16  }
  0xed   : > { %9592 = dma.hbm_to_vmem [thread:$0]  (!%p10650_p5), %s10432_s17, 8192, %s1036_s11, [#allocation5], %s10362_s10, %s10362_s10, %s10363_s1  }
  0xee   : > { %s10364_s28 = smov [#allocation9]   ;;  %s10365_s26 = smov [#allocation12]  }
  0xef   : > { %s1063_s0 = sshll.u32 %s10364_s28, 4  ;;  %s1097_s22 = sshll.u32 %s10365_s26, 4  ;;  %s1064_s0 = int_to_ptr.vmem [resolvable:$true] %s1063_s0  ;;  %s10750_s22 = int_to_ptr.vmem [resolvable:$true] %s1097_s22 }
  0xf0   : > { %s10134_s2 = scalar_lea.hbm %s10447_s29, 64 }
  0xf1   : > { %p10135_p6 = scmp.ne.s32.totalorder %s10447_s29, %s10134_s2  ;;  %p10141_p10 = scmp.lt.u32.totalorder %s10134_s2, %s10447_s29 }
  0xf3   : > { %p10137_p8 = pnand %p10135_p6, %p10662_p7 }
  0xf5   : > { %p10138_p9 = pneg %p10137_p8 }
  0xf7   : > { %p10143_p11 = pnand %p10141_p10, %p10138_p9 }
  0xf9   : > { %10146 = shalt.err (!%p10143_p11)
}
  0xfa   : > { %s10147_s9 = scalar_lea.vmem %s1064_s0, 64  ;;  %p10155_p13 = scmp.lt.s32.totalorder %s1064_s0, %s1064_s0 }
  0xfb   : > { %p10148_p2 = scmp.ne.s32.totalorder %s1064_s0, %s10147_s9  ;;  %p10156_p0 = scmp.lt.s32.totalorder %s10147_s9, %s10147_s9 }
  0xfd   : > { %p10150_p3 = pnand %p10148_p2, %p10662_p7  ;;  %p10157_p1 = por %p10156_p0, %p10155_p13 }
  0xff   : > { %p10151_p12 = pneg %p10150_p3 }
 0x101   : > { %p10158_p4 = pnand %p10157_p1, %p10151_p12 }
 0x103   : > { %10161 = shalt.err (!%p10158_p4)
}
 0x104   : > { %9598 = dma.hbm_to_vmem [thread:$0]  (!%p10650_p5), %s10447_s29, 64, %s1064_s0, [#allocation8]  }
 0x105   : > { %s10162_s11 = scalar_lea.hbm %s10477_s30, 64 }
 0x106   : > { %p10163_p6 = scmp.ne.s32.totalorder %s10477_s30, %s10162_s11  ;;  %p10169_p10 = scmp.lt.u32.totalorder %s10162_s11, %s10477_s30 }
 0x108   : > { %p10165_p8 = pnand %p10163_p6, %p10662_p7 }
 0x10a   : > { %p10166_p9 = pneg %p10165_p8 }
 0x10c   : > { %p10171_p11 = pnand %p10169_p10, %p10166_p9 }
 0x10e   : > { %10174 = shalt.err (!%p10171_p11)
}
 0x10f   : > { %s10175_s9 = scalar_lea.vmem %s10750_s22, 64  ;;  %p10183_p13 = scmp.lt.s32.totalorder %s10750_s22, %s10750_s22 }
 0x110   : > { %p10176_p2 = scmp.ne.s32.totalorder %s10750_s22, %s10175_s9  ;;  %p10184_p0 = scmp.lt.s32.totalorder %s10175_s9, %s10175_s9 }
 0x112   : > { %p10178_p3 = pnand %p10176_p2, %p10662_p7  ;;  %p10185_p1 = por %p10184_p0, %p10183_p13 }
 0x114   : > { %p10179_p12 = pneg %p10178_p3 }
 0x116   : > { %p10186_p4 = pnand %p10185_p1, %p10179_p12 }
 0x118   : > { %10189 = shalt.err (!%p10186_p4)
}
 0x119   : > { %9604 = dma.hbm_to_vmem [thread:$0]  (!%p10650_p5), %s10477_s30, 64, %s10750_s22, [#allocation11]  }
 0x11a   : > { %s10366_s10 = smov [#allocation15]   ;;  %s10367_s28 = smov [#allocation18]  }
 0x11b   : > { %s1125_s1 = sshll.u32 %s10366_s10, 4  ;;  %s1174_s0 = sshll.u32 %s10367_s28, 4  ;;  %s1126_s1 = int_to_ptr.vmem [resolvable:$true] %s1125_s1  ;;  %s10777_s0 = int_to_ptr.vmem [resolvable:$true] %s1174_s0 }
 0x11c   : > { %s10190_s26 = scalar_lea.hbm %s10497_s27, 64 }
 0x11d   : > { %p10191_p6 = scmp.ne.s32.totalorder %s10497_s27, %s10190_s26  ;;  %p10197_p10 = scmp.lt.u32.totalorder %s10190_s26, %s10497_s27 }
 0x11f   : > { %p10193_p8 = pnand %p10191_p6, %p10662_p7 }
 0x121   : > { %p10194_p9 = pneg %p10193_p8 }
 0x123   : > { %p10199_p11 = pnand %p10197_p10, %p10194_p9 }
 0x125   : > { %10202 = shalt.err (!%p10199_p11)
}
 0x126   : > { %s10203_s2 = scalar_lea.vmem %s1126_s1, 64  ;;  %p10211_p13 = scmp.lt.s32.totalorder %s1126_s1, %s1126_s1 }
 0x127   : > { %p10204_p2 = scmp.ne.s32.totalorder %s1126_s1, %s10203_s2  ;;  %p10212_p0 = scmp.lt.s32.totalorder %s10203_s2, %s10203_s2 }
 0x129   : > { %p10206_p3 = pnand %p10204_p2, %p10662_p7  ;;  %p10213_p1 = por %p10212_p0, %p10211_p13 }
 0x12b   : > { %p10207_p12 = pneg %p10206_p3 }
 0x12d   : > { %p10214_p4 = pnand %p10213_p1, %p10207_p12 }
 0x12f   : > { %10217 = shalt.err (!%p10214_p4)
}
 0x130   : > { %9610 = dma.hbm_to_vmem [thread:$0]  (!%p10650_p5), %s10497_s27, 64, %s1126_s1, [#allocation14]  }
 0x131   : > { %s10218_s22 = scalar_lea.hbm %s10552_s20, 32 }
 0x132   : > { %p10219_p6 = scmp.ne.s32.totalorder %s10552_s20, %s10218_s22  ;;  %p10225_p10 = scmp.lt.u32.totalorder %s10218_s22, %s10552_s20 }
 0x134   : > { %p10221_p8 = pnand %p10219_p6, %p10662_p7 }
 0x136   : > { %p10222_p9 = pneg %p10221_p8 }
 0x138   : > { %p10227_p11 = pnand %p10225_p10, %p10222_p9 }
 0x13a   : > { %10230 = shalt.err (!%p10227_p11)
}
 0x13b   : > { %s10231_s11 = scalar_lea.vmem %s10777_s0, 32  ;;  %p10239_p13 = scmp.lt.s32.totalorder %s10777_s0, %s10777_s0 }
 0x13c   : > { %p10232_p2 = scmp.ne.s32.totalorder %s10777_s0, %s10231_s11  ;;  %p10240_p0 = scmp.lt.s32.totalorder %s10231_s11, %s10231_s11 }
 0x13e   : > { %p10234_p3 = pnand %p10232_p2, %p10662_p7  ;;  %p10241_p1 = por %p10240_p0, %p10239_p13 }
 0x140   : > { %p10235_p12 = pneg %p10234_p3 }
 0x142   : > { %p10242_p4 = pnand %p10241_p1, %p10235_p12 }
 0x144   : > { %10245 = shalt.err (!%p10242_p4)
}
 0x145   : > { %9616 = dma.hbm_to_vmem [thread:$0]  (!%p10650_p5), %s10552_s20, 32, %s10777_s0, [#allocation17]  }
 0x146   : > { %s10368_s9 = smov [#allocation19]   ;;  %s10246_s1 = scalar_lea.hbm %s10602_s4, 32 }
 0x147   : > { %s1212_s10 = sshll.u32 %s10368_s9, 4  ;;  %p10247_p6 = scmp.ne.s32.totalorder %s10602_s4, %s10246_s1  ;;  %s1213_s10 = int_to_ptr.vmem [resolvable:$true] %s1212_s10 }
 0x148   : > { %p10253_p10 = scmp.lt.u32.totalorder %s10246_s1, %s10602_s4 }
 0x149   : > { %p10249_p8 = pnand %p10247_p6, %p10662_p7 }
 0x14b   : > { %p10250_p9 = pneg %p10249_p8 }
 0x14d   : > { %p10255_p11 = pnand %p10253_p10, %p10250_p9 }
 0x14f   : > { %10258 = shalt.err (!%p10255_p11)
}
 0x150   : > { %s10259_s28 = scalar_lea.vmem %s1213_s10, 32  ;;  %p10267_p13 = scmp.lt.s32.totalorder %s1213_s10, %s1213_s10 }
 0x151   : > { %p10260_p2 = scmp.ne.s32.totalorder %s1213_s10, %s10259_s28  ;;  %p10268_p0 = scmp.lt.s32.totalorder %s10259_s28, %s10259_s28 }
 0x153   : > { %p10262_p3 = pnand %p10260_p2, %p10662_p7  ;;  %p10269_p1 = por %p10268_p0, %p10267_p13 }
 0x155   : > { %p10263_p12 = pneg %p10262_p3 }
 0x157   : > { %p10270_p4 = pnand %p10269_p1, %p10263_p12 }
 0x159   : > { %10273 = shalt.err (!%p10270_p4)
}
 0x15a   : > { %9619 = dma.hbm_to_vmem [thread:$0]  (!%p10650_p5), %s10602_s4, 32, %s1213_s10, [#allocation20]  }
 0x15b   : > { %p14116_p6 = scmp.ne.s32.totalorder %s14113_s16, 0 }
 0x15d   : > { %1243 = sbr.rel (%p14116_p6) target bundleno = 3464 (0xd88), region = 184 }
 0x164   : > { %p14117_p8 = scmp.ne.s32.totalorder %s14112_s15, 0 }
 0x166   : > { %10279 = dma.done.wait (%p14117_p8), [#allocation3], 73728  }
 0x167   : > { %10281 = vsyncadd (%p14117_p8), [#allocation3], 4294893568 }
 0x168   : > { %10283 = dma.done.wait (%p14117_p8), [#allocation5], 45056  }
 0x169   : > { %10285 = vsyncadd (%p14117_p8), [#allocation5], 4294922240 }
 0x16a   : > { %10287 = dma.done.wait (%p14117_p8), [#allocation8], 128  }
 0x16b   : > { %10289 = vsyncadd (%p14117_p8), [#allocation8], 4294967168 }
 0x16c   : > { %10291 = dma.done.wait (%p14117_p8), [#allocation11], 128  }
 0x16d   : > { %10293 = vsyncadd (%p14117_p8), [#allocation11], 4294967168 }
 0x16e   : > { %10295 = dma.done.wait (%p14117_p8), [#allocation14], 128  }
 0x16f   : > { %10297 = vsyncadd (%p14117_p8), [#allocation14], 4294967168 }
 0x170   : > { %10299 = dma.done.wait (%p14117_p8), [#allocation17], 96  }
 0x171   : > { %10301 = vsyncadd (%p14117_p8), [#allocation17], 4294967200 }
 0x172   : > { %10303 = dma.done.wait (%p14117_p8), [#allocation20], 32  }
 0x173   : > { %10305 = vsyncadd (%p14117_p8), [#allocation20], 4294967264  ;;  %v13470_v0 = vmov 2   ;;  %v13474_v1 = vmov 0   ;;  %v10846_v2 = vld [vmem:[#allocation7] sm:$0xf] }
 0x174   : > { %9753 = vset.pattern.permute.xlu1 %v13470_v0  ;;  %9751 = vset.pattern.permute.xlu0 %v13474_v1  ;;  %v1439_v3 = vld [vmem:[#allocation2 + $0x8] sm:$0xff]  ;;  %v1457_v4 = vld [vmem:[#allocation2 + $0x98] sm:$0xff]  ;;  %v1438_v9 = vld [vmem:[#allocation2] sm:$0xff]  ;;  %v13472_v21 = vmov 3   ;;  %v13476_v22 = vmov 1   ;;  %v13468_v37 = vmov 4  }
 0x175   : > { %2400 = vperm.xlu1 %9753, %v10846_v2   ;;  %2368 = vperm.xlu0 %9751, %v10846_v2   ;;  %v1441_v5 = vld [vmem:[#allocation2 + $0x18] sm:$0xff]  ;;  %v1459_v6 = vld [vmem:[#allocation2 + $0xa8] sm:$0xff]  ;;  %v10850_v7 = vpack.c.bf16 %v1457_v4, %v1439_v3  ;;  %v1456_v10 = vld [vmem:[#allocation2 + $0x90] sm:$0xff]  ;;  %v13466_v38 = vmov 5   ;;  %v13464_v53 = vmov 6   ;;  %s14183_s15 = sld [smem:[#allocation31_spill]] }
 0x176   : > { %v10852_v8 = vpack.c.bf16 %v1459_v6, %v1441_v5  ;;  %v1440_v11 = vld [vmem:[#allocation2 + $0x10] sm:$0xff]  ;;  %v10854_v12 = vpack.c.bf16 %v1456_v10, %v1438_v9  ;;  %v1458_v13 = vld [vmem:[#allocation2 + $0xa0] sm:$0xff]  ;;  %v1475_v14 = vld [vmem:[#allocation2 + $0x128] sm:$0xff]  ;;  %v13462_v10 = vmov 7   ;;  %s14184_s16 = sld [smem:[#allocation33_spill]]  ;;  %s14186_s23 = sld [smem:[#allocation28_spill]] }
 0x177   : > { %v1493_v15 = vld [vmem:[#allocation2 + $0x1b8] sm:$0xff]  ;;  %7456 = vmatprep.subr.bf16.mxu0 %v10850_v7  ;;  %v10858_v16 = vpack.c.bf16 %v1458_v13, %v1440_v11  ;;  %v1495_v19 = vld [vmem:[#allocation2 + $0x1c8] sm:$0xff]  ;;  %v1474_v20 = vld [vmem:[#allocation2 + $0x120] sm:$0xff]  ;;  %s14187_s18 = sadd.s32 4294967295, %s10308_s7   ;;  %s14473_s22 = sld [smem:[#allocation32_spill]]  ;;  %vm4027_vm0 = vcmask 1043456  }
 0x178   : > { %14118 = vst [vmem:[#allocation53_spill] sm:$0xff] %v10852_v8  ;;  %7520 = vmatprep.subr.bf16.mxu1 %v10852_v8  ;;  %v10860_v17 = vpack.c.bf16 %v1493_v15, %v1475_v14  ;;  %v1477_v18 = vld [vmem:[#allocation2 + $0x138] sm:$0xff]  ;;  %v1492_v24 = vld [vmem:[#allocation2 + $0x1b0] sm:$0xff]  ;;  %v1494_v26 = vld [vmem:[#allocation2 + $0x1c0] sm:$0xff]  ;;  %7458 = vmatpush1.bf16.msra.mxu0 %v10854_v12  ;;  %s7408_s0 = sshll.u32 %s14187_s18, 1  ;;  %s10381_s11 = smov 127  }
 0x179   : > { %14119 = vst [vmem:[#allocation54_spill] sm:$0xff] %v10858_v16  ;;  %9754 = vset.pattern.permute.xlu1 %v13472_v21  ;;  %9752 = vset.pattern.permute.xlu0 %v13476_v22  ;;  %v10864_v23 = vpack.c.bf16 %v1495_v19, %v1477_v18  ;;  %v1476_v25 = vld [vmem:[#allocation2 + $0x130] sm:$0xff]  ;;  %v1511_v27 = vld [vmem:[#allocation2 + $0x248] sm:$0xff]  ;;  %v1529_v28 = vld [vmem:[#allocation2 + $0x2d8] sm:$0xff]  ;;  %v10872_v31 = vpack.c.bf16 %v1492_v24, %v1474_v20  ;;  %p1388_p5 = scmp.lt.s32.totalorder %s7408_s0, 3  ;;  %s10382_s9 = smov 126  }
 0x17a   : > { %2416 = vperm.xlu1 %9754, %v10846_v2   ;;  %2384 = vperm.xlu0 %9752, %v10846_v2   ;;  %v1513_v29 = vld [vmem:[#allocation2 + $0x258] sm:$0xff]  ;;  %v1531_v30 = vld [vmem:[#allocation2 + $0x2e8] sm:$0xff]  ;;  %v10874_v32 = vpack.c.bf16 %v1494_v26, %v1476_v25  ;;  %v10876_v33 = vpack.c.bf16 %v1529_v28, %v1511_v27  ;;  %v1510_v35 = vld [vmem:[#allocation2 + $0x240] sm:$0xff]  ;;  %s10383_s10 = smov 125   ;;  %s14480_s1 = sld [smem:[#allocation34_spill]]  ;;  %vm6995_vm1 = vcmask 1041408  }
 0x17b   : > { %14120 = vst [vmem:[#allocation55_spill] sm:$0xff] %v10864_v23  ;;  %7522 = vmatpush1.bf16.msra.mxu1 %v10858_v16  ;;  %7460 = vmatprep.subr.bf16.mxu0 %v10860_v17  ;;  %v10878_v34 = vpack.c.bf16 %v1531_v30, %v1513_v29  ;;  %v1528_v36 = vld [vmem:[#allocation2 + $0x2d0] sm:$0xff]  ;;  %v1530_v40 = vld [vmem:[#allocation2 + $0x2e0] sm:$0xff]  ;;  %v1547_v41 = vld [vmem:[#allocation2 + $0x368] sm:$0xff]  ;;  %s15032_s0 = smov (!%p1388_p5, %s7408_s0), 3  ;;  %s14481_s28 = sld [smem:[#allocation35_spill]] }
 0x17c   : > { %7524 = vmatprep.subr.bf16.mxu1 %v10864_v23  ;;  %14121 = vst [vmem:[#allocation56_spill] sm:$0xff] %v10874_v32  ;;  %14122 = vst [vmem:[#allocation57_spill] sm:$0xff] %v10876_v33  ;;  %v1512_v39 = vld [vmem:[#allocation2 + $0x250] sm:$0xff]  ;;  %v1565_v42 = vld [vmem:[#allocation2 + $0x3f8] sm:$0xff]  ;;  %7462 = vmatpush1.bf16.msra.mxu0 %v10872_v31  ;;  %v10889_v46 = vpack.c.bf16 %v1528_v36, %v1510_v35  ;;  %s7409_s26 = sshll.u32 %s15032_s0, 3  ;;  %s14488_s18 = sld [smem:[#allocation36_spill]] }
 0x17d   : > { %14123 = vst [vmem:[#allocation58_spill] sm:$0xff] %v10878_v34  ;;  %v1549_v43 = vld [vmem:[#allocation2 + $0x378] sm:$0xff]  ;;  %v1567_v44 = vld [vmem:[#allocation2 + $0x408] sm:$0xff]  ;;  %v1400_v45 = vld [vmem:[%s10442_s25] sm:$0xf]  ;;  %7464 = vmatprep.subr.bf16.mxu0 %v10876_v33  ;;  %v10891_v47 = vpack.c.bf16 %v1530_v40, %v1512_v39  ;;  %v10893_v48 = vpack.c.bf16 %v1565_v42, %v1547_v41  ;;  %s11088_s2 = scalar_lea.vmem %s14186_s23, %s7409_s26  ;;  %s14487_s23 = sld [smem:[#allocation37_spill]] }
 0x17e   : > { %9755 = vset.pattern.permute.xlu1 %v13468_v37  ;;  %9756 = vset.pattern.permute.xlu0 %v13466_v38  ;;  %14124 = vst [vmem:[#allocation59_spill] sm:$0xff] %v10889_v46  ;;  %v10895_v49 = vpack.c.bf16 %v1567_v44, %v1549_v43  ;;  %v1546_v50 = vld [vmem:[#allocation2 + $0x360] sm:$0xff]  ;;  %v1564_v51 = vld [vmem:[#allocation2 + $0x3f0] sm:$0xff]  ;;  %v1583_v55 = vld [vmem:[#allocation2 + $0x488] sm:$0xff] }
 0x17f   : > { %2432 = vperm.xlu1 %9755, %v10846_v2   ;;  %2448 = vperm.xlu0 %9756, %v10846_v2   ;;  %14125 = vst [vmem:[#allocation60_spill] sm:$0xff] %v10891_v47  ;;  %14126 = vst [vmem:[#allocation61_spill] sm:$0xff] %v10893_v48  ;;  %v1548_v52 = vld [vmem:[#allocation2 + $0x370] sm:$0xff]  ;;  %v1566_v54 = vld [vmem:[#allocation2 + $0x400] sm:$0xff]  ;;  %v10902_v59 = vpack.c.bf16 %v1564_v51, %v1546_v50 }
 0x180   : > { %7526 = vmatpush1.bf16.msra.mxu1 %v10874_v32  ;;  %14127 = vst [vmem:[#allocation62_spill] sm:$0xff] %v10895_v49  ;;  %v1601_v56 = vld [vmem:[#allocation2 + $0x518] sm:$0xff]  ;;  %v1603_v58 = vld [vmem:[#allocation2 + $0x528] sm:$0xff]  ;;  %7466 = vmatpush1.bf16.msra.mxu0 %v10889_v46  ;;  %v10906_v60 = vpack.c.bf16 %v1566_v54, %v1548_v52  ;;  %v1582_v62 = vld [vmem:[#allocation2 + $0x480] sm:$0xff] }
 0x181   : > { %7528 = vmatprep.subr.bf16.mxu1 %v10878_v34  ;;  %v1585_v57 = vld [vmem:[#allocation2 + $0x498] sm:$0xff]  ;;  %14128 = vst [vmem:[#allocation63_spill] sm:$0xff] %v10902_v59  ;;  %7468 = vmatprep.subr.bf16.mxu0 %v10893_v48  ;;  %v10908_v61 = vpack.c.bf16 %v1601_v56, %v1583_v55  ;;  %v1600_v63 = vld [vmem:[#allocation2 + $0x510] sm:$0xff]  ;;  %v1602_v5 = vld [vmem:[#allocation2 + $0x520] sm:$0xff] }
 0x182   : > { %14129 = vst [vmem:[#allocation64_spill] sm:$0xff] %v10906_v60  ;;  %v1584_v3 = vld [vmem:[#allocation2 + $0x490] sm:$0xff]  ;;  %v10910_v4 = vpack.c.bf16 %v1603_v58, %v1585_v57  ;;  %v1619_v6 = vld [vmem:[#allocation2 + $0x5a8] sm:$0xff]  ;;  %v1637_v9 = vld [vmem:[#allocation2 + $0x638] sm:$0xff]  ;;  %v10916_v14 = vpack.c.bf16 %v1600_v63, %v1582_v62 }
 0x183   : > { %9757 = vset.pattern.permute.xlu1 %v13464_v53  ;;  %9759 = vset.pattern.permute.xlu0 %v13474_v1  ;;  %14130 = vst [vmem:[#allocation65_spill] sm:$0xff] %v10908_v61  ;;  %v1621_v11 = vld [vmem:[#allocation2 + $0x5b8] sm:$0xff]  ;;  %v1639_v13 = vld [vmem:[#allocation2 + $0x648] sm:$0xff]  ;;  %v10920_v15 = vpack.c.bf16 %v1602_v5, %v1584_v3  ;;  %v10922_v18 = vpack.c.bf16 %v1637_v9, %v1619_v6  ;;  %v1618_v19 = vld [vmem:[#allocation2 + $0x5a0] sm:$0xff] }
 0x184   : > { %2464 = vperm.xlu1 %9757, %v10846_v2   ;;  %2497 = vperm.xlu0 %9759, %v1400_v45   ;;  %14131 = vst [vmem:[#allocation66_spill] sm:$0xff] %v10910_v4  ;;  %14132 = vst [vmem:[#allocation67_spill] sm:$0xff] %v10916_v14  ;;  %v1636_v20 = vld [vmem:[#allocation2 + $0x630] sm:$0xff]  ;;  %v10925_v25 = vpack.c.bf16 %v1639_v13, %v1621_v11  ;;  %v1655_v26 = vld [vmem:[#allocation2 + $0x6c8] sm:$0xff] }
 0x185   : > { %7530 = vmatpush1.bf16.msra.mxu1 %v10891_v47  ;;  %7470 = vmatpush1.bf16.msra.mxu0 %v10902_v59  ;;  %14133 = vst [vmem:[#allocation68_spill] sm:$0xff] %v10920_v15  ;;  %14134 = vst [vmem:[#allocation69_spill] sm:$0xff] %v10922_v18  ;;  %v1620_v24 = vld [vmem:[#allocation2 + $0x5b0] sm:$0xff]  ;;  %v1673_v27 = vld [vmem:[#allocation2 + $0x758] sm:$0xff]  ;;  %v10928_v30 = vpack.c.bf16 %v1636_v20, %v1618_v19 }
 0x186   : > { %7532 = vmatprep.subr.bf16.mxu1 %v10895_v49  ;;  %7472 = vmatprep.subr.bf16.mxu0 %v10908_v61  ;;  %14135 = vst [vmem:[#allocation70_spill] sm:$0xff] %v10925_v25  ;;  %v1657_v28 = vld [vmem:[#allocation2 + $0x6d8] sm:$0xff]  ;;  %v1675_v29 = vld [vmem:[#allocation2 + $0x768] sm:$0xff]  ;;  %v10935_v36 = vpack.c.bf16 %v1673_v27, %v1655_v26  ;;  %v1654_v39 = vld [vmem:[#allocation2 + $0x6c0] sm:$0xff] }
 0x187   : > { %14136 = vst [vmem:[#allocation71_spill] sm:$0xff] %v10928_v30  ;;  %v1672_v40 = vld [vmem:[#allocation2 + $0x750] sm:$0xff]  ;;  %v10938_v42 = vpack.c.bf16 %v1675_v29, %v1657_v28  ;;  %v1674_v43 = vld [vmem:[#allocation2 + $0x760] sm:$0xff]  ;;  %v1691_v44 = vld [vmem:[#allocation2 + $0x7e8] sm:$0xff] }
 0x188   : > { %9758 = vset.pattern.permute.xlu1 %v13462_v10  ;;  %9762 = vset.pattern.permute.xlu0 %v13470_v0  ;;  %14138 = vst [vmem:[#allocation73_spill] sm:$0xff] %v10935_v36  ;;  %v1656_v41 = vld [vmem:[#allocation2 + $0x6d0] sm:$0xff]  ;;  %v1709_v45 = vld [vmem:[#allocation2 + $0x878] sm:$0xff]  ;;  %v1711_v51 = vld [vmem:[#allocation2 + $0x888] sm:$0xff]  ;;  %v10941_v52 = vpack.c.bf16 %v1672_v40, %v1654_v39 }
 0x189   : > { %2480 = vperm.xlu1 %9758, %v10846_v2   ;;  %7534 = vmatpush1.bf16.msra.mxu1 %v10906_v60  ;;  %v1638_v2 = vld [vmem:[#allocation2 + $0x640] sm:$0xff]  ;;  %14139 = vst [vmem:[#allocation74_spill] sm:$0xff] %v10938_v42  ;;  %v1693_v50 = vld [vmem:[#allocation2 + $0x7f8] sm:$0xff]  ;;  %v10945_v54 = vpack.c.bf16 %v1674_v43, %v1656_v41  ;;  %v10947_v55 = vpack.c.bf16 %v1709_v45, %v1691_v44  ;;  %v1708_v57 = vld [vmem:[#allocation2 + $0x870] sm:$0xff] }
 0x18a   : > { %7536 = vmatprep.subr.bf16.mxu1 %v10910_v4  ;;  %7474 = vmatpush1.bf16.msra.mxu0 %v10916_v14  ;;  %v10933_v35 = vpack.c.bf16 %v1638_v2, %v1620_v24  ;;  %14140 = vst [vmem:[#allocation75_spill] sm:$0xff] %v10941_v52  ;;  %v1690_v56 = vld [vmem:[#allocation2 + $0x7e0] sm:$0xff]  ;;  %v1692_v58 = vld [vmem:[#allocation2 + $0x7f0] sm:$0xff]  ;;  %v10950_v62 = vpack.c.bf16 %v1711_v51, %v1693_v50  ;;  %v1727_v3 = vld [vmem:[#allocation2 + $0x908] sm:$0xff] }
 0x18b   : > { %7476 = vmatprep.subr.bf16.mxu0 %v10922_v18  ;;  %14141 = vst [vmem:[#allocation76_spill] sm:$0xff] %v10945_v54  ;;  %14142 = vst [vmem:[#allocation77_spill] sm:$0xff] %v10947_v55  ;;  %v1710_v63 = vld [vmem:[#allocation2 + $0x880] sm:$0xff]  ;;  %v1745_v5 = vld [vmem:[#allocation2 + $0x998] sm:$0xff]  ;;  %v10953_v11 = vpack.c.bf16 %v1708_v57, %v1690_v56 }
 0x18c   : > { %14137 = vst [vmem:[#allocation72_spill] sm:$0xff] %v10933_v35  ;;  %14143 = vst [vmem:[#allocation78_spill] sm:$0xff] %v10950_v62  ;;  %v1729_v6 = vld [vmem:[#allocation2 + $0x918] sm:$0xff]  ;;  %v1747_v9 = vld [vmem:[#allocation2 + $0x9a8] sm:$0xff]  ;;  %v10957_v13 = vpack.c.bf16 %v1710_v63, %v1692_v58  ;;  %v10959_v19 = vpack.c.bf16 %v1745_v5, %v1727_v3 }
 0x18d   : > { %9760 = vset.pattern.permute.xlu1 %v13474_v1  ;;  %7538 = vmatpush1.bf16.msra.mxu1 %v10920_v15  ;;  %14144 = vst [vmem:[#allocation79_spill] sm:$0xff] %v10953_v11  ;;  %v1726_v20 = vld [vmem:[#allocation2 + $0x900] sm:$0xff]  ;;  %v1744_v24 = vld [vmem:[#allocation2 + $0x990] sm:$0xff]  ;;  %v10962_v26 = vpack.c.bf16 %v1747_v9, %v1729_v6  ;;  %v1763_v28 = vld [vmem:[#allocation2 + $0xa28] sm:$0xff] }
 0x18e   : > { %7540 = vmatprep.subr.bf16.mxu1 %v10925_v25  ;;  %7478 = vmatpush1.bf16.msra.mxu0 %v10928_v30  ;;  %14145 = vst [vmem:[#allocation80_spill] sm:$0xff] %v10957_v13  ;;  %14146 = vst [vmem:[#allocation81_spill] sm:$0xff] %v10959_v19  ;;  %v1728_v2 = vld [vmem:[#allocation2 + $0x910] sm:$0xff]  ;;  %v1746_v27 = vld [vmem:[#allocation2 + $0x9a0] sm:$0xff]  ;;  %v10965_v41 = vpack.c.bf16 %v1744_v24, %v1726_v20 }
 0x18f   : > { %7480 = vmatprep.subr.bf16.mxu0 %v10935_v36  ;;  %14147 = vst [vmem:[#allocation82_spill] sm:$0xff] %v10962_v26  ;;  %v1781_v29 = vld [vmem:[#allocation2 + $0xab8] sm:$0xff]  ;;  %v1783_v40 = vld [vmem:[#allocation2 + $0xac8] sm:$0xff]  ;;  %v10969_v43 = vpack.c.bf16 %v1746_v27, %v1728_v2  ;;  %v1762_v45 = vld [vmem:[#allocation2 + $0xa20] sm:$0xff] }
 0x190   : > { %v1765_v39 = vld [vmem:[#allocation2 + $0xa38] sm:$0xff]  ;;  %14148 = vst [vmem:[#allocation83_spill] sm:$0xff] %v10965_v41  ;;  %v10971_v44 = vpack.c.bf16 %v1781_v29, %v1763_v28  ;;  %v1780_v50 = vld [vmem:[#allocation2 + $0xab0] sm:$0xff]  ;;  %v1782_v57 = vld [vmem:[#allocation2 + $0xac0] sm:$0xff] }
 0x191   : > { %7542 = vmatpush1.bf16.msra.mxu1 %v10933_v35  ;;  %14149 = vst [vmem:[#allocation84_spill] sm:$0xff] %v10969_v43  ;;  %v1764_v51 = vld [vmem:[#allocation2 + $0xa30] sm:$0xff]  ;;  %v10974_v56 = vpack.c.bf16 %v1783_v40, %v1765_v39  ;;  %v1799_v58 = vld [vmem:[#allocation2 + $0xb48] sm:$0xff]  ;;  %v1817_v63 = vld [vmem:[#allocation2 + $0xbd8] sm:$0xff]  ;;  %v10977_v6 = vpack.c.bf16 %v1780_v50, %v1762_v45 }
 0x192   : > { %7544 = vmatprep.subr.bf16.mxu1 %v10938_v42  ;;  %7482 = vmatpush1.bf16.msra.mxu0 %v10941_v52  ;;  %14150 = vst [vmem:[#allocation85_spill] sm:$0xff] %v10971_v44  ;;  %v1801_v3 = vld [vmem:[#allocation2 + $0xb58] sm:$0xff]  ;;  %v1819_v5 = vld [vmem:[#allocation2 + $0xbe8] sm:$0xff]  ;;  %v10981_v9 = vpack.c.bf16 %v1782_v57, %v1764_v51  ;;  %v10983_v20 = vpack.c.bf16 %v1817_v63, %v1799_v58  ;;  %v1798_v24 = vld [vmem:[#allocation2 + $0xb40] sm:$0xff] }
 0x193   : > { %7484 = vmatprep.subr.bf16.mxu0 %v10947_v55  ;;  %14151 = vst [vmem:[#allocation86_spill] sm:$0xff] %v10974_v56  ;;  %14152 = vst [vmem:[#allocation87_spill] sm:$0xff] %v10977_v6  ;;  %v1816_v2 = vld [vmem:[#allocation2 + $0xbd0] sm:$0xff]  ;;  %v10986_v28 = vpack.c.bf16 %v1819_v5, %v1801_v3  ;;  %v1818_v29 = vld [vmem:[#allocation2 + $0xbe0] sm:$0xff] }
 0x194   : > { %14153 = vst [vmem:[#allocation88_spill] sm:$0xff] %v10981_v9  ;;  %14154 = vst [vmem:[#allocation89_spill] sm:$0xff] %v10983_v20  ;;  %v1800_v27 = vld [vmem:[#allocation2 + $0xb50] sm:$0xff]  ;;  %v1835_v39 = vld [vmem:[#allocation2 + $0xc68] sm:$0xff]  ;;  %v10989_v10 = vpack.c.bf16 %v1816_v2, %v1798_v24 }
 0x195   : > { %7546 = vmatpush1.bf16.msra.mxu1 %v10945_v54  ;;  %14155 = vst [vmem:[#allocation90_spill] sm:$0xff] %v10986_v28  ;;  %v1853_v40 = vld [vmem:[#allocation2 + $0xcf8] sm:$0xff]  ;;  %v1855_v50 = vld [vmem:[#allocation2 + $0xd08] sm:$0xff]  ;;  %v10993_v51 = vpack.c.bf16 %v1818_v29, %v1800_v27  ;;  %v1834_v58 = vld [vmem:[#allocation2 + $0xc60] sm:$0xff] }
 0x196   : > { %7548 = vmatprep.subr.bf16.mxu1 %v10950_v62  ;;  %7486 = vmatpush1.bf16.msra.mxu0 %v10953_v11  ;;  %v1837_v45 = vld [vmem:[#allocation2 + $0xc78] sm:$0xff]  ;;  %14156 = vst [vmem:[#allocation91_spill] sm:$0xff] %v10989_v10  ;;  %v10995_v57 = vpack.c.bf16 %v1853_v40, %v1835_v39  ;;  %v1852_v63 = vld [vmem:[#allocation2 + $0xcf0] sm:$0xff]  ;;  %v1854_v53 = vld [vmem:[#allocation2 + $0xd00] sm:$0xff] }
 0x197   : > { %7488 = vmatprep.subr.bf16.mxu0 %v10959_v19  ;;  %14157 = vst [vmem:[#allocation92_spill] sm:$0xff] %v10993_v51  ;;  %v1836_v3 = vld [vmem:[#allocation2 + $0xc70] sm:$0xff]  ;;  %v10998_v5 = vpack.c.bf16 %v1855_v50, %v1837_v45  ;;  %v1871_v38 = vld [vmem:[#allocation2 + $0xd88] sm:$0xff]  ;;  %v1889_v37 = vld [vmem:[#allocation2 + $0xe18] sm:$0xff]  ;;  %v11001_v0 = vpack.c.bf16 %v1852_v63, %v1834_v58 }
 0x198   : > { %14158 = vst [vmem:[#allocation93_spill] sm:$0xff] %v10995_v57  ;;  %v1873_v24 = vld [vmem:[#allocation2 + $0xd98] sm:$0xff]  ;;  %v1891_v2 = vld [vmem:[#allocation2 + $0xe28] sm:$0xff]  ;;  %v11005_v27 = vpack.c.bf16 %v1854_v53, %v1836_v3  ;;  %v11007_v29 = vpack.c.bf16 %v1889_v37, %v1871_v38  ;;  %v1870_v39 = vld [vmem:[#allocation2 + $0xd80] sm:$0xff] }
 0x199   : > { %7550 = vmatpush1.bf16.msra.mxu1 %v10957_v13  ;;  %14159 = vst [vmem:[#allocation94_spill] sm:$0xff] %v10998_v5  ;;  %14160 = vst [vmem:[#allocation95_spill] sm:$0xff] %v11001_v0  ;;  %v1888_v40 = vld [vmem:[#allocation2 + $0xe10] sm:$0xff]  ;;  %v11010_v50 = vpack.c.bf16 %v1891_v2, %v1873_v24  ;;  %v1890_v21 = vld [vmem:[#allocation2 + $0xe20] sm:$0xff] }
 0x19a   : > { %7552 = vmatprep.subr.bf16.mxu1 %v10962_v26  ;;  %7490 = vmatpush1.bf16.msra.mxu0 %v10965_v41  ;;  %14161 = vst [vmem:[#allocation96_spill] sm:$0xff] %v11005_v27  ;;  %14162 = vst [vmem:[#allocation97_spill] sm:$0xff] %v11007_v29  ;;  %v1872_v45 = vld [vmem:[#allocation2 + $0xd90] sm:$0xff]  ;;  %v1907_v1 = vld [vmem:[#allocation2 + $0xea8] sm:$0xff] }
 0x19b   : > { %7492 = vmatprep.subr.bf16.mxu0 %v10971_v44  ;;  %14163 = vst [vmem:[#allocation98_spill] sm:$0xff] %v11010_v50  ;;  %v1925_v22 = vld [vmem:[#allocation2 + $0xf38] sm:$0xff]  ;;  %v1927_v63 = vld [vmem:[#allocation2 + $0xf48] sm:$0xff]  ;;  %v11017_v37 = vpack.c.bf16 %v1890_v21, %v1872_v45  ;;  %v1906_v53 = vld [vmem:[#allocation2 + $0xea0] sm:$0xff] }
 0x19c   : > { %v1909_v58 = vld [vmem:[#allocation2 + $0xeb8] sm:$0xff]  ;;  %v11019_v38 = vpack.c.bf16 %v1925_v22, %v1907_v1  ;;  %v1924_v3 = vld [vmem:[#allocation2 + $0xf30] sm:$0xff]  ;;  %v1405_v21 = vld [vmem:[#allocation10] sm:$0xf] }
 0x19d   : > { %7554 = vmatpush1.bf16.msra.mxu1 %v10969_v43  ;;  %14165 = vst [vmem:[#allocation100_spill] sm:$0xff] %v11017_v37  ;;  %v1908_v24 = vld [vmem:[#allocation2 + $0xeb0] sm:$0xff]  ;;  %v11022_v2 = vpack.c.bf16 %v1927_v63, %v1909_v58  ;;  %v1942_v45 = vld [vmem:[#allocation2 + $0xfc0] sm:$0xff]  ;;  %3869 = vperm.xlu1 %9760, %v1405_v21  }
 0x19e   : > { %7556 = vmatprep.subr.bf16.mxu1 %v10974_v56  ;;  %7494 = vmatpush1.bf16.msra.mxu0 %v10977_v6  ;;  %14166 = vst [vmem:[#allocation101_spill] sm:$0xff] %v11019_v38  ;;  %v1960_v58 = vld [vmem:[#allocation2 + $0x1050] sm:$0xff] }
 0x19f   : > { %7496 = vmatprep.subr.bf16.mxu0 %v10983_v20  ;;  %14167 = vst [vmem:[#allocation102_spill] sm:$0xff] %v11022_v2  ;;  %v1944_v63 = vld [vmem:[#allocation2 + $0xfd0] sm:$0xff]  ;;  %3901 = vperm.xlu0 %9762, %v1405_v21  }
 0x1a1   : > { %7558 = vmatpush1.bf16.msra.mxu1 %v10981_v9 }
 0x1a2   : > { %7560 = vmatprep.subr.bf16.mxu1 %v10986_v28  ;;  %7498 = vmatpush1.bf16.msra.mxu0 %v10989_v10  ;;  %v1999_v10 = vld [vmem:[#allocation2 + $0x1188] sm:$0xff] }
 0x1a3   : > { %7500 = vmatprep.subr.bf16.mxu0 %v10995_v57  ;;  %v1943_v57 = vld [vmem:[#allocation2 + $0xfc8] sm:$0xff] }
 0x1a5   : > { %7562 = vmatpush1.bf16.msra.mxu1 %v10993_v51  ;;  %v11013_v51 = vpack.c.bf16 %v1888_v40, %v1870_v39  ;;  %v1945_v39 = vld [vmem:[#allocation2 + $0xfd8] sm:$0xff]  ;;  %v1963_v40 = vld [vmem:[#allocation2 + $0x1068] sm:$0xff] }
 0x1a6   : > { %7564 = vmatprep.subr.bf16.mxu1 %v10998_v5  ;;  %7502 = vmatpush1.bf16.msra.mxu0 %v11001_v0  ;;  %v1926_v5 = vld [vmem:[#allocation2 + $0xf40] sm:$0xff]  ;;  %v1961_v0 = vld [vmem:[#allocation2 + $0x1058] sm:$0xff] }
 0x1a7   : > { %14164 = vst [vmem:[#allocation99_spill] sm:$0xff] %v11013_v51  ;;  %7504 = vmatprep.subr.bf16.mxu0 %v11007_v29  ;;  %v11029_v1 = vpack.c.bf16 %v1926_v5, %v1908_v24  ;;  %v11031_v22 = vpack.c.bf16 %v1961_v0, %v1943_v57  ;;  %v1962_v29 = vld [vmem:[#allocation2 + $0x1060] sm:$0xff]  ;;  %v11037_v5 = vpack.c.bf16 %v1960_v58, %v1942_v45  ;;  %v14176_v45 = vmov 1   ;;  %v1445_v58 = vld [vmem:[#allocation2 + $0x38] sm:$0xff] }
 0x1a8   : > { %v11041_v0 = vpack.c.bf16 %v1962_v29, %v1944_v63  ;;  %v1978_v24 = vld [vmem:[#allocation2 + $0x10e0] sm:$0xff]  ;;  %9761 = vset.pattern.permute.xlu1 %v14176_v45 }
 0x1a9   : > { %7566 = vmatpush1.bf16.msra.mxu1 %v11005_v27  ;;  %v11025_v27 = vpack.c.bf16 %v1924_v3, %v1906_v53  ;;  %14169 = vst [vmem:[#allocation104_spill] sm:$0xff] %v11029_v1  ;;  %14170 = vst [vmem:[#allocation105_spill] sm:$0xff] %v11031_v22  ;;  %v1997_v53 = vld [vmem:[#allocation2 + $0x1178] sm:$0xff]  ;;  %3885 = vperm.xlu1 %9761, %v1405_v21  }
 0x1aa   : > { %7568 = vmatprep.subr.bf16.mxu1 %v11010_v50  ;;  %7506 = vmatpush1.bf16.msra.mxu0 %v11013_v51  ;;  %v11034_v50 = vpack.c.bf16 %v1963_v40, %v1945_v39  ;;  %v1979_v51 = vld [vmem:[#allocation2 + $0x10e8] sm:$0xff]  ;;  %v1981_v3 = vld [vmem:[#allocation2 + $0x10f8] sm:$0xff]  ;;  %14172 = vst [vmem:[#allocation107_spill] sm:$0xff] %v11037_v5  ;;  %14173 = vst [vmem:[#allocation108_spill] sm:$0xff] %v11041_v0 }
 0x1ab   : > { %14168 = vst [vmem:[#allocation103_spill] sm:$0xff] %v11025_v27  ;;  %7508 = vmatprep.subr.bf16.mxu0 %v11019_v38  ;;  %v11043_v57 = vpack.c.bf16 %v1997_v53, %v1979_v51  ;;  %v1996_v39 = vld [vmem:[#allocation2 + $0x1170] sm:$0xff]  ;;  %v1998_v38 = vld [vmem:[#allocation2 + $0x1180] sm:$0xff]  ;;  %v14182_v53 = vmov 3  }
 0x1ac   : > { %14171 = vst [vmem:[#allocation106_spill] sm:$0xff] %v11034_v50  ;;  %v1980_v40 = vld [vmem:[#allocation2 + $0x10f0] sm:$0xff]  ;;  %v11051_v51 = vpack.c.bf16 %v1996_v39, %v1978_v24  ;;  %v14188_v24 = vmov 4  }
 0x1ad   : > { %7570 = vmatpush1.bf16.msra.mxu1 %v11017_v37  ;;  %14174 = vst [vmem:[#allocation109_spill] sm:$0xff] %v11043_v57  ;;  %v1443_v37 = vld [vmem:[#allocation2 + $0x28] sm:$0xff]  ;;  %9763 = vset.pattern.permute.xlu1 %v14182_v53 }
 0x1ae   : > { %7572 = vmatprep.subr.bf16.mxu1 %v11022_v2  ;;  %7510 = vmatpush1.bf16.msra.mxu0 %v11025_v27  ;;  %v11046_v2 = vpack.c.bf16 %v1999_v10, %v1981_v3  ;;  %v1461_v27 = vld [vmem:[#allocation2 + $0xb8] sm:$0xff]  ;;  %14178 = vst [vmem:[#allocation111_spill] sm:$0xff] %v11051_v51  ;;  %v11055_v10 = vpack.c.bf16 %v1998_v38, %v1980_v40  ;;  %v1406_v38 = vld [vmem:[%s10472_s24] sm:$0xf]  ;;  %v2371_v3 = vlaneseq }
 0x1af   : > { %7512 = vmatprep.subr.bf16.mxu0 %v11031_v22  ;;  %v14177_v22 = vmov 0   ;;  %v11057_v29 = vpack.c.bf16 %v1461_v27, %v1443_v37  ;;  %3917 = vperm.xlu1 %9763, %v1405_v21   ;;  %v1407_v27 = vld [vmem:[#allocation12] sm:$0xf]  ;;  %v14185_v37 = vmov 2   ;;  %v1403_v21 = vld [vmem:[%s14183_s15] sm:$0xf] }
 0x1b0   : > { %14175 = vst [vmem:[#allocation110_spill] sm:$0xff] %v11046_v2  ;;  %9769 = vset.pattern.permute.xlu0 %v14177_v22  ;;  %14179 = vst [vmem:[#allocation112_spill] sm:$0xff] %v11055_v10  ;;  %v2372_v39 = vshrl.u32 %v2371_v3, 7 }
 0x1b1   : > { %7574 = vmatpush1.bf16.msra.mxu1 %v11029_v1  ;;  %v1463_v1 = vld [vmem:[#allocation2 + $0xc8] sm:$0xff]  ;;  %14180 = vst [vmem:[#allocation113_spill] sm:$0xff] %v11057_v29 }
 0x1b2   : > { %7576 = vmatprep.subr.bf16.mxu1 %v11034_v50  ;;  %7514 = vmatpush1.bf16.msra.mxu0 %v11037_v5  ;;  %v11060_v63 = vpack.c.bf16 %v1463_v1, %v1445_v58  ;;  %v1408_v1 = vld [vmem:[%s14184_s16] sm:$0xf]  ;;  %v11090_v40 = vsub.s32 0, %v2372_v39  ;;  %v11092_v58 = vsub.s32 1, %v2372_v39  ;;  %s14486_s16 = sld [smem:[#allocation38_spill]] }
 0x1b3   : > { %7516 = vmatprep.subr.bf16.mxu0 %v11043_v57  ;;  %9764 = vset.pattern.permute.xlu1 %v14177_v22 }
 0x1b4   : > { %14181 = vst [vmem:[#allocation114_spill] sm:$0xff] %v11060_v63  ;;  %3934 = vperm.xlu1 %9764, %v1406_v38   ;;  %14189 = vst [vmem:[#allocation115_spill] sm:$0xff] %v11090_v40  ;;  %v14191_v38 = vmov 5  }
 0x1b5   : > { %7578 = vmatpush1.bf16.msra.mxu1 %v11041_v0  ;;  %14190 = vst [vmem:[#allocation116_spill] sm:$0xff] %v11092_v58 }
 0x1b6   : > { %7580 = vmatprep.subr.bf16.mxu1 %v11046_v2  ;;  %7518 = vmatpush1.bf16.msra.mxu0 %v11051_v51  ;;  %v14201_v51 = vmov 6  }
 0x1b7   : > { %7584 = vmatprep.subr.bf16.mxu0 %v11057_v29  ;;  %v11113_v29 = vsub.s32 4, %v2372_v39 }
 0x1b8   : > { %3943 = vperm.xlu1 %9764, %v1407_v27  }
 0x1b9   : > { %7582 = vmatpush1.bf16.msra.mxu1 %v11055_v10  ;;  %14198 = vst [vmem:[#allocation123_spill] sm:$0xff] %v11113_v29 }
 0x1ba   : > { %7648 = vmatprep.subr.bf16.mxu1 %v11060_v63 }
 0x1bc   : > { %9765 = vset.pattern.permute.xlu1 %v14176_v45 }
 0x1bd   : > { %3959 = vperm.xlu1 %9765, %v1407_v27  }
 0x1c1   : > { %9766 = vset.pattern.permute.xlu1 %v14185_v37 }
 0x1c2   : > { %3975 = vperm.xlu1 %9766, %v1407_v27  }
 0x1c6   : > { %9767 = vset.pattern.permute.xlu1 %v14177_v22 }
 0x1c7   : > { %3221 = vperm.xlu1 %9767, %v1403_v21  }
 0x1cb   : > { %9768 = vset.pattern.permute.xlu1 %v14182_v53 }
 0x1cc   : > { %3991 = vperm.xlu1 %9768, %v1407_v27   ;;  %v11095_v27 = vsub.s32 2, %v2372_v39 }
 0x1ce   : > { %14192 = vst [vmem:[#allocation117_spill] sm:$0xff] %v11095_v27 }
 0x1d0   : > { %9770 = vset.pattern.permute.xlu1 %v14176_v45  ;;  %v11099_v45 = vsub.s32 3, %v2372_v39 }
 0x1d1   : > { %3237 = vperm.xlu1 %9770, %v1403_v21  }
 0x1d2   : > { %14193 = vst [vmem:[#allocation118_spill] sm:$0xff] %v11099_v45 }
 0x1d5   : > { %9771 = vset.pattern.permute.xlu1 %v14185_v37  ;;  %v1437_v37 = vld [vmem:[%s11088_s2 + $0x8] sm:$0xff] }
 0x1d6   : > { %3253 = vperm.xlu1 %9771, %v1403_v21   ;;  %v11119_v10 = vrot.slane %v1437_v37, %v11095_v27  ;;  %v11138_v20 = vrot.slane %v1437_v37, %v11113_v29 }
 0x1d8   : > { %14200 = vst [vmem:[#allocation125_spill] sm:$0xff] %v11119_v10  ;;  %14206 = vst [vmem:[#allocation130_spill] sm:$0xff] %v11138_v20 }
 0x1da   : > { %9772 = vset.pattern.permute.xlu1 %v14177_v22  ;;  %v11105_v22 = vrot.slane %v1437_v37, %v11090_v40 }
 0x1db   : > { %4008 = vperm.xlu1 %9772, %v1408_v1  }
 0x1dc   : > { %14195 = vst [vmem:[#allocation120_spill] sm:$0xff] %v11105_v22 }
 0x1df   : > { %9773 = vset.pattern.permute.xlu1 %v14182_v53 }
 0x1e0   : > { %3269 = vperm.xlu1 %9773, %v1403_v21  }
 0x1e4   : > { %9774 = vset.pattern.permute.xlu1 %v14188_v24  ;;  %v1436_v24 = vld [vmem:[%s11088_s2] sm:$0xff] }
 0x1e5   : > { %3285 = vperm.xlu1 %9774, %v1403_v21   ;;  %v11102_v3 = vrot.slane %v1436_v24, %v11090_v40  ;;  %v11108_v63 = vrot.slane %v1436_v24, %v11092_v58  ;;  %v11123_v2 = vrot.slane %v1436_v24, %v11099_v45  ;;  %v11126_v40 = vrot.slane %v1437_v37, %v11099_v45 }
 0x1e7   : > { %14194 = vst [vmem:[#allocation119_spill] sm:$0xff] %v11102_v3  ;;  %14196 = vst [vmem:[#allocation121_spill] sm:$0xff] %v11108_v63 }
 0x1e8   : > { %14202 = vst [vmem:[#allocation126_spill] sm:$0xff] %v11123_v2  ;;  %14203 = vst [vmem:[#allocation127_spill] sm:$0xff] %v11126_v40 }
 0x1e9   : > { %9775 = vset.pattern.permute.xlu1 %v14191_v38  ;;  %v11111_v38 = vrot.slane %v1437_v37, %v11092_v58  ;;  %v11128_v58 = vsub.s32 5, %v2372_v39 }
 0x1ea   : > { %3301 = vperm.xlu1 %9775, %v1403_v21   ;;  %v11116_v21 = vrot.slane %v1436_v24, %v11095_v27 }
 0x1eb   : > { %14197 = vst [vmem:[#allocation122_spill] sm:$0xff] %v11111_v38  ;;  %14204 = vst [vmem:[#allocation128_spill] sm:$0xff] %v11128_v58 }
 0x1ec   : > { %14199 = vst [vmem:[#allocation124_spill] sm:$0xff] %v11116_v21 }
 0x1ee   : > { %9776 = vset.pattern.permute.xlu1 %v14201_v51  ;;  %v11135_v51 = vrot.slane %v1436_v24, %v11113_v29 }
 0x1f0   : > { %14205 = vst [vmem:[#allocation129_spill] sm:$0xff] %v11135_v51 }
 0x1f4   : > { %v2401_v1 = vpop.permute.xlu1 %2400  ;;  %v2369_v53 = vpop.permute.xlu0 %2368 }
 0x1f5   : > { %v2379_v5 = vmul.f32 %v11102_v3, %v2369_v53  ;;  %v2380_v50 = vmul.f32 %v11105_v22, %v2369_v53  ;;  %v2411_v45 = vmul.f32 %v11116_v21, %v2401_v1  ;;  %v2412_v9 = vmul.f32 %v11119_v10, %v2401_v1 }
 0x1f6   : > { %v11143_v3 = vrot.slane %v1436_v24, %v11128_v58  ;;  %v11146_v53 = vrot.slane %v1437_v37, %v11128_v58 }
 0x1f8   : > { %14207 = vst [vmem:[#allocation131_spill] sm:$0xff] %v11143_v3  ;;  %14208 = vst [vmem:[#allocation132_spill] sm:$0xff] %v11146_v53 }
 0x1f9   : > { %v2417_v57 = vpop.permute.xlu1 %2416  ;;  %v2385_v0 = vpop.permute.xlu0 %2384 }
 0x1fa   : > { %v2395_v28 = vmul.f32 %v11108_v63, %v2385_v0  ;;  %v2396_v27 = vmul.f32 %v11111_v38, %v2385_v0  ;;  %v11148_v63 = vsub.s32 6, %v2372_v39  ;;  %v2427_v0 = vmul.f32 %v11123_v2, %v2417_v57 }
 0x1fb   : > { %v2428_v38 = vmul.f32 %v11126_v40, %v2417_v57  ;;  %v1605_v40 = vld [vmem:[#allocation2 + $0x538] sm:$0xff] }
 0x1fc   : > { %v2397_v6 = vadd.f32 %v2395_v28, %v2379_v5  ;;  %v2398_v56 = vadd.f32 %v2396_v27, %v2380_v50  ;;  %14209 = vst [vmem:[#allocation133_spill] sm:$0xff] %v11148_v63  ;;  %v11154_v27 = vsub.s32 7, %v2372_v39  ;;  %v11159_v2 = vrot.slane %v1436_v24, %v11148_v63 }
 0x1fe   : > { %v2413_v29 = vadd.f32 %v2411_v45, %v2397_v6  ;;  %v2414_v22 = vadd.f32 %v2412_v9, %v2398_v56  ;;  %v2433_v44 = vpop.permute.xlu1 %2432  ;;  %v2449_v21 = vpop.permute.xlu0 %2448  ;;  %14210 = vst [vmem:[#allocation134_spill] sm:$0xff] %v11154_v27  ;;  %14211 = vst [vmem:[#allocation135_spill] sm:$0xff] %v11159_v2  ;;  %v11162_v6 = vrot.slane %v1437_v37, %v11148_v63 }
 0x1ff   : > { %v2443_v1 = vmul.f32 %v11135_v51, %v2433_v44  ;;  %v2444_v28 = vmul.f32 %v11138_v20, %v2433_v44  ;;  %v2459_v58 = vmul.f32 %v11143_v3, %v2449_v21  ;;  %v2460_v10 = vmul.f32 %v11146_v53, %v2449_v21  ;;  %v1462_v51 = vld [vmem:[#allocation2 + $0xc0] sm:$0xff]  ;;  %v1587_v20 = vld [vmem:[#allocation2 + $0x4a8] sm:$0xff] }
 0x200   : > { %v2429_v50 = vadd.f32 %v2427_v0, %v2413_v29  ;;  %v2430_v5 = vadd.f32 %v2428_v38, %v2414_v22  ;;  %14212 = vst [vmem:[#allocation136_spill] sm:$0xff] %v11162_v6  ;;  %v11165_v45 = vrot.slane %v1436_v24, %v11154_v27  ;;  %v11168_v44 = vrot.slane %v1437_v37, %v11154_v27  ;;  %v1460_v24 = vld [vmem:[#allocation2 + $0xb0] sm:$0xff]  ;;  %v1570_v53 = vld [vmem:[#allocation2 + $0x420] sm:$0xff] }
 0x202   : > { %v2445_v56 = vadd.f32 %v2443_v1, %v2429_v50  ;;  %v2446_v9 = vadd.f32 %v2444_v28, %v2430_v5  ;;  %14213 = vst [vmem:[#allocation137_spill] sm:$0xff] %v11165_v45  ;;  %14214 = vst [vmem:[#allocation138_spill] sm:$0xff] %v11168_v44  ;;  %v1442_v28 = vld [vmem:[#allocation2 + $0x20] sm:$0xff]  ;;  %v1444_v5 = vld [vmem:[#allocation2 + $0x30] sm:$0xff] }
 0x203   : > { %v2465_v57 = vpop.permute.xlu1 %2464  ;;  %v2498_v50 = vpop.permute.xlu0 %2497 }
 0x204   : > { %v2461_v22 = vadd.f32 %v2459_v58, %v2445_v56  ;;  %v2462_v29 = vadd.f32 %v2460_v10, %v2446_v9  ;;  %v2475_v39 = vmul.f32 %v11159_v2, %v2465_v57  ;;  %v2476_v38 = vmul.f32 %v11162_v6, %v2465_v57  ;;  %v1479_v58 = vld [vmem:[#allocation2 + $0x148] sm:$0xff]  ;;  %v1497_v10 = vld [vmem:[#allocation2 + $0x1d8] sm:$0xff]  ;;  %v1552_v6 = vld [vmem:[#allocation2 + $0x390] sm:$0xff] }
 0x205   : > { %v1481_v56 = vld [vmem:[#allocation2 + $0x158] sm:$0xff]  ;;  %v1499_v9 = vld [vmem:[#allocation2 + $0x1e8] sm:$0xff] }
 0x206   : > { %v2477_v0 = vadd.f32 %v2475_v39, %v2461_v22  ;;  %v2478_v3 = vadd.f32 %v2476_v38, %v2462_v29  ;;  %v11178_v22 = vpack.c.bf16 %v1460_v24, %v1442_v28  ;;  %v11180_v29 = vpack.c.bf16 %v1462_v51, %v1444_v5  ;;  %v1478_v39 = vld [vmem:[#allocation2 + $0x140] sm:$0xff]  ;;  %v1496_v38 = vld [vmem:[#allocation2 + $0x1d0] sm:$0xff] }
 0x207   : > { %v11192_v51 = vpack.c.bf16 %v1496_v38, %v1478_v39  ;;  %v1532_v24 = vld [vmem:[#allocation2 + $0x2f0] sm:$0xff]  ;;  %v1571_v39 = vld [vmem:[#allocation2 + $0x428] sm:$0xff] }
 0x208   : > { %v2481_v21 = vpop.permute.xlu1 %2480  ;;  %14215 = vst [vmem:[#allocation139_spill] sm:$0xff] %v11178_v22  ;;  %14216 = vst [vmem:[#allocation140_spill] sm:$0xff] %v11180_v29 }
 0x209   : > { %v2491_v63 = vmul.f32 %v11165_v45, %v2481_v21  ;;  %v2492_v1 = vmul.f32 %v11168_v44, %v2481_v21  ;;  %v1480_v21 = vld [vmem:[#allocation2 + $0x150] sm:$0xff]  ;;  %v1498_v45 = vld [vmem:[#allocation2 + $0x1e0] sm:$0xff]  ;;  %v1515_v44 = vld [vmem:[#allocation2 + $0x268] sm:$0xff]  ;;  %14219 = vst [vmem:[#allocation143_spill] sm:$0xff] %v11192_v51 }
 0x20a   : > { %v11194_v28 = vpack.c.bf16 %v1498_v45, %v1480_v21  ;;  %v1553_v45 = vld [vmem:[#allocation2 + $0x398] sm:$0xff]  ;;  %v1550_v21 = vld [vmem:[#allocation2 + $0x380] sm:$0xff] }
 0x20b   : > { %v2493_v37 = vadd.f32 %v2491_v63, %v2477_v0  ;;  %v2494_v27 = vadd.f32 %v2492_v1, %v2478_v3  ;;  %v11184_v63 = vpack.c.bf16 %v1497_v10, %v1479_v58  ;;  %v11186_v3 = vpack.c.bf16 %v1499_v9, %v1481_v56  ;;  %v1533_v0 = vld [vmem:[#allocation2 + $0x2f8] sm:$0xff]  ;;  %v1535_v1 = vld [vmem:[#allocation2 + $0x308] sm:$0xff]  ;;  %v1516_v58 = vld [vmem:[#allocation2 + $0x270] sm:$0xff] }
 0x20c   : > { %14220 = vst [vmem:[#allocation144_spill] sm:$0xff] %v11194_v28  ;;  %v11198_v5 = vpack.c.bf16 %v1533_v0, %v1515_v44  ;;  %v1534_v10 = vld [vmem:[#allocation2 + $0x300] sm:$0xff]  ;;  %v1551_v56 = vld [vmem:[#allocation2 + $0x388] sm:$0xff]  ;;  %v1569_v9 = vld [vmem:[#allocation2 + $0x418] sm:$0xff] }
 0x20d   : > { %v11174_v2 = vadd.f32 %v2498_v50, %v2493_v37  ;;  %v11176_v57 = vadd.f32 %v2498_v50, %v2494_v27  ;;  %14217 = vst [vmem:[#allocation141_spill] sm:$0xff] %v11184_v63  ;;  %14218 = vst [vmem:[#allocation142_spill] sm:$0xff] %v11186_v3  ;;  %v1517_v27 = vld [vmem:[#allocation2 + $0x278] sm:$0xff]  ;;  %v1514_v50 = vld [vmem:[#allocation2 + $0x260] sm:$0xff]  ;;  %v11208_v44 = vpack.c.bf16 %v1534_v10, %v1516_v58 }
 0x20e   : > { %14221 = vst [vmem:[#allocation145_spill] sm:$0xff] %v11198_v5  ;;  %v11200_v37 = vpack.c.bf16 %v1535_v1, %v1517_v27  ;;  %v11206_v38 = vpack.c.bf16 %v1532_v24, %v1514_v50  ;;  %v1568_v0 = vld [vmem:[#allocation2 + $0x410] sm:$0xff]  ;;  %v11212_v27 = vpack.c.bf16 %v1569_v9, %v1551_v56  ;;  %v11214_v1 = vpack.c.bf16 %v1571_v39, %v1553_v45  ;;  %v1586_v58 = vld [vmem:[#allocation2 + $0x4a0] sm:$0xff] }
 0x20f   : > { %2638 = vmatprep.mubr.f32.mxu0 %v11176_v57  ;;  %2709 = vmatprep.mubr.f32.mxu1 %v11176_v57  ;;  %14224 = vst [vmem:[#allocation148_spill] sm:$0xff] %v11208_v44  ;;  %v11218_v50 = vpack.c.bf16 %v1568_v0, %v1550_v21  ;;  %v11220_v24 = vpack.c.bf16 %v1570_v53, %v1552_v6  ;;  %v1604_v10 = vld [vmem:[#allocation2 + $0x530] sm:$0xff]  ;;  %v1606_v39 = vld [vmem:[#allocation2 + $0x540] sm:$0xff] }
 0x210   : > { %2639 = vmatmul.mubr.f32.vlgmr.msra.gmra.mrb[0].mxu0 %v11174_v2  ;;  %2710 = vmatmul.mubr.f32.vlgmr.msra.gmra.mrb[0].mxu1 %v11174_v2  ;;  %14222 = vst [vmem:[#allocation146_spill] sm:$0xff] %v11200_v37  ;;  %14223 = vst [vmem:[#allocation147_spill] sm:$0xff] %v11206_v38  ;;  %v11224_v56 = vpack.c.bf16 %v1605_v40, %v1587_v20  ;;  %v1588_v45 = vld [vmem:[#allocation2 + $0x4b0] sm:$0xff]  ;;  %v11230_v53 = vpack.c.bf16 %v1604_v10, %v1586_v58  ;;  %v1622_v21 = vld [vmem:[#allocation2 + $0x5c0] sm:$0xff] }
 0x211   : > { %7586 = vmatpush1.bf16.msra.mxu0 %v11178_v22  ;;  %7650 = vmatpush1.bf16.msra.mxu1 %v11180_v29  ;;  %14225 = vst [vmem:[#allocation149_spill] sm:$0xff] %v11212_v27  ;;  %14226 = vst [vmem:[#allocation150_spill] sm:$0xff] %v11214_v1  ;;  %v11232_v6 = vpack.c.bf16 %v1606_v39, %v1588_v45  ;;  %v1640_v0 = vld [vmem:[#allocation2 + $0x650] sm:$0xff]  ;;  %v1658_v45 = vld [vmem:[#allocation2 + $0x6e0] sm:$0xff] }
 0x212   : > { %2780 = vmatprep.mubr.f32.mxu0 %v11176_v57  ;;  %2851 = vmatprep.mubr.f32.mxu1 %v11176_v57  ;;  %14227 = vst [vmem:[#allocation151_spill] sm:$0xff] %v11218_v50  ;;  %14228 = vst [vmem:[#allocation152_spill] sm:$0xff] %v11220_v24  ;;  %v11242_v58 = vpack.c.bf16 %v1640_v0, %v1622_v21  ;;  %v1676_v39 = vld [vmem:[#allocation2 + $0x770] sm:$0xff]  ;;  %v1743_v29 = vld [vmem:[#allocation2 + $0x988] sm:$0xff] }
 0x213   : > { %7588 = vmatprep.subr.bf16.mxu0 %v11184_v63  ;;  %7652 = vmatprep.subr.bf16.mxu1 %v11186_v3  ;;  %14229 = vst [vmem:[#allocation153_spill] sm:$0xff] %v11224_v56  ;;  %14231 = vst [vmem:[#allocation155_spill] sm:$0xff] %v11230_v53  ;;  %v11254_v21 = vpack.c.bf16 %v1676_v39, %v1658_v45  ;;  %v2319_v3 = vld [vmem:[#allocation6 + $0x88] sm:$0xff]  ;;  %v2321_v63 = vld [vmem:[#allocation6 + $0x98] sm:$0xff] }
 0x214   : > { %14232 = vst [vmem:[#allocation156_spill] sm:$0xff] %v11232_v6  ;;  %14235 = vst [vmem:[#allocation159_spill] sm:$0xff] %v11242_v58  ;;  %v1761_v22 = vld [vmem:[#allocation2 + $0xa18] sm:$0xff] }
 0x215   : > { %7590 = vmatpush1.bf16.msra.mxu0 %v11192_v51  ;;  %7654 = vmatpush1.bf16.msra.mxu1 %v11194_v28  ;;  %v1589_v51 = vld [vmem:[#allocation2 + $0x4b8] sm:$0xff]  ;;  %v1607_v28 = vld [vmem:[#allocation2 + $0x548] sm:$0xff]  ;;  %14239 = vst [vmem:[#allocation163_spill] sm:$0xff] %v11254_v21 }
 0x216   : > { %7592 = vmatprep.subr.bf16.mxu0 %v11198_v5  ;;  %7656 = vmatprep.subr.bf16.mxu1 %v11200_v37  ;;  %v11226_v9 = vpack.c.bf16 %v1607_v28, %v1589_v51  ;;  %v1623_v37 = vld [vmem:[#allocation2 + $0x5c8] sm:$0xff]  ;;  %v1625_v5 = vld [vmem:[#allocation2 + $0x5d8] sm:$0xff]  ;;  %v1624_v51 = vld [vmem:[#allocation2 + $0x5d0] sm:$0xff] }
 0x217   : > { %v1642_v28 = vld [vmem:[#allocation2 + $0x660] sm:$0xff] }
 0x218   : > { %14230 = vst [vmem:[#allocation154_spill] sm:$0xff] %v11226_v9  ;;  %v11244_v10 = vpack.c.bf16 %v1642_v28, %v1624_v51  ;;  %v1694_v51 = vld [vmem:[#allocation2 + $0x800] sm:$0xff]  ;;  %v1712_v28 = vld [vmem:[#allocation2 + $0x890] sm:$0xff] }
 0x219   : > { %7594 = vmatpush1.bf16.msra.mxu0 %v11206_v38  ;;  %7658 = vmatpush1.bf16.msra.mxu1 %v11208_v44  ;;  %v1641_v38 = vld [vmem:[#allocation2 + $0x658] sm:$0xff]  ;;  %v1643_v44 = vld [vmem:[#allocation2 + $0x668] sm:$0xff]  ;;  %v11266_v45 = vpack.c.bf16 %v1712_v28, %v1694_v51 }
 0x21a   : > { %7596 = vmatprep.subr.bf16.mxu0 %v11212_v27  ;;  %7660 = vmatprep.subr.bf16.mxu1 %v11214_v1  ;;  %v11236_v20 = vpack.c.bf16 %v1641_v38, %v1623_v37  ;;  %v11238_v40 = vpack.c.bf16 %v1643_v44, %v1625_v5  ;;  %v1659_v1 = vld [vmem:[#allocation2 + $0x6e8] sm:$0xff]  ;;  %v1661_v27 = vld [vmem:[#allocation2 + $0x6f8] sm:$0xff]  ;;  %14236 = vst [vmem:[#allocation160_spill] sm:$0xff] %v11244_v10  ;;  %v1660_v38 = vld [vmem:[#allocation2 + $0x6f0] sm:$0xff] }
 0x21b   : > { %v1678_v44 = vld [vmem:[#allocation2 + $0x780] sm:$0xff]  ;;  %14243 = vst [vmem:[#allocation167_spill] sm:$0xff] %v11266_v45 }
 0x21c   : > { %14233 = vst [vmem:[#allocation157_spill] sm:$0xff] %v11236_v20  ;;  %14234 = vst [vmem:[#allocation158_spill] sm:$0xff] %v11238_v40  ;;  %v11256_v0 = vpack.c.bf16 %v1678_v44, %v1660_v38  ;;  %v1730_v38 = vld [vmem:[#allocation2 + $0x920] sm:$0xff]  ;;  %v1748_v44 = vld [vmem:[#allocation2 + $0x9b0] sm:$0xff] }
 0x21d   : > { %7598 = vmatpush1.bf16.msra.mxu0 %v11218_v50  ;;  %7662 = vmatpush1.bf16.msra.mxu1 %v11220_v24  ;;  %v1677_v50 = vld [vmem:[#allocation2 + $0x778] sm:$0xff]  ;;  %v1679_v24 = vld [vmem:[#allocation2 + $0x788] sm:$0xff]  ;;  %v11278_v51 = vpack.c.bf16 %v1748_v44, %v1730_v38 }
 0x21e   : > { %7600 = vmatprep.subr.bf16.mxu0 %v11224_v56  ;;  %7664 = vmatprep.subr.bf16.mxu1 %v11226_v9  ;;  %v11248_v5 = vpack.c.bf16 %v1677_v50, %v1659_v1  ;;  %v11250_v37 = vpack.c.bf16 %v1679_v24, %v1661_v27  ;;  %v1695_v9 = vld [vmem:[#allocation2 + $0x808] sm:$0xff]  ;;  %v1697_v56 = vld [vmem:[#allocation2 + $0x818] sm:$0xff]  ;;  %14240 = vst [vmem:[#allocation164_spill] sm:$0xff] %v11256_v0  ;;  %v1696_v50 = vld [vmem:[#allocation2 + $0x810] sm:$0xff] }
 0x21f   : > { %v1714_v24 = vld [vmem:[#allocation2 + $0x8a0] sm:$0xff]  ;;  %14247 = vst [vmem:[#allocation171_spill] sm:$0xff] %v11278_v51 }
 0x220   : > { %14237 = vst [vmem:[#allocation161_spill] sm:$0xff] %v11248_v5  ;;  %14238 = vst [vmem:[#allocation162_spill] sm:$0xff] %v11250_v37  ;;  %v11268_v39 = vpack.c.bf16 %v1714_v24, %v1696_v50  ;;  %v1766_v50 = vld [vmem:[#allocation2 + $0xa40] sm:$0xff]  ;;  %v1784_v24 = vld [vmem:[#allocation2 + $0xad0] sm:$0xff] }
 0x221   : > { %7602 = vmatpush1.bf16.msra.mxu0 %v11230_v53  ;;  %7666 = vmatpush1.bf16.msra.mxu1 %v11232_v6  ;;  %v1713_v53 = vld [vmem:[#allocation2 + $0x898] sm:$0xff]  ;;  %v1715_v6 = vld [vmem:[#allocation2 + $0x8a8] sm:$0xff]  ;;  %v11290_v38 = vpack.c.bf16 %v1784_v24, %v1766_v50 }
 0x222   : > { %7604 = vmatprep.subr.bf16.mxu0 %v11236_v20  ;;  %7668 = vmatprep.subr.bf16.mxu1 %v11238_v40  ;;  %v11260_v27 = vpack.c.bf16 %v1713_v53, %v1695_v9  ;;  %v11262_v1 = vpack.c.bf16 %v1715_v6, %v1697_v56  ;;  %v1731_v40 = vld [vmem:[#allocation2 + $0x928] sm:$0xff]  ;;  %v1733_v20 = vld [vmem:[#allocation2 + $0x938] sm:$0xff]  ;;  %14244 = vst [vmem:[#allocation168_spill] sm:$0xff] %v11268_v39  ;;  %v1732_v53 = vld [vmem:[#allocation2 + $0x930] sm:$0xff] }
 0x223   : > { %v1750_v6 = vld [vmem:[#allocation2 + $0x9c0] sm:$0xff]  ;;  %14251 = vst [vmem:[#allocation175_spill] sm:$0xff] %v11290_v38 }
 0x224   : > { %14241 = vst [vmem:[#allocation165_spill] sm:$0xff] %v11260_v27  ;;  %14242 = vst [vmem:[#allocation166_spill] sm:$0xff] %v11262_v1  ;;  %v11280_v28 = vpack.c.bf16 %v1750_v6, %v1732_v53  ;;  %v1802_v53 = vld [vmem:[#allocation2 + $0xb60] sm:$0xff]  ;;  %v1820_v6 = vld [vmem:[#allocation2 + $0xbf0] sm:$0xff] }
 0x225   : > { %7606 = vmatpush1.bf16.msra.mxu0 %v11242_v58  ;;  %7670 = vmatpush1.bf16.msra.mxu1 %v11244_v10  ;;  %v1749_v58 = vld [vmem:[#allocation2 + $0x9b8] sm:$0xff]  ;;  %v1751_v10 = vld [vmem:[#allocation2 + $0x9c8] sm:$0xff]  ;;  %v11302_v50 = vpack.c.bf16 %v1820_v6, %v1802_v53 }
 0x226   : > { %7608 = vmatprep.subr.bf16.mxu0 %v11248_v5  ;;  %7672 = vmatprep.subr.bf16.mxu1 %v11250_v37  ;;  %v11272_v56 = vpack.c.bf16 %v1749_v58, %v1731_v40  ;;  %v11274_v9 = vpack.c.bf16 %v1751_v10, %v1733_v20  ;;  %v1767_v37 = vld [vmem:[#allocation2 + $0xa48] sm:$0xff]  ;;  %v1769_v5 = vld [vmem:[#allocation2 + $0xa58] sm:$0xff]  ;;  %14248 = vst [vmem:[#allocation172_spill] sm:$0xff] %v11280_v28  ;;  %v1768_v58 = vld [vmem:[#allocation2 + $0xa50] sm:$0xff] }
 0x227   : > { %v1786_v10 = vld [vmem:[#allocation2 + $0xae0] sm:$0xff]  ;;  %14255 = vst [vmem:[#allocation179_spill] sm:$0xff] %v11302_v50 }
 0x228   : > { %14245 = vst [vmem:[#allocation169_spill] sm:$0xff] %v11272_v56  ;;  %14246 = vst [vmem:[#allocation170_spill] sm:$0xff] %v11274_v9  ;;  %v11292_v44 = vpack.c.bf16 %v1786_v10, %v1768_v58  ;;  %v1838_v58 = vld [vmem:[#allocation2 + $0xc80] sm:$0xff]  ;;  %v1856_v10 = vld [vmem:[#allocation2 + $0xd10] sm:$0xff] }
 0x229   : > { %7610 = vmatpush1.bf16.msra.mxu0 %v11254_v21  ;;  %7674 = vmatpush1.bf16.msra.mxu1 %v11256_v0  ;;  %v1785_v21 = vld [vmem:[#allocation2 + $0xad8] sm:$0xff]  ;;  %v1787_v0 = vld [vmem:[#allocation2 + $0xae8] sm:$0xff]  ;;  %v11314_v53 = vpack.c.bf16 %v1856_v10, %v1838_v58 }
 0x22a   : > { %7612 = vmatprep.subr.bf16.mxu0 %v11260_v27  ;;  %7676 = vmatprep.subr.bf16.mxu1 %v11262_v1  ;;  %v11284_v20 = vpack.c.bf16 %v1785_v21, %v1767_v37  ;;  %v11286_v40 = vpack.c.bf16 %v1787_v0, %v1769_v5  ;;  %v1803_v1 = vld [vmem:[#allocation2 + $0xb68] sm:$0xff]  ;;  %v1805_v27 = vld [vmem:[#allocation2 + $0xb78] sm:$0xff]  ;;  %14252 = vst [vmem:[#allocation176_spill] sm:$0xff] %v11292_v44  ;;  %v1804_v21 = vld [vmem:[#allocation2 + $0xb70] sm:$0xff] }
 0x22b   : > { %v1822_v0 = vld [vmem:[#allocation2 + $0xc00] sm:$0xff]  ;;  %14259 = vst [vmem:[#allocation183_spill] sm:$0xff] %v11314_v53 }
 0x22c   : > { %14249 = vst [vmem:[#allocation173_spill] sm:$0xff] %v11284_v20  ;;  %14250 = vst [vmem:[#allocation174_spill] sm:$0xff] %v11286_v40  ;;  %v11304_v24 = vpack.c.bf16 %v1822_v0, %v1804_v21  ;;  %v1874_v21 = vld [vmem:[#allocation2 + $0xda0] sm:$0xff]  ;;  %v1892_v0 = vld [vmem:[#allocation2 + $0xe30] sm:$0xff] }
 0x22d   : > { %7614 = vmatpush1.bf16.msra.mxu0 %v11266_v45  ;;  %7678 = vmatpush1.bf16.msra.mxu1 %v11268_v39  ;;  %v1821_v45 = vld [vmem:[#allocation2 + $0xbf8] sm:$0xff]  ;;  %v1823_v39 = vld [vmem:[#allocation2 + $0xc08] sm:$0xff]  ;;  %v11326_v58 = vpack.c.bf16 %v1892_v0, %v1874_v21 }
 0x22e   : > { %7616 = vmatprep.subr.bf16.mxu0 %v11272_v56  ;;  %7680 = vmatprep.subr.bf16.mxu1 %v11274_v9  ;;  %v11296_v5 = vpack.c.bf16 %v1821_v45, %v1803_v1  ;;  %v11298_v37 = vpack.c.bf16 %v1823_v39, %v1805_v27  ;;  %v1839_v9 = vld [vmem:[#allocation2 + $0xc88] sm:$0xff]  ;;  %v1841_v56 = vld [vmem:[#allocation2 + $0xc98] sm:$0xff]  ;;  %14256 = vst [vmem:[#allocation180_spill] sm:$0xff] %v11304_v24  ;;  %v1840_v45 = vld [vmem:[#allocation2 + $0xc90] sm:$0xff] }
 0x22f   : > { %v1858_v39 = vld [vmem:[#allocation2 + $0xd20] sm:$0xff]  ;;  %14263 = vst [vmem:[#allocation187_spill] sm:$0xff] %v11326_v58 }
 0x230   : > { %14253 = vst [vmem:[#allocation177_spill] sm:$0xff] %v11296_v5  ;;  %14254 = vst [vmem:[#allocation178_spill] sm:$0xff] %v11298_v37  ;;  %v11316_v6 = vpack.c.bf16 %v1858_v39, %v1840_v45  ;;  %v1910_v45 = vld [vmem:[#allocation2 + $0xec0] sm:$0xff]  ;;  %v1928_v39 = vld [vmem:[#allocation2 + $0xf50] sm:$0xff] }
 0x231   : > { %7618 = vmatpush1.bf16.msra.mxu0 %v11278_v51  ;;  %7682 = vmatpush1.bf16.msra.mxu1 %v11280_v28  ;;  %v1857_v51 = vld [vmem:[#allocation2 + $0xd18] sm:$0xff]  ;;  %v1859_v28 = vld [vmem:[#allocation2 + $0xd28] sm:$0xff]  ;;  %v11338_v21 = vpack.c.bf16 %v1928_v39, %v1910_v45 }
 0x232   : > { %7620 = vmatprep.subr.bf16.mxu0 %v11284_v20  ;;  %7684 = vmatprep.subr.bf16.mxu1 %v11286_v40  ;;  %v11308_v27 = vpack.c.bf16 %v1857_v51, %v1839_v9  ;;  %v11310_v1 = vpack.c.bf16 %v1859_v28, %v1841_v56  ;;  %v1875_v40 = vld [vmem:[#allocation2 + $0xda8] sm:$0xff]  ;;  %v1877_v20 = vld [vmem:[#allocation2 + $0xdb8] sm:$0xff]  ;;  %14260 = vst [vmem:[#allocation184_spill] sm:$0xff] %v11316_v6  ;;  %v1876_v51 = vld [vmem:[#allocation2 + $0xdb0] sm:$0xff] }
 0x233   : > { %v1894_v28 = vld [vmem:[#allocation2 + $0xe40] sm:$0xff]  ;;  %14267 = vst [vmem:[#allocation191_spill] sm:$0xff] %v11338_v21 }
 0x234   : > { %14257 = vst [vmem:[#allocation181_spill] sm:$0xff] %v11308_v27  ;;  %14258 = vst [vmem:[#allocation182_spill] sm:$0xff] %v11310_v1  ;;  %v11328_v10 = vpack.c.bf16 %v1894_v28, %v1876_v51  ;;  %v1946_v51 = vld [vmem:[#allocation2 + $0xfe0] sm:$0xff]  ;;  %v1964_v28 = vld [vmem:[#allocation2 + $0x1070] sm:$0xff] }
 0x235   : > { %7622 = vmatpush1.bf16.msra.mxu0 %v11290_v38  ;;  %7686 = vmatpush1.bf16.msra.mxu1 %v11292_v44  ;;  %v1893_v38 = vld [vmem:[#allocation2 + $0xe38] sm:$0xff]  ;;  %v1895_v44 = vld [vmem:[#allocation2 + $0xe48] sm:$0xff]  ;;  %v11350_v45 = vpack.c.bf16 %v1964_v28, %v1946_v51 }
 0x236   : > { %7624 = vmatprep.subr.bf16.mxu0 %v11296_v5  ;;  %7688 = vmatprep.subr.bf16.mxu1 %v11298_v37  ;;  %v11320_v56 = vpack.c.bf16 %v1893_v38, %v1875_v40  ;;  %v11322_v9 = vpack.c.bf16 %v1895_v44, %v1877_v20  ;;  %v1911_v37 = vld [vmem:[#allocation2 + $0xec8] sm:$0xff]  ;;  %v1913_v5 = vld [vmem:[#allocation2 + $0xed8] sm:$0xff]  ;;  %14264 = vst [vmem:[#allocation188_spill] sm:$0xff] %v11328_v10  ;;  %v1912_v38 = vld [vmem:[#allocation2 + $0xed0] sm:$0xff] }
 0x237   : > { %v1930_v44 = vld [vmem:[#allocation2 + $0xf60] sm:$0xff]  ;;  %14271 = vst [vmem:[#allocation195_spill] sm:$0xff] %v11350_v45 }
 0x238   : > { %14261 = vst [vmem:[#allocation185_spill] sm:$0xff] %v11320_v56  ;;  %14262 = vst [vmem:[#allocation186_spill] sm:$0xff] %v11322_v9  ;;  %v11340_v0 = vpack.c.bf16 %v1930_v44, %v1912_v38  ;;  %v1982_v38 = vld [vmem:[#allocation2 + $0x1100] sm:$0xff]  ;;  %v2000_v44 = vld [vmem:[#allocation2 + $0x1190] sm:$0xff] }
 0x239   : > { %7626 = vmatpush1.bf16.msra.mxu0 %v11302_v50  ;;  %7690 = vmatpush1.bf16.msra.mxu1 %v11304_v24  ;;  %v1929_v50 = vld [vmem:[#allocation2 + $0xf58] sm:$0xff]  ;;  %v1931_v24 = vld [vmem:[#allocation2 + $0xf68] sm:$0xff]  ;;  %v11362_v51 = vpack.c.bf16 %v2000_v44, %v1982_v38 }
 0x23a   : > { %7628 = vmatprep.subr.bf16.mxu0 %v11308_v27  ;;  %7692 = vmatprep.subr.bf16.mxu1 %v11310_v1  ;;  %v11332_v20 = vpack.c.bf16 %v1929_v50, %v1911_v37  ;;  %v11334_v40 = vpack.c.bf16 %v1931_v24, %v1913_v5  ;;  %v1947_v1 = vld [vmem:[#allocation2 + $0xfe8] sm:$0xff]  ;;  %v1949_v27 = vld [vmem:[#allocation2 + $0xff8] sm:$0xff]  ;;  %14268 = vst [vmem:[#allocation192_spill] sm:$0xff] %v11340_v0  ;;  %v1948_v50 = vld [vmem:[#allocation2 + $0xff0] sm:$0xff] }
 0x23b   : > { %v1966_v24 = vld [vmem:[#allocation2 + $0x1080] sm:$0xff]  ;;  %14275 = vst [vmem:[#allocation199_spill] sm:$0xff] %v11362_v51 }
 0x23c   : > { %14265 = vst [vmem:[#allocation189_spill] sm:$0xff] %v11332_v20  ;;  %14266 = vst [vmem:[#allocation190_spill] sm:$0xff] %v11334_v40  ;;  %v11352_v39 = vpack.c.bf16 %v1966_v24, %v1948_v50  ;;  %v1448_v50 = vld [vmem:[#allocation2 + $0x50] sm:$0xff]  ;;  %v1466_v24 = vld [vmem:[#allocation2 + $0xe0] sm:$0xff] }
 0x23d   : > { %7630 = vmatpush1.bf16.msra.mxu0 %v11314_v53  ;;  %7694 = vmatpush1.bf16.msra.mxu1 %v11316_v6  ;;  %v1965_v53 = vld [vmem:[#allocation2 + $0x1078] sm:$0xff]  ;;  %v1967_v6 = vld [vmem:[#allocation2 + $0x1088] sm:$0xff] }
 0x23e   : > { %7632 = vmatprep.subr.bf16.mxu0 %v11320_v56  ;;  %7696 = vmatprep.subr.bf16.mxu1 %v11322_v9  ;;  %v11344_v5 = vpack.c.bf16 %v1965_v53, %v1947_v1  ;;  %v11346_v37 = vpack.c.bf16 %v1967_v6, %v1949_v27  ;;  %v1983_v9 = vld [vmem:[#allocation2 + $0x1108] sm:$0xff]  ;;  %v1985_v56 = vld [vmem:[#allocation2 + $0x1118] sm:$0xff]  ;;  %14272 = vst [vmem:[#allocation196_spill] sm:$0xff] %v11352_v39  ;;  %v1984_v53 = vld [vmem:[#allocation2 + $0x1110] sm:$0xff] }
 0x23f   : > { %v2002_v6 = vld [vmem:[#allocation2 + $0x11a0] sm:$0xff] }
 0x240   : > { %14269 = vst [vmem:[#allocation193_spill] sm:$0xff] %v11344_v5  ;;  %14270 = vst [vmem:[#allocation194_spill] sm:$0xff] %v11346_v37  ;;  %v11364_v28 = vpack.c.bf16 %v2002_v6, %v1984_v53  ;;  %v1502_v6 = vld [vmem:[#allocation2 + $0x200] sm:$0xff] }
 0x241   : > { %7634 = vmatpush1.bf16.msra.mxu0 %v11326_v58  ;;  %7698 = vmatpush1.bf16.msra.mxu1 %v11328_v10  ;;  %v2001_v58 = vld [vmem:[#allocation2 + $0x1198] sm:$0xff]  ;;  %v2003_v10 = vld [vmem:[#allocation2 + $0x11a8] sm:$0xff] }
 0x242   : > { %7636 = vmatprep.subr.bf16.mxu0 %v11332_v20  ;;  %7700 = vmatprep.subr.bf16.mxu1 %v11334_v40  ;;  %v11356_v27 = vpack.c.bf16 %v2001_v58, %v1983_v9  ;;  %v11358_v1 = vpack.c.bf16 %v2003_v10, %v1985_v56  ;;  %v1447_v40 = vld [vmem:[#allocation2 + $0x48] sm:$0xff]  ;;  %v1449_v20 = vld [vmem:[#allocation2 + $0x58] sm:$0xff]  ;;  %14276 = vst [vmem:[#allocation200_spill] sm:$0xff] %v11364_v28  ;;  %v1446_v58 = vld [vmem:[#allocation2 + $0x40] sm:$0xff] }
 0x243   : > { %v1464_v10 = vld [vmem:[#allocation2 + $0xd0] sm:$0xff] }
 0x244   : > { %14273 = vst [vmem:[#allocation197_spill] sm:$0xff] %v11356_v27  ;;  %14274 = vst [vmem:[#allocation198_spill] sm:$0xff] %v11358_v1  ;;  %v11374_v38 = vpack.c.bf16 %v1464_v10, %v1446_v58  ;;  %v1521_v58 = vld [vmem:[#allocation2 + $0x298] sm:$0xff]  ;;  %v1539_v10 = vld [vmem:[#allocation2 + $0x328] sm:$0xff] }
 0x245   : > { %7638 = vmatpush1.bf16.msra.mxu0 %v11338_v21  ;;  %7702 = vmatpush1.bf16.msra.mxu1 %v11340_v0  ;;  %v1465_v21 = vld [vmem:[#allocation2 + $0xd8] sm:$0xff]  ;;  %v1467_v0 = vld [vmem:[#allocation2 + $0xe8] sm:$0xff] }
 0x246   : > { %7640 = vmatprep.subr.bf16.mxu0 %v11344_v5  ;;  %7704 = vmatprep.subr.bf16.mxu1 %v11346_v37  ;;  %v11368_v56 = vpack.c.bf16 %v1465_v21, %v1447_v40  ;;  %v11370_v9 = vpack.c.bf16 %v1467_v0, %v1449_v20  ;;  %v1483_v37 = vld [vmem:[#allocation2 + $0x168] sm:$0xff]  ;;  %v1485_v5 = vld [vmem:[#allocation2 + $0x178] sm:$0xff]  ;;  %14279 = vst [vmem:[#allocation203_spill] sm:$0xff] %v11374_v38  ;;  %v1482_v40 = vld [vmem:[#allocation2 + $0x160] sm:$0xff] }
 0x247   : > { %v11378_v20 = vpack.c.bf16 %v1466_v24, %v1448_v50  ;;  %v1500_v21 = vld [vmem:[#allocation2 + $0x1f0] sm:$0xff] }
 0x248   : > { %14277 = vst [vmem:[#allocation201_spill] sm:$0xff] %v11368_v56  ;;  %14278 = vst [vmem:[#allocation202_spill] sm:$0xff] %v11370_v9  ;;  %v1484_v0 = vld [vmem:[#allocation2 + $0x170] sm:$0xff]  ;;  %v11388_v50 = vpack.c.bf16 %v1500_v21, %v1482_v40  ;;  %v1555_v40 = vld [vmem:[#allocation2 + $0x3a8] sm:$0xff] }
 0x249   : > { %7642 = vmatpush1.bf16.msra.mxu0 %v11350_v45  ;;  %7706 = vmatpush1.bf16.msra.mxu1 %v11352_v39  ;;  %v1501_v45 = vld [vmem:[#allocation2 + $0x1f8] sm:$0xff]  ;;  %v1503_v39 = vld [vmem:[#allocation2 + $0x208] sm:$0xff]  ;;  %14280 = vst [vmem:[#allocation204_spill] sm:$0xff] %v11378_v20  ;;  %v1520_v24 = vld [vmem:[#allocation2 + $0x290] sm:$0xff] }
 0x24a   : > { %7644 = vmatprep.subr.bf16.mxu0 %v11356_v27  ;;  %7708 = vmatprep.subr.bf16.mxu1 %v11358_v1  ;;  %v11380_v44 = vpack.c.bf16 %v1501_v45, %v1483_v37  ;;  %v11382_v53 = vpack.c.bf16 %v1503_v39, %v1485_v5  ;;  %v1519_v1 = vld [vmem:[#allocation2 + $0x288] sm:$0xff]  ;;  %14283 = vst [vmem:[#allocation207_spill] sm:$0xff] %v11388_v50  ;;  %v1518_v45 = vld [vmem:[#allocation2 + $0x280] sm:$0xff]  ;;  %v1536_v39 = vld [vmem:[#allocation2 + $0x310] sm:$0xff] }
 0x24b   : > { %v11392_v5 = vpack.c.bf16 %v1502_v6, %v1484_v0  ;;  %v1573_v21 = vld [vmem:[#allocation2 + $0x438] sm:$0xff]  ;;  %v11401_v0 = vpack.c.bf16 %v1536_v39, %v1518_v45  ;;  %v1554_v6 = vld [vmem:[#allocation2 + $0x3a0] sm:$0xff]  ;;  %v1611_v39 = vld [vmem:[#allocation2 + $0x568] sm:$0xff] }
 0x24c   : > { %14281 = vst [vmem:[#allocation205_spill] sm:$0xff] %v11380_v44  ;;  %14282 = vst [vmem:[#allocation206_spill] sm:$0xff] %v11382_v53  ;;  %v1593_v45 = vld [vmem:[#allocation2 + $0x4d8] sm:$0xff] }
 0x24d   : > { %7646 = vmatpush1.bf16.msra.mxu0 %v11362_v51  ;;  %7710 = vmatpush1.bf16.msra.mxu1 %v11364_v28  ;;  %v1537_v51 = vld [vmem:[#allocation2 + $0x318] sm:$0xff]  ;;  %14284 = vst [vmem:[#allocation208_spill] sm:$0xff] %v11392_v5  ;;  %14287 = vst [vmem:[#allocation211_spill] sm:$0xff] %v11401_v0  ;;  %v1591_v28 = vld [vmem:[#allocation2 + $0x4c8] sm:$0xff] }
 0x24e   : > { %7712 = vmatprep.subr.bf16.mxu0 %v11368_v56  ;;  %7776 = vmatprep.subr.bf16.mxu1 %v11370_v9  ;;  %v11394_v37 = vpack.c.bf16 %v1537_v51, %v1519_v1  ;;  %v1538_v9 = vld [vmem:[#allocation2 + $0x320] sm:$0xff]  ;;  %v1557_v56 = vld [vmem:[#allocation2 + $0x3b8] sm:$0xff]  ;;  %v11407_v51 = vpack.c.bf16 %v1573_v21, %v1555_v40  ;;  %v11422_v21 = vpack.c.bf16 %v1611_v39, %v1593_v45  ;;  %v1628_v45 = vld [vmem:[#allocation2 + $0x5f0] sm:$0xff] }
 0x24f   : > { %v11405_v1 = vpack.c.bf16 %v1538_v9, %v1520_v24  ;;  %v1590_v40 = vld [vmem:[#allocation2 + $0x4c0] sm:$0xff]  ;;  %v1509_v27 = vld [vmem:[#allocation2 + $0x238] sm:$0xff] }
 0x250   : > { %2781 = vmatmul.mubr.f32.vlgmr.msra.gmra.mrb[2].mxu0 %v11174_v2  ;;  %2852 = vmatmul.mubr.f32.vlgmr.msra.gmra.mrb[2].mxu1 %v11174_v2  ;;  %14285 = vst [vmem:[#allocation209_spill] sm:$0xff] %v11394_v37  ;;  %14289 = vst [vmem:[#allocation213_spill] sm:$0xff] %v11407_v51 }
 0x251   : > { %7714 = vmatpush1.bf16.msra.mxu0 %v11374_v38  ;;  %2922 = vmatprep.mubr.f32.mxu0 %v11176_v57  ;;  %v11398_v38 = vpack.c.bf16 %v1539_v10, %v1521_v58  ;;  %14288 = vst [vmem:[#allocation212_spill] sm:$0xff] %v11405_v1  ;;  %v1572_v58 = vld [vmem:[#allocation2 + $0x430] sm:$0xff]  ;;  %14294 = vst [vmem:[#allocation218_spill] sm:$0xff] %v11422_v21 }
 0x252   : > { %7778 = vmatpush1.bf16.msra.mxu1 %v11378_v20  ;;  %2993 = vmatprep.mubr.f32.mxu1 %v11176_v57  ;;  %v1575_v20 = vld [vmem:[#allocation2 + $0x448] sm:$0xff]  ;;  %v1556_v10 = vld [vmem:[#allocation2 + $0x3b0] sm:$0xff] }
 0x253   : > { %7716 = vmatprep.subr.bf16.mxu0 %v11380_v44  ;;  %7780 = vmatprep.subr.bf16.mxu1 %v11382_v53  ;;  %14286 = vst [vmem:[#allocation210_spill] sm:$0xff] %v11398_v38  ;;  %v11410_v53 = vpack.c.bf16 %v1575_v20, %v1557_v56  ;;  %v1574_v44 = vld [vmem:[#allocation2 + $0x440] sm:$0xff]  ;;  %v1608_v56 = vld [vmem:[#allocation2 + $0x550] sm:$0xff] }
 0x254   : > { %v11417_v9 = vpack.c.bf16 %v1574_v44, %v1556_v10  ;;  %v1592_v20 = vld [vmem:[#allocation2 + $0x4d0] sm:$0xff] }
 0x255   : > { %7718 = vmatpush1.bf16.msra.mxu0 %v11388_v50  ;;  %14290 = vst [vmem:[#allocation214_spill] sm:$0xff] %v11410_v53  ;;  %v1609_v50 = vld [vmem:[#allocation2 + $0x558] sm:$0xff]  ;;  %v1644_v10 = vld [vmem:[#allocation2 + $0x670] sm:$0xff] }
 0x256   : > { %7782 = vmatpush1.bf16.msra.mxu1 %v11392_v5  ;;  %7720 = vmatprep.subr.bf16.mxu0 %v11394_v37  ;;  %v11413_v5 = vpack.c.bf16 %v1572_v58, %v1554_v6  ;;  %14292 = vst [vmem:[#allocation216_spill] sm:$0xff] %v11417_v9  ;;  %v11419_v24 = vpack.c.bf16 %v1609_v50, %v1591_v28  ;;  %v1627_v37 = vld [vmem:[#allocation2 + $0x5e8] sm:$0xff]  ;;  %v1629_v6 = vld [vmem:[#allocation2 + $0x5f8] sm:$0xff]  ;;  %v1626_v50 = vld [vmem:[#allocation2 + $0x5e0] sm:$0xff] }
 0x257   : > { %7784 = vmatprep.subr.bf16.mxu1 %v11398_v38  ;;  %v1610_v38 = vld [vmem:[#allocation2 + $0x560] sm:$0xff]  ;;  %v1647_v58 = vld [vmem:[#allocation2 + $0x688] sm:$0xff] }
 0x258   : > { %14291 = vst [vmem:[#allocation215_spill] sm:$0xff] %v11413_v5  ;;  %14293 = vst [vmem:[#allocation217_spill] sm:$0xff] %v11419_v24  ;;  %v11429_v28 = vpack.c.bf16 %v1610_v38, %v1592_v20  ;;  %v11434_v39 = vpack.c.bf16 %v1647_v58, %v1629_v6  ;;  %v1680_v20 = vld [vmem:[#allocation2 + $0x790] sm:$0xff] }
 0x259   : > { %7722 = vmatpush1.bf16.msra.mxu0 %v11401_v0  ;;  %v1645_v0 = vld [vmem:[#allocation2 + $0x678] sm:$0xff]  ;;  %v1664_v6 = vld [vmem:[#allocation2 + $0x710] sm:$0xff] }
 0x25a   : > { %7786 = vmatpush1.bf16.msra.mxu1 %v11405_v1  ;;  %7724 = vmatprep.subr.bf16.mxu0 %v11407_v51  ;;  %v11425_v1 = vpack.c.bf16 %v1608_v56, %v1590_v40  ;;  %14296 = vst [vmem:[#allocation220_spill] sm:$0xff] %v11429_v28  ;;  %v11431_v44 = vpack.c.bf16 %v1645_v0, %v1627_v37  ;;  %14298 = vst [vmem:[#allocation222_spill] sm:$0xff] %v11434_v39  ;;  %v1663_v51 = vld [vmem:[#allocation2 + $0x708] sm:$0xff]  ;;  %v1665_v40 = vld [vmem:[#allocation2 + $0x718] sm:$0xff] }
 0x25b   : > { %7788 = vmatprep.subr.bf16.mxu1 %v11410_v53  ;;  %v1646_v53 = vld [vmem:[#allocation2 + $0x680] sm:$0xff]  ;;  %v1683_v56 = vld [vmem:[#allocation2 + $0x7a8] sm:$0xff] }
 0x25c   : > { %14295 = vst [vmem:[#allocation219_spill] sm:$0xff] %v11425_v1  ;;  %14297 = vst [vmem:[#allocation221_spill] sm:$0xff] %v11431_v44  ;;  %v11441_v38 = vpack.c.bf16 %v1646_v53, %v1628_v45  ;;  %v1662_v0 = vld [vmem:[#allocation2 + $0x700] sm:$0xff]  ;;  %v11446_v58 = vpack.c.bf16 %v1683_v56, %v1665_v40  ;;  %v1716_v45 = vld [vmem:[#allocation2 + $0x8b0] sm:$0xff] }
 0x25d   : > { %7726 = vmatpush1.bf16.msra.mxu0 %v11413_v5  ;;  %v1681_v5 = vld [vmem:[#allocation2 + $0x798] sm:$0xff]  ;;  %v1700_v40 = vld [vmem:[#allocation2 + $0x830] sm:$0xff] }
 0x25e   : > { %7790 = vmatpush1.bf16.msra.mxu1 %v11417_v9  ;;  %7728 = vmatprep.subr.bf16.mxu0 %v11419_v24  ;;  %v11437_v9 = vpack.c.bf16 %v1644_v10, %v1626_v50  ;;  %14300 = vst [vmem:[#allocation224_spill] sm:$0xff] %v11441_v38  ;;  %v11443_v37 = vpack.c.bf16 %v1681_v5, %v1663_v51  ;;  %14302 = vst [vmem:[#allocation226_spill] sm:$0xff] %v11446_v58  ;;  %v1699_v24 = vld [vmem:[#allocation2 + $0x828] sm:$0xff]  ;;  %v1701_v50 = vld [vmem:[#allocation2 + $0x838] sm:$0xff] }
 0x25f   : > { %7792 = vmatprep.subr.bf16.mxu1 %v11422_v21  ;;  %v1682_v21 = vld [vmem:[#allocation2 + $0x7a0] sm:$0xff]  ;;  %v1719_v10 = vld [vmem:[#allocation2 + $0x8c8] sm:$0xff] }
 0x260   : > { %14299 = vst [vmem:[#allocation223_spill] sm:$0xff] %v11437_v9  ;;  %14301 = vst [vmem:[#allocation225_spill] sm:$0xff] %v11443_v37  ;;  %v11453_v53 = vpack.c.bf16 %v1682_v21, %v1664_v6  ;;  %v1698_v51 = vld [vmem:[#allocation2 + $0x820] sm:$0xff]  ;;  %v11458_v56 = vpack.c.bf16 %v1719_v10, %v1701_v50  ;;  %v1752_v6 = vld [vmem:[#allocation2 + $0x9d0] sm:$0xff] }
 0x261   : > { %7730 = vmatpush1.bf16.msra.mxu0 %v11425_v1  ;;  %v1717_v1 = vld [vmem:[#allocation2 + $0x8b8] sm:$0xff]  ;;  %v1734_v21 = vld [vmem:[#allocation2 + $0x940] sm:$0xff]  ;;  %v1736_v50 = vld [vmem:[#allocation2 + $0x950] sm:$0xff] }
 0x262   : > { %7794 = vmatpush1.bf16.msra.mxu1 %v11429_v28  ;;  %7732 = vmatprep.subr.bf16.mxu0 %v11431_v44  ;;  %v11449_v28 = vpack.c.bf16 %v1680_v20, %v1662_v0  ;;  %14304 = vst [vmem:[#allocation228_spill] sm:$0xff] %v11453_v53  ;;  %v11455_v5 = vpack.c.bf16 %v1717_v1, %v1699_v24  ;;  %14306 = vst [vmem:[#allocation230_spill] sm:$0xff] %v11458_v56  ;;  %v1735_v44 = vld [vmem:[#allocation2 + $0x948] sm:$0xff]  ;;  %v1737_v0 = vld [vmem:[#allocation2 + $0x958] sm:$0xff] }
 0x263   : > { %7796 = vmatprep.subr.bf16.mxu1 %v11434_v39  ;;  %v1718_v39 = vld [vmem:[#allocation2 + $0x8c0] sm:$0xff]  ;;  %v1755_v20 = vld [vmem:[#allocation2 + $0x9e8] sm:$0xff] }
 0x264   : > { %14303 = vst [vmem:[#allocation227_spill] sm:$0xff] %v11449_v28  ;;  %14305 = vst [vmem:[#allocation229_spill] sm:$0xff] %v11455_v5  ;;  %v11465_v1 = vpack.c.bf16 %v1718_v39, %v1700_v40  ;;  %v11470_v10 = vpack.c.bf16 %v1755_v20, %v1737_v0  ;;  %v1770_v39 = vld [vmem:[#allocation2 + $0xa60] sm:$0xff]  ;;  %v1788_v40 = vld [vmem:[#allocation2 + $0xaf0] sm:$0xff] }
 0x265   : > { %7734 = vmatpush1.bf16.msra.mxu0 %v11437_v9  ;;  %v1753_v9 = vld [vmem:[#allocation2 + $0x9d8] sm:$0xff]  ;;  %v1772_v0 = vld [vmem:[#allocation2 + $0xa70] sm:$0xff] }
 0x266   : > { %7798 = vmatpush1.bf16.msra.mxu1 %v11441_v38  ;;  %7736 = vmatprep.subr.bf16.mxu0 %v11443_v37  ;;  %v11461_v38 = vpack.c.bf16 %v1716_v45, %v1698_v51  ;;  %14308 = vst [vmem:[#allocation232_spill] sm:$0xff] %v11465_v1  ;;  %v11467_v24 = vpack.c.bf16 %v1753_v9, %v1735_v44  ;;  %14310 = vst [vmem:[#allocation234_spill] sm:$0xff] %v11470_v10  ;;  %v1771_v37 = vld [vmem:[#allocation2 + $0xa68] sm:$0xff]  ;;  %v1773_v51 = vld [vmem:[#allocation2 + $0xa78] sm:$0xff] }
 0x267   : > { %7800 = vmatprep.subr.bf16.mxu1 %v11446_v58  ;;  %v1754_v58 = vld [vmem:[#allocation2 + $0x9e0] sm:$0xff]  ;;  %v1791_v45 = vld [vmem:[#allocation2 + $0xb08] sm:$0xff] }
 0x268   : > { %14307 = vst [vmem:[#allocation231_spill] sm:$0xff] %v11461_v38  ;;  %14309 = vst [vmem:[#allocation233_spill] sm:$0xff] %v11467_v24  ;;  %v11477_v9 = vpack.c.bf16 %v1754_v58, %v1736_v50  ;;  %v11482_v20 = vpack.c.bf16 %v1791_v45, %v1773_v51  ;;  %v1806_v58 = vld [vmem:[#allocation2 + $0xb80] sm:$0xff]  ;;  %v1824_v50 = vld [vmem:[#allocation2 + $0xc10] sm:$0xff] }
 0x269   : > { %7738 = vmatpush1.bf16.msra.mxu0 %v11449_v28  ;;  %v1789_v28 = vld [vmem:[#allocation2 + $0xaf8] sm:$0xff]  ;;  %v1808_v51 = vld [vmem:[#allocation2 + $0xb90] sm:$0xff] }
 0x26a   : > { %7802 = vmatpush1.bf16.msra.mxu1 %v11453_v53  ;;  %7740 = vmatprep.subr.bf16.mxu0 %v11455_v5  ;;  %v11473_v53 = vpack.c.bf16 %v1752_v6, %v1734_v21  ;;  %14312 = vst [vmem:[#allocation236_spill] sm:$0xff] %v11477_v9  ;;  %v11479_v44 = vpack.c.bf16 %v1789_v28, %v1771_v37  ;;  %14314 = vst [vmem:[#allocation238_spill] sm:$0xff] %v11482_v20  ;;  %v1807_v5 = vld [vmem:[#allocation2 + $0xb88] sm:$0xff]  ;;  %v1809_v21 = vld [vmem:[#allocation2 + $0xb98] sm:$0xff] }
 0x26b   : > { %7804 = vmatprep.subr.bf16.mxu1 %v11458_v56  ;;  %v1790_v56 = vld [vmem:[#allocation2 + $0xb00] sm:$0xff]  ;;  %v1827_v6 = vld [vmem:[#allocation2 + $0xc28] sm:$0xff] }
 0x26c   : > { %14311 = vst [vmem:[#allocation235_spill] sm:$0xff] %v11473_v53  ;;  %14313 = vst [vmem:[#allocation237_spill] sm:$0xff] %v11479_v44  ;;  %v11489_v28 = vpack.c.bf16 %v1790_v56, %v1772_v0  ;;  %v11494_v45 = vpack.c.bf16 %v1827_v6, %v1809_v21  ;;  %v1842_v56 = vld [vmem:[#allocation2 + $0xca0] sm:$0xff]  ;;  %v1860_v0 = vld [vmem:[#allocation2 + $0xd30] sm:$0xff] }
 0x26d   : > { %7742 = vmatpush1.bf16.msra.mxu0 %v11461_v38  ;;  %v1825_v38 = vld [vmem:[#allocation2 + $0xc18] sm:$0xff]  ;;  %v1844_v21 = vld [vmem:[#allocation2 + $0xcb0] sm:$0xff] }
 0x26e   : > { %7806 = vmatpush1.bf16.msra.mxu1 %v11465_v1  ;;  %7744 = vmatprep.subr.bf16.mxu0 %v11467_v24  ;;  %v11485_v1 = vpack.c.bf16 %v1788_v40, %v1770_v39  ;;  %14316 = vst [vmem:[#allocation240_spill] sm:$0xff] %v11489_v28  ;;  %v11491_v37 = vpack.c.bf16 %v1825_v38, %v1807_v5  ;;  %14318 = vst [vmem:[#allocation242_spill] sm:$0xff] %v11494_v45  ;;  %v1843_v24 = vld [vmem:[#allocation2 + $0xca8] sm:$0xff]  ;;  %v1845_v39 = vld [vmem:[#allocation2 + $0xcb8] sm:$0xff] }
 0x26f   : > { %7808 = vmatprep.subr.bf16.mxu1 %v11470_v10  ;;  %v1826_v10 = vld [vmem:[#allocation2 + $0xc20] sm:$0xff]  ;;  %v1863_v40 = vld [vmem:[#allocation2 + $0xd48] sm:$0xff] }
 0x270   : > { %14315 = vst [vmem:[#allocation239_spill] sm:$0xff] %v11485_v1  ;;  %14317 = vst [vmem:[#allocation241_spill] sm:$0xff] %v11491_v37  ;;  %v11501_v38 = vpack.c.bf16 %v1826_v10, %v1808_v51  ;;  %v11506_v6 = vpack.c.bf16 %v1863_v40, %v1845_v39  ;;  %v1878_v10 = vld [vmem:[#allocation2 + $0xdc0] sm:$0xff]  ;;  %v1896_v51 = vld [vmem:[#allocation2 + $0xe50] sm:$0xff] }
 0x271   : > { %7746 = vmatpush1.bf16.msra.mxu0 %v11473_v53  ;;  %v1861_v53 = vld [vmem:[#allocation2 + $0xd38] sm:$0xff]  ;;  %v1880_v39 = vld [vmem:[#allocation2 + $0xdd0] sm:$0xff] }
 0x272   : > { %7810 = vmatpush1.bf16.msra.mxu1 %v11477_v9  ;;  %7748 = vmatprep.subr.bf16.mxu0 %v11479_v44  ;;  %v11497_v9 = vpack.c.bf16 %v1824_v50, %v1806_v58  ;;  %14320 = vst [vmem:[#allocation244_spill] sm:$0xff] %v11501_v38  ;;  %v11503_v5 = vpack.c.bf16 %v1861_v53, %v1843_v24  ;;  %14322 = vst [vmem:[#allocation246_spill] sm:$0xff] %v11506_v6  ;;  %v1879_v44 = vld [vmem:[#allocation2 + $0xdc8] sm:$0xff]  ;;  %v1881_v58 = vld [vmem:[#allocation2 + $0xdd8] sm:$0xff] }
 0x273   : > { %7812 = vmatprep.subr.bf16.mxu1 %v11482_v20  ;;  %v1862_v20 = vld [vmem:[#allocation2 + $0xd40] sm:$0xff]  ;;  %v1899_v50 = vld [vmem:[#allocation2 + $0xe68] sm:$0xff] }
 0x274   : > { %14319 = vst [vmem:[#allocation243_spill] sm:$0xff] %v11497_v9  ;;  %14321 = vst [vmem:[#allocation245_spill] sm:$0xff] %v11503_v5  ;;  %v11513_v53 = vpack.c.bf16 %v1862_v20, %v1844_v21  ;;  %v11518_v40 = vpack.c.bf16 %v1899_v50, %v1881_v58  ;;  %v1914_v20 = vld [vmem:[#allocation2 + $0xee0] sm:$0xff]  ;;  %v1932_v21 = vld [vmem:[#allocation2 + $0xf70] sm:$0xff] }
 0x275   : > { %7750 = vmatpush1.bf16.msra.mxu0 %v11485_v1  ;;  %v1897_v1 = vld [vmem:[#allocation2 + $0xe58] sm:$0xff]  ;;  %v1916_v58 = vld [vmem:[#allocation2 + $0xef0] sm:$0xff] }
 0x276   : > { %7814 = vmatpush1.bf16.msra.mxu1 %v11489_v28  ;;  %7752 = vmatprep.subr.bf16.mxu0 %v11491_v37  ;;  %v11509_v28 = vpack.c.bf16 %v1860_v0, %v1842_v56  ;;  %14324 = vst [vmem:[#allocation248_spill] sm:$0xff] %v11513_v53  ;;  %v11515_v24 = vpack.c.bf16 %v1897_v1, %v1879_v44  ;;  %14326 = vst [vmem:[#allocation250_spill] sm:$0xff] %v11518_v40  ;;  %v1915_v37 = vld [vmem:[#allocation2 + $0xee8] sm:$0xff]  ;;  %v1917_v56 = vld [vmem:[#allocation2 + $0xef8] sm:$0xff] }
 0x277   : > { %7816 = vmatprep.subr.bf16.mxu1 %v11494_v45  ;;  %v1898_v45 = vld [vmem:[#allocation2 + $0xe60] sm:$0xff]  ;;  %v1935_v0 = vld [vmem:[#allocation2 + $0xf88] sm:$0xff] }
 0x278   : > { %14323 = vst [vmem:[#allocation247_spill] sm:$0xff] %v11509_v28  ;;  %14325 = vst [vmem:[#allocation249_spill] sm:$0xff] %v11515_v24  ;;  %v11525_v1 = vpack.c.bf16 %v1898_v45, %v1880_v39  ;;  %v11530_v50 = vpack.c.bf16 %v1935_v0, %v1917_v56  ;;  %v1950_v45 = vld [vmem:[#allocation2 + $0x1000] sm:$0xff]  ;;  %v1968_v39 = vld [vmem:[#allocation2 + $0x1090] sm:$0xff] }
 0x279   : > { %7754 = vmatpush1.bf16.msra.mxu0 %v11497_v9  ;;  %v1933_v9 = vld [vmem:[#allocation2 + $0xf78] sm:$0xff]  ;;  %v1952_v56 = vld [vmem:[#allocation2 + $0x1010] sm:$0xff] }
 0x27a   : > { %7818 = vmatpush1.bf16.msra.mxu1 %v11501_v38  ;;  %7756 = vmatprep.subr.bf16.mxu0 %v11503_v5  ;;  %v11521_v38 = vpack.c.bf16 %v1896_v51, %v1878_v10  ;;  %14328 = vst [vmem:[#allocation252_spill] sm:$0xff] %v11525_v1  ;;  %v11527_v44 = vpack.c.bf16 %v1933_v9, %v1915_v37  ;;  %14330 = vst [vmem:[#allocation254_spill] sm:$0xff] %v11530_v50  ;;  %v1951_v5 = vld [vmem:[#allocation2 + $0x1008] sm:$0xff]  ;;  %v1953_v10 = vld [vmem:[#allocation2 + $0x1018] sm:$0xff] }
 0x27b   : > { %7820 = vmatprep.subr.bf16.mxu1 %v11506_v6  ;;  %v1934_v6 = vld [vmem:[#allocation2 + $0xf80] sm:$0xff]  ;;  %v1971_v51 = vld [vmem:[#allocation2 + $0x10a8] sm:$0xff] }
 0x27c   : > { %14327 = vst [vmem:[#allocation251_spill] sm:$0xff] %v11521_v38  ;;  %14329 = vst [vmem:[#allocation253_spill] sm:$0xff] %v11527_v44  ;;  %v11537_v9 = vpack.c.bf16 %v1934_v6, %v1916_v58  ;;  %v11542_v0 = vpack.c.bf16 %v1971_v51, %v1953_v10  ;;  %v1986_v6 = vld [vmem:[#allocation2 + $0x1120] sm:$0xff]  ;;  %v2004_v58 = vld [vmem:[#allocation2 + $0x11b0] sm:$0xff] }
 0x27d   : > { %7758 = vmatpush1.bf16.msra.mxu0 %v11509_v28  ;;  %v1969_v28 = vld [vmem:[#allocation2 + $0x1098] sm:$0xff]  ;;  %v1988_v10 = vld [vmem:[#allocation2 + $0x1130] sm:$0xff] }
 0x27e   : > { %7822 = vmatpush1.bf16.msra.mxu1 %v11513_v53  ;;  %7760 = vmatprep.subr.bf16.mxu0 %v11515_v24  ;;  %v11533_v53 = vpack.c.bf16 %v1932_v21, %v1914_v20  ;;  %14332 = vst [vmem:[#allocation256_spill] sm:$0xff] %v11537_v9  ;;  %v11539_v37 = vpack.c.bf16 %v1969_v28, %v1951_v5  ;;  %14334 = vst [vmem:[#allocation258_spill] sm:$0xff] %v11542_v0  ;;  %v1987_v24 = vld [vmem:[#allocation2 + $0x1128] sm:$0xff]  ;;  %v1989_v20 = vld [vmem:[#allocation2 + $0x1138] sm:$0xff] }
 0x27f   : > { %7824 = vmatprep.subr.bf16.mxu1 %v11518_v40  ;;  %v1970_v40 = vld [vmem:[#allocation2 + $0x10a0] sm:$0xff]  ;;  %v2007_v21 = vld [vmem:[#allocation2 + $0x11c8] sm:$0xff] }
 0x280   : > { %14331 = vst [vmem:[#allocation255_spill] sm:$0xff] %v11533_v53  ;;  %14333 = vst [vmem:[#allocation257_spill] sm:$0xff] %v11539_v37  ;;  %v11549_v28 = vpack.c.bf16 %v1970_v40, %v1952_v56  ;;  %v11554_v51 = vpack.c.bf16 %v2007_v21, %v1989_v20  ;;  %v1450_v40 = vld [vmem:[#allocation2 + $0x60] sm:$0xff]  ;;  %v1468_v56 = vld [vmem:[#allocation2 + $0xf0] sm:$0xff] }
 0x281   : > { %7762 = vmatpush1.bf16.msra.mxu0 %v11521_v38  ;;  %v2005_v38 = vld [vmem:[#allocation2 + $0x11b8] sm:$0xff]  ;;  %v1452_v21 = vld [vmem:[#allocation2 + $0x70] sm:$0xff] }
 0x282   : > { %7826 = vmatpush1.bf16.msra.mxu1 %v11525_v1  ;;  %7764 = vmatprep.subr.bf16.mxu0 %v11527_v44  ;;  %v11545_v1 = vpack.c.bf16 %v1968_v39, %v1950_v45  ;;  %14336 = vst [vmem:[#allocation260_spill] sm:$0xff] %v11549_v28  ;;  %v11551_v5 = vpack.c.bf16 %v2005_v38, %v1987_v24  ;;  %14338 = vst [vmem:[#allocation262_spill] sm:$0xff] %v11554_v51  ;;  %v1451_v44 = vld [vmem:[#allocation2 + $0x68] sm:$0xff]  ;;  %v1453_v45 = vld [vmem:[#allocation2 + $0x78] sm:$0xff] }
 0x283   : > { %7828 = vmatprep.subr.bf16.mxu1 %v11530_v50  ;;  %v2006_v50 = vld [vmem:[#allocation2 + $0x11c0] sm:$0xff]  ;;  %v1471_v39 = vld [vmem:[#allocation2 + $0x108] sm:$0xff] }
 0x284   : > { %14335 = vst [vmem:[#allocation259_spill] sm:$0xff] %v11545_v1  ;;  %14337 = vst [vmem:[#allocation261_spill] sm:$0xff] %v11551_v5  ;;  %v11561_v38 = vpack.c.bf16 %v2006_v50, %v1988_v10  ;;  %v11566_v20 = vpack.c.bf16 %v1471_v39, %v1453_v45  ;;  %v1504_v50 = vld [vmem:[#allocation2 + $0x210] sm:$0xff]  ;;  %v1506_v39 = vld [vmem:[#allocation2 + $0x220] sm:$0xff] }
 0x285   : > { %7766 = vmatpush1.bf16.msra.mxu0 %v11533_v53  ;;  %v1469_v53 = vld [vmem:[#allocation2 + $0xf8] sm:$0xff]  ;;  %v1488_v10 = vld [vmem:[#allocation2 + $0x190] sm:$0xff] }
 0x286   : > { %7830 = vmatpush1.bf16.msra.mxu1 %v11537_v9  ;;  %7768 = vmatprep.subr.bf16.mxu0 %v11539_v37  ;;  %v11557_v9 = vpack.c.bf16 %v2004_v58, %v1986_v6  ;;  %14340 = vst [vmem:[#allocation264_spill] sm:$0xff] %v11561_v38  ;;  %v11563_v24 = vpack.c.bf16 %v1469_v53, %v1451_v44  ;;  %14342 = vst [vmem:[#allocation266_spill] sm:$0xff] %v11566_v20  ;;  %v1487_v37 = vld [vmem:[#allocation2 + $0x188] sm:$0xff]  ;;  %v1489_v58 = vld [vmem:[#allocation2 + $0x198] sm:$0xff] }
 0x287   : > { %7832 = vmatprep.subr.bf16.mxu1 %v11542_v0  ;;  %v1470_v0 = vld [vmem:[#allocation2 + $0x100] sm:$0xff]  ;;  %v11569_v6 = vpack.c.bf16 %v1468_v56, %v1450_v40  ;;  %v1525_v56 = vld [vmem:[#allocation2 + $0x2b8] sm:$0xff] }
 0x288   : > { %14339 = vst [vmem:[#allocation263_spill] sm:$0xff] %v11557_v9  ;;  %14341 = vst [vmem:[#allocation265_spill] sm:$0xff] %v11563_v24  ;;  %v11573_v53 = vpack.c.bf16 %v1470_v0, %v1452_v21  ;;  %v1486_v44 = vld [vmem:[#allocation2 + $0x180] sm:$0xff] }
 0x289   : > { %7770 = vmatpush1.bf16.msra.mxu0 %v11545_v1  ;;  %v1505_v1 = vld [vmem:[#allocation2 + $0x218] sm:$0xff]  ;;  %14343 = vst [vmem:[#allocation267_spill] sm:$0xff] %v11569_v6  ;;  %v11583_v0 = vpack.c.bf16 %v1504_v50, %v1486_v44  ;;  %v1522_v21 = vld [vmem:[#allocation2 + $0x2a0] sm:$0xff]  ;;  %v1559_v44 = vld [vmem:[#allocation2 + $0x3c8] sm:$0xff] }
 0x28a   : > { %7834 = vmatpush1.bf16.msra.mxu1 %v11549_v28  ;;  %7772 = vmatprep.subr.bf16.mxu0 %v11551_v5  ;;  %v1507_v5 = vld [vmem:[#allocation2 + $0x228] sm:$0xff]  ;;  %14344 = vst [vmem:[#allocation268_spill] sm:$0xff] %v11573_v53  ;;  %v11576_v45 = vpack.c.bf16 %v1505_v1, %v1487_v37  ;;  %v11587_v1 = vpack.c.bf16 %v1506_v39, %v1488_v10  ;;  %v1577_v50 = vld [vmem:[#allocation2 + $0x458] sm:$0xff]  ;;  %v1576_v39 = vld [vmem:[#allocation2 + $0x450] sm:$0xff] }
 0x28b   : > { %7836 = vmatprep.subr.bf16.mxu1 %v11554_v51  ;;  %v1523_v51 = vld [vmem:[#allocation2 + $0x2a8] sm:$0xff]  ;;  %v11579_v40 = vpack.c.bf16 %v1507_v5, %v1489_v58  ;;  %14347 = vst [vmem:[#allocation271_spill] sm:$0xff] %v11583_v0  ;;  %v1524_v5 = vld [vmem:[#allocation2 + $0x2b0] sm:$0xff]  ;;  %v11603_v10 = vpack.c.bf16 %v1577_v50, %v1559_v44  ;;  %v1594_v44 = vld [vmem:[#allocation2 + $0x4e0] sm:$0xff] }
 0x28c   : > { %14345 = vst [vmem:[#allocation269_spill] sm:$0xff] %v11576_v45  ;;  %14348 = vst [vmem:[#allocation272_spill] sm:$0xff] %v11587_v1  ;;  %v1595_v28 = vld [vmem:[#allocation2 + $0x4e8] sm:$0xff] }
 0x28d   : > { %7774 = vmatpush1.bf16.msra.mxu0 %v11557_v9  ;;  %v1541_v9 = vld [vmem:[#allocation2 + $0x338] sm:$0xff]  ;;  %14346 = vst [vmem:[#allocation270_spill] sm:$0xff] %v11579_v40  ;;  %14353 = vst [vmem:[#allocation277_spill] sm:$0xff] %v11603_v10 }
 0x28e   : > { %7838 = vmatpush1.bf16.msra.mxu1 %v11561_v38  ;;  %7840 = vmatprep.subr.bf16.mxu0 %v11563_v24  ;;  %v1543_v38 = vld [vmem:[#allocation2 + $0x348] sm:$0xff]  ;;  %v11589_v37 = vpack.c.bf16 %v1541_v9, %v1523_v51  ;;  %v1561_v24 = vld [vmem:[#allocation2 + $0x3d8] sm:$0xff] }
 0x28f   : > { %7904 = vmatprep.subr.bf16.mxu1 %v11566_v20  ;;  %v1540_v20 = vld [vmem:[#allocation2 + $0x330] sm:$0xff]  ;;  %v11593_v58 = vpack.c.bf16 %v1543_v38, %v1525_v56  ;;  %v1558_v38 = vld [vmem:[#allocation2 + $0x3c0] sm:$0xff] }
 0x290   : > { %2923 = vmatmul.mubr.f32.vlgmr.msra.gmra.mrb[4].mxu0 %v11174_v2  ;;  %14349 = vst [vmem:[#allocation273_spill] sm:$0xff] %v11589_v37  ;;  %v11597_v9 = vpack.c.bf16 %v1540_v20, %v1522_v21  ;;  %v1560_v56 = vld [vmem:[#allocation2 + $0x3d0] sm:$0xff]  ;;  %v1597_v20 = vld [vmem:[#allocation2 + $0x4f8] sm:$0xff]  ;;  %v1615_v21 = vld [vmem:[#allocation2 + $0x588] sm:$0xff] }
 0x291   : > { %2994 = vmatmul.mubr.f32.vlgmr.msra.gmra.mrb[4].mxu1 %v11174_v2  ;;  %7842 = vmatpush1.bf16.msra.mxu0 %v11569_v6  ;;  %14350 = vst [vmem:[#allocation274_spill] sm:$0xff] %v11593_v58  ;;  %v1542_v6 = vld [vmem:[#allocation2 + $0x340] sm:$0xff]  ;;  %v11618_v50 = vpack.c.bf16 %v1615_v21, %v1597_v20  ;;  %v1632_v20 = vld [vmem:[#allocation2 + $0x610] sm:$0xff] }
 0x292   : > { %3064 = vmatprep.mubr.f32.mxu0 %v11176_v57  ;;  %7906 = vmatpush1.bf16.msra.mxu1 %v11573_v53  ;;  %v1579_v53 = vld [vmem:[#allocation2 + $0x468] sm:$0xff]  ;;  %14351 = vst [vmem:[#allocation275_spill] sm:$0xff] %v11597_v9  ;;  %v11601_v51 = vpack.c.bf16 %v1542_v6, %v1524_v5 }
 0x293   : > { %3135 = vmatprep.mubr.f32.mxu1 %v11176_v57  ;;  %7844 = vmatprep.subr.bf16.mxu0 %v11576_v45  ;;  %v1578_v45 = vld [vmem:[#allocation2 + $0x460] sm:$0xff]  ;;  %14358 = vst [vmem:[#allocation282_spill] sm:$0xff] %v11618_v50 }
 0x294   : > { %7908 = vmatprep.subr.bf16.mxu1 %v11579_v40  ;;  %14352 = vst [vmem:[#allocation276_spill] sm:$0xff] %v11601_v51  ;;  %v11606_v40 = vpack.c.bf16 %v1579_v53, %v1561_v24  ;;  %v11613_v6 = vpack.c.bf16 %v1578_v45, %v1560_v56  ;;  %v1612_v24 = vld [vmem:[#allocation2 + $0x570] sm:$0xff] }
 0x295   : > { %7846 = vmatpush1.bf16.msra.mxu0 %v11583_v0  ;;  %v1613_v0 = vld [vmem:[#allocation2 + $0x578] sm:$0xff]  ;;  %v1596_v53 = vld [vmem:[#allocation2 + $0x4f0] sm:$0xff] }
 0x296   : > { %7910 = vmatpush1.bf16.msra.mxu1 %v11587_v1  ;;  %7848 = vmatprep.subr.bf16.mxu0 %v11589_v37  ;;  %14354 = vst [vmem:[#allocation278_spill] sm:$0xff] %v11606_v40  ;;  %v11609_v1 = vpack.c.bf16 %v1576_v39, %v1558_v38  ;;  %14356 = vst [vmem:[#allocation280_spill] sm:$0xff] %v11613_v6  ;;  %v11615_v5 = vpack.c.bf16 %v1613_v0, %v1595_v28  ;;  %v1631_v37 = vld [vmem:[#allocation2 + $0x608] sm:$0xff]  ;;  %v1633_v38 = vld [vmem:[#allocation2 + $0x618] sm:$0xff] }
 0x297   : > { %7912 = vmatprep.subr.bf16.mxu1 %v11593_v58  ;;  %v1614_v58 = vld [vmem:[#allocation2 + $0x580] sm:$0xff]  ;;  %v1651_v39 = vld [vmem:[#allocation2 + $0x6a8] sm:$0xff]  ;;  %v1648_v56 = vld [vmem:[#allocation2 + $0x690] sm:$0xff] }
 0x298   : > { %14355 = vst [vmem:[#allocation279_spill] sm:$0xff] %v11609_v1  ;;  %14357 = vst [vmem:[#allocation281_spill] sm:$0xff] %v11615_v5  ;;  %v11625_v28 = vpack.c.bf16 %v1614_v58, %v1596_v53  ;;  %v1630_v0 = vld [vmem:[#allocation2 + $0x600] sm:$0xff]  ;;  %v11630_v21 = vpack.c.bf16 %v1651_v39, %v1633_v38  ;;  %v1684_v53 = vld [vmem:[#allocation2 + $0x7b0] sm:$0xff] }
 0x299   : > { %7850 = vmatpush1.bf16.msra.mxu0 %v11597_v9  ;;  %v1649_v9 = vld [vmem:[#allocation2 + $0x698] sm:$0xff]  ;;  %v1668_v38 = vld [vmem:[#allocation2 + $0x730] sm:$0xff] }
 0x29a   : > { %7914 = vmatpush1.bf16.msra.mxu1 %v11601_v51  ;;  %7852 = vmatprep.subr.bf16.mxu0 %v11603_v10  ;;  %v11621_v51 = vpack.c.bf16 %v1612_v24, %v1594_v44  ;;  %14360 = vst [vmem:[#allocation284_spill] sm:$0xff] %v11625_v28  ;;  %v11627_v45 = vpack.c.bf16 %v1649_v9, %v1631_v37  ;;  %14362 = vst [vmem:[#allocation286_spill] sm:$0xff] %v11630_v21  ;;  %v1667_v10 = vld [vmem:[#allocation2 + $0x728] sm:$0xff]  ;;  %v1669_v44 = vld [vmem:[#allocation2 + $0x738] sm:$0xff] }
 0x29b   : > { %7916 = vmatprep.subr.bf16.mxu1 %v11606_v40  ;;  %v1650_v40 = vld [vmem:[#allocation2 + $0x6a0] sm:$0xff]  ;;  %v1687_v24 = vld [vmem:[#allocation2 + $0x7c8] sm:$0xff] }
 0x29c   : > { %14359 = vst [vmem:[#allocation283_spill] sm:$0xff] %v11621_v51  ;;  %14361 = vst [vmem:[#allocation285_spill] sm:$0xff] %v11627_v45  ;;  %v11637_v37 = vpack.c.bf16 %v1650_v40, %v1632_v20  ;;  %v1666_v9 = vld [vmem:[#allocation2 + $0x720] sm:$0xff]  ;;  %v11642_v39 = vpack.c.bf16 %v1687_v24, %v1669_v44  ;;  %v1720_v20 = vld [vmem:[#allocation2 + $0x8d0] sm:$0xff] }
 0x29d   : > { %7854 = vmatpush1.bf16.msra.mxu0 %v11609_v1  ;;  %v1685_v1 = vld [vmem:[#allocation2 + $0x7b8] sm:$0xff]  ;;  %v1704_v44 = vld [vmem:[#allocation2 + $0x850] sm:$0xff] }
 0x29e   : > { %7918 = vmatpush1.bf16.msra.mxu1 %v11613_v6  ;;  %7856 = vmatprep.subr.bf16.mxu0 %v11615_v5  ;;  %v11633_v6 = vpack.c.bf16 %v1648_v56, %v1630_v0  ;;  %14364 = vst [vmem:[#allocation288_spill] sm:$0xff] %v11637_v37  ;;  %v11639_v58 = vpack.c.bf16 %v1685_v1, %v1667_v10  ;;  %14366 = vst [vmem:[#allocation290_spill] sm:$0xff] %v11642_v39  ;;  %v1703_v5 = vld [vmem:[#allocation2 + $0x848] sm:$0xff]  ;;  %v1705_v0 = vld [vmem:[#allocation2 + $0x858] sm:$0xff] }
 0x29f   : > { %7920 = vmatprep.subr.bf16.mxu1 %v11618_v50  ;;  %v1686_v50 = vld [vmem:[#allocation2 + $0x7c0] sm:$0xff]  ;;  %v1723_v56 = vld [vmem:[#allocation2 + $0x8e8] sm:$0xff] }
 0x2a0   : > { %14363 = vst [vmem:[#allocation287_spill] sm:$0xff] %v11633_v6  ;;  %14365 = vst [vmem:[#allocation289_spill] sm:$0xff] %v11639_v58  ;;  %v11649_v40 = vpack.c.bf16 %v1686_v50, %v1668_v38  ;;  %v1702_v10 = vld [vmem:[#allocation2 + $0x840] sm:$0xff]  ;;  %v11654_v24 = vpack.c.bf16 %v1723_v56, %v1705_v0  ;;  %v1756_v38 = vld [vmem:[#allocation2 + $0x9f0] sm:$0xff] }
 0x2a1   : > { %7858 = vmatpush1.bf16.msra.mxu0 %v11621_v51  ;;  %v1721_v51 = vld [vmem:[#allocation2 + $0x8d8] sm:$0xff]  ;;  %v1738_v50 = vld [vmem:[#allocation2 + $0x960] sm:$0xff]  ;;  %v1740_v0 = vld [vmem:[#allocation2 + $0x970] sm:$0xff] }
 0x2a2   : > { %7922 = vmatpush1.bf16.msra.mxu1 %v11625_v28  ;;  %7860 = vmatprep.subr.bf16.mxu0 %v11627_v45  ;;  %v11645_v28 = vpack.c.bf16 %v1684_v53, %v1666_v9  ;;  %14368 = vst [vmem:[#allocation292_spill] sm:$0xff] %v11649_v40  ;;  %v11651_v1 = vpack.c.bf16 %v1721_v51, %v1703_v5  ;;  %14370 = vst [vmem:[#allocation294_spill] sm:$0xff] %v11654_v24  ;;  %v1739_v45 = vld [vmem:[#allocation2 + $0x968] sm:$0xff]  ;;  %v1741_v9 = vld [vmem:[#allocation2 + $0x978] sm:$0xff] }
 0x2a3   : > { %7924 = vmatprep.subr.bf16.mxu1 %v11630_v21  ;;  %v1722_v21 = vld [vmem:[#allocation2 + $0x8e0] sm:$0xff]  ;;  %v1759_v53 = vld [vmem:[#allocation2 + $0xa08] sm:$0xff] }
 0x2a4   : > { %14367 = vst [vmem:[#allocation291_spill] sm:$0xff] %v11645_v28  ;;  %14369 = vst [vmem:[#allocation293_spill] sm:$0xff] %v11651_v1  ;;  %v11661_v51 = vpack.c.bf16 %v1722_v21, %v1704_v44  ;;  %v11666_v56 = vpack.c.bf16 %v1759_v53, %v1741_v9  ;;  %v1774_v21 = vld [vmem:[#allocation2 + $0xa80] sm:$0xff]  ;;  %v1792_v44 = vld [vmem:[#allocation2 + $0xb10] sm:$0xff] }
 0x2a5   : > { %7862 = vmatpush1.bf16.msra.mxu0 %v11633_v6  ;;  %v1757_v6 = vld [vmem:[#allocation2 + $0x9f8] sm:$0xff]  ;;  %v1776_v9 = vld [vmem:[#allocation2 + $0xa90] sm:$0xff] }
 0x2a6   : > { %7926 = vmatpush1.bf16.msra.mxu1 %v11637_v37  ;;  %7864 = vmatprep.subr.bf16.mxu0 %v11639_v58  ;;  %v11657_v37 = vpack.c.bf16 %v1720_v20, %v1702_v10  ;;  %14372 = vst [vmem:[#allocation296_spill] sm:$0xff] %v11661_v51  ;;  %v11663_v5 = vpack.c.bf16 %v1757_v6, %v1739_v45  ;;  %14374 = vst [vmem:[#allocation298_spill] sm:$0xff] %v11666_v56  ;;  %v1775_v58 = vld [vmem:[#allocation2 + $0xa88] sm:$0xff]  ;;  %v1777_v10 = vld [vmem:[#allocation2 + $0xa98] sm:$0xff] }
 0x2a7   : > { %7928 = vmatprep.subr.bf16.mxu1 %v11642_v39  ;;  %v1758_v39 = vld [vmem:[#allocation2 + $0xa00] sm:$0xff]  ;;  %v1795_v20 = vld [vmem:[#allocation2 + $0xb28] sm:$0xff] }
 0x2a8   : > { %14371 = vst [vmem:[#allocation295_spill] sm:$0xff] %v11657_v37  ;;  %14373 = vst [vmem:[#allocation297_spill] sm:$0xff] %v11663_v5  ;;  %v11673_v6 = vpack.c.bf16 %v1758_v39, %v1740_v0  ;;  %v11678_v53 = vpack.c.bf16 %v1795_v20, %v1777_v10  ;;  %v1810_v39 = vld [vmem:[#allocation2 + $0xba0] sm:$0xff]  ;;  %v1828_v0 = vld [vmem:[#allocation2 + $0xc30] sm:$0xff] }
 0x2a9   : > { %7866 = vmatpush1.bf16.msra.mxu0 %v11645_v28  ;;  %v1793_v28 = vld [vmem:[#allocation2 + $0xb18] sm:$0xff]  ;;  %v1812_v10 = vld [vmem:[#allocation2 + $0xbb0] sm:$0xff] }
 0x2aa   : > { %7930 = vmatpush1.bf16.msra.mxu1 %v11649_v40  ;;  %7868 = vmatprep.subr.bf16.mxu0 %v11651_v1  ;;  %v11669_v40 = vpack.c.bf16 %v1756_v38, %v1738_v50  ;;  %14376 = vst [vmem:[#allocation300_spill] sm:$0xff] %v11673_v6  ;;  %v11675_v45 = vpack.c.bf16 %v1793_v28, %v1775_v58  ;;  %14378 = vst [vmem:[#allocation302_spill] sm:$0xff] %v11678_v53  ;;  %v1811_v1 = vld [vmem:[#allocation2 + $0xba8] sm:$0xff]  ;;  %v1813_v50 = vld [vmem:[#allocation2 + $0xbb8] sm:$0xff] }
 0x2ab   : > { %7932 = vmatprep.subr.bf16.mxu1 %v11654_v24  ;;  %v1794_v24 = vld [vmem:[#allocation2 + $0xb20] sm:$0xff]  ;;  %v1831_v38 = vld [vmem:[#allocation2 + $0xc48] sm:$0xff] }
 0x2ac   : > { %14375 = vst [vmem:[#allocation299_spill] sm:$0xff] %v11669_v40  ;;  %14377 = vst [vmem:[#allocation301_spill] sm:$0xff] %v11675_v45  ;;  %v11685_v28 = vpack.c.bf16 %v1794_v24, %v1776_v9  ;;  %v11690_v20 = vpack.c.bf16 %v1831_v38, %v1813_v50  ;;  %v1846_v24 = vld [vmem:[#allocation2 + $0xcc0] sm:$0xff]  ;;  %v1864_v9 = vld [vmem:[#allocation2 + $0xd50] sm:$0xff] }
 0x2ad   : > { %7870 = vmatpush1.bf16.msra.mxu0 %v11657_v37  ;;  %v1829_v37 = vld [vmem:[#allocation2 + $0xc38] sm:$0xff]  ;;  %v1848_v50 = vld [vmem:[#allocation2 + $0xcd0] sm:$0xff] }
 0x2ae   : > { %7934 = vmatpush1.bf16.msra.mxu1 %v11661_v51  ;;  %7872 = vmatprep.subr.bf16.mxu0 %v11663_v5  ;;  %v11681_v51 = vpack.c.bf16 %v1792_v44, %v1774_v21  ;;  %14380 = vst [vmem:[#allocation304_spill] sm:$0xff] %v11685_v28  ;;  %v11687_v58 = vpack.c.bf16 %v1829_v37, %v1811_v1  ;;  %14382 = vst [vmem:[#allocation306_spill] sm:$0xff] %v11690_v20  ;;  %v1847_v5 = vld [vmem:[#allocation2 + $0xcc8] sm:$0xff]  ;;  %v1849_v21 = vld [vmem:[#allocation2 + $0xcd8] sm:$0xff] }
 0x2af   : > { %7936 = vmatprep.subr.bf16.mxu1 %v11666_v56  ;;  %v1830_v56 = vld [vmem:[#allocation2 + $0xc40] sm:$0xff]  ;;  %v1867_v44 = vld [vmem:[#allocation2 + $0xd68] sm:$0xff] }
 0x2b0   : > { %14379 = vst [vmem:[#allocation303_spill] sm:$0xff] %v11681_v51  ;;  %14381 = vst [vmem:[#allocation305_spill] sm:$0xff] %v11687_v58  ;;  %v11697_v37 = vpack.c.bf16 %v1830_v56, %v1812_v10  ;;  %v11702_v38 = vpack.c.bf16 %v1867_v44, %v1849_v21  ;;  %v1882_v56 = vld [vmem:[#allocation2 + $0xde0] sm:$0xff]  ;;  %v1900_v10 = vld [vmem:[#allocation2 + $0xe70] sm:$0xff] }
 0x2b1   : > { %7874 = vmatpush1.bf16.msra.mxu0 %v11669_v40  ;;  %v1865_v40 = vld [vmem:[#allocation2 + $0xd58] sm:$0xff]  ;;  %v1884_v21 = vld [vmem:[#allocation2 + $0xdf0] sm:$0xff] }
 0x2b2   : > { %7938 = vmatpush1.bf16.msra.mxu1 %v11673_v6  ;;  %7876 = vmatprep.subr.bf16.mxu0 %v11675_v45  ;;  %v11693_v6 = vpack.c.bf16 %v1828_v0, %v1810_v39  ;;  %14384 = vst [vmem:[#allocation308_spill] sm:$0xff] %v11697_v37  ;;  %v11699_v1 = vpack.c.bf16 %v1865_v40, %v1847_v5  ;;  %14386 = vst [vmem:[#allocation310_spill] sm:$0xff] %v11702_v38  ;;  %v1883_v45 = vld [vmem:[#allocation2 + $0xde8] sm:$0xff]  ;;  %v1885_v39 = vld [vmem:[#allocation2 + $0xdf8] sm:$0xff] }
 0x2b3   : > { %7940 = vmatprep.subr.bf16.mxu1 %v11678_v53  ;;  %v1866_v53 = vld [vmem:[#allocation2 + $0xd60] sm:$0xff]  ;;  %v1903_v0 = vld [vmem:[#allocation2 + $0xe88] sm:$0xff] }
 0x2b4   : > { %14383 = vst [vmem:[#allocation307_spill] sm:$0xff] %v11693_v6  ;;  %14385 = vst [vmem:[#allocation309_spill] sm:$0xff] %v11699_v1  ;;  %v11709_v40 = vpack.c.bf16 %v1866_v53, %v1848_v50  ;;  %v11714_v44 = vpack.c.bf16 %v1903_v0, %v1885_v39  ;;  %v1918_v53 = vld [vmem:[#allocation2 + $0xf00] sm:$0xff]  ;;  %v1936_v50 = vld [vmem:[#allocation2 + $0xf90] sm:$0xff] }
 0x2b5   : > { %7878 = vmatpush1.bf16.msra.mxu0 %v11681_v51  ;;  %v1901_v51 = vld [vmem:[#allocation2 + $0xe78] sm:$0xff]  ;;  %v1920_v39 = vld [vmem:[#allocation2 + $0xf10] sm:$0xff] }
 0x2b6   : > { %7942 = vmatpush1.bf16.msra.mxu1 %v11685_v28  ;;  %7880 = vmatprep.subr.bf16.mxu0 %v11687_v58  ;;  %v11705_v28 = vpack.c.bf16 %v1864_v9, %v1846_v24  ;;  %14388 = vst [vmem:[#allocation312_spill] sm:$0xff] %v11709_v40  ;;  %v11711_v5 = vpack.c.bf16 %v1901_v51, %v1883_v45  ;;  %14390 = vst [vmem:[#allocation314_spill] sm:$0xff] %v11714_v44  ;;  %v1919_v58 = vld [vmem:[#allocation2 + $0xf08] sm:$0xff]  ;;  %v1921_v24 = vld [vmem:[#allocation2 + $0xf18] sm:$0xff] }
 0x2b7   : > { %7944 = vmatprep.subr.bf16.mxu1 %v11690_v20  ;;  %v1902_v20 = vld [vmem:[#allocation2 + $0xe80] sm:$0xff]  ;;  %v1939_v9 = vld [vmem:[#allocation2 + $0xfa8] sm:$0xff] }
 0x2b8   : > { %14387 = vst [vmem:[#allocation311_spill] sm:$0xff] %v11705_v28  ;;  %14389 = vst [vmem:[#allocation313_spill] sm:$0xff] %v11711_v5  ;;  %v11721_v51 = vpack.c.bf16 %v1902_v20, %v1884_v21  ;;  %v11726_v0 = vpack.c.bf16 %v1939_v9, %v1921_v24  ;;  %v1954_v20 = vld [vmem:[#allocation2 + $0x1020] sm:$0xff]  ;;  %v1972_v21 = vld [vmem:[#allocation2 + $0x10b0] sm:$0xff] }
 0x2b9   : > { %7882 = vmatpush1.bf16.msra.mxu0 %v11693_v6  ;;  %v1937_v6 = vld [vmem:[#allocation2 + $0xf98] sm:$0xff]  ;;  %v1956_v24 = vld [vmem:[#allocation2 + $0x1030] sm:$0xff] }
 0x2ba   : > { %7946 = vmatpush1.bf16.msra.mxu1 %v11697_v37  ;;  %7884 = vmatprep.subr.bf16.mxu0 %v11699_v1  ;;  %v11717_v37 = vpack.c.bf16 %v1900_v10, %v1882_v56  ;;  %14392 = vst [vmem:[#allocation316_spill] sm:$0xff] %v11721_v51  ;;  %v11723_v45 = vpack.c.bf16 %v1937_v6, %v1919_v58  ;;  %14394 = vst [vmem:[#allocation318_spill] sm:$0xff] %v11726_v0  ;;  %v1955_v1 = vld [vmem:[#allocation2 + $0x1028] sm:$0xff]  ;;  %v1957_v56 = vld [vmem:[#allocation2 + $0x1038] sm:$0xff] }
 0x2bb   : > { %7948 = vmatprep.subr.bf16.mxu1 %v11702_v38  ;;  %v1938_v38 = vld [vmem:[#allocation2 + $0xfa0] sm:$0xff]  ;;  %v1975_v10 = vld [vmem:[#allocation2 + $0x10c8] sm:$0xff] }
 0x2bc   : > { %14391 = vst [vmem:[#allocation315_spill] sm:$0xff] %v11717_v37  ;;  %14393 = vst [vmem:[#allocation317_spill] sm:$0xff] %v11723_v45  ;;  %v11733_v6 = vpack.c.bf16 %v1938_v38, %v1920_v39  ;;  %v11738_v9 = vpack.c.bf16 %v1975_v10, %v1957_v56  ;;  %v1990_v38 = vld [vmem:[#allocation2 + $0x1140] sm:$0xff]  ;;  %v2008_v39 = vld [vmem:[#allocation2 + $0x11d0] sm:$0xff] }
 0x2bd   : > { %7886 = vmatpush1.bf16.msra.mxu0 %v11705_v28  ;;  %v1973_v28 = vld [vmem:[#allocation2 + $0x10b8] sm:$0xff]  ;;  %v1992_v56 = vld [vmem:[#allocation2 + $0x1150] sm:$0xff] }
 0x2be   : > { %7950 = vmatpush1.bf16.msra.mxu1 %v11709_v40  ;;  %7888 = vmatprep.subr.bf16.mxu0 %v11711_v5  ;;  %v11729_v40 = vpack.c.bf16 %v1936_v50, %v1918_v53  ;;  %14396 = vst [vmem:[#allocation320_spill] sm:$0xff] %v11733_v6  ;;  %v11735_v58 = vpack.c.bf16 %v1973_v28, %v1955_v1  ;;  %14398 = vst [vmem:[#allocation322_spill] sm:$0xff] %v11738_v9  ;;  %v1991_v5 = vld [vmem:[#allocation2 + $0x1148] sm:$0xff]  ;;  %v1993_v53 = vld [vmem:[#allocation2 + $0x1158] sm:$0xff] }
 0x2bf   : > { %7952 = vmatprep.subr.bf16.mxu1 %v11714_v44  ;;  %v1974_v44 = vld [vmem:[#allocation2 + $0x10c0] sm:$0xff]  ;;  %v2011_v50 = vld [vmem:[#allocation2 + $0x11e8] sm:$0xff] }
 0x2c0   : > { %14395 = vst [vmem:[#allocation319_spill] sm:$0xff] %v11729_v40  ;;  %14397 = vst [vmem:[#allocation321_spill] sm:$0xff] %v11735_v58  ;;  %v11745_v28 = vpack.c.bf16 %v1974_v44, %v1956_v24  ;;  %v11750_v10 = vpack.c.bf16 %v2011_v50, %v1993_v53  ;;  %v1454_v44 = vld [vmem:[#allocation2 + $0x80] sm:$0xff]  ;;  %v1472_v24 = vld [vmem:[#allocation2 + $0x110] sm:$0xff] }
 0x2c1   : > { %7890 = vmatpush1.bf16.msra.mxu0 %v11717_v37  ;;  %v2009_v37 = vld [vmem:[#allocation2 + $0x11d8] sm:$0xff]  ;;  %v2302_v50 = vld [vmem:[#allocation6] sm:$0xff] }
 0x2c2   : > { %7954 = vmatpush1.bf16.msra.mxu1 %v11721_v51  ;;  %7892 = vmatprep.subr.bf16.mxu0 %v11723_v45  ;;  %v11741_v51 = vpack.c.bf16 %v1972_v21, %v1954_v20  ;;  %14400 = vst [vmem:[#allocation324_spill] sm:$0xff] %v11745_v28  ;;  %v11747_v1 = vpack.c.bf16 %v2009_v37, %v1991_v5  ;;  %14402 = vst [vmem:[#allocation326_spill] sm:$0xff] %v11750_v10  ;;  %v1455_v45 = vld [vmem:[#allocation2 + $0x88] sm:$0xff]  ;;  %v2305_v21 = vld [vmem:[#allocation6 + $0x18] sm:$0xff] }
 0x2c3   : > { %7956 = vmatprep.subr.bf16.mxu1 %v11726_v0  ;;  %v2010_v0 = vld [vmem:[#allocation2 + $0x11e0] sm:$0xff]  ;;  %v2303_v20 = vld [vmem:[#allocation6 + $0x8] sm:$0xff] }
 0x2c4   : > { %14399 = vst [vmem:[#allocation323_spill] sm:$0xff] %v11741_v51  ;;  %14401 = vst [vmem:[#allocation325_spill] sm:$0xff] %v11747_v1  ;;  %v11757_v37 = vpack.c.bf16 %v2010_v0, %v1992_v56  ;;  %v8031_v53 = vpack.c.bf16 %v2305_v21, %v2303_v20  ;;  %v1508_v0 = vld [vmem:[#allocation2 + $0x230] sm:$0xff]  ;;  %v2306_v56 = vld [vmem:[#allocation6 + $0x20] sm:$0xff] }
 0x2c5   : > { %7894 = vmatpush1.bf16.msra.mxu0 %v11729_v40  ;;  %v1473_v40 = vld [vmem:[#allocation2 + $0x118] sm:$0xff]  ;;  %v2308_v21 = vld [vmem:[#allocation6 + $0x30] sm:$0xff] }
 0x2c6   : > { %7958 = vmatpush1.bf16.msra.mxu1 %v11733_v6  ;;  %7896 = vmatprep.subr.bf16.mxu0 %v11735_v58  ;;  %v11753_v6 = vpack.c.bf16 %v2008_v39, %v1990_v38  ;;  %14404 = vst [vmem:[#allocation328_spill] sm:$0xff] %v11757_v37  ;;  %v11759_v5 = vpack.c.bf16 %v1473_v40, %v1455_v45  ;;  %v1491_v58 = vld [vmem:[#allocation2 + $0x1a8] sm:$0xff]  ;;  %v1490_v45 = vld [vmem:[#allocation2 + $0x1a0] sm:$0xff] }
 0x2c7   : > { %7960 = vmatprep.subr.bf16.mxu1 %v11738_v9  ;;  %v2304_v9 = vld [vmem:[#allocation6 + $0x10] sm:$0xff]  ;;  %v11763_v38 = vpack.c.bf16 %v1472_v24, %v1454_v44  ;;  %v2307_v39 = vld [vmem:[#allocation6 + $0x28] sm:$0xff]  ;;  %v11767_v20 = vpack.c.bf16 %v1509_v27, %v1491_v58  ;;  %v1526_v58 = vld [vmem:[#allocation2 + $0x2c0] sm:$0xff] }
 0x2c8   : > { %14403 = vst [vmem:[#allocation327_spill] sm:$0xff] %v11753_v6  ;;  %14405 = vst [vmem:[#allocation329_spill] sm:$0xff] %v11759_v5  ;;  %v8033_v40 = vpack.c.bf16 %v2304_v9, %v2302_v50  ;;  %v2311_v24 = vld [vmem:[#allocation6 + $0x48] sm:$0xff]  ;;  %v8037_v9 = vpack.c.bf16 %v2308_v21, %v2306_v56  ;;  %v2310_v50 = vld [vmem:[#allocation6 + $0x40] sm:$0xff] }
 0x2c9   : > { %7898 = vmatpush1.bf16.msra.mxu0 %v11741_v51  ;;  %14406 = vst [vmem:[#allocation330_spill] sm:$0xff] %v11763_v38  ;;  %14407 = vst [vmem:[#allocation331_spill] sm:$0xff] %v11767_v20  ;;  %v1581_v51 = vld [vmem:[#allocation2 + $0x478] sm:$0xff]  ;;  %v1562_v56 = vld [vmem:[#allocation2 + $0x3e0] sm:$0xff] }
 0x2ca   : > { %7962 = vmatpush1.bf16.msra.mxu1 %v11745_v28  ;;  %7900 = vmatprep.subr.bf16.mxu0 %v11747_v1  ;;  %v2309_v28 = vld [vmem:[#allocation6 + $0x38] sm:$0xff]  ;;  %v1580_v21 = vld [vmem:[#allocation2 + $0x470] sm:$0xff] }
 0x2cb   : > { %7964 = vmatprep.subr.bf16.mxu1 %v11750_v10  ;;  %v1527_v10 = vld [vmem:[#allocation2 + $0x2c8] sm:$0xff]  ;;  %v1545_v1 = vld [vmem:[#allocation2 + $0x358] sm:$0xff]  ;;  %v8035_v44 = vpack.c.bf16 %v2309_v28, %v2307_v39  ;;  %v2312_v39 = vld [vmem:[#allocation6 + $0x50] sm:$0xff] }
 0x2cc   : > { %v11775_v27 = vpack.c.bf16 %v1545_v1, %v1527_v10  ;;  %v8041_v1 = vpack.c.bf16 %v2312_v39, %v2310_v50  ;;  %v2318_v50 = vld [vmem:[#allocation6 + $0x80] sm:$0xff]  ;;  %v2320_v39 = vld [vmem:[#allocation6 + $0x90] sm:$0xff] }
 0x2cd   : > { %7902 = vmatpush1.bf16.msra.mxu0 %v11753_v6  ;;  %v2313_v6 = vld [vmem:[#allocation6 + $0x58] sm:$0xff] }
 0x2ce   : > { %7966 = vmatpush1.bf16.msra.mxu1 %v11757_v37  ;;  %7968 = vmatprep.subr.bf16.mxu0 %v11759_v5  ;;  %v11772_v5 = vpack.c.bf16 %v1508_v0, %v1490_v45  ;;  %14409 = vst [vmem:[#allocation333_spill] sm:$0xff] %v11775_v27  ;;  %v8039_v28 = vpack.c.bf16 %v2313_v6, %v2311_v24  ;;  %v1563_v37 = vld [vmem:[#allocation2 + $0x3e8] sm:$0xff]  ;;  %v2317_v0 = vld [vmem:[#allocation6 + $0x78] sm:$0xff]  ;;  %v2316_v24 = vld [vmem:[#allocation6 + $0x70] sm:$0xff] }
 0x2cf   : > { %8032 = vmatprep.subr.bf16.mxu1 %v8031_v53  ;;  %v1544_v53 = vld [vmem:[#allocation2 + $0x350] sm:$0xff]  ;;  %v2315_v45 = vld [vmem:[#allocation6 + $0x68] sm:$0xff]  ;;  %v11783_v10 = vpack.c.bf16 %v1581_v51, %v1563_v37  ;;  %v1598_v37 = vld [vmem:[#allocation2 + $0x500] sm:$0xff] }
 0x2d0   : > { %3065 = vmatmul.mubr.f32.vlgmr.msra.gmra.mrb[6].mxu0 %v11174_v2  ;;  %14408 = vst [vmem:[#allocation332_spill] sm:$0xff] %v11772_v5  ;;  %v8043_v6 = vpack.c.bf16 %v2317_v0, %v2315_v45  ;;  %v1635_v45 = vld [vmem:[#allocation2 + $0x628] sm:$0xff]  ;;  %v1653_v0 = vld [vmem:[#allocation2 + $0x6b8] sm:$0xff] }
 0x2d1   : > { %3136 = vmatmul.mubr.f32.vlgmr.msra.gmra.mrb[6].mxu1 %v11174_v2  ;;  %7970 = vmatpush1.bf16.msra.mxu0 %v11763_v38  ;;  %14411 = vst [vmem:[#allocation335_spill] sm:$0xff] %v11783_v10  ;;  %v1599_v38 = vld [vmem:[#allocation2 + $0x508] sm:$0xff] }
 0x2d2   : > { %3206 = vmatprep.mubr.f32.mxu0 %v11176_v57  ;;  %8034 = vmatpush1.bf16.msra.mxu1 %v8033_v40  ;;  %v11780_v40 = vpack.c.bf16 %v1544_v53, %v1526_v58  ;;  %v11786_v58 = vpack.c.bf16 %v1580_v21, %v1562_v56  ;;  %v1616_v53 = vld [vmem:[#allocation2 + $0x590] sm:$0xff] }
 0x2d3   : > { %3860 = vmatprep.mubr.f32.mxu1 %v11176_v57  ;;  %7972 = vmatprep.subr.bf16.mxu0 %v11767_v20  ;;  %v2314_v20 = vld [vmem:[#allocation6 + $0x60] sm:$0xff]  ;;  %v11792_v56 = vpack.c.bf16 %v1616_v53, %v1598_v37  ;;  %v1652_v21 = vld [vmem:[#allocation2 + $0x6b0] sm:$0xff] }
 0x2d4   : > { %8036 = vmatprep.subr.bf16.mxu1 %v8035_v44  ;;  %14410 = vst [vmem:[#allocation334_spill] sm:$0xff] %v11780_v40  ;;  %v1617_v44 = vld [vmem:[#allocation2 + $0x598] sm:$0xff]  ;;  %14412 = vst [vmem:[#allocation336_spill] sm:$0xff] %v11786_v58  ;;  %v1670_v53 = vld [vmem:[#allocation2 + $0x740] sm:$0xff] }
 0x2d5   : > { %7974 = vmatpush1.bf16.msra.mxu0 %v11772_v5  ;;  %v11789_v51 = vpack.c.bf16 %v1617_v44, %v1599_v38  ;;  %v2325_v5 = vld [vmem:[#allocation6 + $0xb8] sm:$0xff]  ;;  %14414 = vst [vmem:[#allocation338_spill] sm:$0xff] %v11792_v56  ;;  %v11795_v38 = vpack.c.bf16 %v1653_v0, %v1635_v45  ;;  %v2328_v0 = vld [vmem:[#allocation6 + $0xd0] sm:$0xff] }
 0x2d6   : > { %8038 = vmatpush1.bf16.msra.mxu1 %v8037_v9  ;;  %7976 = vmatprep.subr.bf16.mxu0 %v11775_v27  ;;  %v8045_v9 = vpack.c.bf16 %v2316_v24, %v2314_v20  ;;  %v2323_v27 = vld [vmem:[#allocation6 + $0xa8] sm:$0xff]  ;;  %v8049_v20 = vpack.c.bf16 %v2320_v39, %v2318_v50  ;;  %v1689_v44 = vld [vmem:[#allocation2 + $0x7d8] sm:$0xff]  ;;  %v1688_v50 = vld [vmem:[#allocation2 + $0x7d0] sm:$0xff] }
 0x2d7   : > { %8040 = vmatprep.subr.bf16.mxu1 %v8039_v28  ;;  %14413 = vst [vmem:[#allocation337_spill] sm:$0xff] %v11789_v51  ;;  %v8047_v28 = vpack.c.bf16 %v2321_v63, %v2319_v3  ;;  %14415 = vst [vmem:[#allocation339_spill] sm:$0xff] %v11795_v38  ;;  %v2322_v63 = vld [vmem:[#allocation6 + $0xa0] sm:$0xff]  ;;  %v2324_v3 = vld [vmem:[#allocation6 + $0xb0] sm:$0xff] }
 0x2d8   : > { %v1671_v24 = vld [vmem:[#allocation2 + $0x748] sm:$0xff]  ;;  %v2326_v39 = vld [vmem:[#allocation6 + $0xc0] sm:$0xff] }
 0x2d9   : > { %7978 = vmatpush1.bf16.msra.mxu0 %v11780_v40  ;;  %v2329_v40 = vld [vmem:[#allocation6 + $0xd8] sm:$0xff] }
 0x2da   : > { %8042 = vmatpush1.bf16.msra.mxu1 %v8041_v1  ;;  %7980 = vmatprep.subr.bf16.mxu0 %v11783_v10  ;;  %v1634_v1 = vld [vmem:[#allocation2 + $0x620] sm:$0xff]  ;;  %v2327_v10 = vld [vmem:[#allocation6 + $0xc8] sm:$0xff] }
 0x2db   : > { %8044 = vmatprep.subr.bf16.mxu1 %v8043_v6  ;;  %v8051_v6 = vpack.c.bf16 %v2325_v5, %v2323_v27  ;;  %v11798_v37 = vpack.c.bf16 %v1652_v21, %v1634_v1  ;;  %v11805_v27 = vpack.c.bf16 %v1689_v44, %v1671_v24  ;;  %v2331_v21 = vld [vmem:[#allocation6 + $0xe8] sm:$0xff]  ;;  %v1724_v24 = vld [vmem:[#allocation2 + $0x8f0] sm:$0xff] }
 0x2dc   : > { %v2332_v44 = vld [vmem:[#allocation6 + $0xf0] sm:$0xff] }
 0x2dd   : > { %7982 = vmatpush1.bf16.msra.mxu0 %v11786_v58  ;;  %14416 = vst [vmem:[#allocation340_spill] sm:$0xff] %v11798_v37  ;;  %14418 = vst [vmem:[#allocation342_spill] sm:$0xff] %v11805_v27 }
 0x2de   : > { %8046 = vmatpush1.bf16.msra.mxu1 %v8045_v9  ;;  %7984 = vmatprep.subr.bf16.mxu0 %v11789_v51  ;;  %v8053_v9 = vpack.c.bf16 %v2324_v3, %v2322_v63  ;;  %v1707_v51 = vld [vmem:[#allocation2 + $0x868] sm:$0xff]  ;;  %v2333_v63 = vld [vmem:[#allocation6 + $0xf8] sm:$0xff]  ;;  %v11812_v3 = vpack.c.bf16 %v1688_v50, %v1670_v53  ;;  %v1760_v50 = vld [vmem:[#allocation2 + $0xa10] sm:$0xff] }
 0x2df   : > { %8048 = vmatprep.subr.bf16.mxu1 %v8047_v28  ;;  %v8055_v28 = vpack.c.bf16 %v2329_v40, %v2327_v10  ;;  %v2330_v40 = vld [vmem:[#allocation6 + $0xe0] sm:$0xff]  ;;  %v8059_v10 = vpack.c.bf16 %v2333_v63, %v2331_v21  ;;  %v1779_v21 = vld [vmem:[#allocation2 + $0xaa8] sm:$0xff]  ;;  %v1797_v63 = vld [vmem:[#allocation2 + $0xb38] sm:$0xff] }
 0x2e0   : > { %14420 = vst [vmem:[#allocation344_spill] sm:$0xff] %v11812_v3 }
 0x2e1   : > { %7986 = vmatpush1.bf16.msra.mxu0 %v11792_v56  ;;  %v1725_v56 = vld [vmem:[#allocation2 + $0x8f8] sm:$0xff] }
 0x2e2   : > { %8050 = vmatpush1.bf16.msra.mxu1 %v8049_v20  ;;  %7988 = vmatprep.subr.bf16.mxu0 %v11795_v38  ;;  %v8057_v38 = vpack.c.bf16 %v2328_v0, %v2326_v39  ;;  %v11814_v58 = vpack.c.bf16 %v1725_v56, %v1707_v51  ;;  %v8061_v51 = vpack.c.bf16 %v2332_v44, %v2330_v40  ;;  %v2334_v39 = vld [vmem:[#allocation6 + $0x100] sm:$0xff]  ;;  %v2336_v0 = vld [vmem:[#allocation6 + $0x110] sm:$0xff]  ;;  %v1833_v44 = vld [vmem:[#allocation2 + $0xc58] sm:$0xff] }
 0x2e3   : > { %v11801_v45 = vpop.f32.mrb[0].mxu0  ;;  %v11803_v5 = vpop.f32.mrb[0].mxu1  ;;  %8052 = vmatprep.subr.bf16.mxu1 %v8051_v6  ;;  %v1706_v6 = vld [vmem:[#allocation2 + $0x860] sm:$0xff]  ;;  %v11821_v56 = vpack.c.bf16 %v1761_v22, %v1743_v29  ;;  %v11827_v22 = vpack.c.bf16 %v1797_v63, %v1779_v21  ;;  %v1869_v63 = vld [vmem:[#allocation2 + $0xd78] sm:$0xff] }
 0x2e4   : > { %14417 = vst [vmem:[#allocation341_spill] sm:$0xff] %v11803_v5  ;;  %v11807_v1 = vpop.f32.mrb[1].mxu0  ;;  %v11809_v20 = vpop.f32.mrb[1].mxu1  ;;  %14421 = vst [vmem:[#allocation345_spill] sm:$0xff] %v11814_v58  ;;  %v2337_v5 = vld [vmem:[#allocation6 + $0x118] sm:$0xff]  ;;  %v11818_v53 = vpack.c.bf16 %v1724_v24, %v1706_v6  ;;  %v1778_v29 = vld [vmem:[#allocation2 + $0xaa0] sm:$0xff] }
 0x2e5   : > { %14419 = vst [vmem:[#allocation343_spill] sm:$0xff] %v11809_v20  ;;  %7990 = vmatpush1.bf16.msra.mxu0 %v11798_v37  ;;  %v2335_v20 = vld [vmem:[#allocation6 + $0x108] sm:$0xff]  ;;  %14423 = vst [vmem:[#allocation347_spill] sm:$0xff] %v11821_v56  ;;  %v2341_v37 = vld [vmem:[#allocation6 + $0x138] sm:$0xff] }
 0x2e6   : > { %8054 = vmatpush1.bf16.msra.mxu1 %v8053_v9  ;;  %7992 = vmatprep.subr.bf16.mxu0 %v11805_v27  ;;  %14422 = vst [vmem:[#allocation346_spill] sm:$0xff] %v11818_v53  ;;  %v1742_v9 = vld [vmem:[#allocation2 + $0x980] sm:$0xff]  ;;  %v2339_v27 = vld [vmem:[#allocation6 + $0x128] sm:$0xff]  ;;  %14425 = vst [vmem:[#allocation349_spill] sm:$0xff] %v11827_v22 }
 0x2e7   : > { %8056 = vmatprep.subr.bf16.mxu1 %v8055_v28  ;;  %v8063_v28 = vpack.c.bf16 %v2337_v5, %v2335_v20  ;;  %v11824_v6 = vpack.c.bf16 %v1760_v50, %v1742_v9  ;;  %v1796_v24 = vld [vmem:[#allocation2 + $0xb30] sm:$0xff]  ;;  %v2338_v40 = vld [vmem:[#allocation6 + $0x120] sm:$0xff]  ;;  %v8067_v5 = vpack.c.bf16 %v2341_v37, %v2339_v27 }
 0x2e8   : > { %v2340_v20 = vld [vmem:[#allocation6 + $0x130] sm:$0xff]  ;;  %v11830_v9 = vpack.c.bf16 %v1796_v24, %v1778_v29  ;;  %v2342_v21 = vld [vmem:[#allocation6 + $0x140] sm:$0xff] }
 0x2e9   : > { %7994 = vmatpush1.bf16.msra.mxu0 %v11812_v3  ;;  %14424 = vst [vmem:[#allocation348_spill] sm:$0xff] %v11824_v6  ;;  %v2345_v3 = vld [vmem:[#allocation6 + $0x158] sm:$0xff]  ;;  %v2344_v27 = vld [vmem:[#allocation6 + $0x150] sm:$0xff] }
 0x2ea   : > { %8058 = vmatpush1.bf16.msra.mxu1 %v8057_v38  ;;  %7996 = vmatprep.subr.bf16.mxu0 %v11814_v58  ;;  %v8065_v38 = vpack.c.bf16 %v2336_v0, %v2334_v39  ;;  %v2343_v58 = vld [vmem:[#allocation6 + $0x148] sm:$0xff]  ;;  %14426 = vst [vmem:[#allocation350_spill] sm:$0xff] %v11830_v9  ;;  %v1814_v39 = vld [vmem:[#allocation2 + $0xbc0] sm:$0xff]  ;;  %v1832_v0 = vld [vmem:[#allocation2 + $0xc50] sm:$0xff] }
 0x2eb   : > { %8060 = vmatprep.subr.bf16.mxu1 %v8059_v10  ;;  %v1815_v10 = vld [vmem:[#allocation2 + $0xbc8] sm:$0xff]  ;;  %v8071_v37 = vpack.c.bf16 %v2345_v3, %v2343_v58  ;;  %v11836_v29 = vpack.c.bf16 %v1832_v0, %v1814_v39  ;;  %v2348_v3 = vld [vmem:[#allocation6 + $0x170] sm:$0xff] }
 0x2ec   : > { %v11833_v50 = vpack.c.bf16 %v1833_v44, %v1815_v10  ;;  %v2346_v10 = vld [vmem:[#allocation6 + $0x160] sm:$0xff]  ;;  %v1905_v44 = vld [vmem:[#allocation2 + $0xe98] sm:$0xff] }
 0x2ed   : > { %7998 = vmatpush1.bf16.msra.mxu0 %v11818_v53  ;;  %v2349_v53 = vld [vmem:[#allocation6 + $0x178] sm:$0xff]  ;;  %14428 = vst [vmem:[#allocation352_spill] sm:$0xff] %v11836_v29 }
 0x2ee   : > { %8062 = vmatpush1.bf16.msra.mxu1 %v8061_v51  ;;  %8000 = vmatprep.subr.bf16.mxu0 %v11821_v56  ;;  %v8069_v51 = vpack.c.bf16 %v2340_v20, %v2338_v40  ;;  %14427 = vst [vmem:[#allocation351_spill] sm:$0xff] %v11833_v50  ;;  %v2347_v56 = vld [vmem:[#allocation6 + $0x168] sm:$0xff]  ;;  %v1850_v40 = vld [vmem:[#allocation2 + $0xce0] sm:$0xff]  ;;  %v1868_v20 = vld [vmem:[#allocation2 + $0xd70] sm:$0xff] }
 0x2ef   : > { %8064 = vmatprep.subr.bf16.mxu1 %v8063_v28  ;;  %v1851_v28 = vld [vmem:[#allocation2 + $0xce8] sm:$0xff]  ;;  %v8075_v58 = vpack.c.bf16 %v2349_v53, %v2347_v56  ;;  %v11842_v39 = vpack.c.bf16 %v1868_v20, %v1850_v40  ;;  %v2352_v56 = vld [vmem:[#allocation6 + $0x190] sm:$0xff] }
 0x2f0   : > { %v11839_v24 = vpack.c.bf16 %v1869_v63, %v1851_v28  ;;  %v2350_v28 = vld [vmem:[#allocation6 + $0x180] sm:$0xff]  ;;  %v1941_v63 = vld [vmem:[#allocation2 + $0xfb8] sm:$0xff] }
 0x2f1   : > { %8002 = vmatpush1.bf16.msra.mxu0 %v11824_v6  ;;  %v2353_v6 = vld [vmem:[#allocation6 + $0x198] sm:$0xff]  ;;  %14430 = vst [vmem:[#allocation354_spill] sm:$0xff] %v11842_v39 }
 0x2f2   : > { %8066 = vmatpush1.bf16.msra.mxu1 %v8065_v38  ;;  %8004 = vmatprep.subr.bf16.mxu0 %v11827_v22  ;;  %v8073_v38 = vpack.c.bf16 %v2344_v27, %v2342_v21  ;;  %14429 = vst [vmem:[#allocation353_spill] sm:$0xff] %v11839_v24  ;;  %v2351_v22 = vld [vmem:[#allocation6 + $0x188] sm:$0xff]  ;;  %v1886_v21 = vld [vmem:[#allocation2 + $0xe00] sm:$0xff]  ;;  %v1904_v27 = vld [vmem:[#allocation2 + $0xe90] sm:$0xff] }
 0x2f3   : > { %8068 = vmatprep.subr.bf16.mxu1 %v8067_v5  ;;  %v1887_v5 = vld [vmem:[#allocation2 + $0xe08] sm:$0xff]  ;;  %v8079_v53 = vpack.c.bf16 %v2353_v6, %v2351_v22  ;;  %v11848_v40 = vpack.c.bf16 %v1904_v27, %v1886_v21  ;;  %v2356_v22 = vld [vmem:[#allocation6 + $0x1b0] sm:$0xff] }
 0x2f4   : > { %v11845_v0 = vpack.c.bf16 %v1905_v44, %v1887_v5  ;;  %v2354_v5 = vld [vmem:[#allocation6 + $0x1a0] sm:$0xff]  ;;  %v1977_v44 = vld [vmem:[#allocation2 + $0x10d8] sm:$0xff] }
 0x2f5   : > { %8006 = vmatpush1.bf16.msra.mxu0 %v11830_v9  ;;  %v2357_v9 = vld [vmem:[#allocation6 + $0x1b8] sm:$0xff]  ;;  %14432 = vst [vmem:[#allocation356_spill] sm:$0xff] %v11848_v40 }
 0x2f6   : > { %8070 = vmatpush1.bf16.msra.mxu1 %v8069_v51  ;;  %8008 = vmatprep.subr.bf16.mxu0 %v11833_v50  ;;  %v8077_v51 = vpack.c.bf16 %v2348_v3, %v2346_v10  ;;  %14431 = vst [vmem:[#allocation355_spill] sm:$0xff] %v11845_v0  ;;  %v2355_v50 = vld [vmem:[#allocation6 + $0x1a8] sm:$0xff]  ;;  %v1922_v10 = vld [vmem:[#allocation2 + $0xf20] sm:$0xff]  ;;  %v1940_v3 = vld [vmem:[#allocation2 + $0xfb0] sm:$0xff] }
 0x2f7   : > { %8072 = vmatprep.subr.bf16.mxu1 %v8071_v37  ;;  %v1923_v37 = vld [vmem:[#allocation2 + $0xf28] sm:$0xff]  ;;  %v8083_v6 = vpack.c.bf16 %v2357_v9, %v2355_v50  ;;  %v11854_v21 = vpack.c.bf16 %v1940_v3, %v1922_v10  ;;  %v2360_v50 = vld [vmem:[#allocation6 + $0x1d0] sm:$0xff] }
 0x2f8   : > { %v11851_v20 = vpack.c.bf16 %v1941_v63, %v1923_v37  ;;  %v2358_v37 = vld [vmem:[#allocation6 + $0x1c0] sm:$0xff]  ;;  %v2013_v63 = vld [vmem:[#allocation2 + $0x11f8] sm:$0xff] }
 0x2f9   : > { %8010 = vmatpush1.bf16.msra.mxu0 %v11836_v29  ;;  %v2361_v29 = vld [vmem:[#allocation6 + $0x1d8] sm:$0xff]  ;;  %14434 = vst [vmem:[#allocation358_spill] sm:$0xff] %v11854_v21 }
 0x2fa   : > { %8074 = vmatpush1.bf16.msra.mxu1 %v8073_v38  ;;  %8012 = vmatprep.subr.bf16.mxu0 %v11839_v24  ;;  %v8081_v38 = vpack.c.bf16 %v2352_v56, %v2350_v28  ;;  %14433 = vst [vmem:[#allocation357_spill] sm:$0xff] %v11851_v20  ;;  %v2359_v24 = vld [vmem:[#allocation6 + $0x1c8] sm:$0xff]  ;;  %v1958_v28 = vld [vmem:[#allocation2 + $0x1040] sm:$0xff]  ;;  %v1976_v56 = vld [vmem:[#allocation2 + $0x10d0] sm:$0xff] }
 0x2fb   : > { %8076 = vmatprep.subr.bf16.mxu1 %v8075_v58  ;;  %v1959_v58 = vld [vmem:[#allocation2 + $0x1048] sm:$0xff]  ;;  %v8087_v9 = vpack.c.bf16 %v2361_v29, %v2359_v24  ;;  %v11860_v10 = vpack.c.bf16 %v1976_v56, %v1958_v28  ;;  %v2362_v29 = vld [vmem:[#allocation6 + $0x1e0] sm:$0xff]  ;;  %v2364_v24 = vld [vmem:[#allocation6 + $0x1f0] sm:$0xff] }
 0x2fc   : > { %v11857_v27 = vpack.c.bf16 %v1977_v44, %v1959_v58  ;;  %v8093_v44 = vpack.c.bf16 %v2364_v24, %v2362_v29  ;;  %v14439_v56 = vld [vmem:[#allocation85_spill] sm:$0xff]  ;;  %v14449_v29 = vld [vmem:[#allocation95_spill] sm:$0xff]  ;;  %v14450_v24 = vld [vmem:[#allocation96_spill] sm:$0xff] }
 0x2fd   : > { %8014 = vmatpush1.bf16.msra.mxu0 %v11842_v39  ;;  %v2365_v39 = vld [vmem:[#allocation6 + $0x1f8] sm:$0xff]  ;;  %14436 = vst [vmem:[#allocation360_spill] sm:$0xff] %v11860_v10 }
 0x2fe   : > { %8078 = vmatpush1.bf16.msra.mxu1 %v8077_v51  ;;  %8016 = vmatprep.subr.bf16.mxu0 %v11845_v0  ;;  %v8085_v51 = vpack.c.bf16 %v2356_v22, %v2354_v5  ;;  %14435 = vst [vmem:[#allocation359_spill] sm:$0xff] %v11857_v27  ;;  %v2363_v0 = vld [vmem:[#allocation6 + $0x1e8] sm:$0xff]  ;;  %v1994_v5 = vld [vmem:[#allocation2 + $0x1160] sm:$0xff]  ;;  %v2012_v22 = vld [vmem:[#allocation2 + $0x11f0] sm:$0xff] }
 0x2ff   : > { %8080 = vmatprep.subr.bf16.mxu1 %v8079_v53  ;;  %v1995_v53 = vld [vmem:[#allocation2 + $0x1168] sm:$0xff]  ;;  %v11866_v58 = vpack.c.bf16 %v2012_v22, %v1994_v5  ;;  %v14446_v5 = vld [vmem:[#allocation92_spill] sm:$0xff]  ;;  %v14447_v22 = vld [vmem:[#allocation93_spill] sm:$0xff] }
 0x300   : > { %v11863_v3 = vpack.c.bf16 %v2013_v63, %v1995_v53  ;;  %v14443_v53 = vld [vmem:[#allocation89_spill] sm:$0xff]  ;;  %v14444_v63 = vld [vmem:[#allocation90_spill] sm:$0xff] }
 0x301   : > { %8018 = vmatpush1.bf16.msra.mxu0 %v11848_v40  ;;  %14438 = vst [vmem:[#allocation362_spill] sm:$0xff] %v11866_v58 }
 0x302   : > { %8082 = vmatpush1.bf16.msra.mxu1 %v8081_v38  ;;  %8020 = vmatprep.subr.bf16.mxu0 %v11851_v20  ;;  %v8089_v38 = vpack.c.bf16 %v2360_v50, %v2358_v37  ;;  %14437 = vst [vmem:[#allocation361_spill] sm:$0xff] %v11863_v3  ;;  %v14440_v37 = vld [vmem:[#allocation86_spill] sm:$0xff]  ;;  %v14442_v50 = vld [vmem:[#allocation88_spill] sm:$0xff] }
 0x303   : > { %8084 = vmatprep.subr.bf16.mxu1 %v8083_v6  ;;  %v8091_v6 = vpack.c.bf16 %v2365_v39, %v2363_v0 }
 0x305   : > { %8022 = vmatpush1.bf16.msra.mxu0 %v11854_v21 }
 0x306   : > { %8086 = vmatpush1.bf16.msra.mxu1 %v8085_v51  ;;  %8024 = vmatprep.subr.bf16.mxu0 %v11857_v27  ;;  %v14472_v27 = vld [vmem:[#allocation118_spill] sm:$0xff] }
 0x307   : > { %8088 = vmatprep.subr.bf16.mxu1 %v8087_v9  ;;  %v14441_v9 = vld [vmem:[#allocation87_spill] sm:$0xff] }
 0x309   : > { %8026 = vmatpush1.bf16.msra.mxu0 %v11860_v10 }
 0x30a   : > { %8090 = vmatpush1.bf16.msra.mxu1 %v8089_v38  ;;  %8028 = vmatprep.subr.bf16.mxu0 %v11863_v3  ;;  %v14445_v38 = vld [vmem:[#allocation91_spill] sm:$0xff] }
 0x30b   : > { %8092 = vmatprep.subr.bf16.mxu1 %v8091_v6  ;;  %v14448_v6 = vld [vmem:[#allocation94_spill] sm:$0xff] }
 0x30d   : > { %8030 = vmatpush1.bf16.msra.mxu0 %v11866_v58  ;;  %v14471_v58 = vld [vmem:[#allocation117_spill] sm:$0xff] }
 0x30e   : > { %8094 = vmatpush1.bf16.msra.mxu1 %v8093_v44  ;;  %8096 = vmatprep.subr.bf16.mxu0 %v10850_v7  ;;  %v14451_v44 = vld [vmem:[#allocation97_spill] sm:$0xff] }
 0x30f   : > { %8160 = vmatprep.subr.bf16.mxu1 %v10852_v8 }
 0x310   : > { %3207 = vmatmul.mubr.f32.vlgmr.msra.gmra.mrb[8].mxu0 %v11174_v2 }
 0x311   : > { %3861 = vmatmul.mubr.f32.vlgmr.msra.gmra.mrb[8].mxu1 %v11174_v2  ;;  %8098 = vmatpush1.bf16.msra.mxu0 %v10854_v12 }
 0x312   : > { %8162 = vmatpush1.bf16.msra.mxu1 %v10858_v16  ;;  %8100 = vmatprep.subr.bf16.mxu0 %v10860_v17 }
 0x313   : > { %8164 = vmatprep.subr.bf16.mxu1 %v10864_v23  ;;  %v14469_v23 = vld [vmem:[#allocation115_spill] sm:$0xff] }
 0x315   : > { %8102 = vmatpush1.bf16.msra.mxu0 %v10872_v31 }
 0x316   : > { %8166 = vmatpush1.bf16.msra.mxu1 %v10874_v32  ;;  %8104 = vmatprep.subr.bf16.mxu0 %v10876_v33 }
 0x317   : > { %8168 = vmatprep.subr.bf16.mxu1 %v10878_v34 }
 0x319   : > { %8106 = vmatpush1.bf16.msra.mxu0 %v10889_v46 }
 0x31a   : > { %8170 = vmatpush1.bf16.msra.mxu1 %v10891_v47  ;;  %8108 = vmatprep.subr.bf16.mxu0 %v10893_v48 }
 0x31b   : > { %8172 = vmatprep.subr.bf16.mxu1 %v10895_v49 }
 0x31d   : > { %8110 = vmatpush1.bf16.msra.mxu0 %v10902_v59  ;;  %v14475_v59 = vld [vmem:[#allocation341_spill] sm:$0xff] }
 0x31e   : > { %8174 = vmatpush1.bf16.msra.mxu1 %v10906_v60  ;;  %8112 = vmatprep.subr.bf16.mxu0 %v10908_v61 }
 0x31f   : > { %8176 = vmatprep.subr.bf16.mxu1 %v10910_v4 }
 0x321   : > { %8114 = vmatpush1.bf16.msra.mxu0 %v10916_v14 }
 0x322   : > { %8178 = vmatpush1.bf16.msra.mxu1 %v10920_v15  ;;  %8116 = vmatprep.subr.bf16.mxu0 %v10922_v18 }
 0x323   : > { %v11893_v39 = vpop.f32.mrb[2].mxu0  ;;  %v11895_v0 = vpop.f32.mrb[2].mxu1  ;;  %8180 = vmatprep.subr.bf16.mxu1 %v10925_v25  ;;  %v14468_v25 = vld [vmem:[#allocation114_spill] sm:$0xff] }
 0x324   : > { %v11898_v51 = vpop.f32.mrb[3].mxu0  ;;  %v11900_v28 = vpop.f32.mrb[3].mxu1 }
 0x325   : > { %8118 = vmatpush1.bf16.msra.mxu0 %v10928_v30 }
 0x326   : > { %8182 = vmatpush1.bf16.msra.mxu1 %v10933_v35  ;;  %8120 = vmatprep.subr.bf16.mxu0 %v10935_v36  ;;  %v14466_v35 = vld [vmem:[#allocation112_spill] sm:$0xff] }
 0x327   : > { %8184 = vmatprep.subr.bf16.mxu1 %v10938_v42  ;;  %v14464_v42 = vld [vmem:[#allocation110_spill] sm:$0xff] }
 0x329   : > { %8122 = vmatpush1.bf16.msra.mxu0 %v10941_v52 }
 0x32a   : > { %8186 = vmatpush1.bf16.msra.mxu1 %v10945_v54  ;;  %8124 = vmatprep.subr.bf16.mxu0 %v10947_v55  ;;  %v14462_v54 = vld [vmem:[#allocation108_spill] sm:$0xff] }
 0x32b   : > { %8188 = vmatprep.subr.bf16.mxu1 %v10950_v62  ;;  %v14460_v62 = vld [vmem:[#allocation106_spill] sm:$0xff] }
 0x32d   : > { %8126 = vmatpush1.bf16.msra.mxu0 %v10953_v11 }
 0x32e   : > { %8190 = vmatpush1.bf16.msra.mxu1 %v10957_v13  ;;  %8128 = vmatprep.subr.bf16.mxu0 %v10959_v19  ;;  %v14458_v13 = vld [vmem:[#allocation104_spill] sm:$0xff] }
 0x32f   : > { %8192 = vmatprep.subr.bf16.mxu1 %v10962_v26  ;;  %v14456_v26 = vld [vmem:[#allocation102_spill] sm:$0xff] }
 0x331   : > { %8130 = vmatpush1.bf16.msra.mxu0 %v10965_v41 }
 0x332   : > { %8194 = vmatpush1.bf16.msra.mxu1 %v10969_v43  ;;  %8132 = vmatprep.subr.bf16.mxu0 %v14439_v56  ;;  %v14454_v43 = vld [vmem:[#allocation100_spill] sm:$0xff] }
 0x333   : > { %8196 = vmatprep.subr.bf16.mxu1 %v14440_v37  ;;  %v14452_v37 = vld [vmem:[#allocation98_spill] sm:$0xff] }
 0x335   : > { %8134 = vmatpush1.bf16.msra.mxu0 %v14441_v9 }
 0x336   : > { %8198 = vmatpush1.bf16.msra.mxu1 %v14442_v50  ;;  %8136 = vmatprep.subr.bf16.mxu0 %v14443_v53  ;;  %v14453_v50 = vld [vmem:[#allocation99_spill] sm:$0xff] }
 0x337   : > { %8200 = vmatprep.subr.bf16.mxu1 %v14444_v63  ;;  %v14455_v63 = vld [vmem:[#allocation101_spill] sm:$0xff] }
 0x339   : > { %8138 = vmatpush1.bf16.msra.mxu0 %v14445_v38 }
 0x33a   : > { %8202 = vmatpush1.bf16.msra.mxu1 %v14446_v5  ;;  %8140 = vmatprep.subr.bf16.mxu0 %v14447_v22  ;;  %v14457_v5 = vld [vmem:[#allocation103_spill] sm:$0xff] }
 0x33b   : > { %8204 = vmatprep.subr.bf16.mxu1 %v14448_v6  ;;  %v14459_v6 = vld [vmem:[#allocation105_spill] sm:$0xff] }
 0x33d   : > { %8142 = vmatpush1.bf16.msra.mxu0 %v14449_v29 }
 0x33e   : > { %8206 = vmatpush1.bf16.msra.mxu1 %v14450_v24  ;;  %8144 = vmatprep.subr.bf16.mxu0 %v14451_v44  ;;  %v14461_v24 = vld [vmem:[#allocation107_spill] sm:$0xff] }
 0x33f   : > { %8208 = vmatprep.subr.bf16.mxu1 %v14452_v37  ;;  %v14463_v37 = vld [vmem:[#allocation109_spill] sm:$0xff] }
 0x341   : > { %8146 = vmatpush1.bf16.msra.mxu0 %v14453_v50 }
 0x342   : > { %8210 = vmatpush1.bf16.msra.mxu1 %v14454_v43  ;;  %8148 = vmatprep.subr.bf16.mxu0 %v14455_v63  ;;  %v14465_v43 = vld [vmem:[#allocation111_spill] sm:$0xff] }
 0x343   : > { %8212 = vmatprep.subr.bf16.mxu1 %v14456_v26  ;;  %v14467_v26 = vld [vmem:[#allocation113_spill] sm:$0xff] }
 0x345   : > { %8150 = vmatpush1.bf16.msra.mxu0 %v14457_v5 }
 0x346   : > { %8214 = vmatpush1.bf16.msra.mxu1 %v14458_v13  ;;  %8152 = vmatprep.subr.bf16.mxu0 %v14459_v6  ;;  %v3902_v6 = vpop.permute.xlu0 %3901 }
 0x347   : > { %8216 = vmatprep.subr.bf16.mxu1 %v14460_v62 }
 0x349   : > { %8154 = vmatpush1.bf16.msra.mxu0 %v14461_v24 }
 0x34a   : > { %8218 = vmatpush1.bf16.msra.mxu1 %v14462_v54  ;;  %8156 = vmatprep.subr.bf16.mxu0 %v14463_v37 }
 0x34b   : > { %8220 = vmatprep.subr.bf16.mxu1 %v14464_v42 }
 0x34d   : > { %8158 = vmatpush1.bf16.msra.mxu0 %v14465_v43 }
 0x34e   : > { %8222 = vmatpush1.bf16.msra.mxu1 %v14466_v35  ;;  %8224 = vmatprep.subr.bf16.mxu0 %v14467_v26  ;;  %v3870_v35 = vpop.permute.xlu1 %3869  ;;  %v14470_v26 = vld [vmem:[#allocation116_spill] sm:$0xff] }
 0x34f   : > { %8288 = vmatprep.subr.bf16.mxu1 %v14468_v25 }
 0x352   : > { %v3886_v47 = vpop.permute.xlu1 %3885 }
 0x356   : > { %v3918_v20 = vpop.permute.xlu1 %3917 }
 0x35a   : > { %v3935_v55 = vpop.permute.xlu1 %3934 }
 0x363   : > { %v11946_v13 = vpop.f32.mrb[4].mxu0 }
 0x364   : > { %v11948_v15 = vpop.f32.mrb[4].mxu1  ;;  %v11950_v62 = vpop.f32.mrb[5].mxu0 }
 0x365   : > { %v11952_v4 = vpop.f32.mrb[5].mxu1 }
 0x3a3   : > { %v11954_v54 = vpop.f32.mrb[6].mxu0 }
 0x3a4   : > { %v11956_v60 = vpop.f32.mrb[6].mxu1  ;;  %v11958_v42 = vpop.f32.mrb[7].mxu0 }
 0x3a5   : > { %v11960_v49 = vpop.f32.mrb[7].mxu1 }
 0x3e3   : > { %v11962_v34 = vpop.f32.mrb[8].mxu0 }
 0x3e4   : > { %v3862_v25 = vpop.f32.mrb[8].mxu1  ;;  %v11964_v32 = vpop.f32.mrb[9].mxu0 }
 0x3e5   : > { %v3875_v16 = vrot.slane %v3862_v25, %v14469_v23  ;;  %v3891_v8 = vrot.slane %v3862_v25, %v14470_v26  ;;  %v3864_v43 = vpop.f32.mrb[9].mxu1  ;;  %v3907_v37 = vrot.slane %v3862_v25, %v14471_v58  ;;  %v3923_v5 = vrot.slane %v3862_v25, %v14472_v27 }
 0x3e6   : > { %v3879_v3 = vrot.slane %v3864_v43, %v14469_v23  ;;  %v3895_v24 = vrot.slane %v3864_v43, %v14470_v26  ;;  %v3911_v10 = vrot.slane %v3864_v43, %v14471_v58  ;;  %v3927_v50 = vrot.slane %v3864_v43, %v14472_v27 }
 0x3e7   : > { %v3880_v21 = vmul.f32 %v3875_v16, %v3870_v35  ;;  %v3896_v63 = vmul.f32 %v3891_v8, %v3886_v47  ;;  %v3912_v22 = vmul.f32 %v3907_v37, %v3902_v6  ;;  %v3928_v9 = vmul.f32 %v3923_v5, %v3918_v20 }
 0x3e8   : > { %v3881_v40 = vmul.f32 %v3879_v3, %v3870_v35  ;;  %v3897_v44 = vmul.f32 %v3895_v24, %v3886_v47  ;;  %v3913_v53 = vmul.f32 %v3911_v10, %v3902_v6  ;;  %v3929_v41 = vmul.f32 %v3927_v50, %v3918_v20  ;;  %v1404_v20 = vld [vmem:[%s14473_s22] sm:$0xf]  ;;  %v1409_v6 = vld [vmem:[#allocation13] sm:$0xf]  ;;  %s14489_s22 = sld [smem:[#allocation30_spill]] }
 0x3e9   : > { %v3898_v29 = vadd.f32 %v3896_v63, %v3880_v21  ;;  %v14046_v10 = vmov 11   ;;  %v3227_v24 = vrot.slane %v11801_v45, %v14469_v23 }
 0x3ea   : > { %v3899_v38 = vadd.f32 %v3897_v44, %v3881_v40  ;;  %v3231_v44 = vrot.slane %v11807_v1, %v14469_v23 }
 0x3eb   : > { %v3914_v56 = vadd.f32 %v3912_v22, %v3898_v29 }
 0x3ec   : > { %v3915_v19 = vadd.f32 %v3913_v53, %v3899_v38 }
 0x3ed   : > { %v3930_v11 = vadd.f32 %v3928_v9, %v3914_v56 }
 0x3ee   : > { %v3931_v25 = vadd.f32 %v3929_v41, %v3915_v19  ;;  %v14042_v19 = vmov 19   ;;  %v14043_v41 = vmov 20  }
 0x3ef   : > { %v3937_v16 = vadd.f32 %v3935_v55, %v3930_v11  ;;  %v11985_v11 = vld [vmem:[%s14183_s15] sm:$0xf] }
 0x3f0   : > { %v3938_v8 = vadd.f32 %v3935_v55, %v3931_v25  ;;  %v14044_v55 = vmov 14  }
 0x3f1   : > { %v11975_v43 = vsub.f32 %v11174_v2, %v3937_v16  ;;  %v14474_v2 = vmov 0   ;;  %v3243_v16 = vrot.slane %v11801_v45, %v14470_v26 }
 0x3f2   : > { %v11978_v47 = vsub.f32 %v11176_v57, %v3938_v8  ;;  %v11995_v57 = vpop.permute.xlu1 %3943  ;;  %v3247_v8 = vrot.slane %v11807_v1, %v14470_v26 }
 0x3f3   : > { %v4028_v35 = vsel %vm4027_vm0, %v11975_v43, 0.0 }
 0x3f4   : > { %v4029_v40 = vsel %vm4027_vm0, %v11978_v47, 0.0 }
 0x3f5   : > { %v4030_v21 = vadd.f32 %v4029_v40, %v4028_v35 }
 0x3f6   : > { %v11997_v3 = vpop.permute.xlu1 %3959 }
 0x3f7   : > { %4031 = vadd.xlane.f32.xlu0 %v4030_v21 }
 0x3fa   : > { %v11999_v56 = vpop.permute.xlu1 %3975 }
 0x3fe   : > { %v3222_v37 = vpop.permute.xlu1 %3221 }
 0x402   : > { %v12001_v9 = vpop.permute.xlu1 %3991 }
 0x406   : > { %v3238_v50 = vpop.permute.xlu1 %3237 }
 0x407   : > { %v3249_v52 = vmul.f32 %v3247_v8, %v3238_v50 }
 0x40a   : > { %v3254_v53 = vpop.permute.xlu1 %3253 }
 0x40d   : > { %3215 = vperm.xlu0 %9769, %v1404_v20   ;;  %v3259_v20 = vrot.slane %v11801_v45, %v14471_v58 }
 0x40e   : > { %v12003_v63 = vpop.permute.xlu1 %4008 }
 0x411   : > { %9781 = vset.pattern.permute.xlu0 %v14046_v10  ;;  %v3275_v10 = vrot.slane %v11801_v45, %v14472_v27 }
 0x412   : > { %3397 = vperm.xlu0 %9781, %v11985_v11   ;;  %v3270_v22 = vpop.permute.xlu1 %3269 }
 0x416   : > { %9784 = vset.pattern.permute.xlu0 %v14044_v55  ;;  %v3286_v55 = vpop.permute.xlu1 %3285 }
 0x417   : > { %3445 = vperm.xlu0 %9784, %v11985_v11  }
 0x41a   : > { %v3302_v8 = vpop.permute.xlu1 %3301 }
 0x41b   : > { %9789 = vset.pattern.permute.xlu0 %v14042_v19  ;;  %v3232_v19 = vmul.f32 %v3227_v24, %v3222_v37 }
 0x41c   : > { %3525 = vperm.xlu0 %9789, %v11985_v11  }
 0x420   : > { %9792 = vset.pattern.permute.xlu0 %v14043_v41  ;;  %v3233_v41 = vmul.f32 %v3231_v44, %v3222_v37  ;;  %v14476_v37 = vld [vmem:[#allocation343_spill] sm:$0xff]  ;;  %v3264_v44 = vmul.f32 %v3259_v20, %v3254_v53 }
 0x421   : > { %3541 = vperm.xlu0 %9792, %v11985_v11   ;;  %v3295_v24 = vrot.slane %v14476_v37, %v14469_v23 }
 0x423   : > { %v3297_v33 = vmul.f32 %v3295_v24, %v3286_v55  ;;  %v1411_v24 = vld [vmem:[#allocation15] sm:$0xf] }
 0x425   : > { %9795 = vset.pattern.permute.xlu0 %v14474_v2 }
 0x484   : > { %v4032_v38 = vpop.xlane.xlu0 %4031 }
 0x485   : > { %v4034_v5 = vmul.f32 0.00390625, %v4032_v38  ;;  %v3263_v38 = vrot.slane %v11807_v1, %v14471_v58 }
 0x487   : > { %v4044_v29 = vrot.slane %v4034_v5, %v14470_v26  ;;  %v4038_v25 = vrot.slane %v4034_v5, %v14469_v23  ;;  %v4054_v40 = vrot.slane %v4034_v5, %v14471_v58  ;;  %v4064_v61 = vrot.slane %v4034_v5, %v14472_v27 }
 0x488   : > { %v3265_v48 = vmul.f32 %v3263_v38, %v3254_v53 }
 0x489   : > { %v4045_v35 = vmul.f32 %v4044_v29, %v1409_v6  ;;  %v12016_v21 = vmul.f32 %v4038_v25, %v1409_v6  ;;  %v3279_v29 = vrot.slane %v11807_v1, %v14472_v27  ;;  %v3248_v25 = vmul.f32 %v3243_v16, %v3238_v50 }
 0x48a   : > { %v4055_v14 = vmul.f32 %v4054_v40, %v1409_v6  ;;  %v3280_v1 = vmul.f32 %v3275_v10, %v3270_v22  ;;  %v4065_v16 = vmul.f32 %v4064_v61, %v1409_v6  ;;  %v14074_v61 = vmov 12  }
 0x48b   : > { %4047 = vrot.lane.b32.xlu1 %v4045_v35, %s10381_s11  ;;  %v3291_v35 = vrot.slane %v14475_v59, %v14469_v23  ;;  %v14073_v6 = vmov 15  }
 0x48c   : > { %v3216_v36 = vpop.permute.xlu0 %3215 }
 0x48d   : > { %v3234_v30 = vadd.f32 %v3232_v19, %v3216_v36  ;;  %v3235_v18 = vadd.f32 %v3233_v41, %v3216_v36  ;;  %v3307_v19 = vrot.slane %v14475_v59, %v14470_v26  ;;  %v3311_v36 = vrot.slane %v14476_v37, %v14470_v26 }
 0x48e   : > { %v3281_v41 = vmul.f32 %v3279_v29, %v3270_v22  ;;  %v3296_v40 = vmul.f32 %v3291_v35, %v3286_v55  ;;  %v14477_v22 = vmov 7   ;;  %v14078_v55 = vmov 13  }
 0x48f   : > { %v3250_v45 = vadd.f32 %v3248_v25, %v3234_v30  ;;  %v3251_v46 = vadd.f32 %v3249_v52, %v3235_v18  ;;  %4057 = vrot.lane.b32.xlu1 %v4055_v14, %s10382_s9  ;;  %v3312_v18 = vmul.f32 %v3307_v19, %v3302_v8  ;;  %v3313_v14 = vmul.f32 %v3311_v36, %v3302_v8  ;;  %s14616_s9 = sld [smem:[#allocation39_spill]] }
 0x490   : > { %v14077_v29 = vmov 16   ;;  %v14076_v25 = vmov 17   ;;  %v14072_v35 = vmov 18   ;;  %v14065_v19 = vmov 22  }
 0x491   : > { %v3266_v50 = vadd.f32 %v3264_v44, %v3250_v45  ;;  %v3267_v5 = vadd.f32 %v3265_v48, %v3251_v46  ;;  %v14080_v46 = vmov 8   ;;  %v14075_v48 = vmov 9  }
 0x492   : > { %v14478_v44 = vmov 1   ;;  %v14479_v45 = vmov 2   ;;  %v10395_v36 = vmov 23  }
 0x493   : > { %v3282_v20 = vadd.f32 %v3280_v1, %v3266_v50  ;;  %v3283_v53 = vadd.f32 %v3281_v41, %v3267_v5  ;;  %4067 = vrot.lane.b32.xlu1 %v4065_v16, %s10383_s10  ;;  %v14069_v1 = vmov 21   ;;  %v14060_v41 = vmov 24   ;;  %s14629_s10 = sld [smem:[#allocation40_spill]] }
 0x494   : > { %v14059_v50 = vmov 25   ;;  %v14058_v5 = vmov 27   ;;  %v14070_v16 = vmov 28  }
 0x495   : > { %v3298_v30 = vadd.f32 %v3296_v40, %v3282_v20  ;;  %v3299_v52 = vadd.f32 %v3297_v33, %v3283_v53  ;;  %v14079_v33 = vmov 10   ;;  %v14061_v40 = vmov 30  }
 0x497   : > { %3317 = vperm.xlu1 %9776, %v11985_v11   ;;  %v12037_v10 = vadd.f32 %v3312_v18, %v3298_v30  ;;  %v12039_v38 = vadd.f32 %v3313_v14, %v3299_v52  ;;  %v14064_v14 = vmov 31   ;;  %v1410_v30 = vld [vmem:[%s14480_s1] sm:$0xf]  ;;  %s14716_s1 = sld [smem:[#allocation41_spill]] }
 0x49b   : > { %9777 = vset.pattern.permute.xlu1 %v14477_v22 }
 0x49c   : > { %3333 = vperm.xlu1 %9777, %v11985_v11  }
 0x4a0   : > { %9778 = vset.pattern.permute.xlu1 %v14080_v46 }
 0x4a1   : > { %3349 = vperm.xlu1 %9778, %v11985_v11  }
 0x4a5   : > { %9779 = vset.pattern.permute.xlu1 %v14075_v48 }
 0x4a6   : > { %3365 = vperm.xlu1 %9779, %v11985_v11  }
 0x4aa   : > { %9780 = vset.pattern.permute.xlu1 %v14079_v33 }
 0x4ab   : > { %3381 = vperm.xlu1 %9780, %v11985_v11  }
 0x4af   : > { %9782 = vset.pattern.permute.xlu1 %v14074_v61 }
 0x4b0   : > { %3413 = vperm.xlu1 %9782, %v11985_v11  }
 0x4b4   : > { %9783 = vset.pattern.permute.xlu1 %v14078_v55 }
 0x4b5   : > { %3429 = vperm.xlu1 %9783, %v11985_v11  }
 0x4b9   : > { %9785 = vset.pattern.permute.xlu1 %v14073_v6 }
 0x4ba   : > { %3461 = vperm.xlu1 %9785, %v11985_v11  }
 0x4be   : > { %9786 = vset.pattern.permute.xlu1 %v14077_v29 }
 0x4bf   : > { %3477 = vperm.xlu1 %9786, %v11985_v11  }
 0x4c3   : > { %9787 = vset.pattern.permute.xlu1 %v14076_v25 }
 0x4c4   : > { %3493 = vperm.xlu1 %9787, %v11985_v11  }
 0x4c8   : > { %9788 = vset.pattern.permute.xlu1 %v14072_v35 }
 0x4c9   : > { %3509 = vperm.xlu1 %9788, %v11985_v11  }
 0x4cd   : > { %9790 = vset.pattern.permute.xlu1 %v14474_v2 }
 0x4ce   : > { %4083 = vperm.xlu1 %9790, %v1411_v24  }
 0x4d2   : > { %9791 = vset.pattern.permute.xlu1 %v14478_v44 }
 0x4d3   : > { %4099 = vperm.xlu1 %9791, %v1411_v24  }
 0x4d7   : > { %9793 = vset.pattern.permute.xlu1 %v14479_v45 }
 0x4d8   : > { %4115 = vperm.xlu1 %9793, %v1411_v24  }
 0x4dc   : > { %9794 = vset.pattern.permute.xlu1 %v14069_v1 }
 0x4dd   : > { %3557 = vperm.xlu1 %9794, %v11985_v11  }
 0x4e1   : > { %9797 = vset.pattern.permute.xlu1 %v14065_v19 }
 0x4e2   : > { %3573 = vperm.xlu1 %9797, %v11985_v11  }
 0x4e6   : > { %9798 = vset.pattern.permute.xlu1 %v10395_v36 }
 0x4e7   : > { %3589 = vperm.xlu1 %9798, %v11985_v11  }
 0x4eb   : > { %9800 = vset.pattern.permute.xlu1 %v14060_v41  ;;  %v14063_v41 = vmov 33  }
 0x4ec   : > { %3605 = vperm.xlu1 %9800, %v11985_v11  }
 0x4f0   : > { %9801 = vset.pattern.permute.xlu1 %v14059_v50 }
 0x4f1   : > { %3621 = vperm.xlu1 %9801, %v11985_v11  }
 0x4f5   : > { %9803 = vset.pattern.permute.xlu1 %v14058_v5 }
 0x4f6   : > { %3653 = vperm.xlu1 %9803, %v11985_v11  }
 0x4fa   : > { %9804 = vset.pattern.permute.xlu1 %v14070_v16 }
 0x4fb   : > { %3669 = vperm.xlu1 %9804, %v11985_v11  }
 0x4fd   : > { %v4048_v8 = vpop.permute.xlu1 %4047 }
 0x4fe   : > { %v4050_v53 = vadd.f32 %v4048_v8, %v12016_v21  ;;  %v14482_v21 = vmov 3   ;;  %v1412_v8 = vld [vmem:[%s14481_s28] sm:$0xf]  ;;  %s14725_s28 = sld [smem:[#allocation42_spill]] }
 0x4ff   : > { %9806 = vset.pattern.permute.xlu1 %v14061_v40  ;;  %v14062_v40 = vmov 34  }
 0x500   : > { %3701 = vperm.xlu1 %9806, %v11985_v11  }
 0x501   : > { %v4058_v20 = vpop.permute.xlu1 %4057 }
 0x502   : > { %v4060_v18 = vadd.f32 %v4058_v20, %v4050_v53 }
 0x504   : > { %9807 = vset.pattern.permute.xlu1 %v14064_v14 }
 0x505   : > { %3717 = vperm.xlu1 %9807, %v11985_v11   ;;  %v4068_v52 = vpop.permute.xlu1 %4067 }
 0x506   : > { %v4070_v5 = vadd.f32 %v4068_v52, %v4060_v18 }
 0x508   : > { %v4071_v50 = vadd.f32 %v4070_v5, %v1410_v30  ;;  %v3323_v5 = vrot.slane %v14475_v59, %v14471_v58  ;;  %v14071_v30 = vmov 26  }
 0x509   : > { %9809 = vset.pattern.permute.xlu1 %v14063_v41 }
 0x50a   : > { %3749 = vperm.xlu1 %9809, %v11985_v11   ;;  %4074 = vperm.xlu0 %9795, %v4071_v50   ;;  %v3327_v50 = vrot.slane %v14476_v37, %v14471_v58 }
 0x50e   : > { %9810 = vset.pattern.permute.xlu1 %v14062_v40  ;;  %9796 = vset.pattern.permute.xlu0 %v14482_v21  ;;  %v3343_v40 = vrot.slane %v14476_v37, %v14472_v27  ;;  %v14068_v37 = vmov 32  }
 0x50f   : > { %3765 = vperm.xlu1 %9810, %v11985_v11   ;;  %4131 = vperm.xlu0 %9796, %v1411_v24  }
 0x513   : > { %9799 = vset.pattern.permute.xlu0 %v14474_v2  ;;  %9812 = vset.pattern.permute.xlu1 %v14474_v2 }
 0x514   : > { %4148 = vperm.xlu0 %9799, %v1412_v8   ;;  %v3339_v8 = vrot.slane %v14475_v59, %v14472_v27 }
 0x516   : > { %v3318_v20 = vpop.permute.xlu1 %3317 }
 0x517   : > { %v3328_v53 = vmul.f32 %v3323_v5, %v3318_v20  ;;  %v3329_v18 = vmul.f32 %v3327_v50, %v3318_v20  ;;  %v14066_v5 = vmov 29  }
 0x518   : > { %9802 = vset.pattern.permute.xlu0 %v14071_v30 }
 0x519   : > { %v3330_v24 = vadd.f32 %v3328_v53, %v12037_v10  ;;  %v3331_v52 = vadd.f32 %v3329_v18, %v12039_v38  ;;  %3637 = vperm.xlu0 %9802, %v11985_v11   ;;  %v3355_v10 = vrot.slane %v11893_v39, %v14469_v23  ;;  %v3359_v38 = vrot.slane %v11898_v51, %v14469_v23 }
 0x51b   : > { %v3334_v41 = vpop.permute.xlu1 %3333 }
 0x51c   : > { %v3344_v14 = vmul.f32 %v3339_v8, %v3334_v41  ;;  %v3345_v19 = vmul.f32 %v3343_v40, %v3334_v41 }
 0x51d   : > { %9805 = vset.pattern.permute.xlu0 %v14066_v5  ;;  %v14067_v5 = vmov 35  }
 0x51e   : > { %v3346_v50 = vadd.f32 %v3344_v14, %v3330_v24  ;;  %v3347_v20 = vadd.f32 %v3345_v19, %v3331_v52  ;;  %3685 = vperm.xlu0 %9805, %v11985_v11   ;;  %v3371_v19 = vrot.slane %v11893_v39, %v14470_v26  ;;  %v3375_v14 = vrot.slane %v11898_v51, %v14470_v26 }
 0x520   : > { %v3350_v59 = vpop.permute.xlu1 %3349 }
 0x521   : > { %v3360_v53 = vmul.f32 %v3355_v10, %v3350_v59  ;;  %v3361_v18 = vmul.f32 %v3359_v38, %v3350_v59  ;;  %v3398_v59 = vpop.permute.xlu0 %3397 }
 0x522   : > { %9808 = vset.pattern.permute.xlu0 %v14068_v37 }
 0x523   : > { %v3362_v41 = vadd.f32 %v3360_v53, %v3346_v50  ;;  %v3363_v40 = vadd.f32 %v3361_v18, %v3347_v20  ;;  %3733 = vperm.xlu0 %9808, %v11985_v11   ;;  %v3387_v50 = vrot.slane %v11893_v39, %v14471_v58  ;;  %v3391_v20 = vrot.slane %v11898_v51, %v14471_v58 }
 0x524   : > { %v3403_v18 = vrot.slane %v11893_v39, %v14472_v27 }
 0x525   : > { %v3366_v24 = vpop.permute.xlu1 %3365 }
 0x526   : > { %v3376_v52 = vmul.f32 %v3371_v19, %v3366_v24  ;;  %v3377_v8 = vmul.f32 %v3375_v14, %v3366_v24  ;;  %v3407_v19 = vrot.slane %v11898_v51, %v14472_v27 }
 0x527   : > { %9811 = vset.pattern.permute.xlu0 %v14067_v5  ;;  %v3423_v5 = vrot.slane %v11900_v28, %v14469_v23 }
 0x528   : > { %v3378_v10 = vadd.f32 %v3376_v52, %v3362_v41  ;;  %v3379_v38 = vadd.f32 %v3377_v8, %v3363_v40  ;;  %3781 = vperm.xlu0 %9811, %v11985_v11   ;;  %v3408_v41 = vmul.f32 %v3403_v18, %v3398_v59  ;;  %v3409_v11 = vmul.f32 %v3407_v19, %v3398_v59 }
 0x529   : > { %v3419_v8 = vrot.slane %v11895_v0, %v14469_v23  ;;  %v3455_v18 = vrot.slane %v11900_v28, %v14471_v58 }
 0x52a   : > { %v3382_v53 = vpop.permute.xlu1 %3381 }
 0x52b   : > { %v3392_v14 = vmul.f32 %v3387_v50, %v3382_v53  ;;  %v3393_v24 = vmul.f32 %v3391_v20, %v3382_v53  ;;  %v3435_v20 = vrot.slane %v11895_v0, %v14470_v26  ;;  %v3451_v53 = vrot.slane %v11895_v0, %v14471_v58 }
 0x52c   : > { %9814 = vset.pattern.permute.xlu0 %v14479_v45 }
 0x52d   : > { %v3394_v40 = vadd.f32 %v3392_v14, %v3378_v10  ;;  %v3395_v52 = vadd.f32 %v3393_v24, %v3379_v38  ;;  %v3439_v10 = vrot.slane %v11900_v28, %v14470_v26  ;;  %v3446_v38 = vpop.permute.xlu0 %3445 }
 0x52e   : > { %v3456_v24 = vmul.f32 %v3451_v53, %v3446_v38  ;;  %v3503_v53 = vrot.slane %v11950_v62, %v14470_v26 }
 0x52f   : > { %v3414_v37 = vpop.permute.xlu1 %3413  ;;  %v3410_v1 = vadd.f32 %v3408_v41, %v3394_v40  ;;  %v3411_v39 = vadd.f32 %v3409_v11, %v3395_v52 }
 0x530   : > { %v3424_v16 = vmul.f32 %v3419_v8, %v3414_v37  ;;  %v3425_v30 = vmul.f32 %v3423_v5, %v3414_v37  ;;  %v3457_v5 = vmul.f32 %v3455_v18, %v3446_v38  ;;  %v3471_v37 = vrot.slane %v11900_v28, %v14472_v27 }
 0x531   : > { %v3499_v28 = vrot.slane %v11946_v13, %v14470_v26  ;;  %v3526_v18 = vpop.permute.xlu0 %3525 }
 0x532   : > { %v3426_v51 = vadd.f32 %v3424_v16, %v3410_v1  ;;  %v3427_v50 = vadd.f32 %v3425_v30, %v3411_v39  ;;  %v3467_v30 = vrot.slane %v11895_v0, %v14472_v27 }
 0x534   : > { %v3430_v59 = vpop.permute.xlu1 %3429 }
 0x535   : > { %v3440_v19 = vmul.f32 %v3435_v20, %v3430_v59  ;;  %v3441_v14 = vmul.f32 %v3439_v10, %v3430_v59  ;;  %v3483_v20 = vrot.slane %v11946_v13, %v14469_v23 }
 0x537   : > { %v3442_v1 = vadd.f32 %v3440_v19, %v3426_v51  ;;  %v3443_v16 = vadd.f32 %v3441_v14, %v3427_v50  ;;  %v3487_v51 = vrot.slane %v11950_v62, %v14469_v23  ;;  %v12151_v14 = vld [vmem:[#allocation9] sm:$0xf] }
 0x538   : > { %2504 = vperm.xlu1 %9812, %v12151_v14   ;;  %2520 = vperm.xlu0 %9814, %v12151_v14  }
 0x539   : > { %v3462_v41 = vpop.permute.xlu1 %3461  ;;  %v3458_v11 = vadd.f32 %v3456_v24, %v3442_v1  ;;  %v3459_v40 = vadd.f32 %v3457_v5, %v3443_v16 }
 0x53a   : > { %v3472_v52 = vmul.f32 %v3467_v30, %v3462_v41  ;;  %v3473_v8 = vmul.f32 %v3471_v37, %v3462_v41  ;;  %v3519_v30 = vrot.slane %v11950_v62, %v14471_v58  ;;  %v3531_v37 = vrot.slane %v11946_v13, %v14472_v27 }
 0x53c   : > { %v3474_v39 = vadd.f32 %v3472_v52, %v3458_v11  ;;  %v3475_v35 = vadd.f32 %v3473_v8, %v3459_v40  ;;  %9813 = vset.pattern.permute.xlu1 %v14478_v44  ;;  %v14483_v11 = vmov 5   ;;  %v3535_v40 = vrot.slane %v11950_v62, %v14472_v27  ;;  %v3542_v52 = vpop.permute.xlu0 %3541 }
 0x53d   : > { %9817 = vset.pattern.permute.xlu0 %v14483_v11  ;;  %2512 = vperm.xlu1 %9813, %v12151_v14  }
 0x53e   : > { %v3478_v50 = vpop.permute.xlu1 %3477  ;;  %2544 = vperm.xlu0 %9817, %v12151_v14  }
 0x53f   : > { %v3488_v10 = vmul.f32 %v3483_v20, %v3478_v50  ;;  %v3489_v38 = vmul.f32 %v3487_v51, %v3478_v50  ;;  %v3547_v20 = vrot.slane %v11948_v15, %v14469_v23  ;;  %v3536_v51 = vmul.f32 %v3531_v37, %v3526_v18 }
 0x540   : > { %v3537_v50 = vmul.f32 %v3535_v40, %v3526_v18  ;;  %v3965_v18 = vrot.slane %v11975_v43, %v14470_v26 }
 0x541   : > { %v3490_v0 = vadd.f32 %v3488_v10, %v3474_v39  ;;  %v3491_v59 = vadd.f32 %v3489_v38, %v3475_v35  ;;  %v3515_v35 = vrot.slane %v11946_v13, %v14471_v58  ;;  %v3551_v13 = vrot.slane %v11952_v4, %v14469_v23  ;;  %9815 = vset.pattern.permute.xlu1 %v14482_v21 }
 0x542   : > { %9820 = vset.pattern.permute.xlu0 %v14474_v2  ;;  %2528 = vperm.xlu1 %9815, %v12151_v14  }
 0x543   : > { %v3494_v19 = vpop.permute.xlu1 %3493 }
 0x544   : > { %v3504_v24 = vmul.f32 %v3499_v28, %v3494_v19  ;;  %v3505_v5 = vmul.f32 %v3503_v53, %v3494_v19 }
 0x546   : > { %v3506_v1 = vadd.f32 %v3504_v24, %v3490_v0  ;;  %v3507_v16 = vadd.f32 %v3505_v5, %v3491_v59  ;;  %v3552_v0 = vmul.f32 %v3547_v20, %v3542_v52  ;;  %v3553_v59 = vmul.f32 %v3551_v13, %v3542_v52 }
 0x547   : > { %v3949_v5 = vrot.slane %v11975_v43, %v14469_v23 }
 0x548   : > { %v3510_v41 = vpop.permute.xlu1 %3509 }
 0x549   : > { %v3520_v8 = vmul.f32 %v3515_v35, %v3510_v41  ;;  %v3521_v39 = vmul.f32 %v3519_v30, %v3510_v41  ;;  %v14484_v30 = vmov 4   ;;  %v3954_v37 = vmul.f32 %v3949_v5, %v11995_v57 }
 0x54a   : > { %9816 = vset.pattern.permute.xlu1 %v14484_v30  ;;  %v3970_v41 = vmul.f32 %v3965_v18, %v11997_v3 }
 0x54b   : > { %v3522_v10 = vadd.f32 %v3520_v8, %v3506_v1  ;;  %v3523_v38 = vadd.f32 %v3521_v39, %v3507_v16  ;;  %v3953_v1 = vrot.slane %v11978_v47, %v14469_v23  ;;  %v3969_v16 = vrot.slane %v11978_v47, %v14470_v26  ;;  %2536 = vperm.xlu1 %9816, %v12151_v14  }
 0x54c   : > { %v3981_v8 = vrot.slane %v11975_v43, %v14471_v58  ;;  %v3985_v39 = vrot.slane %v11978_v47, %v14471_v58  ;;  %v3972_v13 = vadd.f32 %v3970_v41, %v3954_v37 }
 0x54d   : > { %v3538_v62 = vadd.f32 %v3536_v51, %v3522_v10  ;;  %v3539_v28 = vadd.f32 %v3537_v50, %v3523_v38  ;;  %v12171_v53 = vpop.permute.xlu1 %4083  ;;  %v3955_v40 = vmul.f32 %v3953_v1, %v11995_v57  ;;  %v3971_v52 = vmul.f32 %v3969_v16, %v11997_v3 }
 0x54e   : > { %v14485_v51 = vmov 6   ;;  %v3986_v10 = vmul.f32 %v3981_v8, %v11999_v56  ;;  %v3997_v57 = vrot.slane %v11975_v43, %v14472_v27  ;;  %v3987_v3 = vmul.f32 %v3985_v39, %v11999_v56 }
 0x54f   : > { %v3554_v19 = vadd.f32 %v3552_v0, %v3538_v62  ;;  %v3555_v24 = vadd.f32 %v3553_v59, %v3539_v28  ;;  %9818 = vset.pattern.permute.xlu1 %v14485_v51  ;;  %v3973_v50 = vadd.f32 %v3971_v52, %v3955_v40  ;;  %v4001_v38 = vrot.slane %v11978_v47, %v14472_v27 }
 0x550   : > { %2552 = vperm.xlu1 %9818, %v12151_v14   ;;  %v3563_v0 = vrot.slane %v11948_v15, %v14470_v26  ;;  %v3567_v59 = vrot.slane %v11952_v4, %v14470_v26  ;;  %v3988_v62 = vadd.f32 %v3986_v10, %v3972_v13  ;;  %v4002_v16 = vmul.f32 %v3997_v57, %v12001_v9  ;;  %v1415_v57 = vld [vmem:[#allocation16] sm:$0xf] }
 0x551   : > { %v3989_v5 = vadd.f32 %v3987_v3, %v3973_v50  ;;  %v4003_v56 = vmul.f32 %v4001_v38, %v12001_v9  ;;  %v3579_v52 = vrot.slane %v11948_v15, %v14471_v58  ;;  %v3583_v8 = vrot.slane %v11952_v4, %v14471_v58 }
 0x552   : > { %v12184_v35 = vpop.permute.xlu1 %4099  ;;  %v4004_v40 = vadd.f32 %v4002_v16, %v3988_v62  ;;  %v3595_v3 = vrot.slane %v11948_v15, %v14472_v27  ;;  %v3599_v38 = vrot.slane %v11952_v4, %v14472_v27  ;;  %v3611_v16 = vrot.slane %v11954_v54, %v14469_v23 }
 0x553   : > { %v4005_v39 = vadd.f32 %v4003_v56, %v3989_v5 }
 0x554   : > { %9819 = vset.pattern.permute.xlu1 %v14477_v22 }
 0x555   : > { %2560 = vperm.xlu1 %9819, %v12151_v14   ;;  %v4011_v14 = vadd.f32 %v12003_v63, %v4004_v40  ;;  %v3627_v40 = vrot.slane %v11954_v54, %v14470_v26 }
 0x557   : > { %v12196_v20 = vpop.permute.xlu1 %4115 }
 0x559   : > { %9821 = vset.pattern.permute.xlu1 %v14474_v2 }
 0x55a   : > { %5391 = vperm.xlu1 %9821, %v1415_v57  }
 0x55c   : > { %v3558_v28 = vpop.permute.xlu1 %3557 }
 0x55d   : > { %v3568_v18 = vmul.f32 %v3563_v0, %v3558_v28  ;;  %v3569_v1 = vmul.f32 %v3567_v59, %v3558_v28  ;;  %v7412_v28 = vmul.f32 -1.442695, %v4011_v14 }
 0x55e   : > { %9822 = vset.pattern.permute.xlu1 %v14478_v44 }
 0x55f   : > { %v3570_v37 = vadd.f32 %v3568_v18, %v3554_v19  ;;  %v3571_v41 = vadd.f32 %v3569_v1, %v3555_v24  ;;  %v4012_v24 = vadd.f32 %v12003_v63, %v4005_v39  ;;  %5407 = vperm.xlu1 %9822, %v1415_v57   ;;  %v3615_v63 = vrot.slane %v11958_v42, %v14469_v23 }
 0x560   : > { %9911 = vpow2.f32 %v7412_v28 }
 0x561   : > { %v3574_v13 = vpop.permute.xlu1 %3573  ;;  %v7413_v5 = vmul.f32 -1.442695, %v4012_v24  ;;  %v1414_v24 = vld [vmem:[%s14487_s23] sm:$0xf]  ;;  %s14997_s23 = sld [smem:[#allocation44_spill]] }
 0x562   : > { %v3584_v50 = vmul.f32 %v3579_v52, %v3574_v13  ;;  %v3585_v10 = vmul.f32 %v3583_v8, %v3574_v13  ;;  %v3631_v52 = vrot.slane %v11958_v42, %v14470_v26 }
 0x563   : > { %9913 = vpow2.f32 %v7413_v5  ;;  %9824 = vset.pattern.permute.xlu1 %v14482_v21 }
 0x564   : > { %v3586_v9 = vadd.f32 %v3584_v50, %v3570_v37  ;;  %v3587_v19 = vadd.f32 %v3585_v10, %v3571_v41  ;;  %5439 = vperm.xlu1 %9824, %v1415_v57   ;;  %v1416_v50 = vld [vmem:[%s14486_s16] sm:$0xf]  ;;  %s14918_s16 = sld [smem:[#allocation43_spill]] }
 0x566   : > { %v3590_v0 = vpop.permute.xlu1 %3589 }
 0x567   : > { %v3600_v59 = vmul.f32 %v3595_v3, %v3590_v0  ;;  %v3601_v62 = vmul.f32 %v3599_v38, %v3590_v0  ;;  %v12244_v0 = vld [vmem:[%s14488_s18] sm:$0xf]  ;;  %s15001_s18 = sld [smem:[#allocation45_spill]] }
 0x568   : > { %9825 = vset.pattern.permute.xlu1 %v14474_v2 }
 0x569   : > { %v3602_v18 = vadd.f32 %v3600_v59, %v3586_v9  ;;  %v3603_v1 = vadd.f32 %v3601_v62, %v3587_v19  ;;  %5456 = vperm.xlu1 %9825, %v1416_v50   ;;  %v1402_v59 = vld [vmem:[%s14489_s22] sm:$0xf]  ;;  %s15017_s22 = sld [smem:[#allocation46_spill]] }
 0x56a   : > { %v9912_v9 = vpop.eup %9911  ;;  %2569 = vperm.xlu0 %9820, %v1402_v59  }
 0x56b   : > { %v3606_v15 = vpop.permute.xlu1 %3605  ;;  %v4019_v3 = vadd.f32 1.0, %v9912_v9 }
 0x56c   : > { %v3616_v4 = vmul.f32 %v3611_v16, %v3606_v15  ;;  %v3617_v56 = vmul.f32 %v3615_v63, %v3606_v15 }
 0x56d   : > { %v9914_v19 = vpop.eup %9913  ;;  %4808 = vperm.xlu1 %9825, %v1414_v24   ;;  %9915 = vrcp.f32 %v4019_v3 }
 0x56e   : > { %v3618_v37 = vadd.f32 %v3616_v4, %v3602_v18  ;;  %v3619_v41 = vadd.f32 %v3617_v56, %v3603_v1  ;;  %v4020_v38 = vadd.f32 1.0, %v9914_v19  ;;  %9823 = vset.pattern.permute.xlu0 %v14479_v45 }
 0x56f   : > { %5423 = vperm.xlu0 %9823, %v1415_v57  }
 0x570   : > { %v3622_v8 = vpop.permute.xlu1 %3621  ;;  %9917 = vrcp.f32 %v4020_v38 }
 0x571   : > { %v3632_v39 = vmul.f32 %v3627_v40, %v3622_v8  ;;  %v3633_v13 = vmul.f32 %v3631_v52, %v3622_v8  ;;  %9827 = vset.pattern.permute.xlu1 %v14478_v44 }
 0x572   : > { %4830 = vperm.xlu1 %9827, %v12244_v0  }
 0x573   : > { %v12237_v10 = vadd.f32 %v3632_v39, %v3618_v37  ;;  %v12239_v14 = vadd.f32 %v3633_v13, %v3619_v41  ;;  %9826 = vset.pattern.permute.xlu0 %v14474_v2 }
 0x574   : > { %4814 = vperm.xlu0 %9826, %v12244_v0  }
 0x575   : > { %v3654_v5 = vpop.permute.xlu1 %3653 }
 0x576   : > { %9829 = vset.pattern.permute.xlu1 %v14482_v21 }
 0x577   : > { %4862 = vperm.xlu1 %9829, %v12244_v0   ;;  %v9916_v62 = vpop.eup %9915 }
 0x578   : > { %v4025_v16 = vmul.f32 %v9916_v62, %v11975_v43  ;;  %9828 = vset.pattern.permute.xlu0 %v14479_v45 }
 0x579   : > { %4846 = vperm.xlu0 %9828, %v12244_v0  }
 0x57a   : > { %v9918_v28 = vpop.eup %9917  ;;  %v3670_v56 = vpop.permute.xlu1 %3669 }
 0x57b   : > { %9830 = vset.pattern.permute.xlu1 %v14484_v30  ;;  %v4026_v1 = vmul.f32 %v9918_v28, %v11978_v47 }
 0x57c   : > { %4878 = vperm.xlu1 %9830, %v12244_v0  }
 0x57d   : > { %9831 = vset.pattern.permute.xlu0 %v14483_v11 }
 0x57e   : > { %4894 = vperm.xlu0 %9831, %v12244_v0  }
 0x57f   : > { %v3702_v3 = vpop.permute.xlu1 %3701 }
 0x580   : > { %9832 = vset.pattern.permute.xlu1 %v14485_v51 }
 0x581   : > { %4910 = vperm.xlu1 %9832, %v12244_v0  }
 0x582   : > { %9834 = vset.pattern.permute.xlu0 %v14080_v46  ;;  %v14545_v46 = vld [vmem:[#allocation181_spill] sm:$0xff] }
 0x583   : > { %4942 = vperm.xlu0 %9834, %v12244_v0  }
 0x585   : > { %9833 = vset.pattern.permute.xlu1 %v14477_v22 }
 0x586   : > { %4926 = vperm.xlu1 %9833, %v12244_v0  }
 0x589   : > { %v4075_v18 = vpop.permute.xlu0 %4074 }
 0x58a   : > { %v4077_v63 = vmul.f32 %v4075_v18, %v11975_v43  ;;  %v4078_v57 = vmul.f32 %v4075_v18, %v11978_v47  ;;  %9835 = vset.pattern.permute.xlu1 %v14075_v48  ;;  %v14538_v48 = vld [vmem:[#allocation174_spill] sm:$0xff] }
 0x58b   : > { %4958 = vperm.xlu1 %9835, %v12244_v0  }
 0x58c   : > { %v4079_v15 = vadd.f32 %v4077_v63, %v4025_v16  ;;  %v4080_v4 = vadd.f32 %v4078_v57, %v4026_v1 }
 0x58e   : > { %v4132_v37 = vpop.permute.xlu0 %4131  ;;  %v4093_v41 = vrot.slane %v4080_v4, %v14469_v23  ;;  %v4109_v40 = vrot.slane %v4080_v4, %v14470_v26  ;;  %v4125_v43 = vrot.slane %v4080_v4, %v14471_v58  ;;  %v4089_v47 = vrot.slane %v4079_v15, %v14469_v23 }
 0x58f   : > { %v4141_v52 = vrot.slane %v4080_v4, %v14472_v27  ;;  %v4105_v50 = vrot.slane %v4079_v15, %v14470_v26  ;;  %v4121_v9 = vrot.slane %v4079_v15, %v14471_v58  ;;  %v4137_v38 = vrot.slane %v4079_v15, %v14472_v27  ;;  %9836 = vset.pattern.permute.xlu1 %v14079_v33  ;;  %v14544_v33 = vld [vmem:[#allocation180_spill] sm:$0xff] }
 0x590   : > { %v4095_v8 = vmul.f32 %v4093_v41, %v12171_v53  ;;  %v4111_v39 = vmul.f32 %v4109_v40, %v12184_v35  ;;  %v4094_v13 = vmul.f32 %v4089_v47, %v12171_v53  ;;  %v4127_v24 = vmul.f32 %v4125_v43, %v12196_v20  ;;  %v3718_v43 = vpop.permute.xlu1 %3717  ;;  %4974 = vperm.xlu1 %9836, %v12244_v0  }
 0x591   : > { %v4110_v62 = vmul.f32 %v4105_v50, %v12184_v35  ;;  %v4143_v28 = vmul.f32 %v4141_v52, %v4132_v37  ;;  %v4126_v1 = vmul.f32 %v4121_v9, %v12196_v20  ;;  %v4142_v63 = vmul.f32 %v4137_v38, %v4132_v37 }
 0x592   : > { %v4113_v19 = vadd.f32 %v4111_v39, %v4095_v8  ;;  %v3643_v15 = vrot.slane %v11954_v54, %v14471_v58  ;;  %v3647_v35 = vrot.slane %v11958_v42, %v14471_v58  ;;  %v3659_v20 = vrot.slane %v11954_v54, %v14472_v27 }
 0x593   : > { %v4149_v59 = vpop.permute.xlu0 %4148  ;;  %v4112_v53 = vadd.f32 %v4110_v62, %v4094_v13  ;;  %v3663_v4 = vrot.slane %v11958_v42, %v14472_v27  ;;  %v3675_v37 = vrot.slane %v11956_v60, %v14469_v23  ;;  %v3679_v50 = vrot.slane %v11960_v49, %v14469_v23 }
 0x594   : > { %v4129_v18 = vadd.f32 %v4127_v24, %v4113_v19  ;;  %v3664_v39 = vmul.f32 %v3659_v20, %v3654_v5  ;;  %v14490_v24 = vmov 11   ;;  %v3695_v62 = vrot.slane %v11960_v49, %v14470_v26  ;;  %9838 = vset.pattern.permute.xlu1 %v14074_v61  ;;  %v14537_v61 = vld [vmem:[#allocation173_spill] sm:$0xff] }
 0x595   : > { %v4128_v57 = vadd.f32 %v4126_v1, %v4112_v53  ;;  %v3665_v13 = vmul.f32 %v3663_v4, %v3654_v5  ;;  %9837 = vset.pattern.permute.xlu0 %v14490_v24  ;;  %v3680_v38 = vmul.f32 %v3675_v37, %v3670_v56  ;;  %v3691_v5 = vrot.slane %v11956_v60, %v14470_v26  ;;  %v14547_v24 = vld [vmem:[#allocation183_spill] sm:$0xff] }
 0x596   : > { %v4145_v16 = vadd.f32 %v4143_v28, %v4129_v18  ;;  %4990 = vperm.xlu0 %9837, %v12244_v0   ;;  %v3681_v28 = vmul.f32 %v3679_v50, %v3670_v56  ;;  %v3723_v56 = vrot.slane %v11956_v60, %v14472_v27  ;;  %v3727_v20 = vrot.slane %v11960_v49, %v14472_v27 }
 0x597   : > { %v4144_v47 = vadd.f32 %v4142_v63, %v4128_v57  ;;  %v3711_v63 = vrot.slane %v11960_v49, %v14471_v58  ;;  %v3750_v57 = vpop.permute.xlu1 %3749  ;;  %5006 = vperm.xlu1 %9838, %v12244_v0   ;;  %v14491_v4 = vmov 14  }
 0x598   : > { %v4152_v41 = vadd.f32 %v4149_v59, %v4145_v16  ;;  %v3638_v40 = vpop.permute.xlu0 %3637 }
 0x599   : > { %v3648_v52 = vmul.f32 %v3643_v15, %v3638_v40  ;;  %v3649_v8 = vmul.f32 %v3647_v35, %v3638_v40  ;;  %v4151_v54 = vadd.f32 %v4149_v59, %v4144_v47  ;;  %v3713_v40 = vmul.f32 %v3711_v63, %v3702_v3 }
 0x59a   : > { %v7415_v9 = vmul.f32 -1.442695, %v4152_v41  ;;  %9840 = vset.pattern.permute.xlu0 %v14491_v4  ;;  %v3791_v63 = vrot.slane %v11964_v32, %v14472_v27  ;;  %v14546_v4 = vld [vmem:[#allocation182_spill] sm:$0xff] }
 0x59b   : > { %v3650_v42 = vadd.f32 %v3648_v52, %v12237_v10  ;;  %v3651_v19 = vadd.f32 %v3649_v8, %v12239_v14  ;;  %v7414_v59 = vmul.f32 -1.442695, %v4151_v54  ;;  %v3707_v14 = vrot.slane %v11956_v60, %v14471_v58  ;;  %5038 = vperm.xlu0 %9840, %v12244_v0   ;;  %9839 = vset.pattern.permute.xlu1 %v14078_v55  ;;  %v14542_v55 = vld [vmem:[#allocation178_spill] sm:$0xff] }
 0x59c   : > { %9919 = vpow2.f32 %v7415_v9  ;;  %v3739_v52 = vrot.slane %v11962_v34, %v14469_v23  ;;  %v3743_v8 = vrot.slane %v11964_v32, %v14469_v23  ;;  %v3755_v9 = vrot.slane %v11962_v34, %v14470_v26  ;;  %5022 = vperm.xlu1 %9839, %v12244_v0  }
 0x59d   : > { %v3666_v18 = vadd.f32 %v3664_v39, %v3650_v42  ;;  %v3667_v10 = vadd.f32 %v3665_v13, %v3651_v19  ;;  %v3686_v53 = vpop.permute.xlu0 %3685  ;;  %9921 = vpow2.f32 %v7414_v59  ;;  %v3712_v41 = vmul.f32 %v3707_v14, %v3702_v3  ;;  %v3766_v42 = vpop.permute.xlu1 %3765 }
 0x59e   : > { %v3696_v1 = vmul.f32 %v3691_v5, %v3686_v53  ;;  %v3697_v16 = vmul.f32 %v3695_v62, %v3686_v53  ;;  %v3728_v39 = vmul.f32 %v3723_v56, %v3718_v43  ;;  %v3729_v13 = vmul.f32 %v3727_v20, %v3718_v43 }
 0x59f   : > { %v3682_v15 = vadd.f32 %v3680_v38, %v3666_v18  ;;  %v3683_v35 = vadd.f32 %v3681_v28, %v3667_v10  ;;  %v3759_v3 = vrot.slane %v11964_v32, %v14470_v26  ;;  %9843 = vset.pattern.permute.xlu0 %v14076_v25  ;;  %v3760_v62 = vmul.f32 %v3755_v9, %v3750_v57  ;;  %v14540_v25 = vld [vmem:[#allocation176_spill] sm:$0xff] }
 0x5a0   : > { %v3771_v28 = vrot.slane %v11962_v34, %v14471_v58  ;;  %v3775_v59 = vrot.slane %v11964_v32, %v14471_v58  ;;  %5086 = vperm.xlu0 %9843, %v12244_v0   ;;  %9841 = vset.pattern.permute.xlu1 %v14073_v6  ;;  %v14536_v6 = vld [vmem:[#allocation172_spill] sm:$0xff] }
 0x5a1   : > { %v3698_v37 = vadd.f32 %v3696_v1, %v3682_v15  ;;  %v3699_v47 = vadd.f32 %v3697_v16, %v3683_v35  ;;  %v3761_v18 = vmul.f32 %v3759_v3, %v3750_v57  ;;  %v3787_v16 = vrot.slane %v11962_v34, %v14472_v27  ;;  %5054 = vperm.xlu1 %9841, %v12244_v0   ;;  %v14496_v3 = vld [vmem:[#allocation139_spill] sm:$0xff] }
 0x5a2   : > { %v3734_v60 = vpop.permute.xlu0 %3733  ;;  %v3776_v1 = vmul.f32 %v3771_v28, %v3766_v42  ;;  %v3777_v56 = vmul.f32 %v3775_v59, %v3766_v42  ;;  %v14492_v57 = vmov 20   ;;  %v14498_v42 = vld [vmem:[#allocation141_spill] sm:$0xff]  ;;  %v14504_v28 = vld [vmem:[#allocation146_spill] sm:$0xff]  ;;  %v14505_v59 = vmov 21  }
 0x5a3   : > { %v3714_v49 = vadd.f32 %v3712_v41, %v3698_v37  ;;  %v3715_v50 = vadd.f32 %v3713_v40, %v3699_v47  ;;  %v3744_v54 = vmul.f32 %v3739_v52, %v3734_v60  ;;  %v3745_v5 = vmul.f32 %v3743_v8, %v3734_v60 }
 0x5a4   : > { %9846 = vset.pattern.permute.xlu0 %v14492_v57  ;;  %v14519_v57 = vld [vmem:[#allocation158_spill] sm:$0xff] }
 0x5a5   : > { %v3730_v19 = vadd.f32 %v3728_v39, %v3714_v49  ;;  %v3731_v38 = vadd.f32 %v3729_v13, %v3715_v50  ;;  %5134 = vperm.xlu0 %9846, %v12244_v0   ;;  %9842 = vset.pattern.permute.xlu1 %v14077_v29  ;;  %v14493_v39 = vmov 18   ;;  %v14494_v49 = vmov 26   ;;  %v14541_v29 = vld [vmem:[#allocation177_spill] sm:$0xff] }
 0x5a6   : > { %v9920_v43 = vpop.eup %9919  ;;  %5070 = vperm.xlu1 %9842, %v12244_v0  }
 0x5a7   : > { %v4160_v10 = vadd.f32 1.0, %v9920_v43  ;;  %v3746_v53 = vadd.f32 %v3744_v54, %v3730_v19  ;;  %v3747_v14 = vadd.f32 %v3745_v5, %v3731_v38  ;;  %v3782_v15 = vpop.permute.xlu0 %3781  ;;  %v9922_v35 = vpop.eup %9921  ;;  %v14497_v54 = vld [vmem:[#allocation140_spill] sm:$0xff]  ;;  %v14499_v19 = vld [vmem:[#allocation142_spill] sm:$0xff]  ;;  %v14500_v38 = vmov 28   ;;  %v14501_v5 = vld [vmem:[#allocation143_spill] sm:$0xff] }
 0x5a8   : > { %v4159_v40 = vadd.f32 1.0, %v9922_v35  ;;  %v3792_v52 = vmul.f32 %v3787_v16, %v3782_v15  ;;  %v3793_v34 = vmul.f32 %v3791_v63, %v3782_v15  ;;  %v14502_v43 = vld [vmem:[#allocation144_spill] sm:$0xff]  ;;  %v14511_v16 = vld [vmem:[#allocation151_spill] sm:$0xff]  ;;  %v14513_v15 = vld [vmem:[#allocation153_spill] sm:$0xff] }
 0x5a9   : > { %9923 = vrcp.f32 %v4160_v10  ;;  %v3762_v20 = vadd.f32 %v3760_v62, %v3746_v53  ;;  %v3763_v41 = vadd.f32 %v3761_v18, %v3747_v14  ;;  %9849 = vset.pattern.permute.xlu0 %v10395_v36  ;;  %v14495_v36 = vmov 19   ;;  %v14503_v62 = vld [vmem:[#allocation145_spill] sm:$0xff]  ;;  %v14506_v18 = vld [vmem:[#allocation147_spill] sm:$0xff]  ;;  %v14507_v10 = vld [vmem:[#allocation148_spill] sm:$0xff] }
 0x5aa   : > { %9925 = vrcp.f32 %v4159_v40  ;;  %5182 = vperm.xlu0 %9849, %v12244_v0   ;;  %9844 = vset.pattern.permute.xlu1 %v14493_v39  ;;  %v14508_v53 = vld [vmem:[#allocation149_spill] sm:$0xff]  ;;  %v14509_v14 = vld [vmem:[#allocation150_spill] sm:$0xff]  ;;  %v14512_v63 = vld [vmem:[#allocation152_spill] sm:$0xff] }
 0x5ab   : > { %v3778_v37 = vadd.f32 %v3776_v1, %v3762_v20  ;;  %v3779_v47 = vadd.f32 %v3777_v56, %v3763_v41  ;;  %5102 = vperm.xlu1 %9844, %v12244_v0   ;;  %v14510_v1 = vmov 29   ;;  %v14514_v35 = vld [vmem:[#allocation154_spill] sm:$0xff]  ;;  %v14515_v56 = vmov 22   ;;  %v14516_v20 = vld [vmem:[#allocation155_spill] sm:$0xff]  ;;  %v14517_v41 = vld [vmem:[#allocation156_spill] sm:$0xff] }
 0x5ac   : > { %v14518_v40 = vld [vmem:[#allocation157_spill] sm:$0xff] }
 0x5ad   : > { %v3794_v32 = vadd.f32 %v3792_v52, %v3778_v37  ;;  %v3795_v8 = vadd.f32 %v3793_v34, %v3779_v47  ;;  %v14520_v37 = vmov 24   ;;  %v14521_v47 = vld [vmem:[#allocation159_spill] sm:$0xff]  ;;  %v14522_v52 = vld [vmem:[#allocation160_spill] sm:$0xff]  ;;  %v14523_v34 = vld [vmem:[#allocation161_spill] sm:$0xff] }
 0x5ae   : > { %9852 = vset.pattern.permute.xlu0 %v14494_v49  ;;  %v14527_v39 = vld [vmem:[#allocation165_spill] sm:$0xff]  ;;  %v14528_v49 = vld [vmem:[#allocation166_spill] sm:$0xff] }
 0x5af   : > { %5230 = vperm.xlu0 %9852, %v12244_v0   ;;  %9845 = vset.pattern.permute.xlu1 %v14495_v36  ;;  %v14530_v36 = vld [vmem:[#allocation167_spill] sm:$0xff] }
 0x5b0   : > { %5118 = vperm.xlu1 %9845, %v12244_v0  }
 0x5b3   : > { %v9924_v60 = vpop.eup %9923  ;;  %9855 = vset.pattern.permute.xlu0 %v14500_v38  ;;  %v14531_v38 = vld [vmem:[#allocation168_spill] sm:$0xff] }
 0x5b4   : > { %v12348_v13 = vmul.f32 %v9924_v60, %v3795_v8  ;;  %v9926_v50 = vpop.eup %9925  ;;  %5262 = vperm.xlu0 %9855, %v12244_v0   ;;  %9847 = vset.pattern.permute.xlu1 %v14505_v59  ;;  %v14525_v8 = vld [vmem:[#allocation163_spill] sm:$0xff]  ;;  %v14526_v60 = vld [vmem:[#allocation164_spill] sm:$0xff]  ;;  %v14532_v59 = vld [vmem:[#allocation169_spill] sm:$0xff] }
 0x5b5   : > { %v12355_v9 = vmul.f32 %v9926_v50, %v3794_v32  ;;  %5150 = vperm.xlu1 %9847, %v12244_v0   ;;  %v14524_v32 = vld [vmem:[#allocation162_spill] sm:$0xff]  ;;  %v14529_v50 = vmov 25  }
 0x5b6   : > { %4231 = vmatprep.mubr.f32.mxu0 %v12348_v13  ;;  %4302 = vmatprep.mubr.f32.mxu1 %v12348_v13 }
 0x5b7   : > { %4232 = vmatmul.mubr.f32.vlgmr.msra.gmra.mrb[10].mxu0 %v12355_v9  ;;  %4303 = vmatmul.mubr.f32.vlgmr.msra.gmra.mrb[10].mxu1 %v12355_v9 }
 0x5b8   : > { %8226 = vmatpush1.bf16.msra.mxu0 %v14496_v3  ;;  %8290 = vmatpush1.bf16.msra.mxu1 %v14497_v54  ;;  %v14643_v54 = vld [vmem:[#allocation122_spill] sm:$0xff] }
 0x5b9   : > { %4373 = vmatprep.mubr.f32.mxu0 %v12348_v13  ;;  %4444 = vmatprep.mubr.f32.mxu1 %v12348_v13 }
 0x5ba   : > { %8228 = vmatprep.subr.bf16.mxu0 %v14498_v42  ;;  %8292 = vmatprep.subr.bf16.mxu1 %v14499_v19  ;;  %v14579_v19 = vld [vmem:[#allocation215_spill] sm:$0xff] }
 0x5bb   : > { %9857 = vset.pattern.permute.xlu0 %v14510_v1  ;;  %9848 = vset.pattern.permute.xlu1 %v14515_v56  ;;  %v14533_v1 = vld [vmem:[#allocation170_spill] sm:$0xff]  ;;  %v14534_v56 = vmov 27  }
 0x5bc   : > { %8230 = vmatpush1.bf16.msra.mxu0 %v14501_v5  ;;  %8294 = vmatpush1.bf16.msra.mxu1 %v14502_v43  ;;  %v14577_v43 = vld [vmem:[#allocation213_spill] sm:$0xff] }
 0x5bd   : > { %8232 = vmatprep.subr.bf16.mxu0 %v14503_v62  ;;  %8296 = vmatprep.subr.bf16.mxu1 %v14504_v28  ;;  %v14576_v28 = vld [vmem:[#allocation212_spill] sm:$0xff] }
 0x5be   : > { %5278 = vperm.xlu0 %9857, %v12244_v0   ;;  %5166 = vperm.xlu1 %9848, %v12244_v0  }
 0x5c0   : > { %8234 = vmatpush1.bf16.msra.mxu0 %v14506_v18  ;;  %8298 = vmatpush1.bf16.msra.mxu1 %v14507_v10  ;;  %v14575_v10 = vld [vmem:[#allocation211_spill] sm:$0xff] }
 0x5c1   : > { %8236 = vmatprep.subr.bf16.mxu0 %v14508_v53  ;;  %8300 = vmatprep.subr.bf16.mxu1 %v14509_v14  ;;  %v14574_v14 = vld [vmem:[#allocation210_spill] sm:$0xff] }
 0x5c2   : > { %9860 = vset.pattern.permute.xlu0 %v14482_v21  ;;  %9850 = vset.pattern.permute.xlu1 %v14520_v37  ;;  %v14535_v37 = vld [vmem:[#allocation171_spill] sm:$0xff] }
 0x5c3   : > { %5198 = vperm.xlu1 %9850, %v12244_v0  }
 0x5c4   : > { %8238 = vmatpush1.bf16.msra.mxu0 %v14511_v16  ;;  %8302 = vmatpush1.bf16.msra.mxu1 %v14512_v63  ;;  %v14572_v63 = vld [vmem:[#allocation208_spill] sm:$0xff] }
 0x5c5   : > { %8240 = vmatprep.subr.bf16.mxu0 %v14513_v15  ;;  %8304 = vmatprep.subr.bf16.mxu1 %v14514_v35  ;;  %v14566_v35 = vld [vmem:[#allocation202_spill] sm:$0xff] }
 0x5c7   : > { %9851 = vset.pattern.permute.xlu1 %v14529_v50  ;;  %v14539_v50 = vld [vmem:[#allocation175_spill] sm:$0xff] }
 0x5c8   : > { %8242 = vmatpush1.bf16.msra.mxu0 %v14516_v20  ;;  %8306 = vmatpush1.bf16.msra.mxu1 %v14517_v41  ;;  %v14564_v41 = vld [vmem:[#allocation200_spill] sm:$0xff] }
 0x5c9   : > { %8244 = vmatprep.subr.bf16.mxu0 %v14518_v40  ;;  %8308 = vmatprep.subr.bf16.mxu1 %v14519_v57  ;;  %v14562_v57 = vld [vmem:[#allocation198_spill] sm:$0xff] }
 0x5ca   : > { %5214 = vperm.xlu1 %9851, %v12244_v0  }
 0x5cc   : > { %8246 = vmatpush1.bf16.msra.mxu0 %v14521_v47  ;;  %8310 = vmatpush1.bf16.msra.mxu1 %v14522_v52  ;;  %v14560_v52 = vld [vmem:[#allocation196_spill] sm:$0xff] }
 0x5cd   : > { %8248 = vmatprep.subr.bf16.mxu0 %v14523_v34  ;;  %8312 = vmatprep.subr.bf16.mxu1 %v14524_v32  ;;  %v14558_v32 = vld [vmem:[#allocation194_spill] sm:$0xff] }
 0x5ce   : > { %9853 = vset.pattern.permute.xlu1 %v14534_v56  ;;  %v14543_v56 = vld [vmem:[#allocation179_spill] sm:$0xff] }
 0x5cf   : > { %5246 = vperm.xlu1 %9853, %v12244_v0  }
 0x5d0   : > { %8250 = vmatpush1.bf16.msra.mxu0 %v14525_v8  ;;  %8314 = vmatpush1.bf16.msra.mxu1 %v14526_v60  ;;  %v14556_v60 = vld [vmem:[#allocation192_spill] sm:$0xff] }
 0x5d1   : > { %8252 = vmatprep.subr.bf16.mxu0 %v14527_v39  ;;  %8316 = vmatprep.subr.bf16.mxu1 %v14528_v49  ;;  %v14554_v49 = vld [vmem:[#allocation190_spill] sm:$0xff]  ;;  %v14741_v39 = vld [vmem:[#allocation344_spill] sm:$0xff] }
 0x5d3   : > { %9854 = vset.pattern.permute.xlu1 %v14474_v2 }
 0x5d4   : > { %8254 = vmatpush1.bf16.msra.mxu0 %v14530_v36  ;;  %8318 = vmatpush1.bf16.msra.mxu1 %v14531_v38  ;;  %v14553_v38 = vld [vmem:[#allocation189_spill] sm:$0xff] }
 0x5d5   : > { %8256 = vmatprep.subr.bf16.mxu0 %v14532_v59  ;;  %8320 = vmatprep.subr.bf16.mxu1 %v14533_v1  ;;  %v14551_v1 = vld [vmem:[#allocation187_spill] sm:$0xff] }
 0x5d8   : > { %8258 = vmatpush1.bf16.msra.mxu0 %v14535_v37  ;;  %8322 = vmatpush1.bf16.msra.mxu1 %v14536_v6  ;;  %v14549_v6 = vld [vmem:[#allocation185_spill] sm:$0xff] }
 0x5d9   : > { %8260 = vmatprep.subr.bf16.mxu0 %v14537_v61  ;;  %8324 = vmatprep.subr.bf16.mxu1 %v14538_v48  ;;  %v14548_v48 = vld [vmem:[#allocation184_spill] sm:$0xff] }
 0x5dc   : > { %8262 = vmatpush1.bf16.msra.mxu0 %v14539_v50  ;;  %8326 = vmatpush1.bf16.msra.mxu1 %v14540_v25  ;;  %v14550_v25 = vld [vmem:[#allocation186_spill] sm:$0xff] }
 0x5dd   : > { %8264 = vmatprep.subr.bf16.mxu0 %v14541_v29  ;;  %8328 = vmatprep.subr.bf16.mxu1 %v14542_v55  ;;  %v14552_v55 = vld [vmem:[#allocation188_spill] sm:$0xff]  ;;  %v14739_v50 = vld [vmem:[#allocation342_spill] sm:$0xff] }
 0x5e0   : > { %8266 = vmatpush1.bf16.msra.mxu0 %v14543_v56  ;;  %8330 = vmatpush1.bf16.msra.mxu1 %v14544_v33  ;;  %v14555_v33 = vld [vmem:[#allocation191_spill] sm:$0xff] }
 0x5e1   : > { %8268 = vmatprep.subr.bf16.mxu0 %v14545_v46  ;;  %8332 = vmatprep.subr.bf16.mxu1 %v14546_v4  ;;  %v14557_v4 = vld [vmem:[#allocation193_spill] sm:$0xff] }
 0x5e4   : > { %8270 = vmatpush1.bf16.msra.mxu0 %v14547_v24  ;;  %8334 = vmatpush1.bf16.msra.mxu1 %v14548_v48  ;;  %v14559_v48 = vld [vmem:[#allocation195_spill] sm:$0xff] }
 0x5e5   : > { %8272 = vmatprep.subr.bf16.mxu0 %v14549_v6  ;;  %8336 = vmatprep.subr.bf16.mxu1 %v14550_v25  ;;  %v14561_v25 = vld [vmem:[#allocation197_spill] sm:$0xff] }
 0x5e8   : > { %8274 = vmatpush1.bf16.msra.mxu0 %v14551_v1  ;;  %8338 = vmatpush1.bf16.msra.mxu1 %v14552_v55  ;;  %v14563_v55 = vld [vmem:[#allocation199_spill] sm:$0xff] }
 0x5e9   : > { %8276 = vmatprep.subr.bf16.mxu0 %v14553_v38  ;;  %8340 = vmatprep.subr.bf16.mxu1 %v14554_v49  ;;  %v14565_v49 = vld [vmem:[#allocation201_spill] sm:$0xff]  ;;  %v14695_v1 = vld [vmem:[#allocation315_spill] sm:$0xff] }
 0x5ec   : > { %8278 = vmatpush1.bf16.msra.mxu0 %v14555_v33  ;;  %8342 = vmatpush1.bf16.msra.mxu1 %v14556_v60  ;;  %v14570_v60 = vld [vmem:[#allocation206_spill] sm:$0xff]  ;;  %v14672_v33 = vld [vmem:[#allocation295_spill] sm:$0xff] }
 0x5ed   : > { %8280 = vmatprep.subr.bf16.mxu0 %v14557_v4  ;;  %8344 = vmatprep.subr.bf16.mxu1 %v14558_v32  ;;  %v14567_v32 = vld [vmem:[#allocation203_spill] sm:$0xff] }
 0x5f0   : > { %8282 = vmatpush1.bf16.msra.mxu0 %v14559_v48  ;;  %8346 = vmatpush1.bf16.msra.mxu1 %v14560_v52  ;;  %v14568_v52 = vld [vmem:[#allocation204_spill] sm:$0xff]  ;;  %v14660_v48 = vld [vmem:[#allocation130_spill] sm:$0xff] }
 0x5f1   : > { %8284 = vmatprep.subr.bf16.mxu0 %v14561_v25  ;;  %8348 = vmatprep.subr.bf16.mxu1 %v14562_v57  ;;  %v14569_v57 = vld [vmem:[#allocation205_spill] sm:$0xff] }
 0x5f2   : > { %v14657_v25 = vld [vmem:[#allocation285_spill] sm:$0xff] }
 0x5f4   : > { %8286 = vmatpush1.bf16.msra.mxu0 %v14563_v55  ;;  %8350 = vmatpush1.bf16.msra.mxu1 %v14564_v41  ;;  %v14571_v41 = vld [vmem:[#allocation207_spill] sm:$0xff] }
 0x5f5   : > { %8352 = vmatprep.subr.bf16.mxu0 %v14565_v49  ;;  %8416 = vmatprep.subr.bf16.mxu1 %v14566_v35  ;;  %v14573_v35 = vld [vmem:[#allocation209_spill] sm:$0xff]  ;;  %v14649_v49 = vld [vmem:[#allocation279_spill] sm:$0xff] }
 0x5f6   : > { %v14655_v55 = vld [vmem:[#allocation283_spill] sm:$0xff] }
 0x5f7   : > { %4374 = vmatmul.mubr.f32.vlgmr.msra.gmra.mrb[12].mxu0 %v12355_v9  ;;  %4445 = vmatmul.mubr.f32.vlgmr.msra.gmra.mrb[12].mxu1 %v12355_v9 }
 0x5f8   : > { %8354 = vmatpush1.bf16.msra.mxu0 %v14567_v32  ;;  %4515 = vmatprep.mubr.f32.mxu0 %v12348_v13 }
 0x5f9   : > { %8418 = vmatpush1.bf16.msra.mxu1 %v14568_v52  ;;  %4586 = vmatprep.mubr.f32.mxu1 %v12348_v13  ;;  %v14578_v52 = vld [vmem:[#allocation214_spill] sm:$0xff] }
 0x5fa   : > { %8356 = vmatprep.subr.bf16.mxu0 %v14569_v57  ;;  %8420 = vmatprep.subr.bf16.mxu1 %v14570_v60  ;;  %v14580_v57 = vld [vmem:[#allocation216_spill] sm:$0xff]  ;;  %v14581_v60 = vld [vmem:[#allocation217_spill] sm:$0xff] }
 0x5fc   : > { %8358 = vmatpush1.bf16.msra.mxu0 %v14571_v41  ;;  %v14582_v41 = vld [vmem:[#allocation218_spill] sm:$0xff] }
 0x5fd   : > { %8422 = vmatpush1.bf16.msra.mxu1 %v14572_v63  ;;  %8360 = vmatprep.subr.bf16.mxu0 %v14573_v35  ;;  %v14583_v63 = vld [vmem:[#allocation219_spill] sm:$0xff]  ;;  %v14584_v35 = vld [vmem:[#allocation220_spill] sm:$0xff] }
 0x5fe   : > { %8424 = vmatprep.subr.bf16.mxu1 %v14574_v14  ;;  %v14585_v14 = vld [vmem:[#allocation221_spill] sm:$0xff] }
 0x600   : > { %8362 = vmatpush1.bf16.msra.mxu0 %v14575_v10  ;;  %v14586_v10 = vld [vmem:[#allocation222_spill] sm:$0xff] }
 0x601   : > { %8426 = vmatpush1.bf16.msra.mxu1 %v14576_v28  ;;  %8364 = vmatprep.subr.bf16.mxu0 %v14577_v43  ;;  %v14587_v28 = vld [vmem:[#allocation223_spill] sm:$0xff]  ;;  %v14588_v43 = vld [vmem:[#allocation224_spill] sm:$0xff] }
 0x602   : > { %8428 = vmatprep.subr.bf16.mxu1 %v14578_v52  ;;  %v14589_v52 = vld [vmem:[#allocation225_spill] sm:$0xff] }
 0x604   : > { %8366 = vmatpush1.bf16.msra.mxu0 %v14579_v19  ;;  %v14590_v19 = vld [vmem:[#allocation226_spill] sm:$0xff] }
 0x605   : > { %8430 = vmatpush1.bf16.msra.mxu1 %v14580_v57  ;;  %8368 = vmatprep.subr.bf16.mxu0 %v14581_v60  ;;  %v14591_v57 = vld [vmem:[#allocation227_spill] sm:$0xff]  ;;  %v14592_v60 = vld [vmem:[#allocation228_spill] sm:$0xff] }
 0x606   : > { %8432 = vmatprep.subr.bf16.mxu1 %v14582_v41  ;;  %v14593_v41 = vld [vmem:[#allocation229_spill] sm:$0xff] }
 0x608   : > { %8370 = vmatpush1.bf16.msra.mxu0 %v14583_v63  ;;  %v14594_v63 = vld [vmem:[#allocation230_spill] sm:$0xff] }
 0x609   : > { %8434 = vmatpush1.bf16.msra.mxu1 %v14584_v35  ;;  %8372 = vmatprep.subr.bf16.mxu0 %v14585_v14  ;;  %v14595_v35 = vld [vmem:[#allocation231_spill] sm:$0xff]  ;;  %v14596_v14 = vld [vmem:[#allocation232_spill] sm:$0xff] }
 0x60a   : > { %8436 = vmatprep.subr.bf16.mxu1 %v14586_v10  ;;  %v14597_v10 = vld [vmem:[#allocation233_spill] sm:$0xff] }
 0x60c   : > { %8374 = vmatpush1.bf16.msra.mxu0 %v14587_v28  ;;  %v14598_v28 = vld [vmem:[#allocation234_spill] sm:$0xff] }
 0x60d   : > { %8438 = vmatpush1.bf16.msra.mxu1 %v14588_v43  ;;  %8376 = vmatprep.subr.bf16.mxu0 %v14589_v52  ;;  %v14599_v43 = vld [vmem:[#allocation235_spill] sm:$0xff]  ;;  %v14600_v52 = vld [vmem:[#allocation236_spill] sm:$0xff] }
 0x60e   : > { %8440 = vmatprep.subr.bf16.mxu1 %v14590_v19  ;;  %v14601_v19 = vld [vmem:[#allocation237_spill] sm:$0xff] }
 0x610   : > { %8378 = vmatpush1.bf16.msra.mxu0 %v14591_v57  ;;  %v14602_v57 = vld [vmem:[#allocation238_spill] sm:$0xff] }
 0x611   : > { %8442 = vmatpush1.bf16.msra.mxu1 %v14592_v60  ;;  %8380 = vmatprep.subr.bf16.mxu0 %v14593_v41  ;;  %v14603_v60 = vld [vmem:[#allocation239_spill] sm:$0xff]  ;;  %v14604_v41 = vld [vmem:[#allocation240_spill] sm:$0xff] }
 0x612   : > { %8444 = vmatprep.subr.bf16.mxu1 %v14594_v63  ;;  %v14605_v63 = vld [vmem:[#allocation241_spill] sm:$0xff] }
 0x614   : > { %8382 = vmatpush1.bf16.msra.mxu0 %v14595_v35  ;;  %v14606_v35 = vld [vmem:[#allocation242_spill] sm:$0xff] }
 0x615   : > { %8446 = vmatpush1.bf16.msra.mxu1 %v14596_v14  ;;  %8384 = vmatprep.subr.bf16.mxu0 %v14597_v10  ;;  %v14607_v14 = vld [vmem:[#allocation243_spill] sm:$0xff]  ;;  %v14608_v10 = vld [vmem:[#allocation244_spill] sm:$0xff] }
 0x616   : > { %8448 = vmatprep.subr.bf16.mxu1 %v14598_v28  ;;  %v14609_v28 = vld [vmem:[#allocation245_spill] sm:$0xff] }
 0x618   : > { %8386 = vmatpush1.bf16.msra.mxu0 %v14599_v43  ;;  %v14610_v43 = vld [vmem:[#allocation246_spill] sm:$0xff] }
 0x619   : > { %8450 = vmatpush1.bf16.msra.mxu1 %v14600_v52  ;;  %8388 = vmatprep.subr.bf16.mxu0 %v14601_v19  ;;  %v14611_v52 = vld [vmem:[#allocation247_spill] sm:$0xff]  ;;  %v14612_v19 = vld [vmem:[#allocation248_spill] sm:$0xff] }
 0x61a   : > { %8452 = vmatprep.subr.bf16.mxu1 %v14602_v57  ;;  %v14613_v57 = vld [vmem:[#allocation249_spill] sm:$0xff] }
 0x61c   : > { %8390 = vmatpush1.bf16.msra.mxu0 %v14603_v60  ;;  %v14614_v60 = vld [vmem:[#allocation250_spill] sm:$0xff] }
 0x61d   : > { %8454 = vmatpush1.bf16.msra.mxu1 %v14604_v41  ;;  %8392 = vmatprep.subr.bf16.mxu0 %v14605_v63  ;;  %v14615_v41 = vld [vmem:[#allocation251_spill] sm:$0xff]  ;;  %v14626_v63 = vld [vmem:[#allocation261_spill] sm:$0xff] }
 0x61e   : > { %8456 = vmatprep.subr.bf16.mxu1 %v14606_v35  ;;  %v14617_v35 = vld [vmem:[#allocation252_spill] sm:$0xff] }
 0x620   : > { %8394 = vmatpush1.bf16.msra.mxu0 %v14607_v14  ;;  %v14618_v14 = vld [vmem:[#allocation253_spill] sm:$0xff] }
 0x621   : > { %8458 = vmatpush1.bf16.msra.mxu1 %v14608_v10  ;;  %8396 = vmatprep.subr.bf16.mxu0 %v14609_v28  ;;  %v14619_v10 = vld [vmem:[#allocation254_spill] sm:$0xff]  ;;  %v14620_v28 = vld [vmem:[#allocation255_spill] sm:$0xff] }
 0x622   : > { %8460 = vmatprep.subr.bf16.mxu1 %v14610_v43  ;;  %v14621_v43 = vld [vmem:[#allocation256_spill] sm:$0xff] }
 0x624   : > { %8398 = vmatpush1.bf16.msra.mxu0 %v14611_v52  ;;  %v14622_v52 = vld [vmem:[#allocation257_spill] sm:$0xff] }
 0x625   : > { %8462 = vmatpush1.bf16.msra.mxu1 %v14612_v19  ;;  %8400 = vmatprep.subr.bf16.mxu0 %v14613_v57  ;;  %v14623_v19 = vld [vmem:[#allocation258_spill] sm:$0xff]  ;;  %v14624_v57 = vld [vmem:[#allocation259_spill] sm:$0xff] }
 0x626   : > { %8464 = vmatprep.subr.bf16.mxu1 %v14614_v60  ;;  %v14625_v60 = vld [vmem:[#allocation260_spill] sm:$0xff] }
 0x628   : > { %8402 = vmatpush1.bf16.msra.mxu0 %v14615_v41  ;;  %v14627_v41 = vld [vmem:[#allocation262_spill] sm:$0xff] }
 0x629   : > { %8466 = vmatpush1.bf16.msra.mxu1 %v14617_v35  ;;  %8404 = vmatprep.subr.bf16.mxu0 %v14618_v14  ;;  %v14628_v35 = vld [vmem:[#allocation263_spill] sm:$0xff]  ;;  %v14641_v14 = vld [vmem:[#allocation274_spill] sm:$0xff] }
 0x62a   : > { %8468 = vmatprep.subr.bf16.mxu1 %v14619_v10  ;;  %v14630_v10 = vld [vmem:[#allocation264_spill] sm:$0xff] }
 0x62c   : > { %8406 = vmatpush1.bf16.msra.mxu0 %v14620_v28  ;;  %v14631_v28 = vld [vmem:[#allocation265_spill] sm:$0xff] }
 0x62d   : > { %8470 = vmatpush1.bf16.msra.mxu1 %v14621_v43  ;;  %8408 = vmatprep.subr.bf16.mxu0 %v14622_v52  ;;  %v12511_v43 = vld [vmem:[%s14616_s9] sm:$0xf]  ;;  %v14632_v52 = vld [vmem:[#allocation266_spill] sm:$0xff]  ;;  %s15025_s9 = sld [smem:[#allocation47_spill]] }
 0x62e   : > { %8472 = vmatprep.subr.bf16.mxu1 %v14623_v19  ;;  %6108 = vperm.xlu1 %9854, %v12511_v43   ;;  %v14635_v19 = vld [vmem:[#allocation269_spill] sm:$0xff] }
 0x62f   : > { %6132 = vperm.xlu0 %9860, %v12511_v43  }
 0x630   : > { %8410 = vmatpush1.bf16.msra.mxu0 %v14624_v57  ;;  %v14639_v57 = vld [vmem:[#allocation272_spill] sm:$0xff] }
 0x631   : > { %8474 = vmatpush1.bf16.msra.mxu1 %v14625_v60  ;;  %8412 = vmatprep.subr.bf16.mxu0 %v14626_v63  ;;  %v12519_v60 = vpop.permute.xlu1 %2504  ;;  %v14638_v63 = vmov 32  }
 0x632   : > { %8476 = vmatprep.subr.bf16.mxu1 %v14627_v41  ;;  %v14633_v41 = vld [vmem:[#allocation267_spill] sm:$0xff] }
 0x633   : > { %9863 = vset.pattern.permute.xlu0 %v14638_v63  ;;  %v14645_v63 = vld [vmem:[#allocation276_spill] sm:$0xff] }
 0x634   : > { %8414 = vmatpush1.bf16.msra.mxu0 %v14628_v35  ;;  %v14637_v35 = vld [vmem:[#allocation271_spill] sm:$0xff]  ;;  %5326 = vperm.xlu0 %9863, %v12244_v0  }
 0x635   : > { %8478 = vmatpush1.bf16.msra.mxu1 %v14630_v10  ;;  %8480 = vmatprep.subr.bf16.mxu0 %v14631_v28  ;;  %v14634_v10 = vld [vmem:[#allocation268_spill] sm:$0xff]  ;;  %v14636_v28 = vld [vmem:[#allocation270_spill] sm:$0xff]  ;;  %v12532_v32 = vpop.permute.xlu1 %2512 }
 0x636   : > { %8544 = vmatprep.subr.bf16.mxu1 %v14632_v52  ;;  %v1418_v52 = vld [vmem:[%s14629_s10] sm:$0xf]  ;;  %s15026_s10 = sld [smem:[#allocation48_spill]] }
 0x637   : > { %4516 = vmatmul.mubr.f32.vlgmr.msra.gmra.mrb[14].mxu0 %v12355_v9  ;;  %6102 = vperm.xlu1 %9854, %v1418_v52   ;;  %v2516_v52 = vmul.f32 %v12532_v32, %v14643_v54 }
 0x638   : > { %4587 = vmatmul.mubr.f32.vlgmr.msra.gmra.mrb[14].mxu1 %v12355_v9  ;;  %8482 = vmatpush1.bf16.msra.mxu0 %v14633_v41  ;;  %v14640_v41 = vld [vmem:[#allocation273_spill] sm:$0xff] }
 0x639   : > { %4657 = vmatprep.mubr.f32.mxu0 %v12348_v13  ;;  %8546 = vmatpush1.bf16.msra.mxu1 %v14634_v10  ;;  %v14642_v10 = vld [vmem:[#allocation120_spill] sm:$0xff] }
 0x63a   : > { %4728 = vmatprep.mubr.f32.mxu1 %v12348_v13  ;;  %8484 = vmatprep.subr.bf16.mxu0 %v14635_v19  ;;  %v2508_v19 = vmul.f32 %v12519_v60, %v14642_v10 }
 0x63b   : > { %8548 = vmatprep.subr.bf16.mxu1 %v14636_v28  ;;  %9856 = vset.pattern.permute.xlu1 %v14478_v44  ;;  %v14644_v28 = vld [vmem:[#allocation275_spill] sm:$0xff] }
 0x63c   : > { %8486 = vmatpush1.bf16.msra.mxu0 %v14637_v35  ;;  %6116 = vperm.xlu1 %9856, %v12511_v43   ;;  %v2518_v10 = vadd.f32 %v2516_v52, %v2508_v19  ;;  %v14648_v35 = vld [vmem:[#allocation125_spill] sm:$0xff]  ;;  %v14653_v19 = vld [vmem:[#allocation127_spill] sm:$0xff] }
 0x63d   : > { %8550 = vmatpush1.bf16.msra.mxu1 %v14639_v57  ;;  %8488 = vmatprep.subr.bf16.mxu0 %v14640_v41  ;;  %v14646_v57 = vld [vmem:[#allocation277_spill] sm:$0xff]  ;;  %v12545_v41 = vpop.permute.xlu0 %2520 }
 0x63e   : > { %8552 = vmatprep.subr.bf16.mxu1 %v14641_v14  ;;  %v14647_v14 = vld [vmem:[#allocation278_spill] sm:$0xff]  ;;  %9866 = vset.pattern.permute.xlu0 %v14485_v51  ;;  %v2524_v54 = vmul.f32 %v12545_v41, %v14648_v35  ;;  %v14654_v51 = vmov 35  }
 0x63f   : > { %6156 = vperm.xlu0 %9866, %v12511_v43  }
 0x640   : > { %8490 = vmatpush1.bf16.msra.mxu0 %v14644_v28  ;;  %v12552_v28 = vpop.permute.xlu1 %2528  ;;  %9858 = vset.pattern.permute.xlu1 %v14479_v45  ;;  %v2526_v35 = vadd.f32 %v2524_v54, %v2518_v10  ;;  %v14662_v54 = vld [vmem:[#allocation288_spill] sm:$0xff] }
 0x641   : > { %8554 = vmatpush1.bf16.msra.mxu1 %v14645_v63  ;;  %8492 = vmatprep.subr.bf16.mxu0 %v14646_v57  ;;  %v14650_v63 = vld [vmem:[#allocation280_spill] sm:$0xff]  ;;  %v14651_v57 = vld [vmem:[#allocation281_spill] sm:$0xff]  ;;  %v2532_v52 = vmul.f32 %v12552_v28, %v14653_v19 }
 0x642   : > { %8556 = vmatprep.subr.bf16.mxu1 %v14647_v14  ;;  %v14652_v14 = vld [vmem:[#allocation282_spill] sm:$0xff]  ;;  %6124 = vperm.xlu1 %9858, %v12511_v43  }
 0x643   : > { %9869 = vset.pattern.permute.xlu0 %v14654_v51  ;;  %v2534_v10 = vadd.f32 %v2532_v52, %v2526_v35  ;;  %v14661_v51 = vld [vmem:[#allocation287_spill] sm:$0xff] }
 0x644   : > { %8494 = vmatpush1.bf16.msra.mxu0 %v14649_v49  ;;  %5374 = vperm.xlu0 %9869, %v12244_v0   ;;  %v14656_v49 = vld [vmem:[#allocation284_spill] sm:$0xff]  ;;  %v14667_v52 = vld [vmem:[#allocation291_spill] sm:$0xff] }
 0x645   : > { %8558 = vmatpush1.bf16.msra.mxu1 %v14650_v63  ;;  %8496 = vmatprep.subr.bf16.mxu0 %v14651_v57  ;;  %v14658_v63 = vld [vmem:[#allocation286_spill] sm:$0xff]  ;;  %v12567_v57 = vpop.permute.xlu1 %2536 }
 0x646   : > { %8560 = vmatprep.subr.bf16.mxu1 %v14652_v14  ;;  %v14659_v14 = vmov 30   ;;  %v2540_v19 = vmul.f32 %v12567_v57, %v14660_v48  ;;  %v14666_v48 = vmov 31  }
 0x647   : > { %9859 = vset.pattern.permute.xlu1 %v14659_v14  ;;  %v14665_v14 = vld [vmem:[#allocation132_spill] sm:$0xff] }
 0x648   : > { %8498 = vmatpush1.bf16.msra.mxu0 %v14655_v55  ;;  %5294 = vperm.xlu1 %9859, %v12244_v0   ;;  %v2542_v55 = vadd.f32 %v2540_v19, %v2534_v10 }
 0x649   : > { %8562 = vmatpush1.bf16.msra.mxu1 %v14656_v49  ;;  %8500 = vmatprep.subr.bf16.mxu0 %v14657_v25  ;;  %v14663_v49 = vld [vmem:[#allocation289_spill] sm:$0xff]  ;;  %v14664_v25 = vld [vmem:[#allocation290_spill] sm:$0xff]  ;;  %v12584_v35 = vpop.permute.xlu1 %2552 }
 0x64a   : > { %8564 = vmatprep.subr.bf16.mxu1 %v14658_v63  ;;  %9872 = vset.pattern.permute.xlu0 %v14478_v44  ;;  %v12578_v63 = vpop.permute.xlu0 %2544 }
 0x64b   : > { %v2548_v4 = vmul.f32 %v12578_v63, %v14665_v14  ;;  %v14673_v14 = vld [vmem:[#allocation296_spill] sm:$0xff] }
 0x64c   : > { %8502 = vmatpush1.bf16.msra.mxu0 %v14661_v51  ;;  %9861 = vset.pattern.permute.xlu1 %v14666_v48  ;;  %v14668_v51 = vld [vmem:[#allocation292_spill] sm:$0xff]  ;;  %v14674_v48 = vld [vmem:[#allocation297_spill] sm:$0xff] }
 0x64d   : > { %8566 = vmatpush1.bf16.msra.mxu1 %v14662_v54  ;;  %8504 = vmatprep.subr.bf16.mxu0 %v14663_v49  ;;  %v14669_v54 = vld [vmem:[#allocation293_spill] sm:$0xff]  ;;  %v14670_v49 = vld [vmem:[#allocation294_spill] sm:$0xff]  ;;  %v2550_v10 = vadd.f32 %v2548_v4, %v2542_v55  ;;  %v12597_v38 = vpop.permute.xlu1 %2560  ;;  %v14678_v55 = vld [vmem:[#allocation300_spill] sm:$0xff] }
 0x64e   : > { %8568 = vmatprep.subr.bf16.mxu1 %v14664_v25  ;;  %5310 = vperm.xlu1 %9861, %v12244_v0   ;;  %v14671_v25 = vld [vmem:[#allocation136_spill] sm:$0xff]  ;;  %v14679_v4 = vld [vmem:[#allocation301_spill] sm:$0xff] }
 0x64f   : > { %v2556_v19 = vmul.f32 %v12584_v35, %v14671_v25  ;;  %v14677_v25 = vld [vmem:[#allocation299_spill] sm:$0xff] }
 0x650   : > { %8506 = vmatpush1.bf16.msra.mxu0 %v14667_v52  ;;  %v14675_v52 = vld [vmem:[#allocation298_spill] sm:$0xff] }
 0x651   : > { %8570 = vmatpush1.bf16.msra.mxu1 %v14668_v51  ;;  %8508 = vmatprep.subr.bf16.mxu0 %v14669_v54  ;;  %v14676_v51 = vld [vmem:[#allocation138_spill] sm:$0xff]  ;;  %v2558_v54 = vadd.f32 %v2556_v19, %v2550_v10  ;;  %v12612_v19 = vpop.permute.xlu0 %2569 }
 0x652   : > { %8572 = vmatprep.subr.bf16.mxu1 %v14670_v49  ;;  %9862 = vset.pattern.permute.xlu1 %v14484_v30  ;;  %v2564_v49 = vmul.f32 %v12597_v38, %v14676_v51  ;;  %v14680_v30 = vld [vmem:[#allocation302_spill] sm:$0xff] }
 0x653   : > { %6140 = vperm.xlu1 %9862, %v12511_v43   ;;  %v14684_v51 = vld [vmem:[#allocation306_spill] sm:$0xff] }
 0x654   : > { %8510 = vmatpush1.bf16.msra.mxu0 %v14672_v33  ;;  %v14683_v33 = vld [vmem:[#allocation305_spill] sm:$0xff] }
 0x655   : > { %8574 = vmatpush1.bf16.msra.mxu1 %v14673_v14  ;;  %8512 = vmatprep.subr.bf16.mxu0 %v14674_v48  ;;  %v2566_v14 = vadd.f32 %v2564_v49, %v2558_v54  ;;  %v14682_v48 = vld [vmem:[#allocation304_spill] sm:$0xff]  ;;  %v14688_v54 = vld [vmem:[#allocation309_spill] sm:$0xff] }
 0x656   : > { %8576 = vmatprep.subr.bf16.mxu1 %v14675_v52  ;;  %v14681_v52 = vld [vmem:[#allocation303_spill] sm:$0xff]  ;;  %v14687_v49 = vld [vmem:[#allocation308_spill] sm:$0xff] }
 0x657   : > { %9864 = vset.pattern.permute.xlu1 %v14483_v11  ;;  %v2573_v10 = vadd.f32 %v12612_v19, %v2566_v14  ;;  %v12617_v11 = vpop.permute.xlu1 %5391  ;;  %v14691_v14 = vmov 34  }
 0x658   : > { %8514 = vmatpush1.bf16.msra.mxu0 %v14677_v25  ;;  %6148 = vperm.xlu1 %9864, %v12511_v43  }
 0x659   : > { %8578 = vmatpush1.bf16.msra.mxu1 %v14678_v55  ;;  %8516 = vmatprep.subr.bf16.mxu0 %v14679_v4  ;;  %v14685_v55 = vmov 33   ;;  %v14694_v4 = vld [vmem:[#allocation314_spill] sm:$0xff] }
 0x65a   : > { %8580 = vmatprep.subr.bf16.mxu1 %v14680_v30  ;;  %v14686_v30 = vld [vmem:[#allocation307_spill] sm:$0xff] }
 0x65b   : > { %v12630_v25 = vpop.permute.xlu1 %5407 }
 0x65c   : > { %8518 = vmatpush1.bf16.msra.mxu0 %v14681_v52  ;;  %9865 = vset.pattern.permute.xlu1 %v14685_v55  ;;  %v14690_v52 = vld [vmem:[#allocation311_spill] sm:$0xff]  ;;  %v14692_v55 = vld [vmem:[#allocation312_spill] sm:$0xff] }
 0x65d   : > { %8582 = vmatpush1.bf16.msra.mxu1 %v14682_v48  ;;  %8520 = vmatprep.subr.bf16.mxu0 %v14683_v33  ;;  %v14689_v48 = vld [vmem:[#allocation310_spill] sm:$0xff]  ;;  %v5417_v33 = vrot.slane %v2573_v10, %v14470_v26 }
 0x65e   : > { %8584 = vmatprep.subr.bf16.mxu1 %v14684_v51  ;;  %5342 = vperm.xlu1 %9865, %v12244_v0   ;;  %v5401_v51 = vrot.slane %v2573_v10, %v14469_v23 }
 0x660   : > { %8522 = vmatpush1.bf16.msra.mxu0 %v14686_v30  ;;  %v14693_v30 = vld [vmem:[#allocation313_spill] sm:$0xff] }
 0x661   : > { %8586 = vmatpush1.bf16.msra.mxu1 %v14687_v49  ;;  %8524 = vmatprep.subr.bf16.mxu0 %v14688_v54  ;;  %v5419_v49 = vmul.f32 %v5417_v33, %v12630_v25  ;;  %v5433_v54 = vrot.slane %v2573_v10, %v14471_v58  ;;  %v14699_v33 = vld [vmem:[#allocation319_spill] sm:$0xff] }
 0x662   : > { %8588 = vmatprep.subr.bf16.mxu1 %v14689_v48  ;;  %9867 = vset.pattern.permute.xlu1 %v14691_v14  ;;  %v5403_v48 = vmul.f32 %v5401_v51, %v12617_v11  ;;  %v14697_v14 = vld [vmem:[#allocation317_spill] sm:$0xff] }
 0x663   : > { %5358 = vperm.xlu1 %9867, %v12244_v0   ;;  %v5449_v0 = vrot.slane %v2573_v10, %v14472_v27  ;;  %v14704_v10 = vld [vmem:[#allocation323_spill] sm:$0xff] }
 0x664   : > { %8526 = vmatpush1.bf16.msra.mxu0 %v14690_v52  ;;  %v14696_v52 = vld [vmem:[#allocation316_spill] sm:$0xff] }
 0x665   : > { %8590 = vmatpush1.bf16.msra.mxu1 %v14692_v55  ;;  %8528 = vmatprep.subr.bf16.mxu0 %v14693_v30  ;;  %v14698_v55 = vld [vmem:[#allocation318_spill] sm:$0xff]  ;;  %v12640_v30 = vpop.permute.xlu0 %5423 }
 0x666   : > { %8592 = vmatprep.subr.bf16.mxu1 %v14694_v4  ;;  %v5421_v4 = vadd.f32 %v5419_v49, %v5403_v48  ;;  %v5435_v51 = vmul.f32 %v5433_v54, %v12640_v30  ;;  %v14703_v48 = vmov 8   ;;  %v14705_v49 = vld [vmem:[#allocation324_spill] sm:$0xff]  ;;  %v14706_v54 = vld [vmem:[#allocation325_spill] sm:$0xff] }
 0x667   : > { %9868 = vset.pattern.permute.xlu1 %v14477_v22 }
 0x668   : > { %8530 = vmatpush1.bf16.msra.mxu0 %v14695_v1  ;;  %6164 = vperm.xlu1 %9868, %v12511_v43   ;;  %v14700_v1 = vld [vmem:[#allocation320_spill] sm:$0xff]  ;;  %v5437_v22 = vadd.f32 %v5435_v51, %v5421_v4 }
 0x669   : > { %8594 = vmatpush1.bf16.msra.mxu1 %v14696_v52  ;;  %8532 = vmatprep.subr.bf16.mxu0 %v14697_v14  ;;  %v14701_v52 = vld [vmem:[#allocation321_spill] sm:$0xff]  ;;  %v14702_v14 = vld [vmem:[#allocation322_spill] sm:$0xff]  ;;  %v14709_v4 = vld [vmem:[#allocation328_spill] sm:$0xff] }
 0x66a   : > { %8596 = vmatprep.subr.bf16.mxu1 %v14698_v55  ;;  %v12650_v55 = vpop.permute.xlu1 %5439 }
 0x66b   : > { %v5451_v6 = vmul.f32 %v5449_v0, %v12650_v55  ;;  %v14710_v0 = vld [vmem:[#allocation329_spill] sm:$0xff] }
 0x66c   : > { %8534 = vmatpush1.bf16.msra.mxu0 %v14699_v33  ;;  %9870 = vset.pattern.permute.xlu1 %v14703_v48  ;;  %v14708_v33 = vld [vmem:[#allocation327_spill] sm:$0xff]  ;;  %v14713_v48 = vld [vmem:[#allocation121_spill] sm:$0xff] }
 0x66d   : > { %8598 = vmatpush1.bf16.msra.mxu1 %v14700_v1  ;;  %8536 = vmatprep.subr.bf16.mxu0 %v14701_v52  ;;  %v14707_v1 = vld [vmem:[#allocation326_spill] sm:$0xff]  ;;  %v5453_v52 = vadd.f32 %v5451_v6, %v5437_v22  ;;  %v14712_v6 = vld [vmem:[#allocation119_spill] sm:$0xff] }
 0x66e   : > { %8600 = vmatprep.subr.bf16.mxu1 %v14702_v14  ;;  %6172 = vperm.xlu1 %9870, %v12511_v43   ;;  %v12660_v14 = vpop.permute.xlu1 %5456  ;;  %v14711_v22 = vld [vmem:[#allocation330_spill] sm:$0xff]  ;;  %v2507_v51 = vmul.f32 %v12519_v60, %v14712_v6  ;;  %v14719_v6 = vld [vmem:[#allocation57_spill] sm:$0xff] }
 0x66f   : > { %v12668_v43 = vadd.f32 %v12660_v14, %v5453_v52  ;;  %v14715_v52 = vld [vmem:[#allocation332_spill] sm:$0xff] }
 0x670   : > { %8538 = vmatpush1.bf16.msra.mxu0 %v14704_v10 }
 0x671   : > { %8602 = vmatpush1.bf16.msra.mxu1 %v14705_v49  ;;  %8540 = vmatprep.subr.bf16.mxu0 %v14706_v54  ;;  %v14718_v49 = vld [vmem:[#allocation124_spill] sm:$0xff]  ;;  %v14738_v54 = vld [vmem:[#allocation135_spill] sm:$0xff] }
 0x672   : > { %8604 = vmatprep.subr.bf16.mxu1 %v14707_v1  ;;  %9871 = vset.pattern.permute.xlu1 %v14474_v2  ;;  %v14714_v1 = vld [vmem:[#allocation331_spill] sm:$0xff]  ;;  %v2523_v60 = vmul.f32 %v12545_v41, %v14718_v49  ;;  %v14728_v41 = vld [vmem:[#allocation337_spill] sm:$0xff]  ;;  %v2555_v10 = vmul.f32 %v12584_v35, %v14738_v54 }
 0x673   : > { %v12697_v49 = vld [vmem:[%s14716_s1] sm:$0xff]  ;;  %s15027_s1 = sld [smem:[#allocation49_spill]] }
 0x674   : > { %8542 = vmatpush1.bf16.msra.mxu0 %v14708_v33  ;;  %6181 = vperm.xlu1 %9871, %v12697_v49   ;;  %v14737_v33 = vld [vmem:[#allocation71_spill] sm:$0xff]  ;;  %v14742_v35 = vld [vmem:[#allocation137_spill] sm:$0xff] }
 0x675   : > { %8606 = vmatpush1.bf16.msra.mxu1 %v14709_v4  ;;  %8608 = vmatprep.subr.bf16.mxu0 %v14710_v0  ;;  %v2515_v4 = vmul.f32 %v12532_v32, %v14713_v48  ;;  %v14720_v48 = vld [vmem:[#allocation334_spill] sm:$0xff]  ;;  %v2563_v54 = vmul.f32 %v12597_v38, %v14742_v35  ;;  %v14745_v38 = vld [vmem:[#allocation77_spill] sm:$0xff] }
 0x676   : > { %8672 = vmatprep.subr.bf16.mxu1 %v10850_v7  ;;  %v4809_v7 = vpop.permute.xlu1 %4808  ;;  %6197 = vperm.xlu0 %9872, %v12697_v49  }
 0x677   : > { %4658 = vmatmul.mubr.f32.vlgmr.msra.gmra.mrb[16].mxu0 %v12355_v9 }
 0x678   : > { %4729 = vmatmul.mubr.f32.vlgmr.msra.gmra.mrb[16].mxu1 %v12355_v9  ;;  %8610 = vmatpush1.bf16.msra.mxu0 %v14711_v22  ;;  %v14723_v22 = vld [vmem:[#allocation126_spill] sm:$0xff] }
 0x679   : > { %4799 = vmatprep.mubr.f32.mxu0 %v12348_v13  ;;  %8674 = vmatpush1.bf16.msra.mxu1 %v10854_v12  ;;  %v14717_v13 = vld [vmem:[#allocation333_spill] sm:$0xff]  ;;  %v2517_v12 = vadd.f32 %v2515_v4, %v2507_v51  ;;  %v14726_v4 = vld [vmem:[#allocation336_spill] sm:$0xff]  ;;  %v14727_v51 = vld [vmem:[#allocation63_spill] sm:$0xff] }
 0x67a   : > { %8612 = vmatprep.subr.bf16.mxu0 %v14714_v1  ;;  %8676 = vmatprep.subr.bf16.mxu1 %v10860_v17  ;;  %v4831_v32 = vpop.permute.xlu1 %4830  ;;  %v14721_v1 = vld [vmem:[#allocation59_spill] sm:$0xff] }
 0x67b   : > { %5525 = vmatprep.mubr.f32.mxu1 %v12668_v43  ;;  %v14722_v17 = vld [vmem:[#allocation335_spill] sm:$0xff]  ;;  %v2525_v0 = vadd.f32 %v2523_v60, %v2517_v12  ;;  %9874 = vset.pattern.permute.xlu0 %v14479_v45 }
 0x67c   : > { %8614 = vmatpush1.bf16.msra.mxu0 %v14715_v52  ;;  %v2531_v52 = vmul.f32 %v12552_v28, %v14723_v22  ;;  %v4815_v28 = vpop.permute.xlu0 %4814  ;;  %v14731_v22 = vld [vmem:[#allocation338_spill] sm:$0xff]  ;;  %v14732_v12 = vld [vmem:[#allocation67_spill] sm:$0xff]  ;;  %6213 = vperm.xlu0 %9874, %v12697_v49  }
 0x67d   : > { %8678 = vmatpush1.bf16.msra.mxu1 %v10872_v31  ;;  %8616 = vmatprep.subr.bf16.mxu0 %v14717_v13  ;;  %v14724_v31 = vld [vmem:[#allocation61_spill] sm:$0xff]  ;;  %v14733_v60 = vld [vmem:[#allocation339_spill] sm:$0xff] }
 0x67e   : > { %8680 = vmatprep.subr.bf16.mxu1 %v14719_v6  ;;  %v14729_v6 = vld [vmem:[#allocation129_spill] sm:$0xff] }
 0x67f   : > { %v14730_v13 = vld [vmem:[#allocation65_spill] sm:$0xff] }
 0x680   : > { %8618 = vmatpush1.bf16.msra.mxu0 %v14720_v48  ;;  %v2533_v48 = vadd.f32 %v2531_v52, %v2525_v0  ;;  %v4847_v46 = vpop.permute.xlu0 %4846  ;;  %9877 = vset.pattern.permute.xlu0 %v14482_v21 }
 0x681   : > { %8682 = vmatpush1.bf16.msra.mxu1 %v14721_v1  ;;  %8620 = vmatprep.subr.bf16.mxu0 %v14722_v17  ;;  %v2539_v1 = vmul.f32 %v12567_v57, %v14729_v6  ;;  %v4863_v17 = vpop.permute.xlu1 %4862 }
 0x682   : > { %8684 = vmatprep.subr.bf16.mxu1 %v14724_v31  ;;  %v12708_v31 = vld [vmem:[%s14725_s28] sm:$0xff]  ;;  %s15028_s28 = sld [smem:[#allocation50_spill]] }
 0x683   : > { %6246 = vperm.xlu1 %9871, %v12708_v31   ;;  %6294 = vperm.xlu0 %9877, %v12708_v31  }
 0x684   : > { %8622 = vmatpush1.bf16.msra.mxu0 %v14726_v4 }
 0x685   : > { %8686 = vmatpush1.bf16.msra.mxu1 %v14727_v51  ;;  %8624 = vmatprep.subr.bf16.mxu0 %v14728_v41  ;;  %v2541_v51 = vadd.f32 %v2539_v1, %v2533_v48  ;;  %v14734_v41 = vld [vmem:[#allocation131_spill] sm:$0xff]  ;;  %v4879_v48 = vpop.permute.xlu1 %4878 }
 0x686   : > { %8688 = vmatprep.subr.bf16.mxu1 %v14730_v13  ;;  %v2547_v57 = vmul.f32 %v12578_v63, %v14734_v41  ;;  %v14735_v13 = vld [vmem:[#allocation69_spill] sm:$0xff]  ;;  %v14736_v41 = vld [vmem:[#allocation340_spill] sm:$0xff] }
 0x687   : > { %9873 = vset.pattern.permute.xlu1 %v14478_v44  ;;  %9879 = vset.pattern.permute.xlu0 %v14478_v44 }
 0x688   : > { %8626 = vmatpush1.bf16.msra.mxu0 %v14731_v22  ;;  %v2549_v24 = vadd.f32 %v2547_v57, %v2541_v51  ;;  %6262 = vperm.xlu1 %9873, %v12708_v31  }
 0x689   : > { %8690 = vmatpush1.bf16.msra.mxu1 %v14732_v12  ;;  %8628 = vmatprep.subr.bf16.mxu0 %v14733_v60 }
 0x68a   : > { %v4233_v0 = vpop.f32.mrb[10].mxu0  ;;  %v12712_v52 = vpop.f32.mrb[10].mxu1  ;;  %8692 = vmatprep.subr.bf16.mxu1 %v14735_v13 }
 0x68b   : > { %v4820_v6 = vrot.slane %v4233_v0, %v14469_v23  ;;  %v4836_v22 = vrot.slane %v4233_v0, %v14470_v26  ;;  %v4235_v12 = vpop.f32.mrb[11].mxu0  ;;  %v12718_v4 = vpop.f32.mrb[11].mxu1  ;;  %v4852_v13 = vrot.slane %v4233_v0, %v14471_v58  ;;  %v4868_v59 = vrot.slane %v4233_v0, %v14472_v27 }
 0x68c   : > { %v4824_v1 = vrot.slane %v4235_v12, %v14469_v23  ;;  %v4840_v63 = vrot.slane %v4235_v12, %v14470_v26  ;;  %8630 = vmatpush1.bf16.msra.mxu0 %v14736_v41  ;;  %v4856_v29 = vrot.slane %v4235_v12, %v14471_v58  ;;  %v14740_v41 = vld [vmem:[#allocation73_spill] sm:$0xff]  ;;  %v4884_v57 = vrot.slane %v12712_v52, %v14469_v23  ;;  %v4911_v0 = vpop.permute.xlu1 %4910 }
 0x68d   : > { %v4825_v60 = vmul.f32 %v4820_v6, %v4815_v28  ;;  %8694 = vmatpush1.bf16.msra.mxu1 %v14737_v33  ;;  %8632 = vmatprep.subr.bf16.mxu0 %v14739_v50  ;;  %v4841_v37 = vmul.f32 %v4836_v22, %v4831_v32  ;;  %v4872_v33 = vrot.slane %v4235_v12, %v14472_v27 }
 0x68e   : > { %v4826_v56 = vmul.f32 %v4824_v1, %v4815_v28  ;;  %8696 = vmatprep.subr.bf16.mxu1 %v14740_v41  ;;  %v4842_v36 = vmul.f32 %v4840_v63, %v4831_v32  ;;  %v4857_v51 = vmul.f32 %v4852_v13, %v4847_v46  ;;  %v2557_v22 = vadd.f32 %v2555_v10, %v2549_v24  ;;  %v4895_v63 = vpop.permute.xlu0 %4894  ;;  %v14747_v13 = vld [vmem:[#allocation79_spill] sm:$0xff] }
 0x68f   : > { %v4827_v61 = vadd.f32 %v4825_v60, %v4809_v7  ;;  %v14743_v60 = vld [vmem:[#allocation75_spill] sm:$0xff]  ;;  %v4858_v41 = vmul.f32 %v4856_v29, %v4847_v46  ;;  %v4873_v32 = vmul.f32 %v4868_v59, %v4863_v17  ;;  %v4904_v46 = vrot.slane %v12718_v4, %v14470_v26  ;;  %v14746_v29 = vld [vmem:[#allocation346_spill] sm:$0xff]  ;;  %9875 = vset.pattern.permute.xlu1 %v14479_v45 }
 0x690   : > { %v4828_v6 = vadd.f32 %v4826_v56, %v4809_v7  ;;  %8634 = vmatpush1.bf16.msra.mxu0 %v14741_v39  ;;  %v4888_v56 = vrot.slane %v12718_v4, %v14469_v23  ;;  %v14744_v7 = vld [vmem:[#allocation345_spill] sm:$0xff]  ;;  %v4889_v10 = vmul.f32 %v4884_v57, %v4879_v48  ;;  %v4936_v57 = vrot.slane %v12718_v4, %v14472_v27 }
 0x691   : > { %v4843_v28 = vadd.f32 %v4841_v37, %v4827_v61  ;;  %8698 = vmatpush1.bf16.msra.mxu1 %v14743_v60  ;;  %8636 = vmatprep.subr.bf16.mxu0 %v14744_v7  ;;  %v4900_v61 = vrot.slane %v12712_v52, %v14470_v26  ;;  %v4874_v37 = vmul.f32 %v4872_v33, %v4863_v17 }
 0x692   : > { %v4844_v1 = vadd.f32 %v4842_v36, %v4828_v6  ;;  %8700 = vmatprep.subr.bf16.mxu1 %v14745_v38  ;;  %v4916_v36 = vrot.slane %v12712_v52, %v14471_v58  ;;  %v14748_v6 = vld [vmem:[#allocation347_spill] sm:$0xff]  ;;  %v4920_v17 = vrot.slane %v12718_v4, %v14471_v58  ;;  %v4890_v35 = vmul.f32 %v4888_v56, %v4879_v48  ;;  %v14750_v38 = vld [vmem:[#allocation348_spill] sm:$0xff] }
 0x693   : > { %v4859_v12 = vadd.f32 %v4857_v51, %v4843_v28  ;;  %v14749_v28 = vld [vmem:[#allocation81_spill] sm:$0xff]  ;;  %v4932_v51 = vrot.slane %v12712_v52, %v14472_v27  ;;  %6278 = vperm.xlu1 %9875, %v12708_v31   ;;  %v14759_v31 = vld [vmem:[#allocation91_spill] sm:$0xff] }
 0x694   : > { %v4860_v24 = vadd.f32 %v4858_v41, %v4844_v1  ;;  %8638 = vmatpush1.bf16.msra.mxu0 %v14746_v29  ;;  %v4905_v1 = vmul.f32 %v4900_v61, %v4895_v63  ;;  %v4927_v41 = vpop.permute.xlu1 %4926  ;;  %v4921_v56 = vmul.f32 %v4916_v36, %v4911_v0  ;;  %v14753_v61 = vld [vmem:[#allocation85_spill] sm:$0xff] }
 0x695   : > { %v4875_v59 = vadd.f32 %v4873_v32, %v4859_v12  ;;  %8702 = vmatpush1.bf16.msra.mxu1 %v14747_v13  ;;  %8640 = vmatprep.subr.bf16.mxu0 %v14748_v6  ;;  %v4906_v12 = vmul.f32 %v4904_v46, %v4895_v63  ;;  %v2565_v13 = vadd.f32 %v2563_v54, %v2557_v22  ;;  %v14756_v54 = vld [vmem:[#allocation351_spill] sm:$0xff] }
 0x696   : > { %v4876_v33 = vadd.f32 %v4874_v37, %v4860_v24  ;;  %8704 = vmatprep.subr.bf16.mxu1 %v14749_v28  ;;  %v14751_v37 = vld [vmem:[#allocation83_spill] sm:$0xff]  ;;  %v14752_v24 = vld [vmem:[#allocation349_spill] sm:$0xff]  ;;  %v4937_v4 = vmul.f32 %v4932_v51, %v4927_v41  ;;  %v4938_v63 = vmul.f32 %v4936_v57, %v4927_v41  ;;  %v14758_v28 = vld [vmem:[#allocation352_spill] sm:$0xff] }
 0x697   : > { %v4891_v60 = vadd.f32 %v4889_v10, %v4875_v59  ;;  %v4922_v59 = vmul.f32 %v4920_v17, %v4911_v0  ;;  %v2572_v22 = vadd.f32 %v12612_v19, %v2565_v13  ;;  %v14757_v17 = vld [vmem:[#allocation89_spill] sm:$0xff]  ;;  %9876 = vset.pattern.permute.xlu1 %v14482_v21  ;;  %v14762_v41 = vld [vmem:[#allocation354_spill] sm:$0xff]  ;;  %v14763_v57 = vld [vmem:[#allocation95_spill] sm:$0xff] }
 0x698   : > { %v4892_v32 = vadd.f32 %v4890_v35, %v4876_v33  ;;  %8642 = vmatpush1.bf16.msra.mxu0 %v14750_v38  ;;  %v14754_v33 = vld [vmem:[#allocation350_spill] sm:$0xff]  ;;  %v14755_v35 = vld [vmem:[#allocation87_spill] sm:$0xff]  ;;  %6229 = vperm.xlu1 %9876, %v12697_v49   ;;  %v14760_v51 = vld [vmem:[#allocation353_spill] sm:$0xff] }
 0x699   : > { %v4907_v48 = vadd.f32 %v4905_v1, %v4891_v60  ;;  %8706 = vmatpush1.bf16.msra.mxu1 %v14751_v37  ;;  %8644 = vmatprep.subr.bf16.mxu0 %v14752_v24  ;;  %v5397_v60 = vrot.slane %v2572_v22, %v14469_v23  ;;  %v5413_v19 = vrot.slane %v2572_v22, %v14470_v26  ;;  %v14761_v1 = vld [vmem:[#allocation93_spill] sm:$0xff]  ;;  %v14764_v49 = vld [vmem:[#allocation355_spill] sm:$0xff]  ;;  %v14766_v37 = vld [vmem:[#allocation356_spill] sm:$0xff] }
 0x69a   : > { %v4908_v52 = vadd.f32 %v4906_v12, %v4892_v32  ;;  %8708 = vmatprep.subr.bf16.mxu1 %v14753_v61  ;;  %v14767_v13 = vld [vmem:[#allocation99_spill] sm:$0xff]  ;;  %v5445_v61 = vrot.slane %v2572_v22, %v14472_v27 }
 0x69b   : > { %v4923_v10 = vadd.f32 %v4921_v56, %v4907_v48  ;;  %v5402_v32 = vmul.f32 %v5397_v60, %v12617_v11  ;;  %v5418_v12 = vmul.f32 %v5413_v19, %v12630_v25  ;;  %v5429_v48 = vrot.slane %v2572_v22, %v14471_v58  ;;  %v14765_v56 = vld [vmem:[#allocation97_spill] sm:$0xff]  ;;  %v14770_v11 = vld [vmem:[#allocation358_spill] sm:$0xff]  ;;  %v14771_v25 = vld [vmem:[#allocation103_spill] sm:$0xff] }
 0x69c   : > { %v4924_v46 = vadd.f32 %v4922_v59, %v4908_v52  ;;  %8646 = vmatpush1.bf16.msra.mxu0 %v14754_v33  ;;  %9878 = vset.pattern.permute.xlu1 %v14474_v2  ;;  %v14768_v52 = vld [vmem:[#allocation357_spill] sm:$0xff]  ;;  %v14775_v60 = vld [vmem:[#allocation107_spill] sm:$0xff] }
 0x69d   : > { %v12771_v36 = vadd.f32 %v4937_v4, %v4923_v10  ;;  %8710 = vmatpush1.bf16.msra.mxu1 %v14755_v35  ;;  %8648 = vmatprep.subr.bf16.mxu0 %v14756_v54  ;;  %v5420_v59 = vadd.f32 %v5418_v12, %v5402_v32  ;;  %v5434_v4 = vmul.f32 %v5429_v48, %v12640_v30  ;;  %v14769_v10 = vld [vmem:[#allocation101_spill] sm:$0xff]  ;;  %v14782_v48 = vld [vmem:[#allocation54_spill] sm:$0xff] }
 0x69e   : > { %v12776_v0 = vadd.f32 %v4938_v63, %v4924_v46  ;;  %8712 = vmatprep.subr.bf16.mxu1 %v14757_v17  ;;  %v14772_v63 = vld [vmem:[#allocation359_spill] sm:$0xff]  ;;  %v5450_v46 = vmul.f32 %v5445_v61, %v12650_v55  ;;  %v14773_v17 = vld [vmem:[#allocation105_spill] sm:$0xff]  ;;  %v14788_v61 = vld [vmem:[#allocation64_spill] sm:$0xff] }
 0x69f   : > { %v5436_v35 = vadd.f32 %v5434_v4, %v5420_v59  ;;  %v14776_v22 = vld [vmem:[#allocation361_spill] sm:$0xff]  ;;  %v14786_v59 = vld [vmem:[#allocation60_spill] sm:$0xff] }
 0x6a0   : > { %8650 = vmatpush1.bf16.msra.mxu0 %v14758_v28  ;;  %v14777_v19 = vld [vmem:[#allocation109_spill] sm:$0xff]  ;;  %v14790_v4 = vld [vmem:[#allocation68_spill] sm:$0xff] }
 0x6a1   : > { %8714 = vmatpush1.bf16.msra.mxu1 %v14759_v31  ;;  %8652 = vmatprep.subr.bf16.mxu0 %v14760_v51  ;;  %v14774_v31 = vld [vmem:[#allocation360_spill] sm:$0xff]  ;;  %v5452_v30 = vadd.f32 %v5450_v46, %v5436_v35  ;;  %v14780_v32 = vld [vmem:[#allocation53_spill] sm:$0xff] }
 0x6a2   : > { %8716 = vmatprep.subr.bf16.mxu1 %v14761_v1  ;;  %v14778_v1 = vld [vmem:[#allocation362_spill] sm:$0xff]  ;;  %v14781_v12 = vld [vmem:[#allocation113_spill] sm:$0xff] }
 0x6a3   : > { %v12815_v55 = vadd.f32 %v12660_v14, %v5452_v30  ;;  %v14784_v14 = vld [vmem:[#allocation56_spill] sm:$0xff] }
 0x6a4   : > { %8654 = vmatpush1.bf16.msra.mxu0 %v14762_v41 }
 0x6a5   : > { %8718 = vmatpush1.bf16.msra.mxu1 %v14763_v57  ;;  %8656 = vmatprep.subr.bf16.mxu0 %v14764_v49  ;;  %v14779_v57 = vld [vmem:[#allocation111_spill] sm:$0xff] }
 0x6a6   : > { %8720 = vmatprep.subr.bf16.mxu1 %v14765_v56  ;;  %v14783_v56 = vld [vmem:[#allocation55_spill] sm:$0xff] }
 0x6a8   : > { %8658 = vmatpush1.bf16.msra.mxu0 %v14766_v37 }
 0x6a9   : > { %8722 = vmatpush1.bf16.msra.mxu1 %v14767_v13  ;;  %8660 = vmatprep.subr.bf16.mxu0 %v14768_v52  ;;  %v14785_v13 = vld [vmem:[#allocation58_spill] sm:$0xff] }
 0x6aa   : > { %8724 = vmatprep.subr.bf16.mxu1 %v14769_v10  ;;  %v14791_v10 = vld [vmem:[#allocation70_spill] sm:$0xff] }
 0x6ac   : > { %8662 = vmatpush1.bf16.msra.mxu0 %v14770_v11 }
 0x6ad   : > { %8726 = vmatpush1.bf16.msra.mxu1 %v14771_v25  ;;  %8664 = vmatprep.subr.bf16.mxu0 %v14772_v63 }
 0x6ae   : > { %8728 = vmatprep.subr.bf16.mxu1 %v14773_v17 }
 0x6b0   : > { %8666 = vmatpush1.bf16.msra.mxu0 %v14774_v31 }
 0x6b1   : > { %8730 = vmatpush1.bf16.msra.mxu1 %v14775_v60  ;;  %8668 = vmatprep.subr.bf16.mxu0 %v14776_v22 }
 0x6b2   : > { %8732 = vmatprep.subr.bf16.mxu1 %v14777_v19 }
 0x6b4   : > { %8670 = vmatpush1.bf16.msra.mxu0 %v14778_v1 }
 0x6b5   : > { %8734 = vmatpush1.bf16.msra.mxu1 %v14779_v57  ;;  %8736 = vmatprep.subr.bf16.mxu0 %v14780_v32  ;;  %v14793_v32 = vld [vmem:[#allocation74_spill] sm:$0xff] }
 0x6b6   : > { %8800 = vmatprep.subr.bf16.mxu1 %v14781_v12 }
 0x6b7   : > { %4800 = vmatmul.mubr.f32.vlgmr.msra.gmra.mrb[18].mxu0 %v12355_v9  ;;  %v4959_v9 = vpop.permute.xlu1 %4958 }
 0x6b8   : > { %5526 = vmatmul.mubr.f32.vlgmr.msra.gmra.mrb[18].mxu1 %v12815_v55  ;;  %8738 = vmatpush1.bf16.msra.mxu0 %v14782_v48 }
 0x6b9   : > { %5596 = vmatprep.mubr.f32.mxu0 %v12668_v43  ;;  %8802 = vmatpush1.bf16.msra.mxu1 %v14496_v3  ;;  %v14787_v3 = vld [vmem:[#allocation62_spill] sm:$0xff] }
 0x6ba   : > { %5667 = vmatprep.mubr.f32.mxu1 %v12668_v43  ;;  %8740 = vmatprep.subr.bf16.mxu0 %v14783_v56 }
 0x6bb   : > { %8804 = vmatprep.subr.bf16.mxu1 %v14498_v42  ;;  %v14789_v42 = vld [vmem:[#allocation66_spill] sm:$0xff] }
 0x6bc   : > { %8742 = vmatpush1.bf16.msra.mxu0 %v14784_v14 }
 0x6bd   : > { %8806 = vmatpush1.bf16.msra.mxu1 %v14501_v5  ;;  %8744 = vmatprep.subr.bf16.mxu0 %v14785_v13  ;;  %v4975_v5 = vpop.permute.xlu1 %4974 }
 0x6be   : > { %8808 = vmatprep.subr.bf16.mxu1 %v14503_v62  ;;  %v4943_v62 = vpop.permute.xlu0 %4942 }
 0x6c0   : > { %8746 = vmatpush1.bf16.msra.mxu0 %v14786_v59 }
 0x6c1   : > { %8810 = vmatpush1.bf16.msra.mxu1 %v14506_v18  ;;  %8748 = vmatprep.subr.bf16.mxu0 %v14787_v3 }
 0x6c2   : > { %8812 = vmatprep.subr.bf16.mxu1 %v14508_v53  ;;  %v4991_v14 = vpop.permute.xlu0 %4990 }
 0x6c4   : > { %8750 = vmatpush1.bf16.msra.mxu0 %v14788_v61  ;;  %v14794_v61 = vld [vmem:[#allocation76_spill] sm:$0xff] }
 0x6c5   : > { %8814 = vmatpush1.bf16.msra.mxu1 %v14511_v16  ;;  %8752 = vmatprep.subr.bf16.mxu0 %v14789_v42 }
 0x6c6   : > { %8816 = vmatprep.subr.bf16.mxu1 %v14513_v15  ;;  %v5007_v15 = vpop.permute.xlu1 %5006 }
 0x6c8   : > { %8754 = vmatpush1.bf16.msra.mxu0 %v14790_v4 }
 0x6c9   : > { %8818 = vmatpush1.bf16.msra.mxu1 %v14516_v20  ;;  %8756 = vmatprep.subr.bf16.mxu0 %v14791_v10  ;;  %v14792_v20 = vld [vmem:[#allocation72_spill] sm:$0xff] }
 0x6ca   : > { %v4375_v18 = vpop.f32.mrb[12].mxu0  ;;  %v12841_v25 = vpop.f32.mrb[12].mxu1  ;;  %8820 = vmatprep.subr.bf16.mxu1 %v14518_v40 }
 0x6cb   : > { %v4948_v53 = vrot.slane %v4375_v18, %v14469_v23  ;;  %v4964_v16 = vrot.slane %v4375_v18, %v14470_v26  ;;  %v4377_v46 = vpop.f32.mrb[13].mxu0  ;;  %v12846_v35 = vpop.f32.mrb[13].mxu1  ;;  %v4980_v19 = vrot.slane %v4375_v18, %v14471_v58  ;;  %v4996_v56 = vrot.slane %v4375_v18, %v14472_v27  ;;  %v14795_v18 = vld [vmem:[#allocation78_spill] sm:$0xff] }
 0x6cc   : > { %v4952_v17 = vrot.slane %v4377_v46, %v14469_v23  ;;  %v4968_v60 = vrot.slane %v4377_v46, %v14470_v26  ;;  %8758 = vmatpush1.bf16.msra.mxu0 %v14792_v20  ;;  %v4984_v57 = vrot.slane %v4377_v46, %v14471_v58  ;;  %v5000_v3 = vrot.slane %v4377_v46, %v14472_v27 }
 0x6cd   : > { %v4953_v30 = vmul.f32 %v4948_v53, %v4943_v62  ;;  %8822 = vmatpush1.bf16.msra.mxu1 %v14521_v47  ;;  %8760 = vmatprep.subr.bf16.mxu0 %v14793_v32  ;;  %v4969_v48 = vmul.f32 %v4964_v16, %v4959_v9  ;;  %v4985_v42 = vmul.f32 %v4980_v19, %v4975_v5  ;;  %v14796_v16 = vld [vmem:[#allocation165_spill] sm:$0xff]  ;;  %v14798_v19 = vld [vmem:[#allocation167_spill] sm:$0xff]  ;;  %v5039_v32 = vpop.permute.xlu0 %5038 }
 0x6ce   : > { %v4954_v40 = vmul.f32 %v4952_v17, %v4943_v62  ;;  %8824 = vmatprep.subr.bf16.mxu1 %v14523_v34  ;;  %v4970_v59 = vmul.f32 %v4968_v60, %v4959_v9  ;;  %v5012_v4 = vrot.slane %v12841_v25, %v14469_v23  ;;  %v4986_v10 = vmul.f32 %v4984_v57, %v4975_v5  ;;  %v14797_v60 = vld [vmem:[#allocation80_spill] sm:$0xff] }
 0x6cf   : > { %v4955_v12 = vadd.f32 %v4953_v30, %v12771_v36  ;;  %v5023_v36 = vpop.permute.xlu1 %5022  ;;  %v5016_v34 = vrot.slane %v12846_v35, %v14469_v23  ;;  %v5001_v9 = vmul.f32 %v4996_v56, %v4991_v14  ;;  %v5028_v53 = vrot.slane %v12841_v25, %v14470_v26  ;;  %v14800_v56 = vld [vmem:[#allocation169_spill] sm:$0xff] }
 0x6d0   : > { %v4956_v13 = vadd.f32 %v4954_v40, %v12776_v0  ;;  %8762 = vmatpush1.bf16.msra.mxu0 %v14794_v61  ;;  %v5002_v17 = vmul.f32 %v5000_v3, %v4991_v14  ;;  %v5017_v5 = vmul.f32 %v5012_v4, %v5007_v15  ;;  %v5044_v30 = vrot.slane %v12841_v25, %v14471_v58  ;;  %v14799_v40 = vld [vmem:[#allocation82_spill] sm:$0xff]  ;;  %v14801_v4 = vld [vmem:[#allocation84_spill] sm:$0xff] }
 0x6d1   : > { %v4971_v47 = vadd.f32 %v4969_v48, %v4955_v12  ;;  %8826 = vmatpush1.bf16.msra.mxu1 %v14525_v8  ;;  %8764 = vmatprep.subr.bf16.mxu0 %v14795_v18  ;;  %v5032_v8 = vrot.slane %v12846_v35, %v14470_v26  ;;  %v5018_v57 = vmul.f32 %v5016_v34, %v5007_v15  ;;  %v14803_v34 = vld [vmem:[#allocation86_spill] sm:$0xff] }
 0x6d2   : > { %v4972_v62 = vadd.f32 %v4970_v59, %v4956_v13  ;;  %8828 = vmatprep.subr.bf16.mxu1 %v14796_v16  ;;  %v5048_v48 = vrot.slane %v12846_v35, %v14471_v58  ;;  %v5060_v14 = vrot.slane %v12841_v25, %v14472_v27  ;;  %v5033_v59 = vmul.f32 %v5028_v53, %v5023_v36 }
 0x6d3   : > { %v4987_v0 = vadd.f32 %v4985_v42, %v4971_v47  ;;  %v5055_v3 = vpop.permute.xlu1 %5054  ;;  %v5064_v61 = vrot.slane %v12846_v35, %v14472_v27  ;;  %v5034_v42 = vmul.f32 %v5032_v8, %v5023_v36  ;;  %v14806_v36 = vld [vmem:[#allocation175_spill] sm:$0xff]  ;;  %v14807_v8 = vld [vmem:[#allocation90_spill] sm:$0xff] }
 0x6d4   : > { %v4988_v46 = vadd.f32 %v4986_v10, %v4972_v62  ;;  %8766 = vmatpush1.bf16.msra.mxu0 %v14797_v60  ;;  %v5049_v62 = vmul.f32 %v5044_v30, %v5039_v32  ;;  %v14802_v10 = vld [vmem:[#allocation171_spill] sm:$0xff]  ;;  %v5065_v25 = vmul.f32 %v5060_v14, %v5055_v3 }
 0x6d5   : > { %v5003_v20 = vadd.f32 %v5001_v9, %v4987_v0  ;;  %8830 = vmatpush1.bf16.msra.mxu1 %v14798_v19  ;;  %8768 = vmatprep.subr.bf16.mxu0 %v14799_v40  ;;  %v5050_v0 = vmul.f32 %v5048_v48, %v5039_v32  ;;  %v14804_v9 = vld [vmem:[#allocation173_spill] sm:$0xff]  ;;  %v5066_v16 = vmul.f32 %v5064_v61, %v5055_v3  ;;  %v14810_v30 = vld [vmem:[#allocation179_spill] sm:$0xff]  ;;  %v14811_v19 = vld [vmem:[#allocation94_spill] sm:$0xff] }
 0x6d6   : > { %v5004_v12 = vadd.f32 %v5002_v17, %v4988_v46  ;;  %8832 = vmatprep.subr.bf16.mxu1 %v14800_v56  ;;  %v14805_v17 = vld [vmem:[#allocation88_spill] sm:$0xff]  ;;  %v14812_v40 = vld [vmem:[#allocation181_spill] sm:$0xff]  ;;  %v14814_v32 = vld [vmem:[#allocation183_spill] sm:$0xff] }
 0x6d7   : > { %v5019_v13 = vadd.f32 %v5017_v5, %v5003_v20  ;;  %v14808_v5 = vld [vmem:[#allocation177_spill] sm:$0xff]  ;;  %v14809_v20 = vld [vmem:[#allocation92_spill] sm:$0xff]  ;;  %v14818_v14 = vld [vmem:[#allocation187_spill] sm:$0xff] }
 0x6d8   : > { %v5020_v47 = vadd.f32 %v5018_v57, %v5004_v12  ;;  %8770 = vmatpush1.bf16.msra.mxu0 %v14801_v4  ;;  %v14813_v57 = vld [vmem:[#allocation96_spill] sm:$0xff]  ;;  %v14815_v12 = vld [vmem:[#allocation98_spill] sm:$0xff]  ;;  %v14816_v48 = vld [vmem:[#allocation185_spill] sm:$0xff] }
 0x6d9   : > { %v5035_v15 = vadd.f32 %v5033_v59, %v5019_v13  ;;  %8834 = vmatpush1.bf16.msra.mxu1 %v14802_v10  ;;  %8772 = vmatprep.subr.bf16.mxu0 %v14803_v34  ;;  %v14817_v56 = vld [vmem:[#allocation100_spill] sm:$0xff]  ;;  %v14819_v13 = vld [vmem:[#allocation102_spill] sm:$0xff]  ;;  %v14820_v59 = vld [vmem:[#allocation189_spill] sm:$0xff] }
 0x6da   : > { %v5036_v18 = vadd.f32 %v5034_v42, %v5020_v47  ;;  %8836 = vmatprep.subr.bf16.mxu1 %v14804_v9  ;;  %v14821_v3 = vld [vmem:[#allocation104_spill] sm:$0xff]  ;;  %v14822_v61 = vld [vmem:[#allocation191_spill] sm:$0xff]  ;;  %v14823_v47 = vld [vmem:[#allocation106_spill] sm:$0xff] }
 0x6db   : > { %v5051_v53 = vadd.f32 %v5049_v62, %v5035_v15  ;;  %v14824_v42 = vld [vmem:[#allocation193_spill] sm:$0xff]  ;;  %v14825_v4 = vld [vmem:[#allocation108_spill] sm:$0xff]  ;;  %v14826_v15 = vld [vmem:[#allocation195_spill] sm:$0xff] }
 0x6dc   : > { %v5052_v46 = vadd.f32 %v5050_v0, %v5036_v18  ;;  %8774 = vmatpush1.bf16.msra.mxu0 %v14805_v17  ;;  %v14827_v62 = vld [vmem:[#allocation110_spill] sm:$0xff]  ;;  %v14828_v10 = vld [vmem:[#allocation197_spill] sm:$0xff]  ;;  %v14829_v34 = vld [vmem:[#allocation112_spill] sm:$0xff] }
 0x6dd   : > { %v12889_v35 = vadd.f32 %v5065_v25, %v5051_v53  ;;  %8838 = vmatpush1.bf16.msra.mxu1 %v14806_v36  ;;  %8776 = vmatprep.subr.bf16.mxu0 %v14807_v8  ;;  %v14830_v18 = vld [vmem:[#allocation199_spill] sm:$0xff]  ;;  %v14831_v0 = vld [vmem:[#allocation114_spill] sm:$0xff]  ;;  %v14832_v9 = vld [vmem:[#allocation201_spill] sm:$0xff] }
 0x6de   : > { %v12893_v60 = vadd.f32 %v5066_v16, %v5052_v46  ;;  %8840 = vmatprep.subr.bf16.mxu1 %v14808_v5  ;;  %v14833_v25 = vld [vmem:[#allocation140_spill] sm:$0xff]  ;;  %v14834_v53 = vld [vmem:[#allocation203_spill] sm:$0xff]  ;;  %v14835_v16 = vld [vmem:[#allocation142_spill] sm:$0xff]  ;;  %v5071_v5 = vpop.permute.xlu1 %5070 }
 0x6df   : > { %v14836_v46 = vld [vmem:[#allocation205_spill] sm:$0xff]  ;;  %v14837_v17 = vld [vmem:[#allocation144_spill] sm:$0xff]  ;;  %v14838_v36 = vld [vmem:[#allocation207_spill] sm:$0xff] }
 0x6e0   : > { %8778 = vmatpush1.bf16.msra.mxu0 %v14809_v20  ;;  %v14839_v8 = vld [vmem:[#allocation146_spill] sm:$0xff]  ;;  %v14840_v20 = vld [vmem:[#allocation209_spill] sm:$0xff] }
 0x6e1   : > { %8842 = vmatpush1.bf16.msra.mxu1 %v14810_v30  ;;  %8780 = vmatprep.subr.bf16.mxu0 %v14811_v19  ;;  %v14841_v30 = vld [vmem:[#allocation148_spill] sm:$0xff]  ;;  %v14842_v19 = vld [vmem:[#allocation211_spill] sm:$0xff] }
 0x6e2   : > { %8844 = vmatprep.subr.bf16.mxu1 %v14812_v40  ;;  %v14843_v40 = vld [vmem:[#allocation150_spill] sm:$0xff] }
 0x6e4   : > { %8782 = vmatpush1.bf16.msra.mxu0 %v14813_v57  ;;  %v14844_v57 = vld [vmem:[#allocation213_spill] sm:$0xff] }
 0x6e5   : > { %8846 = vmatpush1.bf16.msra.mxu1 %v14814_v32  ;;  %8784 = vmatprep.subr.bf16.mxu0 %v14815_v12  ;;  %v5103_v32 = vpop.permute.xlu1 %5102  ;;  %v14845_v12 = vld [vmem:[#allocation152_spill] sm:$0xff] }
 0x6e6   : > { %8848 = vmatprep.subr.bf16.mxu1 %v14816_v48  ;;  %v14846_v48 = vld [vmem:[#allocation215_spill] sm:$0xff] }
 0x6e8   : > { %8786 = vmatpush1.bf16.msra.mxu0 %v14817_v56  ;;  %v14847_v56 = vld [vmem:[#allocation154_spill] sm:$0xff] }
 0x6e9   : > { %8850 = vmatpush1.bf16.msra.mxu1 %v14818_v14  ;;  %8788 = vmatprep.subr.bf16.mxu0 %v14819_v13  ;;  %v14848_v14 = vld [vmem:[#allocation217_spill] sm:$0xff]  ;;  %v14849_v13 = vld [vmem:[#allocation156_spill] sm:$0xff] }
 0x6ea   : > { %8852 = vmatprep.subr.bf16.mxu1 %v14820_v59  ;;  %v14850_v59 = vld [vmem:[#allocation219_spill] sm:$0xff] }
 0x6ec   : > { %8790 = vmatpush1.bf16.msra.mxu0 %v14821_v3  ;;  %v14851_v3 = vld [vmem:[#allocation158_spill] sm:$0xff] }
 0x6ed   : > { %8854 = vmatpush1.bf16.msra.mxu1 %v14822_v61  ;;  %8792 = vmatprep.subr.bf16.mxu0 %v14823_v47  ;;  %v5119_v61 = vpop.permute.xlu1 %5118 }
 0x6ee   : > { %8856 = vmatprep.subr.bf16.mxu1 %v14824_v42  ;;  %v14852_v42 = vld [vmem:[#allocation221_spill] sm:$0xff] }
 0x6f0   : > { %8794 = vmatpush1.bf16.msra.mxu0 %v14825_v4 }
 0x6f1   : > { %8858 = vmatpush1.bf16.msra.mxu1 %v14826_v15  ;;  %8796 = vmatprep.subr.bf16.mxu0 %v14827_v62 }
 0x6f2   : > { %8860 = vmatprep.subr.bf16.mxu1 %v14828_v10 }
 0x6f4   : > { %8798 = vmatpush1.bf16.msra.mxu0 %v14829_v34  ;;  %v5087_v34 = vpop.permute.xlu0 %5086 }
 0x6f5   : > { %8862 = vmatpush1.bf16.msra.mxu1 %v14830_v18  ;;  %8864 = vmatprep.subr.bf16.mxu0 %v14831_v0 }
 0x6f6   : > { %8928 = vmatprep.subr.bf16.mxu1 %v14832_v9 }
 0x6f7   : > { %5597 = vmatmul.mubr.f32.vlgmr.msra.gmra.mrb[20].mxu0 %v12815_v55 }
 0x6f8   : > { %5668 = vmatmul.mubr.f32.vlgmr.msra.gmra.mrb[20].mxu1 %v12815_v55  ;;  %8866 = vmatpush1.bf16.msra.mxu0 %v14833_v25  ;;  %v14853_v25 = vld [vmem:[#allocation160_spill] sm:$0xff] }
 0x6f9   : > { %5738 = vmatprep.mubr.f32.mxu0 %v12668_v43  ;;  %8930 = vmatpush1.bf16.msra.mxu1 %v14834_v53 }
 0x6fa   : > { %5809 = vmatprep.mubr.f32.mxu1 %v12668_v43  ;;  %8868 = vmatprep.subr.bf16.mxu0 %v14835_v16 }
 0x6fb   : > { %8932 = vmatprep.subr.bf16.mxu1 %v14836_v46  ;;  %v14854_v46 = vld [vmem:[#allocation223_spill] sm:$0xff] }
 0x6fc   : > { %8870 = vmatpush1.bf16.msra.mxu0 %v14837_v17 }
 0x6fd   : > { %8934 = vmatpush1.bf16.msra.mxu1 %v14838_v36  ;;  %8872 = vmatprep.subr.bf16.mxu0 %v14839_v8  ;;  %v14855_v36 = vld [vmem:[#allocation162_spill] sm:$0xff] }
 0x6fe   : > { %8936 = vmatprep.subr.bf16.mxu1 %v14840_v20 }
 0x700   : > { %8874 = vmatpush1.bf16.msra.mxu0 %v14841_v30 }
 0x701   : > { %8938 = vmatpush1.bf16.msra.mxu1 %v14842_v19  ;;  %8876 = vmatprep.subr.bf16.mxu0 %v14843_v40  ;;  %v14856_v40 = vld [vmem:[#allocation225_spill] sm:$0xff] }
 0x702   : > { %8940 = vmatprep.subr.bf16.mxu1 %v14844_v57  ;;  %v5151_v57 = vpop.permute.xlu1 %5150 }
 0x704   : > { %8878 = vmatpush1.bf16.msra.mxu0 %v14845_v12 }
 0x705   : > { %8942 = vmatpush1.bf16.msra.mxu1 %v14846_v48  ;;  %8880 = vmatprep.subr.bf16.mxu0 %v14847_v56 }
 0x706   : > { %8944 = vmatprep.subr.bf16.mxu1 %v14848_v14  ;;  %v14857_v14 = vld [vmem:[#allocation164_spill] sm:$0xff] }
 0x708   : > { %8882 = vmatpush1.bf16.msra.mxu0 %v14849_v13 }
 0x709   : > { %8946 = vmatpush1.bf16.msra.mxu1 %v14850_v59  ;;  %8884 = vmatprep.subr.bf16.mxu0 %v14851_v3  ;;  %v14858_v59 = vld [vmem:[#allocation227_spill] sm:$0xff]  ;;  %v5135_v3 = vpop.permute.xlu0 %5134 }
 0x70a   : > { %v4517_v47 = vpop.f32.mrb[14].mxu0  ;;  %8948 = vmatprep.subr.bf16.mxu1 %v14852_v42 }
 0x70b   : > { %v5076_v4 = vrot.slane %v4517_v47, %v14469_v23  ;;  %v5092_v15 = vrot.slane %v4517_v47, %v14470_v26  ;;  %v12946_v62 = vpop.f32.mrb[14].mxu1  ;;  %v4519_v10 = vpop.f32.mrb[15].mxu0  ;;  %v5108_v16 = vrot.slane %v4517_v47, %v14471_v58  ;;  %v5124_v30 = vrot.slane %v4517_v47, %v14472_v27 }
 0x70c   : > { %v5080_v18 = vrot.slane %v4519_v10, %v14469_v23  ;;  %v5096_v0 = vrot.slane %v4519_v10, %v14470_v26  ;;  %v12950_v9 = vpop.f32.mrb[15].mxu1  ;;  %8886 = vmatpush1.bf16.msra.mxu0 %v14853_v25  ;;  %v5112_v19 = vrot.slane %v4519_v10, %v14471_v58  ;;  %v5128_v56 = vrot.slane %v4519_v10, %v14472_v27 }
 0x70d   : > { %v5081_v53 = vmul.f32 %v5076_v4, %v5071_v5  ;;  %8950 = vmatpush1.bf16.msra.mxu1 %v14854_v46  ;;  %8888 = vmatprep.subr.bf16.mxu0 %v14855_v36  ;;  %v5097_v20 = vmul.f32 %v5092_v15, %v5087_v34  ;;  %v5113_v13 = vmul.f32 %v5108_v16, %v5103_v32  ;;  %v14859_v15 = vld [vmem:[#allocation166_spill] sm:$0xff]  ;;  %v14861_v16 = vld [vmem:[#allocation168_spill] sm:$0xff]  ;;  %v14862_v36 = vld [vmem:[#allocation231_spill] sm:$0xff] }
 0x70e   : > { %v5082_v17 = vmul.f32 %v5080_v18, %v5071_v5  ;;  %8952 = vmatprep.subr.bf16.mxu1 %v14856_v40  ;;  %v5098_v48 = vmul.f32 %v5096_v0, %v5087_v34  ;;  %v5114_v42 = vmul.f32 %v5112_v19, %v5103_v32  ;;  %v5144_v4 = vrot.slane %v12950_v9, %v14469_v23  ;;  %v14860_v18 = vld [vmem:[#allocation229_spill] sm:$0xff]  ;;  %v5167_v19 = vpop.permute.xlu1 %5166 }
 0x70f   : > { %v5083_v8 = vadd.f32 %v5081_v53, %v12889_v35  ;;  %v5140_v35 = vrot.slane %v12946_v62, %v14469_v23  ;;  %v5129_v34 = vmul.f32 %v5124_v30, %v5119_v61  ;;  %v5156_v10 = vrot.slane %v12946_v62, %v14470_v26  ;;  %v14864_v40 = vld [vmem:[#allocation233_spill] sm:$0xff] }
 0x710   : > { %v5084_v12 = vadd.f32 %v5082_v17, %v12893_v60  ;;  %8890 = vmatpush1.bf16.msra.mxu0 %v14857_v14  ;;  %v5130_v25 = vmul.f32 %v5128_v56, %v5119_v61  ;;  %v5160_v53 = vrot.slane %v12950_v9, %v14470_v26  ;;  %v5172_v17 = vrot.slane %v12946_v62, %v14471_v58 }
 0x711   : > { %v5099_v5 = vadd.f32 %v5097_v20, %v5083_v8  ;;  %8954 = vmatpush1.bf16.msra.mxu1 %v14858_v59  ;;  %8892 = vmatprep.subr.bf16.mxu0 %v14859_v15  ;;  %v5145_v46 = vmul.f32 %v5140_v35, %v5135_v3  ;;  %v14863_v8 = vld [vmem:[#allocation170_spill] sm:$0xff]  ;;  %v5146_v30 = vmul.f32 %v5144_v4, %v5135_v3  ;;  %v14865_v59 = vld [vmem:[#allocation172_spill] sm:$0xff] }
 0x712   : > { %v5100_v47 = vadd.f32 %v5098_v48, %v5084_v12  ;;  %8956 = vmatprep.subr.bf16.mxu1 %v14860_v18  ;;  %v5176_v61 = vrot.slane %v12950_v9, %v14471_v58  ;;  %v5161_v12 = vmul.f32 %v5156_v10, %v5151_v57  ;;  %v5188_v56 = vrot.slane %v12946_v62, %v14472_v27  ;;  %v14867_v4 = vld [vmem:[#allocation174_spill] sm:$0xff] }
 0x713   : > { %v5115_v60 = vadd.f32 %v5113_v13, %v5099_v5  ;;  %v5162_v14 = vmul.f32 %v5160_v53, %v5151_v57  ;;  %v5183_v13 = vpop.permute.xlu0 %5182  ;;  %v5192_v35 = vrot.slane %v12950_v9, %v14472_v27  ;;  %v14870_v9 = vld [vmem:[#allocation239_spill] sm:$0xff]  ;;  %v14871_v53 = vld [vmem:[#allocation178_spill] sm:$0xff] }
 0x714   : > { %v5116_v0 = vadd.f32 %v5114_v42, %v5100_v47  ;;  %8894 = vmatpush1.bf16.msra.mxu0 %v14861_v16  ;;  %v5177_v47 = vmul.f32 %v5172_v17, %v5167_v19  ;;  %v14866_v42 = vld [vmem:[#allocation235_spill] sm:$0xff]  ;;  %v5193_v62 = vmul.f32 %v5188_v56, %v5183_v13  ;;  %v14883_v56 = vld [vmem:[#allocation190_spill] sm:$0xff] }
 0x715   : > { %v5131_v32 = vadd.f32 %v5129_v34, %v5115_v60  ;;  %8958 = vmatpush1.bf16.msra.mxu1 %v14862_v36  ;;  %8896 = vmatprep.subr.bf16.mxu0 %v14863_v8  ;;  %v5178_v60 = vmul.f32 %v5176_v61, %v5167_v19  ;;  %v14868_v34 = vld [vmem:[#allocation237_spill] sm:$0xff]  ;;  %v5194_v18 = vmul.f32 %v5192_v35, %v5183_v13  ;;  %v14874_v17 = vld [vmem:[#allocation243_spill] sm:$0xff]  ;;  %v14875_v36 = vld [vmem:[#allocation182_spill] sm:$0xff] }
 0x716   : > { %v5132_v20 = vadd.f32 %v5130_v25, %v5116_v0  ;;  %8960 = vmatprep.subr.bf16.mxu1 %v14864_v40  ;;  %v14869_v0 = vld [vmem:[#allocation176_spill] sm:$0xff]  ;;  %v14876_v8 = vld [vmem:[#allocation245_spill] sm:$0xff]  ;;  %v14879_v19 = vld [vmem:[#allocation186_spill] sm:$0xff] }
 0x717   : > { %v5147_v48 = vadd.f32 %v5145_v46, %v5131_v32  ;;  %v14872_v32 = vld [vmem:[#allocation241_spill] sm:$0xff]  ;;  %v14873_v46 = vld [vmem:[#allocation180_spill] sm:$0xff]  ;;  %v14886_v13 = vld [vmem:[#allocation255_spill] sm:$0xff] }
 0x718   : > { %v5148_v5 = vadd.f32 %v5146_v30, %v5132_v20  ;;  %8898 = vmatpush1.bf16.msra.mxu0 %v14865_v59  ;;  %v14877_v20 = vld [vmem:[#allocation184_spill] sm:$0xff]  ;;  %v14878_v30 = vld [vmem:[#allocation247_spill] sm:$0xff]  ;;  %v14880_v61 = vld [vmem:[#allocation249_spill] sm:$0xff] }
 0x719   : > { %v5163_v3 = vadd.f32 %v5161_v12, %v5147_v48  ;;  %8962 = vmatpush1.bf16.msra.mxu1 %v14866_v42  ;;  %8900 = vmatprep.subr.bf16.mxu0 %v14867_v4  ;;  %v14881_v40 = vld [vmem:[#allocation188_spill] sm:$0xff]  ;;  %v5199_v12 = vpop.permute.xlu1 %5198  ;;  %v14882_v48 = vld [vmem:[#allocation251_spill] sm:$0xff]  ;;  %v14887_v35 = vld [vmem:[#allocation194_spill] sm:$0xff] }
 0x71a   : > { %v5164_v15 = vadd.f32 %v5162_v14, %v5148_v5  ;;  %8964 = vmatprep.subr.bf16.mxu1 %v14868_v34  ;;  %v14884_v14 = vld [vmem:[#allocation253_spill] sm:$0xff]  ;;  %v14885_v5 = vld [vmem:[#allocation192_spill] sm:$0xff]  ;;  %v14890_v42 = vld [vmem:[#allocation259_spill] sm:$0xff] }
 0x71b   : > { %v5179_v10 = vadd.f32 %v5177_v47, %v5163_v3  ;;  %v14888_v59 = vld [vmem:[#allocation257_spill] sm:$0xff]  ;;  %v14889_v47 = vld [vmem:[#allocation196_spill] sm:$0xff]  ;;  %v14891_v4 = vld [vmem:[#allocation198_spill] sm:$0xff] }
 0x71c   : > { %v5180_v57 = vadd.f32 %v5178_v60, %v5164_v15  ;;  %8902 = vmatpush1.bf16.msra.mxu0 %v14869_v0  ;;  %v14892_v15 = vld [vmem:[#allocation261_spill] sm:$0xff]  ;;  %v14893_v34 = vld [vmem:[#allocation200_spill] sm:$0xff]  ;;  %v14898_v0 = vld [vmem:[#allocation267_spill] sm:$0xff] }
 0x71d   : > { %v12991_v25 = vadd.f32 %v5193_v62, %v5179_v10  ;;  %8966 = vmatpush1.bf16.msra.mxu1 %v14870_v9  ;;  %8904 = vmatprep.subr.bf16.mxu0 %v14871_v53  ;;  %v5215_v3 = vpop.permute.xlu1 %5214  ;;  %v14894_v10 = vld [vmem:[#allocation263_spill] sm:$0xff]  ;;  %v14895_v62 = vld [vmem:[#allocation202_spill] sm:$0xff] }
 0x71e   : > { %v12995_v16 = vadd.f32 %v5194_v18, %v5180_v57  ;;  %8968 = vmatprep.subr.bf16.mxu1 %v14872_v32  ;;  %v14896_v57 = vld [vmem:[#allocation265_spill] sm:$0xff]  ;;  %v14897_v18 = vld [vmem:[#allocation204_spill] sm:$0xff]  ;;  %v14899_v53 = vld [vmem:[#allocation206_spill] sm:$0xff] }
 0x71f   : > { %v14900_v32 = vld [vmem:[#allocation269_spill] sm:$0xff] }
 0x720   : > { %8906 = vmatpush1.bf16.msra.mxu0 %v14873_v46  ;;  %v14901_v46 = vld [vmem:[#allocation208_spill] sm:$0xff] }
 0x721   : > { %8970 = vmatpush1.bf16.msra.mxu1 %v14874_v17  ;;  %8908 = vmatprep.subr.bf16.mxu0 %v14875_v36  ;;  %v13018_v60 = vpop.permute.xlu1 %5246  ;;  %v14902_v17 = vld [vmem:[#allocation271_spill] sm:$0xff]  ;;  %v14903_v36 = vld [vmem:[#allocation210_spill] sm:$0xff] }
 0x722   : > { %8972 = vmatprep.subr.bf16.mxu1 %v14876_v8  ;;  %v14904_v8 = vld [vmem:[#allocation273_spill] sm:$0xff] }
 0x724   : > { %8910 = vmatpush1.bf16.msra.mxu0 %v14877_v20 }
 0x725   : > { %8974 = vmatpush1.bf16.msra.mxu1 %v14878_v30  ;;  %8912 = vmatprep.subr.bf16.mxu0 %v14879_v19  ;;  %v13029_v9 = vpop.permute.xlu1 %6108  ;;  %v14905_v30 = vld [vmem:[#allocation212_spill] sm:$0xff]  ;;  %v14906_v19 = vld [vmem:[#allocation275_spill] sm:$0xff] }
 0x726   : > { %8976 = vmatprep.subr.bf16.mxu1 %v14880_v61  ;;  %v14907_v61 = vld [vmem:[#allocation214_spill] sm:$0xff] }
 0x728   : > { %8914 = vmatpush1.bf16.msra.mxu0 %v14881_v40  ;;  %v14908_v40 = vld [vmem:[#allocation277_spill] sm:$0xff] }
 0x729   : > { %8978 = vmatpush1.bf16.msra.mxu1 %v14882_v48  ;;  %8916 = vmatprep.subr.bf16.mxu0 %v14883_v56  ;;  %v13038_v20 = vpop.permute.xlu1 %6102  ;;  %v14909_v48 = vld [vmem:[#allocation216_spill] sm:$0xff]  ;;  %v14910_v56 = vld [vmem:[#allocation279_spill] sm:$0xff] }
 0x72a   : > { %8980 = vmatprep.subr.bf16.mxu1 %v14884_v14  ;;  %v14911_v14 = vld [vmem:[#allocation218_spill] sm:$0xff] }
 0x72c   : > { %8918 = vmatpush1.bf16.msra.mxu0 %v14885_v5 }
 0x72d   : > { %8982 = vmatpush1.bf16.msra.mxu1 %v14886_v13  ;;  %8920 = vmatprep.subr.bf16.mxu0 %v14887_v35  ;;  %v13047_v5 = vpop.permute.xlu1 %6116  ;;  %v14912_v13 = vld [vmem:[#allocation281_spill] sm:$0xff]  ;;  %v5231_v35 = vpop.permute.xlu0 %5230 }
 0x72e   : > { %8984 = vmatprep.subr.bf16.mxu1 %v14888_v59  ;;  %v14913_v59 = vld [vmem:[#allocation220_spill] sm:$0xff] }
 0x730   : > { %8922 = vmatpush1.bf16.msra.mxu0 %v14889_v47  ;;  %v14914_v47 = vld [vmem:[#allocation283_spill] sm:$0xff] }
 0x731   : > { %8986 = vmatpush1.bf16.msra.mxu1 %v14890_v42  ;;  %8924 = vmatprep.subr.bf16.mxu0 %v14891_v4  ;;  %v14915_v42 = vld [vmem:[#allocation222_spill] sm:$0xff] }
 0x732   : > { %8988 = vmatprep.subr.bf16.mxu1 %v14892_v15  ;;  %v14916_v15 = vld [vmem:[#allocation285_spill] sm:$0xff] }
 0x734   : > { %8926 = vmatpush1.bf16.msra.mxu0 %v14893_v34 }
 0x735   : > { %8990 = vmatpush1.bf16.msra.mxu1 %v14894_v10  ;;  %8992 = vmatprep.subr.bf16.mxu0 %v14895_v62 }
 0x736   : > { %9056 = vmatprep.subr.bf16.mxu1 %v14896_v57 }
 0x737   : > { %5739 = vmatmul.mubr.f32.vlgmr.msra.gmra.mrb[22].mxu0 %v12815_v55 }
 0x738   : > { %5810 = vmatmul.mubr.f32.vlgmr.msra.gmra.mrb[22].mxu1 %v12815_v55  ;;  %8994 = vmatpush1.bf16.msra.mxu0 %v14897_v18  ;;  %v13058_v18 = vpop.permute.xlu1 %6124 }
 0x739   : > { %5880 = vmatprep.mubr.f32.mxu0 %v12668_v43  ;;  %9058 = vmatpush1.bf16.msra.mxu1 %v14898_v0 }
 0x73a   : > { %5951 = vmatprep.mubr.f32.mxu1 %v12668_v43  ;;  %8996 = vmatprep.subr.bf16.mxu0 %v14899_v53 }
 0x73b   : > { %9060 = vmatprep.subr.bf16.mxu1 %v14900_v32 }
 0x73c   : > { %8998 = vmatpush1.bf16.msra.mxu0 %v14901_v46  ;;  %v14917_v46 = vld [vmem:[#allocation224_spill] sm:$0xff] }
 0x73d   : > { %9062 = vmatpush1.bf16.msra.mxu1 %v14902_v17  ;;  %9000 = vmatprep.subr.bf16.mxu0 %v14903_v36 }
 0x73e   : > { %9064 = vmatprep.subr.bf16.mxu1 %v14904_v8  ;;  %v14919_v8 = vld [vmem:[#allocation287_spill] sm:$0xff] }
 0x740   : > { %9002 = vmatpush1.bf16.msra.mxu0 %v14905_v30  ;;  %v5263_v30 = vpop.permute.xlu0 %5262 }
 0x741   : > { %9066 = vmatpush1.bf16.msra.mxu1 %v14906_v19  ;;  %9004 = vmatprep.subr.bf16.mxu0 %v14907_v61 }
 0x742   : > { %9068 = vmatprep.subr.bf16.mxu1 %v14908_v40  ;;  %v14920_v40 = vld [vmem:[#allocation226_spill] sm:$0xff] }
 0x744   : > { %9006 = vmatpush1.bf16.msra.mxu0 %v14909_v48 }
 0x745   : > { %9070 = vmatpush1.bf16.msra.mxu1 %v14910_v56  ;;  %9008 = vmatprep.subr.bf16.mxu0 %v14911_v14 }
 0x746   : > { %9072 = vmatprep.subr.bf16.mxu1 %v14912_v13  ;;  %v14921_v13 = vld [vmem:[#allocation289_spill] sm:$0xff] }
 0x748   : > { %9010 = vmatpush1.bf16.msra.mxu0 %v14913_v59 }
 0x749   : > { %9074 = vmatpush1.bf16.msra.mxu1 %v14914_v47  ;;  %9012 = vmatprep.subr.bf16.mxu0 %v14915_v42 }
 0x74a   : > { %v4659_v4 = vpop.f32.mrb[16].mxu0  ;;  %9076 = vmatprep.subr.bf16.mxu1 %v14916_v15  ;;  %v14922_v15 = vld [vmem:[#allocation228_spill] sm:$0xff] }
 0x74b   : > { %v5204_v34 = vrot.slane %v4659_v4, %v14469_v23  ;;  %v5220_v10 = vrot.slane %v4659_v4, %v14470_v26  ;;  %v13056_v62 = vpop.f32.mrb[16].mxu1  ;;  %v4661_v57 = vpop.f32.mrb[17].mxu0  ;;  %v5236_v36 = vrot.slane %v4659_v4, %v14471_v58  ;;  %v5252_v14 = vrot.slane %v4659_v4, %v14472_v27 }
 0x74c   : > { %v5208_v0 = vrot.slane %v4661_v57, %v14469_v23  ;;  %v5224_v53 = vrot.slane %v4661_v57, %v14470_v26  ;;  %v13062_v32 = vpop.f32.mrb[17].mxu1  ;;  %9014 = vmatpush1.bf16.msra.mxu0 %v14917_v46  ;;  %v5240_v61 = vrot.slane %v4661_v57, %v14471_v58  ;;  %v5256_v42 = vrot.slane %v4661_v57, %v14472_v27 }
 0x74d   : > { %v5209_v17 = vmul.f32 %v5204_v34, %v5199_v12  ;;  %9078 = vmatpush1.bf16.msra.mxu1 %v14919_v8  ;;  %9016 = vmatprep.subr.bf16.mxu0 %v14920_v40  ;;  %v5225_v56 = vmul.f32 %v5220_v10, %v5215_v3  ;;  %v1421_v34 = vld [vmem:[%s14918_s16] sm:$0xff]  ;;  %v5268_v46 = vrot.slane %v13056_v62, %v14469_v23  ;;  %v14923_v8 = vld [vmem:[#allocation291_spill] sm:$0xff]  ;;  %v5279_v40 = vpop.permute.xlu0 %5278  ;;  %s15029_s16 = sld [smem:[#allocation51_spill]] }
 0x74e   : > { %v5210_v19 = vmul.f32 %v5208_v0, %v5199_v12  ;;  %9080 = vmatprep.subr.bf16.mxu1 %v14921_v13  ;;  %v5226_v47 = vmul.f32 %v5224_v53, %v5215_v3  ;;  %v5241_v0 = vmul.f32 %v5236_v36, %v5231_v35  ;;  %v5242_v4 = vmul.f32 %v5240_v61, %v5231_v35  ;;  %v14925_v36 = vld [vmem:[#allocation293_spill] sm:$0xff]  ;;  %v14926_v61 = vld [vmem:[#allocation232_spill] sm:$0xff] }
 0x74f   : > { %v5211_v48 = vadd.f32 %v5209_v17, %v12991_v25  ;;  %v5295_v25 = vpop.permute.xlu1 %5294  ;;  %v5272_v17 = vrot.slane %v13062_v32, %v14469_v23  ;;  %v5257_v3 = vmul.f32 %v5252_v14, %v13018_v60  ;;  %v5284_v53 = vrot.slane %v13056_v62, %v14470_v26  ;;  %6313 = vperm.xlu1 %9878, %v1421_v34   ;;  %v14929_v34 = vld [vmem:[#allocation297_spill] sm:$0xff] }
 0x750   : > { %v5212_v59 = vadd.f32 %v5210_v19, %v12995_v16  ;;  %9018 = vmatpush1.bf16.msra.mxu0 %v14922_v15  ;;  %v14924_v16 = vld [vmem:[#allocation230_spill] sm:$0xff]  ;;  %v5258_v19 = vmul.f32 %v5256_v42, %v13018_v60  ;;  %v5288_v35 = vrot.slane %v13062_v32, %v14470_v26  ;;  %v5273_v13 = vmul.f32 %v5268_v46, %v5263_v30 }
 0x751   : > { %v5227_v12 = vadd.f32 %v5225_v56, %v5211_v48  ;;  %9082 = vmatpush1.bf16.msra.mxu1 %v14923_v8  ;;  %9020 = vmatprep.subr.bf16.mxu0 %v14924_v16  ;;  %v5300_v56 = vrot.slane %v13056_v62, %v14471_v58  ;;  %v5304_v15 = vrot.slane %v13062_v32, %v14471_v58 }
 0x752   : > { %v5228_v10 = vadd.f32 %v5226_v47, %v5212_v59  ;;  %9084 = vmatprep.subr.bf16.mxu1 %v14925_v36  ;;  %v14927_v59 = vld [vmem:[#allocation295_spill] sm:$0xff]  ;;  %v14928_v47 = vld [vmem:[#allocation234_spill] sm:$0xff]  ;;  %v5274_v42 = vmul.f32 %v5272_v17, %v5263_v30  ;;  %v5289_v8 = vmul.f32 %v5284_v53, %v5279_v40  ;;  %v5320_v46 = vrot.slane %v13062_v32, %v14472_v27 }
 0x753   : > { %v5243_v57 = vadd.f32 %v5241_v0, %v5227_v12  ;;  %v5316_v12 = vrot.slane %v13056_v62, %v14472_v27  ;;  %v5290_v16 = vmul.f32 %v5288_v35, %v5279_v40  ;;  %v5305_v36 = vmul.f32 %v5300_v56, %v5295_v25  ;;  %v14932_v30 = vld [vmem:[#allocation238_spill] sm:$0xff]  ;;  %v14935_v40 = vld [vmem:[#allocation303_spill] sm:$0xff] }
 0x754   : > { %v5244_v48 = vadd.f32 %v5242_v4, %v5228_v10  ;;  %9022 = vmatpush1.bf16.msra.mxu0 %v14926_v61  ;;  %v5311_v10 = vpop.permute.xlu1 %5310  ;;  %v14931_v61 = vld [vmem:[#allocation299_spill] sm:$0xff]  ;;  %v14936_v35 = vld [vmem:[#allocation242_spill] sm:$0xff] }
 0x755   : > { %v5259_v14 = vadd.f32 %v5257_v3, %v5243_v57  ;;  %9086 = vmatpush1.bf16.msra.mxu1 %v14927_v59  ;;  %9024 = vmatprep.subr.bf16.mxu0 %v14928_v47  ;;  %v14930_v3 = vld [vmem:[#allocation236_spill] sm:$0xff]  ;;  %v5321_v62 = vmul.f32 %v5316_v12, %v5311_v10  ;;  %v14937_v47 = vld [vmem:[#allocation305_spill] sm:$0xff]  ;;  %v14943_v12 = vld [vmem:[#allocation311_spill] sm:$0xff] }
 0x756   : > { %v5260_v60 = vadd.f32 %v5258_v19, %v5244_v48  ;;  %9088 = vmatprep.subr.bf16.mxu1 %v14929_v34  ;;  %v5306_v19 = vmul.f32 %v5304_v15, %v5295_v25  ;;  %v14933_v48 = vld [vmem:[#allocation301_spill] sm:$0xff]  ;;  %v14934_v59 = vld [vmem:[#allocation240_spill] sm:$0xff]  ;;  %v14939_v25 = vld [vmem:[#allocation307_spill] sm:$0xff] }
 0x757   : > { %v5275_v0 = vadd.f32 %v5273_v13, %v5259_v14  ;;  %v5322_v14 = vmul.f32 %v5320_v46, %v5311_v10  ;;  %v14940_v15 = vld [vmem:[#allocation246_spill] sm:$0xff]  ;;  %v14942_v34 = vld [vmem:[#allocation248_spill] sm:$0xff]  ;;  %v14947_v46 = vld [vmem:[#allocation315_spill] sm:$0xff] }
 0x758   : > { %v5276_v4 = vadd.f32 %v5274_v42, %v5260_v60  ;;  %9026 = vmatpush1.bf16.msra.mxu0 %v14930_v3  ;;  %v14938_v60 = vld [vmem:[#allocation244_spill] sm:$0xff]  ;;  %v14941_v42 = vld [vmem:[#allocation309_spill] sm:$0xff] }
 0x759   : > { %v5291_v57 = vadd.f32 %v5289_v8, %v5275_v0  ;;  %9090 = vmatpush1.bf16.msra.mxu1 %v14931_v61  ;;  %9028 = vmatprep.subr.bf16.mxu0 %v14932_v30  ;;  %v14944_v0 = vld [vmem:[#allocation250_spill] sm:$0xff]  ;;  %v14945_v8 = vld [vmem:[#allocation313_spill] sm:$0xff]  ;;  %v14946_v10 = vld [vmem:[#allocation252_spill] sm:$0xff] }
 0x75a   : > { %v5292_v17 = vadd.f32 %v5290_v16, %v5276_v4  ;;  %9092 = vmatprep.subr.bf16.mxu1 %v14933_v48  ;;  %v14948_v4 = vld [vmem:[#allocation254_spill] sm:$0xff]  ;;  %v14949_v16 = vld [vmem:[#allocation317_spill] sm:$0xff]  ;;  %v14950_v3 = vld [vmem:[#allocation256_spill] sm:$0xff] }
 0x75b   : > { %v5307_v53 = vadd.f32 %v5305_v36, %v5291_v57  ;;  %v14951_v57 = vld [vmem:[#allocation319_spill] sm:$0xff]  ;;  %v14952_v36 = vld [vmem:[#allocation258_spill] sm:$0xff]  ;;  %v14953_v61 = vld [vmem:[#allocation321_spill] sm:$0xff] }
 0x75c   : > { %v5308_v13 = vadd.f32 %v5306_v19, %v5292_v17  ;;  %9030 = vmatpush1.bf16.msra.mxu0 %v14934_v59  ;;  %v14954_v30 = vld [vmem:[#allocation260_spill] sm:$0xff]  ;;  %v14955_v17 = vld [vmem:[#allocation323_spill] sm:$0xff]  ;;  %v14956_v19 = vld [vmem:[#allocation262_spill] sm:$0xff] }
 0x75d   : > { %v13106_v32 = vadd.f32 %v5321_v62, %v5307_v53  ;;  %9094 = vmatpush1.bf16.msra.mxu1 %v14935_v40  ;;  %9032 = vmatprep.subr.bf16.mxu0 %v14936_v35  ;;  %v14957_v48 = vld [vmem:[#allocation325_spill] sm:$0xff]  ;;  %v14958_v62 = vld [vmem:[#allocation264_spill] sm:$0xff]  ;;  %v14959_v53 = vld [vmem:[#allocation327_spill] sm:$0xff] }
 0x75e   : > { %v13110_v56 = vadd.f32 %v5322_v14, %v5308_v13  ;;  %9096 = vmatprep.subr.bf16.mxu1 %v14937_v47  ;;  %v14960_v14 = vld [vmem:[#allocation266_spill] sm:$0xff]  ;;  %v14961_v13 = vld [vmem:[#allocation329_spill] sm:$0xff]  ;;  %v14962_v59 = vld [vmem:[#allocation268_spill] sm:$0xff] }
 0x75f   : > { %v14963_v40 = vld [vmem:[#allocation330_spill] sm:$0xff]  ;;  %v14965_v47 = vld [vmem:[#allocation331_spill] sm:$0xff] }
 0x760   : > { %9034 = vmatpush1.bf16.msra.mxu0 %v14938_v60  ;;  %v14964_v35 = vld [vmem:[#allocation270_spill] sm:$0xff]  ;;  %v14966_v60 = vld [vmem:[#allocation272_spill] sm:$0xff] }
 0x761   : > { %9098 = vmatpush1.bf16.msra.mxu1 %v14939_v25  ;;  %9036 = vmatprep.subr.bf16.mxu0 %v14940_v15  ;;  %v13146_v25 = vpop.permute.xlu1 %6140  ;;  %v14967_v15 = vld [vmem:[#allocation332_spill] sm:$0xff] }
 0x762   : > { %9100 = vmatprep.subr.bf16.mxu1 %v14941_v42  ;;  %v14968_v42 = vld [vmem:[#allocation274_spill] sm:$0xff] }
 0x764   : > { %9038 = vmatpush1.bf16.msra.mxu0 %v14942_v34  ;;  %v14969_v34 = vld [vmem:[#allocation333_spill] sm:$0xff] }
 0x765   : > { %9102 = vmatpush1.bf16.msra.mxu1 %v14943_v12  ;;  %9040 = vmatprep.subr.bf16.mxu0 %v14944_v0  ;;  %v13151_v12 = vpop.permute.xlu0 %6132  ;;  %v14970_v0 = vld [vmem:[#allocation276_spill] sm:$0xff] }
 0x766   : > { %9104 = vmatprep.subr.bf16.mxu1 %v14945_v8  ;;  %v14971_v8 = vld [vmem:[#allocation334_spill] sm:$0xff] }
 0x768   : > { %9042 = vmatpush1.bf16.msra.mxu0 %v14946_v10  ;;  %v14973_v10 = vld [vmem:[#allocation335_spill] sm:$0xff] }
 0x769   : > { %9106 = vmatpush1.bf16.msra.mxu1 %v14947_v46  ;;  %9044 = vmatprep.subr.bf16.mxu0 %v14948_v4  ;;  %v13157_v46 = vpop.permute.xlu1 %6148  ;;  %v5327_v4 = vpop.permute.xlu0 %5326 }
 0x76a   : > { %9108 = vmatprep.subr.bf16.mxu1 %v14949_v16  ;;  %v14974_v16 = vld [vmem:[#allocation280_spill] sm:$0xff] }
 0x76c   : > { %9046 = vmatpush1.bf16.msra.mxu0 %v14950_v3  ;;  %v14975_v3 = vld [vmem:[#allocation336_spill] sm:$0xff] }
 0x76d   : > { %9110 = vmatpush1.bf16.msra.mxu1 %v14951_v57  ;;  %9048 = vmatprep.subr.bf16.mxu0 %v14952_v36  ;;  %v14976_v57 = vld [vmem:[#allocation282_spill] sm:$0xff]  ;;  %v14977_v36 = vld [vmem:[#allocation337_spill] sm:$0xff] }
 0x76e   : > { %9112 = vmatprep.subr.bf16.mxu1 %v14953_v61  ;;  %v14978_v61 = vld [vmem:[#allocation284_spill] sm:$0xff] }
 0x770   : > { %9050 = vmatpush1.bf16.msra.mxu0 %v14954_v30  ;;  %v5343_v30 = vpop.permute.xlu1 %5342 }
 0x771   : > { %9114 = vmatpush1.bf16.msra.mxu1 %v14955_v17  ;;  %9052 = vmatprep.subr.bf16.mxu0 %v14956_v19  ;;  %v14979_v17 = vld [vmem:[#allocation338_spill] sm:$0xff] }
 0x772   : > { %9116 = vmatprep.subr.bf16.mxu1 %v14957_v48  ;;  %v14980_v19 = vld [vmem:[#allocation286_spill] sm:$0xff]  ;;  %v13166_v48 = vpop.permute.xlu0 %6156 }
 0x774   : > { %9054 = vmatpush1.bf16.msra.mxu0 %v14958_v62 }
 0x775   : > { %9118 = vmatpush1.bf16.msra.mxu1 %v14959_v53  ;;  %9120 = vmatprep.subr.bf16.mxu0 %v14960_v14  ;;  %v14981_v53 = vld [vmem:[#allocation339_spill] sm:$0xff] }
 0x776   : > { %9184 = vmatprep.subr.bf16.mxu1 %v14961_v13 }
 0x777   : > { %5881 = vmatmul.mubr.f32.vlgmr.msra.gmra.mrb[24].mxu0 %v12815_v55 }
 0x778   : > { %5952 = vmatmul.mubr.f32.vlgmr.msra.gmra.mrb[24].mxu1 %v12815_v55  ;;  %9122 = vmatpush1.bf16.msra.mxu0 %v14962_v59 }
 0x779   : > { %6022 = vmatprep.mubr.f32.mxu0 %v12668_v43  ;;  %9186 = vmatpush1.bf16.msra.mxu1 %v14963_v40 }
 0x77a   : > { %6093 = vmatprep.mubr.f32.mxu1 %v12668_v43  ;;  %9124 = vmatprep.subr.bf16.mxu0 %v14964_v35  ;;  %v14972_v43 = vld [vmem:[#allocation278_spill] sm:$0xff] }
 0x77b   : > { %9188 = vmatprep.subr.bf16.mxu1 %v14965_v47 }
 0x77c   : > { %9126 = vmatpush1.bf16.msra.mxu0 %v14966_v60 }
 0x77d   : > { %9190 = vmatpush1.bf16.msra.mxu1 %v14967_v15  ;;  %9128 = vmatprep.subr.bf16.mxu0 %v14968_v42  ;;  %v14982_v15 = vld [vmem:[#allocation288_spill] sm:$0xff] }
 0x77e   : > { %9192 = vmatprep.subr.bf16.mxu1 %v14969_v34 }
 0x780   : > { %9130 = vmatpush1.bf16.msra.mxu0 %v14970_v0  ;;  %v14983_v0 = vld [vmem:[#allocation340_spill] sm:$0xff] }
 0x781   : > { %9194 = vmatpush1.bf16.msra.mxu1 %v14971_v8  ;;  %9132 = vmatprep.subr.bf16.mxu0 %v14972_v43 }
 0x782   : > { %9196 = vmatprep.subr.bf16.mxu1 %v14973_v10  ;;  %v14984_v10 = vld [vmem:[#allocation290_spill] sm:$0xff] }
 0x784   : > { %9134 = vmatpush1.bf16.msra.mxu0 %v14974_v16 }
 0x785   : > { %9198 = vmatpush1.bf16.msra.mxu1 %v14975_v3  ;;  %9136 = vmatprep.subr.bf16.mxu0 %v14976_v57 }
 0x786   : > { %9200 = vmatprep.subr.bf16.mxu1 %v14977_v36  ;;  %v5359_v36 = vpop.permute.xlu1 %5358 }
 0x788   : > { %9138 = vmatpush1.bf16.msra.mxu0 %v14978_v61 }
 0x789   : > { %9202 = vmatpush1.bf16.msra.mxu1 %v14979_v17  ;;  %9140 = vmatprep.subr.bf16.mxu0 %v14980_v19  ;;  %v5375_v19 = vpop.permute.xlu0 %5374 }
 0x78a   : > { %v4801_v62 = vpop.f32.mrb[18].mxu0  ;;  %9204 = vmatprep.subr.bf16.mxu1 %v14981_v53 }
 0x78b   : > { %v5332_v14 = vrot.slane %v4801_v62, %v14469_v23  ;;  %v5348_v13 = vrot.slane %v4801_v62, %v14470_v26  ;;  %v13171_v59 = vpop.f32.mrb[18].mxu1  ;;  %v4803_v40 = vpop.f32.mrb[19].mxu0  ;;  %v5364_v34 = vrot.slane %v4801_v62, %v14471_v58  ;;  %v5380_v57 = vrot.slane %v4801_v62, %v14472_v27 }
 0x78c   : > { %v5336_v35 = vrot.slane %v4803_v40, %v14469_v23  ;;  %v5352_v47 = vrot.slane %v4803_v40, %v14470_v26  ;;  %v13175_v60 = vpop.f32.mrb[19].mxu1  ;;  %9142 = vmatpush1.bf16.msra.mxu0 %v14982_v15  ;;  %v5368_v43 = vrot.slane %v4803_v40, %v14471_v58  ;;  %v5384_v53 = vrot.slane %v4803_v40, %v14472_v27  ;;  %v14987_v40 = vld [vmem:[#allocation296_spill] sm:$0xff] }
 0x78d   : > { %v5337_v42 = vmul.f32 %v5332_v14, %v5327_v4  ;;  %9206 = vmatpush1.bf16.msra.mxu1 %v14983_v0  ;;  %9144 = vmatprep.subr.bf16.mxu0 %v14984_v10  ;;  %v5353_v3 = vmul.f32 %v5348_v13, %v5343_v30  ;;  %v14985_v14 = vld [vmem:[#allocation292_spill] sm:$0xff]  ;;  %v5369_v15 = vmul.f32 %v5364_v34, %v5359_v36  ;;  %v14988_v34 = vld [vmem:[#allocation298_spill] sm:$0xff] }
 0x78e   : > { %v5338_v8 = vmul.f32 %v5336_v35, %v5327_v4  ;;  %9208 = vmatprep.subr.bf16.mxu1 %v14739_v50  ;;  %v5354_v17 = vmul.f32 %v5352_v47, %v5343_v30  ;;  %v1422_v4 = vld [vmem:[#allocation18] sm:$0x3]  ;;  %v5370_v62 = vmul.f32 %v5368_v43, %v5359_v36  ;;  %v5386_v47 = vmul.f32 %v5384_v53, %v5375_v19  ;;  %v14990_v0 = vld [vmem:[#allocation302_spill] sm:$0xff] }
 0x78f   : > { %v5339_v16 = vadd.f32 %v5337_v42, %v13106_v32  ;;  %v14986_v32 = vld [vmem:[#allocation294_spill] sm:$0xff]  ;;  %6320 = vperm.xlu1 %9878, %v1422_v4   ;;  %6336 = vperm.xlu0 %9879, %v1422_v4   ;;  %v14994_v43 = vld [vmem:[#allocation308_spill] sm:$0xff] }
 0x790   : > { %v5340_v61 = vadd.f32 %v5338_v8, %v13110_v56  ;;  %9146 = vmatpush1.bf16.msra.mxu0 %v14985_v14  ;;  %v5385_v56 = vmul.f32 %v5380_v57, %v5375_v19  ;;  %v14992_v8 = vld [vmem:[#allocation306_spill] sm:$0xff]  ;;  %v14999_v10 = vld [vmem:[#allocation312_spill] sm:$0xff]  ;;  %v13232_v57 = vld [vmem:[%s15001_s18] sm:$0x3]  ;;  %s15030_s18 = sld [smem:[#allocation52_spill]] }
 0x791   : > { %v5355_v35 = vadd.f32 %v5353_v3, %v5339_v16  ;;  %9210 = vmatpush1.bf16.msra.mxu1 %v14741_v39  ;;  %9148 = vmatprep.subr.bf16.mxu0 %v14986_v32  ;;  %v15002_v16 = vmov 6   ;;  %v1423_v3 = vld [vmem:[%s14997_s23] sm:$0x3]  ;;  %v15007_v36 = vld [vmem:[#allocation324_spill] sm:$0xff]  ;;  %v2024_v32 = vld [vmem:[#allocation4 + $0x50] sm:$0xff]  ;;  %s10408_s23 = smov 1  }
 0x792   : > { %v5356_v13 = vadd.f32 %v5354_v17, %v5340_v61  ;;  %9212 = vmatprep.subr.bf16.mxu1 %v14744_v7  ;;  %v14989_v7 = vld [vmem:[#allocation300_spill] sm:$0xff] }
 0x793   : > { %v5371_v50 = vadd.f32 %v5369_v15, %v5355_v35  ;;  %9880 = vset.pattern.permute.xlu1 %v14479_v45  ;;  %v2015_v15 = vld [vmem:[#allocation4 + $0x8] sm:$0xff] }
 0x794   : > { %v5372_v30 = vadd.f32 %v5370_v62, %v5356_v13  ;;  %9150 = vmatpush1.bf16.msra.mxu0 %v14987_v40  ;;  %6352 = vperm.xlu1 %9880, %v1422_v4   ;;  %v9247_v13 = vpack.c.bf16 %v2024_v32, %v2015_v15  ;;  %v2014_v62 = vld [vmem:[#allocation4] sm:$0xff]  ;;  %v2025_v40 = vld [vmem:[#allocation4 + $0x58] sm:$0xff]  ;;  %v2079_v15 = vld [vmem:[#allocation4 + $0x208] sm:$0xff] }
 0x795   : > { %v13192_v42 = vadd.f32 %v5385_v56, %v5371_v50  ;;  %9214 = vmatpush1.bf16.msra.mxu1 %v14746_v29  ;;  %9152 = vmatprep.subr.bf16.mxu0 %v14988_v34  ;;  %v14991_v29 = vld [vmem:[#allocation304_spill] sm:$0xff]  ;;  %v2023_v50 = vld [vmem:[#allocation4 + $0x48] sm:$0xff] }
 0x796   : > { %v13196_v39 = vadd.f32 %v5386_v47, %v5372_v30  ;;  %9216 = vmatprep.subr.bf16.mxu1 %v14748_v6  ;;  %v14993_v6 = vmov 4   ;;  %v9249_v30 = vpack.c.bf16 %v2023_v50, %v2014_v62  ;;  %v2016_v47 = vld [vmem:[#allocation4 + $0x10] sm:$0xff]  ;;  %v2033_v34 = vld [vmem:[#allocation4 + $0x98] sm:$0xff]  ;;  %v2087_v32 = vld [vmem:[#allocation4 + $0x248] sm:$0xff]  ;;  %v15013_v50 = vmov 13  }
 0x797   : > { %9882 = vset.pattern.permute.xlu0 %v14993_v6 }
 0x798   : > { %9154 = vmatpush1.bf16.msra.mxu0 %v14989_v7  ;;  %9881 = vset.pattern.permute.xlu1 %v14482_v21  ;;  %v15011_v7 = vmov 10  }
 0x799   : > { %9218 = vmatpush1.bf16.msra.mxu1 %v14750_v38  ;;  %9156 = vmatprep.subr.bf16.mxu0 %v14990_v0  ;;  %v14995_v38 = vmov 5   ;;  %v2042_v0 = vld [vmem:[#allocation4 + $0xe0] sm:$0xff] }
 0x79a   : > { %9220 = vmatprep.subr.bf16.mxu1 %v14752_v24  ;;  %6368 = vperm.xlu1 %9881, %v1422_v4   ;;  %v14996_v24 = vld [vmem:[#allocation310_spill] sm:$0xff] }
 0x79b   : > { %6384 = vperm.xlu0 %9882, %v1422_v4  }
 0x79c   : > { %9158 = vmatpush1.bf16.msra.mxu0 %v14991_v29  ;;  %v2035_v29 = vld [vmem:[#allocation4 + $0xa8] sm:$0xff] }
 0x79d   : > { %9222 = vmatpush1.bf16.msra.mxu1 %v14754_v33  ;;  %9160 = vmatprep.subr.bf16.mxu0 %v14992_v8  ;;  %v14998_v33 = vmov 7   ;;  %v2044_v8 = vld [vmem:[#allocation4 + $0xf0] sm:$0xff] }
 0x79e   : > { %9224 = vmatprep.subr.bf16.mxu1 %v14756_v54  ;;  %9883 = vset.pattern.permute.xlu1 %v14995_v38  ;;  %v15000_v54 = vld [vmem:[#allocation314_spill] sm:$0xff] }
 0x79f   : > { %6400 = vperm.xlu1 %9883, %v1422_v4   ;;  %9885 = vset.pattern.permute.xlu0 %v14998_v33 }
 0x7a0   : > { %9162 = vmatpush1.bf16.msra.mxu0 %v14994_v43  ;;  %6432 = vperm.xlu0 %9885, %v1422_v4   ;;  %v9315_v43 = vpack.c.bf16 %v2044_v8, %v2035_v29  ;;  %v2114_v29 = vld [vmem:[#allocation4 + $0x320] sm:$0xff]  ;;  %v2107_v8 = vld [vmem:[#allocation4 + $0x2e8] sm:$0xff] }
 0x7a1   : > { %9226 = vmatpush1.bf16.msra.mxu1 %v14758_v28  ;;  %9164 = vmatprep.subr.bf16.mxu0 %v14996_v24  ;;  %v15003_v28 = vld [vmem:[#allocation316_spill] sm:$0xff] }
 0x7a2   : > { %9228 = vmatprep.subr.bf16.mxu1 %v14760_v51  ;;  %v15004_v51 = vld [vmem:[#allocation318_spill] sm:$0xff]  ;;  %v2041_v24 = vld [vmem:[#allocation4 + $0xd8] sm:$0xff] }
 0x7a3   : > { %9884 = vset.pattern.permute.xlu1 %v15002_v16 }
 0x7a4   : > { %9166 = vmatpush1.bf16.msra.mxu0 %v14999_v10  ;;  %6416 = vperm.xlu1 %9884, %v1422_v4  }
 0x7a5   : > { %9230 = vmatpush1.bf16.msra.mxu1 %v14762_v41  ;;  %9168 = vmatprep.subr.bf16.mxu0 %v15000_v54  ;;  %v15005_v41 = vld [vmem:[#allocation320_spill] sm:$0xff]  ;;  %v2043_v54 = vld [vmem:[#allocation4 + $0xe8] sm:$0xff] }
 0x7a6   : > { %9232 = vmatprep.subr.bf16.mxu1 %v14764_v49  ;;  %9887 = vset.pattern.permute.xlu0 %v14474_v2  ;;  %v15006_v49 = vld [vmem:[#allocation322_spill] sm:$0xff] }
 0x7a8   : > { %9170 = vmatpush1.bf16.msra.mxu0 %v15003_v28  ;;  %9886 = vset.pattern.permute.xlu1 %v14474_v2  ;;  %v2051_v28 = vld [vmem:[#allocation4 + $0x128] sm:$0xff] }
 0x7a9   : > { %9234 = vmatpush1.bf16.msra.mxu1 %v14766_v37  ;;  %9172 = vmatprep.subr.bf16.mxu0 %v15004_v51  ;;  %v15008_v37 = vld [vmem:[#allocation326_spill] sm:$0xff]  ;;  %v2060_v51 = vld [vmem:[#allocation4 + $0x170] sm:$0xff] }
 0x7aa   : > { %9236 = vmatprep.subr.bf16.mxu1 %v14768_v52  ;;  %6449 = vperm.xlu1 %9886, %v1423_v3   ;;  %v15009_v52 = vld [vmem:[#allocation328_spill] sm:$0xff] }
 0x7ac   : > { %9174 = vmatpush1.bf16.msra.mxu0 %v15005_v41  ;;  %v9255_v41 = vpack.c.bf16 %v2060_v51, %v2051_v28  ;;  %v2106_v28 = vld [vmem:[#allocation4 + $0x2e0] sm:$0xff]  ;;  %v2115_v51 = vld [vmem:[#allocation4 + $0x328] sm:$0xff] }
 0x7ad   : > { %9238 = vmatpush1.bf16.msra.mxu1 %v14770_v11  ;;  %9176 = vmatprep.subr.bf16.mxu0 %v15006_v49  ;;  %v6111_v11 = vmul.f32 %v13029_v9, %v13171_v59  ;;  %v2053_v49 = vld [vmem:[#allocation4 + $0x138] sm:$0xff] }
 0x7ae   : > { %9240 = vmatprep.subr.bf16.mxu1 %v14772_v63  ;;  %6816 = vperm.xlu1 %9886, %v13232_v57   ;;  %v6112_v63 = vmul.f32 %v13029_v9, %v13175_v60  ;;  %v15010_v9 = vmov 8  }
 0x7b0   : > { %9178 = vmatpush1.bf16.msra.mxu0 %v15007_v36  ;;  %v6114_v61 = vadd.f32 %v6112_v63, %v13038_v20  ;;  %v2062_v36 = vld [vmem:[#allocation4 + $0x180] sm:$0xff]  ;;  %v2052_v63 = vld [vmem:[#allocation4 + $0x130] sm:$0xff] }
 0x7b1   : > { %9242 = vmatpush1.bf16.msra.mxu1 %v14774_v31  ;;  %9180 = vmatprep.subr.bf16.mxu0 %v15008_v37  ;;  %v6113_v31 = vadd.f32 %v6111_v11, %v13038_v20  ;;  %v2017_v20 = vld [vmem:[#allocation4 + $0x18] sm:$0xff]  ;;  %v2050_v37 = vld [vmem:[#allocation4 + $0x120] sm:$0xff]  ;;  %v2059_v11 = vld [vmem:[#allocation4 + $0x168] sm:$0xff] }
 0x7b2   : > { %9244 = vmatprep.subr.bf16.mxu1 %v14776_v22  ;;  %9888 = vset.pattern.permute.xlu1 %v14478_v44 }
 0x7b3   : > { %6826 = vperm.xlu1 %9888, %v13232_v57  }
 0x7b4   : > { %9182 = vmatpush1.bf16.msra.mxu0 %v15009_v52  ;;  %v9319_v52 = vpack.c.bf16 %v2062_v36, %v2053_v49  ;;  %v9333_v49 = vpack.c.bf16 %v2115_v51, %v2106_v28  ;;  %v15015_v36 = vmov 16   ;;  %v2160_v51 = vld [vmem:[#allocation4 + $0x490] sm:$0xff] }
 0x7b5   : > { %9246 = vmatpush1.bf16.msra.mxu1 %v14778_v1  ;;  %9248 = vmatprep.subr.bf16.mxu0 %v9247_v13  ;;  %v2089_v13 = vld [vmem:[#allocation4 + $0x258] sm:$0xff] }
 0x7b7   : > { %6023 = vmatmul.mubr.f32.vlgmr.msra.gmra.mrb[26].mxu0 %v12815_v55  ;;  %9889 = vset.pattern.permute.xlu1 %v14479_v45 }
 0x7b8   : > { %6094 = vmatmul.mubr.f32.vlgmr.msra.gmra.mrb[26].mxu1 %v12815_v55  ;;  %6836 = vperm.xlu1 %9889, %v13232_v57  }
 0x7b9   : > { %9250 = vmatpush1.bf16.msra.mxu0 %v9249_v30 }
 0x7bc   : > { %9891 = vset.pattern.permute.xlu1 %v14993_v6  ;;  %v9251_v6 = vpack.c.bf16 %v2042_v0, %v2033_v34  ;;  %v2088_v34 = vld [vmem:[#allocation4 + $0x250] sm:$0xff]  ;;  %v2105_v0 = vld [vmem:[#allocation4 + $0x2d8] sm:$0xff] }
 0x7bd   : > { %6856 = vperm.xlu1 %9891, %v13232_v57  }
 0x7be   : > { %9252 = vmatprep.subr.bf16.mxu0 %v9251_v6  ;;  %v2116_v6 = vld [vmem:[#allocation4 + $0x330] sm:$0xff] }
 0x7c1   : > { %9892 = vset.pattern.permute.xlu1 %v14995_v38  ;;  %v2032_v38 = vld [vmem:[#allocation4 + $0x90] sm:$0xff] }
 0x7c2   : > { %6866 = vperm.xlu1 %9892, %v13232_v57   ;;  %v9253_v10 = vpack.c.bf16 %v2041_v24, %v2032_v38  ;;  %v9267_v24 = vpack.c.bf16 %v2114_v29, %v2105_v0  ;;  %v2151_v0 = vld [vmem:[#allocation4 + $0x448] sm:$0xff] }
 0x7c4   : > { %9254 = vmatpush1.bf16.msra.mxu0 %v9253_v10  ;;  %v2113_v10 = vld [vmem:[#allocation4 + $0x318] sm:$0xff] }
 0x7c5   : > { %9256 = vmatprep.subr.bf16.mxu0 %v9255_v41 }
 0x7c6   : > { %9894 = vset.pattern.permute.xlu1 %v14998_v33  ;;  %v2034_v33 = vld [vmem:[#allocation4 + $0xa0] sm:$0xff] }
 0x7c7   : > { %6886 = vperm.xlu1 %9894, %v13232_v57   ;;  %v9317_v3 = vpack.c.bf16 %v2043_v54, %v2034_v33  ;;  %v2104_v33 = vld [vmem:[#allocation4 + $0x2d0] sm:$0xff]  ;;  %v9331_v54 = vpack.c.bf16 %v2116_v6, %v2107_v8  ;;  %v2159_v8 = vld [vmem:[#allocation4 + $0x488] sm:$0xff] }
 0x7c8   : > { %v9269_v41 = vpack.c.bf16 %v2113_v10, %v2104_v33  ;;  %v2168_v6 = vld [vmem:[#allocation4 + $0x4d0] sm:$0xff]  ;;  %v2158_v33 = vld [vmem:[#allocation4 + $0x480] sm:$0xff]  ;;  %v2167_v10 = vld [vmem:[#allocation4 + $0x4c8] sm:$0xff] }
 0x7c9   : > { %v9281_v28 = vpack.c.bf16 %v2167_v10, %v2158_v33  ;;  %v2239_v33 = vld [vmem:[#allocation4 + $0x708] sm:$0xff] }
 0x7ca   : > { %v5598_v45 = vpop.f32.mrb[20].mxu0 }
 0x7cb   : > { %v6119_v22 = vmul.f32 %v13047_v5, %v5598_v45  ;;  %v5669_v1 = vpop.f32.mrb[20].mxu1  ;;  %v5600_v55 = vpop.f32.mrb[21].mxu0  ;;  %9895 = vset.pattern.permute.xlu1 %v15010_v9  ;;  %v2061_v45 = vld [vmem:[#allocation4 + $0x178] sm:$0xff] }
 0x7cc   : > { %v6120_v17 = vmul.f32 %v13047_v5, %v5600_v55  ;;  %v5671_v19 = vpop.f32.mrb[21].mxu1  ;;  %v6127_v53 = vmul.f32 %v13058_v18, %v5669_v1  ;;  %6896 = vperm.xlu1 %9895, %v13232_v57   ;;  %v2026_v5 = vld [vmem:[#allocation4 + $0x60] sm:$0xff]  ;;  %v2069_v1 = vld [vmem:[#allocation4 + $0x1b8] sm:$0xff] }
 0x7cd   : > { %v6121_v59 = vadd.f32 %v6119_v22, %v6113_v31  ;;  %v6128_v14 = vmul.f32 %v13058_v18, %v5671_v19  ;;  %v9311_v56 = vpack.c.bf16 %v2026_v5, %v2017_v20  ;;  %v9313_v18 = vpack.c.bf16 %v2025_v40, %v2016_v47  ;;  %v2078_v55 = vld [vmem:[#allocation4 + $0x200] sm:$0xff]  ;;  %v2077_v9 = vld [vmem:[#allocation4 + $0x1f8] sm:$0xff]  ;;  %v2096_v20 = vld [vmem:[#allocation4 + $0x290] sm:$0xff] }
 0x7ce   : > { %v6122_v60 = vadd.f32 %v6120_v17, %v6114_v61  ;;  %v15012_v31 = vmov 11   ;;  %v9257_v22 = vpack.c.bf16 %v2059_v11, %v2050_v37  ;;  %v2071_v61 = vld [vmem:[#allocation4 + $0x1c8] sm:$0xff]  ;;  %v9321_v17 = vpack.c.bf16 %v2061_v45, %v2052_v63  ;;  %v2098_v5 = vld [vmem:[#allocation4 + $0x2a0] sm:$0xff] }
 0x7cf   : > { %v13266_v4 = vadd.f32 %v6127_v53, %v6121_v59  ;;  %9312 = vmatprep.subr.bf16.mxu1 %v9311_v56  ;;  %v9259_v19 = vpack.c.bf16 %v2078_v55, %v2069_v1  ;;  %v2080_v59 = vld [vmem:[#allocation4 + $0x210] sm:$0xff]  ;;  %v9263_v30 = vpack.c.bf16 %v2096_v20, %v2087_v32  ;;  %v2086_v47 = vld [vmem:[#allocation4 + $0x240] sm:$0xff]  ;;  %v2095_v40 = vld [vmem:[#allocation4 + $0x288] sm:$0xff]  ;;  %v15016_v37 = vmov 17  }
 0x7d0   : > { %v13268_v35 = vadd.f32 %v6128_v14, %v6122_v60  ;;  %9897 = vset.pattern.permute.xlu1 %v15011_v7  ;;  %9314 = vmatpush1.bf16.msra.mxu1 %v9313_v18  ;;  %v2068_v53 = vld [vmem:[#allocation4 + $0x1b0] sm:$0xff]  ;;  %v9323_v60 = vpack.c.bf16 %v2080_v59, %v2071_v61  ;;  %v2070_v14 = vld [vmem:[#allocation4 + $0x1c0] sm:$0xff]  ;;  %v9327_v7 = vpack.c.bf16 %v2098_v5, %v2089_v13  ;;  %v2097_v18 = vld [vmem:[#allocation4 + $0x298] sm:$0xff] }
 0x7d1   : > { %6916 = vperm.xlu1 %9897, %v13232_v57   ;;  %9316 = vmatprep.subr.bf16.mxu1 %v9315_v43  ;;  %v9261_v62 = vpack.c.bf16 %v2077_v9, %v2068_v53  ;;  %v9325_v56 = vpack.c.bf16 %v2079_v15, %v2070_v14  ;;  %v9265_v43 = vpack.c.bf16 %v2095_v40, %v2086_v47  ;;  %v2123_v53 = vld [vmem:[#allocation4 + $0x368] sm:$0xff]  ;;  %v2132_v9 = vld [vmem:[#allocation4 + $0x3b0] sm:$0xff]  ;;  %v2134_v15 = vld [vmem:[#allocation4 + $0x3c0] sm:$0xff] }
 0x7d2   : > { %9258 = vmatpush1.bf16.msra.mxu0 %v9257_v22  ;;  %v9329_v38 = vpack.c.bf16 %v2097_v18, %v2088_v34  ;;  %v9271_v14 = vpack.c.bf16 %v2132_v9, %v2123_v53  ;;  %v2122_v32 = vld [vmem:[#allocation4 + $0x360] sm:$0xff]  ;;  %v2133_v5 = vld [vmem:[#allocation4 + $0x3b8] sm:$0xff]  ;;  %v2140_v40 = vld [vmem:[#allocation4 + $0x3f0] sm:$0xff] }
 0x7d3   : > { %9260 = vmatprep.subr.bf16.mxu0 %v9259_v19  ;;  %v2149_v34 = vld [vmem:[#allocation4 + $0x438] sm:$0xff]  ;;  %v2204_v53 = vld [vmem:[#allocation4 + $0x5f0] sm:$0xff] }
 0x7d4   : > { %9318 = vmatpush1.bf16.msra.mxu1 %v9317_v3  ;;  %v15014_v3 = vmov 14   ;;  %v9277_v18 = vpack.c.bf16 %v2149_v34, %v2140_v40  ;;  %v2197_v9 = vld [vmem:[#allocation4 + $0x5b8] sm:$0xff] }
 0x7d5   : > { %9898 = vset.pattern.permute.xlu1 %v15012_v31  ;;  %9320 = vmatprep.subr.bf16.mxu1 %v9319_v52 }
 0x7d6   : > { %6926 = vperm.xlu1 %9898, %v13232_v57   ;;  %9262 = vmatpush1.bf16.msra.mxu0 %v9261_v62  ;;  %v2141_v62 = vld [vmem:[#allocation4 + $0x3f8] sm:$0xff] }
 0x7d7   : > { %9264 = vmatprep.subr.bf16.mxu0 %v9263_v30 }
 0x7d8   : > { %9322 = vmatpush1.bf16.msra.mxu1 %v9321_v17 }
 0x7d9   : > { %9324 = vmatprep.subr.bf16.mxu1 %v9323_v60  ;;  %v2125_v60 = vld [vmem:[#allocation4 + $0x378] sm:$0xff] }
 0x7da   : > { %9900 = vset.pattern.permute.xlu1 %v15013_v50  ;;  %9266 = vmatpush1.bf16.msra.mxu0 %v9265_v43  ;;  %v9335_v20 = vpack.c.bf16 %v2134_v15, %v2125_v60  ;;  %v2150_v50 = vld [vmem:[#allocation4 + $0x440] sm:$0xff]  ;;  %v2161_v43 = vld [vmem:[#allocation4 + $0x498] sm:$0xff] }
 0x7db   : > { %6946 = vperm.xlu1 %9900, %v13232_v57   ;;  %9268 = vmatprep.subr.bf16.mxu0 %v9267_v24  ;;  %v9275_v30 = vpack.c.bf16 %v2150_v50, %v2141_v62  ;;  %v2170_v24 = vld [vmem:[#allocation4 + $0x4e0] sm:$0xff]  ;;  %v2213_v62 = vld [vmem:[#allocation4 + $0x638] sm:$0xff]  ;;  %v2215_v50 = vld [vmem:[#allocation4 + $0x648] sm:$0xff] }
 0x7dc   : > { %9326 = vmatpush1.bf16.msra.mxu1 %v9325_v56  ;;  %v2152_v56 = vld [vmem:[#allocation4 + $0x450] sm:$0xff]  ;;  %v2194_v15 = vld [vmem:[#allocation4 + $0x5a0] sm:$0xff] }
 0x7dd   : > { %9328 = vmatprep.subr.bf16.mxu1 %v9327_v7  ;;  %v2142_v7 = vld [vmem:[#allocation4 + $0x400] sm:$0xff] }
 0x7de   : > { %9270 = vmatpush1.bf16.msra.mxu0 %v9269_v41  ;;  %v9341_v29 = vpack.c.bf16 %v2151_v0, %v2142_v7  ;;  %v2214_v7 = vld [vmem:[#allocation4 + $0x640] sm:$0xff] }
 0x7df   : > { %9901 = vset.pattern.permute.xlu1 %v15014_v3  ;;  %9272 = vmatprep.subr.bf16.mxu0 %v9271_v14  ;;  %v2169_v3 = vld [vmem:[#allocation4 + $0x4d8] sm:$0xff]  ;;  %v2206_v14 = vld [vmem:[#allocation4 + $0x600] sm:$0xff] }
 0x7e0   : > { %6956 = vperm.xlu1 %9901, %v13232_v57   ;;  %9330 = vmatpush1.bf16.msra.mxu1 %v9329_v38  ;;  %v9279_v38 = vpack.c.bf16 %v2168_v6, %v2159_v8  ;;  %v9345_v41 = vpack.c.bf16 %v2169_v3, %v2160_v51  ;;  %v2240_v8 = vld [vmem:[#allocation4 + $0x710] sm:$0xff]  ;;  %v2233_v6 = vld [vmem:[#allocation4 + $0x6d8] sm:$0xff] }
 0x7e1   : > { %9332 = vmatprep.subr.bf16.mxu1 %v9331_v54  ;;  %v9343_v54 = vpack.c.bf16 %v2170_v24, %v2161_v43  ;;  %v2230_v24 = vld [vmem:[#allocation4 + $0x6c0] sm:$0xff]  ;;  %v2241_v51 = vld [vmem:[#allocation4 + $0x718] sm:$0xff] }
 0x7e4   : > { %9903 = vset.pattern.permute.xlu1 %v15015_v36  ;;  %9334 = vmatpush1.bf16.msra.mxu1 %v9333_v49  ;;  %v2177_v49 = vld [vmem:[#allocation4 + $0x518] sm:$0xff]  ;;  %v2186_v36 = vld [vmem:[#allocation4 + $0x560] sm:$0xff] }
 0x7e5   : > { %6976 = vperm.xlu1 %9903, %v13232_v57   ;;  %9336 = vmatprep.subr.bf16.mxu1 %v9335_v20 }
 0x7e9   : > { %9904 = vset.pattern.permute.xlu1 %v15016_v37  ;;  %v2179_v37 = vld [vmem:[#allocation4 + $0x528] sm:$0xff] }
 0x7ea   : > { %6986 = vperm.xlu1 %9904, %v13232_v57  }
 0x7ee   : > { %9905 = vset.pattern.permute.xlu1 %v14474_v2 }
 0x80a   : > { %v5740_v52 = vpop.f32.mrb[22].mxu0 }
 0x80b   : > { %v6135_v11 = vmul.f32 %v13151_v12, %v5740_v52  ;;  %v5811_v63 = vpop.f32.mrb[22].mxu1  ;;  %v5742_v45 = vpop.f32.mrb[23].mxu0  ;;  %v9283_v52 = vpack.c.bf16 %v2186_v36, %v2177_v49  ;;  %v2258_v49 = vld [vmem:[#allocation4 + $0x7a0] sm:$0xff]  ;;  %v2251_v36 = vld [vmem:[#allocation4 + $0x768] sm:$0xff] }
 0x80c   : > { %v6136_v31 = vmul.f32 %v13151_v12, %v5742_v45  ;;  %v5813_v22 = vpop.f32.mrb[23].mxu1  ;;  %v6143_v55 = vmul.f32 %v13146_v25, %v5811_v63  ;;  %v2131_v12 = vld [vmem:[#allocation4 + $0x3a8] sm:$0xff]  ;;  %v2176_v63 = vld [vmem:[#allocation4 + $0x510] sm:$0xff]  ;;  %v2185_v45 = vld [vmem:[#allocation4 + $0x558] sm:$0xff] }
 0x80d   : > { %v6137_v1 = vadd.f32 %v6135_v11, %v13266_v4  ;;  %v6144_v17 = vmul.f32 %v13146_v25, %v5813_v22  ;;  %v9273_v13 = vpack.c.bf16 %v2131_v12, %v2122_v32  ;;  %v2124_v4 = vld [vmem:[#allocation4 + $0x370] sm:$0xff]  ;;  %v2143_v25 = vld [vmem:[#allocation4 + $0x408] sm:$0xff]  ;;  %v9285_v22 = vpack.c.bf16 %v2185_v45, %v2176_v63  ;;  %v2257_v63 = vld [vmem:[#allocation4 + $0x798] sm:$0xff] }
 0x80e   : > { %v6138_v61 = vadd.f32 %v6136_v31, %v13268_v35  ;;  %v9337_v35 = vpack.c.bf16 %v2133_v5, %v2124_v4  ;;  %v9339_v47 = vpack.c.bf16 %v2152_v56, %v2143_v25  ;;  %v2188_v11 = vld [vmem:[#allocation4 + $0x570] sm:$0xff]  ;;  %v2203_v32 = vld [vmem:[#allocation4 + $0x5e8] sm:$0xff]  ;;  %v9351_v12 = vpack.c.bf16 %v2206_v14, %v2197_v9  ;;  %v2205_v4 = vld [vmem:[#allocation4 + $0x5f8] sm:$0xff] }
 0x80f   : > { %v13289_v19 = vadd.f32 %v6143_v55, %v6137_v1  ;;  %9274 = vmatpush1.bf16.msra.mxu0 %v9273_v13  ;;  %v9347_v31 = vpack.c.bf16 %v2188_v11, %v2179_v37  ;;  %v2178_v1 = vld [vmem:[#allocation4 + $0x520] sm:$0xff]  ;;  %v2187_v55 = vld [vmem:[#allocation4 + $0x568] sm:$0xff]  ;;  %v9289_v20 = vpack.c.bf16 %v2203_v32, %v2194_v15  ;;  %v2196_v13 = vld [vmem:[#allocation4 + $0x5b0] sm:$0xff] }
 0x810   : > { %v13291_v59 = vadd.f32 %v6144_v17, %v6138_v61  ;;  %9338 = vmatpush1.bf16.msra.mxu1 %v9337_v35  ;;  %9276 = vmatprep.subr.bf16.mxu0 %v9275_v30  ;;  %v9349_v61 = vpack.c.bf16 %v2187_v55, %v2178_v1  ;;  %v2195_v17 = vld [vmem:[#allocation4 + $0x5a8] sm:$0xff]  ;;  %v9353_v5 = vpack.c.bf16 %v2205_v4, %v2196_v13  ;;  %v2222_v35 = vld [vmem:[#allocation4 + $0x680] sm:$0xff]  ;;  %v2224_v56 = vld [vmem:[#allocation4 + $0x690] sm:$0xff] }
 0x811   : > { %9340 = vmatprep.subr.bf16.mxu1 %v9339_v47  ;;  %v9287_v60 = vpack.c.bf16 %v2204_v53, %v2195_v17  ;;  %v9291_v25 = vpack.c.bf16 %v2222_v35, %v2213_v62  ;;  %v2212_v30 = vld [vmem:[#allocation4 + $0x630] sm:$0xff]  ;;  %v2221_v47 = vld [vmem:[#allocation4 + $0x678] sm:$0xff]  ;;  %v9355_v40 = vpack.c.bf16 %v2224_v56, %v2215_v50  ;;  %v2259_v1 = vld [vmem:[#allocation4 + $0x7a8] sm:$0xff] }
 0x812   : > { %v9293_v34 = vpack.c.bf16 %v2221_v47, %v2212_v30  ;;  %v2248_v11 = vld [vmem:[#allocation4 + $0x750] sm:$0xff]  ;;  %v2267_v55 = vld [vmem:[#allocation4 + $0x7e8] sm:$0xff]  ;;  %v2269_v53 = vld [vmem:[#allocation4 + $0x7f8] sm:$0xff] }
 0x813   : > { %9278 = vmatpush1.bf16.msra.mxu0 %v9277_v18  ;;  %v2223_v18 = vld [vmem:[#allocation4 + $0x688] sm:$0xff]  ;;  %v2276_v17 = vld [vmem:[#allocation4 + $0x830] sm:$0xff]  ;;  %v2278_v9 = vld [vmem:[#allocation4 + $0x840] sm:$0xff] }
 0x814   : > { %9342 = vmatpush1.bf16.msra.mxu1 %v9341_v29  ;;  %9280 = vmatprep.subr.bf16.mxu0 %v9279_v38  ;;  %v9357_v0 = vpack.c.bf16 %v2223_v18, %v2214_v7  ;;  %v2231_v29 = vld [vmem:[#allocation4 + $0x6c8] sm:$0xff]  ;;  %v2242_v38 = vld [vmem:[#allocation4 + $0x720] sm:$0xff]  ;;  %v9367_v14 = vpack.c.bf16 %v2278_v9, %v2269_v53  ;;  %v2277_v13 = vld [vmem:[#allocation4 + $0x838] sm:$0xff] }
 0x815   : > { %9344 = vmatprep.subr.bf16.mxu1 %v9343_v54  ;;  %v9295_v43 = vpack.c.bf16 %v2240_v8, %v2231_v29  ;;  %v9359_v10 = vpack.c.bf16 %v2242_v38, %v2233_v6  ;;  %v9297_v54 = vpack.c.bf16 %v2239_v33, %v2230_v24  ;;  %v2266_v15 = vld [vmem:[#allocation4 + $0x7e0] sm:$0xff]  ;;  %v2275_v32 = vld [vmem:[#allocation4 + $0x828] sm:$0xff]  ;;  %v2285_v4 = vld [vmem:[#allocation4 + $0x878] sm:$0xff] }
 0x816   : > { %v2287_v50 = vld [vmem:[#allocation4 + $0x888] sm:$0xff]  ;;  %v2284_v56 = vld [vmem:[#allocation4 + $0x870] sm:$0xff]  ;;  %v2293_v47 = vld [vmem:[#allocation4 + $0x8b8] sm:$0xff] }
 0x817   : > { %9282 = vmatpush1.bf16.msra.mxu0 %v9281_v28  ;;  %v2232_v28 = vld [vmem:[#allocation4 + $0x6d0] sm:$0xff]  ;;  %v9309_v7 = vpack.c.bf16 %v2293_v47, %v2284_v56  ;;  %v2021_v8 = vld [vmem:[#allocation4 + $0x38] sm:$0xff] }
 0x818   : > { %9346 = vmatpush1.bf16.msra.mxu1 %v9345_v41  ;;  %9284 = vmatprep.subr.bf16.mxu0 %v9283_v52  ;;  %v9361_v3 = vpack.c.bf16 %v2241_v51, %v2232_v28  ;;  %v2249_v41 = vld [vmem:[#allocation4 + $0x758] sm:$0xff]  ;;  %v2260_v52 = vld [vmem:[#allocation4 + $0x7b0] sm:$0xff] }
 0x819   : > { %9348 = vmatprep.subr.bf16.mxu1 %v9347_v31  ;;  %v9299_v37 = vpack.c.bf16 %v2258_v49, %v2249_v41  ;;  %v9363_v45 = vpack.c.bf16 %v2260_v52, %v2251_v36  ;;  %v9301_v31 = vpack.c.bf16 %v2257_v63, %v2248_v11  ;;  %v2028_v29 = vld [vmem:[#allocation4 + $0x70] sm:$0xff]  ;;  %v6165_v11 = vpop.permute.xlu1 %6164 }
 0x81b   : > { %9286 = vmatpush1.bf16.msra.mxu0 %v9285_v22  ;;  %v2250_v22 = vld [vmem:[#allocation4 + $0x760] sm:$0xff] }
 0x81c   : > { %9350 = vmatpush1.bf16.msra.mxu1 %v9349_v61  ;;  %9288 = vmatprep.subr.bf16.mxu0 %v9287_v60  ;;  %v9365_v61 = vpack.c.bf16 %v2259_v1, %v2250_v22  ;;  %v9303_v60 = vpack.c.bf16 %v2276_v17, %v2267_v55  ;;  %v1425_v55 = vld [vmem:[%s15017_s22] sm:$0x3]  ;;  %v6207_v17 = vrot.slane %v13196_v39, %v14470_v26 }
 0x81d   : > { %9352 = vmatprep.subr.bf16.mxu1 %v9351_v12  ;;  %v2268_v12 = vld [vmem:[#allocation4 + $0x7f0] sm:$0xff]  ;;  %v6173_v63 = vpop.permute.xlu1 %6172  ;;  %6810 = vperm.xlu0 %9887, %v1425_v55  }
 0x81e   : > { %v9369_v62 = vpack.c.bf16 %v2277_v13, %v2268_v12 }
 0x81f   : > { %9290 = vmatpush1.bf16.msra.mxu0 %v9289_v20  ;;  %v9305_v20 = vpack.c.bf16 %v2275_v32, %v2266_v15 }
 0x820   : > { %9354 = vmatpush1.bf16.msra.mxu1 %v9353_v5  ;;  %9292 = vmatprep.subr.bf16.mxu0 %v9291_v25  ;;  %v2294_v5 = vld [vmem:[#allocation4 + $0x8c0] sm:$0xff]  ;;  %v2296_v25 = vld [vmem:[#allocation4 + $0x8d0] sm:$0xff] }
 0x821   : > { %9356 = vmatprep.subr.bf16.mxu1 %v9355_v40  ;;  %v9307_v35 = vpack.c.bf16 %v2294_v5, %v2285_v4  ;;  %v9371_v30 = vpack.c.bf16 %v2296_v25, %v2287_v50  ;;  %v2286_v40 = vld [vmem:[#allocation4 + $0x880] sm:$0xff]  ;;  %9890 = vset.pattern.permute.xlu0 %v14482_v21  ;;  %v6219_v25 = vrot.slane %v13192_v42, %v14471_v58 }
 0x822   : > { %6846 = vperm.xlu0 %9890, %v13232_v57  }
 0x823   : > { %9294 = vmatpush1.bf16.msra.mxu0 %v9293_v34  ;;  %v2295_v34 = vld [vmem:[#allocation4 + $0x8c8] sm:$0xff] }
 0x824   : > { %9358 = vmatpush1.bf16.msra.mxu1 %v9357_v0  ;;  %9296 = vmatprep.subr.bf16.mxu0 %v9295_v43  ;;  %v9373_v18 = vpack.c.bf16 %v2295_v34, %v2286_v40  ;;  %v2019_v0 = vld [vmem:[#allocation4 + $0x28] sm:$0xff]  ;;  %v2030_v43 = vld [vmem:[#allocation4 + $0x80] sm:$0xff]  ;;  %v6223_v40 = vrot.slane %v13196_v39, %v14471_v58 }
 0x825   : > { %9360 = vmatprep.subr.bf16.mxu1 %v9359_v10  ;;  %v9375_v6 = vpack.c.bf16 %v2028_v29, %v2019_v0  ;;  %v9439_v38 = vpack.c.bf16 %v2030_v43, %v2021_v8 }
 0x826   : > { %9893 = vset.pattern.permute.xlu0 %v15002_v16  ;;  %v6239_v16 = vrot.slane %v13196_v39, %v14472_v27 }
 0x827   : > { %9298 = vmatpush1.bf16.msra.mxu0 %v9297_v54  ;;  %6876 = vperm.xlu0 %9893, %v13232_v57  }
 0x828   : > { %9362 = vmatpush1.bf16.msra.mxu1 %v9361_v3  ;;  %9300 = vmatprep.subr.bf16.mxu0 %v9299_v37 }
 0x829   : > { %9364 = vmatprep.subr.bf16.mxu1 %v9363_v45  ;;  %v6182_v45 = vpop.permute.xlu1 %6181 }
 0x82b   : > { %9302 = vmatpush1.bf16.msra.mxu0 %v9301_v31 }
 0x82c   : > { %9366 = vmatpush1.bf16.msra.mxu1 %v9365_v61  ;;  %9304 = vmatprep.subr.bf16.mxu0 %v9303_v60  ;;  %v6191_v61 = vrot.slane %v13196_v39, %v14469_v23 }
 0x82d   : > { %9368 = vmatprep.subr.bf16.mxu1 %v9367_v14  ;;  %v6247_v31 = vpop.permute.xlu1 %6246 }
 0x82e   : > { %v6193_v5 = vmul.f32 %v6191_v61, %v6182_v45 }
 0x82f   : > { %9306 = vmatpush1.bf16.msra.mxu0 %v9305_v20 }
 0x830   : > { %9370 = vmatpush1.bf16.msra.mxu1 %v9369_v62  ;;  %9308 = vmatprep.subr.bf16.mxu0 %v9307_v35 }
 0x831   : > { %9372 = vmatprep.subr.bf16.mxu1 %v9371_v30  ;;  %v6263_v22 = vpop.permute.xlu1 %6262  ;;  %v6235_v30 = vrot.slane %v13192_v42, %v14472_v27 }
 0x833   : > { %9310 = vmatpush1.bf16.msra.mxu0 %v9309_v7 }
 0x834   : > { %9374 = vmatpush1.bf16.msra.mxu1 %v9373_v18  ;;  %9376 = vmatprep.subr.bf16.mxu0 %v9375_v6  ;;  %v15018_v6 = vmov 9  }
 0x835   : > { %9440 = vmatprep.subr.bf16.mxu1 %v9439_v38  ;;  %v6279_v1 = vpop.permute.xlu1 %6278  ;;  %9896 = vset.pattern.permute.xlu0 %v15018_v6 }
 0x836   : > { %6906 = vperm.xlu0 %9896, %v13232_v57  }
 0x84a   : > { %v5882_v24 = vpop.f32.mrb[24].mxu0 }
 0x84b   : > { %v6151_v33 = vmul.f32 %v13157_v46, %v5882_v24  ;;  %v5953_v10 = vpop.f32.mrb[24].mxu1  ;;  %v5884_v54 = vpop.f32.mrb[25].mxu0 }
 0x84c   : > { %v6152_v28 = vmul.f32 %v13157_v46, %v5884_v54  ;;  %v5955_v51 = vpop.f32.mrb[25].mxu1  ;;  %v6159_v41 = vmul.f32 %v13166_v48, %v5953_v10  ;;  %v13300_v46 = vpop.permute.xlu1 %6229 }
 0x84d   : > { %v6153_v3 = vadd.f32 %v6151_v33, %v13289_v19  ;;  %v6160_v36 = vmul.f32 %v13166_v48, %v5955_v51  ;;  %v6198_v19 = vpop.permute.xlu0 %6197  ;;  %v6187_v48 = vrot.slane %v13192_v42, %v14469_v23 }
 0x84e   : > { %v6154_v49 = vadd.f32 %v6152_v28, %v13291_v59  ;;  %v6203_v59 = vrot.slane %v13192_v42, %v14470_v26  ;;  %v6209_v62 = vmul.f32 %v6207_v17, %v6198_v19 }
 0x84f   : > { %v6161_v37 = vadd.f32 %v6159_v41, %v6153_v3  ;;  %v6192_v12 = vmul.f32 %v6187_v48, %v6182_v45  ;;  %v6240_v48 = vmul.f32 %v6235_v30, %v13300_v46 }
 0x850   : > { %v6162_v52 = vadd.f32 %v6160_v36, %v6154_v49  ;;  %v13312_v9 = vpop.permute.xlu1 %6313  ;;  %v6208_v20 = vmul.f32 %v6203_v59, %v6198_v19  ;;  %v6211_v43 = vadd.f32 %v6209_v62, %v6193_v5  ;;  %v15019_v19 = vmov 12  }
 0x851   : > { %v6214_v47 = vpop.permute.xlu0 %6213  ;;  %9899 = vset.pattern.permute.xlu0 %v15019_v19 }
 0x852   : > { %v6210_v18 = vadd.f32 %v6208_v20, %v6192_v12  ;;  %v6224_v39 = vmul.f32 %v6219_v25, %v6214_v47  ;;  %v6225_v28 = vmul.f32 %v6223_v40, %v6214_v47  ;;  %6936 = vperm.xlu0 %9899, %v13232_v57  }
 0x854   : > { %v6321_v7 = vpop.permute.xlu1 %6320  ;;  %v6226_v36 = vadd.f32 %v6224_v39, %v6210_v18  ;;  %v15021_v18 = vld [vmem:[#allocation123_spill] sm:$0xff] }
 0x855   : > { %v6295_v51 = vpop.permute.xlu0 %6294 }
 0x858   : > { %v6353_v55 = vpop.permute.xlu1 %6352 }
 0x85c   : > { %v6369_v12 = vpop.permute.xlu1 %6368 }
 0x860   : > { %v6401_v40 = vpop.permute.xlu1 %6400 }
 0x88a   : > { %v6024_v53 = vpop.f32.mrb[26].mxu0 }
 0x88b   : > { %v6167_v60 = vmul.f32 %v6165_v11, %v6024_v53  ;;  %v6095_v21 = vpop.f32.mrb[26].mxu1  ;;  %v6026_v14 = vpop.f32.mrb[27].mxu0  ;;  %v6242_v53 = vadd.f32 %v6240_v48, %v6226_v36 }
 0x88c   : > { %v6168_v15 = vmul.f32 %v6165_v11, %v6026_v14  ;;  %v6097_v32 = vpop.f32.mrb[27].mxu1  ;;  %v6175_v4 = vmul.f32 %v6173_v63, %v6095_v21  ;;  %v6227_v11 = vadd.f32 %v6225_v28, %v6211_v43  ;;  %v15023_v28 = vld [vmem:[#allocation133_spill] sm:$0xff] }
 0x88d   : > { %v6169_v13 = vadd.f32 %v6167_v60, %v6161_v37  ;;  %v6176_v50 = vmul.f32 %v6173_v63, %v6097_v32  ;;  %v15020_v32 = vmov 15  }
 0x88e   : > { %v6170_v35 = vadd.f32 %v6168_v15, %v6162_v52  ;;  %9902 = vset.pattern.permute.xlu0 %v15020_v32  ;;  %v2027_v32 = vld [vmem:[#allocation4 + $0x68] sm:$0xff] }
 0x88f   : > { %v6177_v56 = vadd.f32 %v6175_v4, %v6169_v13  ;;  %6966 = vperm.xlu0 %9902, %v13232_v57  }
 0x890   : > { %v6178_v34 = vadd.f32 %v6176_v50, %v6170_v35 }
 0x891   : > { %v6252_v0 = vrot.slane %v6177_v56, %v14469_v23  ;;  %v6268_v29 = vrot.slane %v6177_v56, %v14470_v26  ;;  %v6284_v8 = vrot.slane %v6177_v56, %v14471_v58  ;;  %v6300_v54 = vrot.slane %v6177_v56, %v14472_v27 }
 0x892   : > { %v6256_v42 = vrot.slane %v6178_v34, %v14469_v23  ;;  %v6272_v38 = vrot.slane %v6178_v34, %v14470_v26  ;;  %v6288_v24 = vrot.slane %v6178_v34, %v14471_v58  ;;  %v6304_v49 = vrot.slane %v6178_v34, %v14472_v27 }
 0x893   : > { %v6257_v33 = vmul.f32 %v6252_v0, %v6247_v31  ;;  %v6273_v10 = vmul.f32 %v6268_v29, %v6263_v22  ;;  %v6289_v52 = vmul.f32 %v6284_v8, %v6279_v1  ;;  %v6305_v61 = vmul.f32 %v6300_v54, %v6295_v51  ;;  %9908 = vset.pattern.permute.xlu0 %v14474_v2 }
 0x894   : > { %v6258_v3 = vmul.f32 %v6256_v42, %v6247_v31  ;;  %v6274_v41 = vmul.f32 %v6272_v38, %v6263_v22  ;;  %v6290_v45 = vmul.f32 %v6288_v24, %v6279_v1  ;;  %v6241_v31 = vmul.f32 %v6239_v16, %v13300_v46  ;;  %v6337_v46 = vpop.permute.xlu0 %6336  ;;  %v15022_v24 = vld [vmem:[#allocation128_spill] sm:$0xff] }
 0x895   : > { %v6275_v37 = vadd.f32 %v6273_v10, %v6257_v33  ;;  %v6306_v17 = vmul.f32 %v6304_v49, %v6295_v51  ;;  %v6417_v49 = vpop.permute.xlu1 %6416 }
 0x896   : > { %v6276_v63 = vadd.f32 %v6274_v41, %v6258_v3  ;;  %v6243_v21 = vadd.f32 %v6241_v31, %v6227_v11  ;;  %v15024_v11 = vld [vmem:[#allocation134_spill] sm:$0xff] }
 0x897   : > { %v6291_v59 = vadd.f32 %v6289_v52, %v6275_v37 }
 0x898   : > { %v6292_v22 = vadd.f32 %v6290_v45, %v6276_v63  ;;  %v6385_v6 = vpop.permute.xlu0 %6384 }
 0x899   : > { %v6307_v60 = vadd.f32 %v6305_v61, %v6291_v59 }
 0x89a   : > { %v6308_v14 = vadd.f32 %v6306_v17, %v6292_v22 }
 0x89b   : > { %v6309_v15 = vadd.f32 %v6307_v60, %v6242_v53 }
 0x89c   : > { %v6310_v1 = vadd.f32 %v6308_v14, %v6243_v21  ;;  %v6433_v19 = vpop.permute.xlu0 %6432  ;;  %v2018_v14 = vld [vmem:[#allocation4 + $0x20] sm:$0xff] }
 0x89d   : > { %v13341_v20 = vadd.f32 %v13312_v9, %v6309_v15 }
 0x89e   : > { %v13344_v13 = vadd.f32 %v13312_v9, %v6310_v1  ;;  %v2020_v1 = vld [vmem:[#allocation4 + $0x30] sm:$0xff] }
 0x89f   : > { %v6358_v4 = vrot.slane %v13341_v20, %v14471_v58  ;;  %v6326_v5 = vrot.slane %v13341_v20, %v14469_v23  ;;  %v6342_v62 = vrot.slane %v13341_v20, %v14470_v26  ;;  %v6374_v50 = vrot.slane %v13341_v20, %v14472_v27 }
 0x8a0   : > { %v6362_v35 = vrot.slane %v13344_v13, %v14471_v58  ;;  %v6330_v57 = vrot.slane %v13344_v13, %v14469_v23  ;;  %v6346_v9 = vrot.slane %v13344_v13, %v14470_v26  ;;  %v6378_v30 = vrot.slane %v13344_v13, %v14472_v27 }
 0x8a1   : > { %v6331_v25 = vmul.f32 %v6326_v5, %v6321_v7  ;;  %v6347_v56 = vmul.f32 %v6342_v62, %v6337_v46  ;;  %v6363_v58 = vmul.f32 %v6358_v4, %v6353_v55  ;;  %v6390_v0 = vrot.slane %v13341_v20, %v15021_v18  ;;  %v2037_v4 = vld [vmem:[#allocation4 + $0xb8] sm:$0xff]  ;;  %v6450_v5 = vpop.permute.xlu1 %6449  ;;  %v2046_v62 = vld [vmem:[#allocation4 + $0x100] sm:$0xff] }
 0x8a2   : > { %v6332_v16 = vmul.f32 %v6330_v57, %v6321_v7  ;;  %v6348_v47 = vmul.f32 %v6346_v9, %v6337_v46  ;;  %v6364_v29 = vmul.f32 %v6362_v35, %v6353_v55  ;;  %v6394_v43 = vrot.slane %v13344_v13, %v15021_v18  ;;  %v2039_v35 = vld [vmem:[#allocation4 + $0xc8] sm:$0xff]  ;;  %v2048_v57 = vld [vmem:[#allocation4 + $0x110] sm:$0xff] }
 0x8a3   : > { %v6349_v34 = vadd.f32 %v6347_v56, %v6331_v25  ;;  %v6379_v42 = vmul.f32 %v6374_v50, %v6369_v12  ;;  %v6406_v39 = vrot.slane %v13341_v20, %v15022_v24  ;;  %v6380_v27 = vmul.f32 %v6378_v30, %v6369_v12  ;;  %v2029_v12 = vld [vmem:[#allocation4 + $0x78] sm:$0xff]  ;;  %v2036_v56 = vld [vmem:[#allocation4 + $0xb0] sm:$0xff] }
 0x8a4   : > { %v6350_v8 = vadd.f32 %v6348_v47, %v6332_v16  ;;  %v6410_v33 = vrot.slane %v13344_v13, %v15022_v24  ;;  %v6395_v54 = vmul.f32 %v6390_v0, %v6385_v6  ;;  %v6422_v51 = vrot.slane %v13341_v20, %v15023_v28  ;;  %v2045_v30 = vld [vmem:[#allocation4 + $0xf8] sm:$0xff]  ;;  %v2038_v47 = vld [vmem:[#allocation4 + $0xc0] sm:$0xff]  ;;  %v2064_v0 = vld [vmem:[#allocation4 + $0x190] sm:$0xff] }
 0x8a5   : > { %v6365_v38 = vadd.f32 %v6363_v58, %v6349_v34  ;;  %v6396_v41 = vmul.f32 %v6394_v43, %v6385_v6  ;;  %v6426_v36 = vrot.slane %v13344_v13, %v15023_v28  ;;  %v6411_v37 = vmul.f32 %v6406_v39, %v6401_v40  ;;  %v2055_v58 = vld [vmem:[#allocation4 + $0x148] sm:$0xff]  ;;  %v2084_v28 = vld [vmem:[#allocation4 + $0x230] sm:$0xff] }
 0x8a6   : > { %v6366_v7 = vadd.f32 %v6364_v29, %v6350_v8  ;;  %v6438_v63 = vrot.slane %v13341_v20, %v15024_v11  ;;  %v6412_v45 = vmul.f32 %v6410_v33, %v6401_v40  ;;  %v6442_v48 = vrot.slane %v13344_v13, %v15024_v11  ;;  %v2047_v40 = vld [vmem:[#allocation4 + $0x108] sm:$0xff]  ;;  %v2057_v29 = vld [vmem:[#allocation4 + $0x158] sm:$0xff]  ;;  %v2066_v8 = vld [vmem:[#allocation4 + $0x1a0] sm:$0xff] }
 0x8a7   : > { %v6381_v10 = vadd.f32 %v6379_v42, %v6365_v38  ;;  %v6427_v61 = vmul.f32 %v6422_v51, %v6417_v49  ;;  %v6428_v22 = vmul.f32 %v6426_v36, %v6417_v49  ;;  %v9377_v50 = vpack.c.bf16 %v2027_v32, %v2018_v14  ;;  %v2054_v42 = vld [vmem:[#allocation4 + $0x140] sm:$0xff]  ;;  %v2063_v38 = vld [vmem:[#allocation4 + $0x188] sm:$0xff]  ;;  %v2073_v33 = vld [vmem:[#allocation4 + $0x1d8] sm:$0xff] }
 0x8a8   : > { %v6382_v3 = vadd.f32 %v6380_v27, %v6366_v7  ;;  %v6443_v53 = vmul.f32 %v6438_v63, %v6433_v19  ;;  %v6444_v21 = vmul.f32 %v6442_v48, %v6433_v19  ;;  %v9441_v25 = vpack.c.bf16 %v2029_v12, %v2020_v1  ;;  %v2056_v27 = vld [vmem:[#allocation4 + $0x150] sm:$0xff]  ;;  %v2065_v7 = vld [vmem:[#allocation4 + $0x198] sm:$0xff]  ;;  %v2083_v11 = vld [vmem:[#allocation4 + $0x228] sm:$0xff] }
 0x8a9   : > { %v6397_v52 = vadd.f32 %v6395_v54, %v6381_v10  ;;  %v9379_v34 = vpack.c.bf16 %v2046_v62, %v2037_v4  ;;  %v9443_v18 = vpack.c.bf16 %v2048_v57, %v2039_v35  ;;  %v9381_v6 = vpack.c.bf16 %v2045_v30, %v2036_v56  ;;  %v2082_v10 = vld [vmem:[#allocation4 + $0x220] sm:$0xff]  ;;  %v2075_v54 = vld [vmem:[#allocation4 + $0x1e8] sm:$0xff]  ;;  %v2081_v49 = vld [vmem:[#allocation4 + $0x218] sm:$0xff] }
 0x8aa   : > { %v6398_v55 = vadd.f32 %v6396_v41, %v6382_v3  ;;  %v9445_v43 = vpack.c.bf16 %v2047_v40, %v2038_v47  ;;  %v9383_v24 = vpack.c.bf16 %v2064_v0, %v2055_v58  ;;  %v9447_v39 = vpack.c.bf16 %v2066_v8, %v2057_v29  ;;  %v2072_v41 = vld [vmem:[#allocation4 + $0x1d0] sm:$0xff]  ;;  %v2091_v63 = vld [vmem:[#allocation4 + $0x268] sm:$0xff]  ;;  %v2102_v19 = vld [vmem:[#allocation4 + $0x2c0] sm:$0xff] }
 0x8ab   : > { %v6413_v59 = vadd.f32 %v6411_v37, %v6397_v52  ;;  %v9385_v51 = vpack.c.bf16 %v2063_v38, %v2054_v42  ;;  %v9449_v3 = vpack.c.bf16 %v2065_v7, %v2056_v27  ;;  %v9387_v36 = vpack.c.bf16 %v2082_v10, %v2073_v33  ;;  %v2074_v52 = vld [vmem:[#allocation4 + $0x1e0] sm:$0xff]  ;;  %v2120_v32 = vld [vmem:[#allocation4 + $0x350] sm:$0xff]  ;;  %v2117_v4 = vld [vmem:[#allocation4 + $0x338] sm:$0xff] }
 0x8ac   : > { %v6414_v31 = vadd.f32 %v6412_v45, %v6398_v55  ;;  %v9451_v37 = vpack.c.bf16 %v2084_v28, %v2075_v54  ;;  %v2100_v45 = vld [vmem:[#allocation4 + $0x2b0] sm:$0xff]  ;;  %v2093_v55 = vld [vmem:[#allocation4 + $0x278] sm:$0xff]  ;;  %v9389_v48 = vpack.c.bf16 %v2081_v49, %v2072_v41  ;;  %v2118_v14 = vld [vmem:[#allocation4 + $0x340] sm:$0xff] }
 0x8ad   : > { %v6429_v17 = vadd.f32 %v6427_v61, %v6413_v59  ;;  %v9453_v59 = vpack.c.bf16 %v2083_v11, %v2074_v52  ;;  %v2090_v61 = vld [vmem:[#allocation4 + $0x260] sm:$0xff]  ;;  %v2119_v57 = vld [vmem:[#allocation4 + $0x348] sm:$0xff]  ;;  %v2129_v56 = vld [vmem:[#allocation4 + $0x398] sm:$0xff] }
 0x8ae   : > { %v6430_v60 = vadd.f32 %v6428_v22, %v6414_v31  ;;  %v2099_v31 = vld [vmem:[#allocation4 + $0x2a8] sm:$0xff]  ;;  %v9391_v22 = vpack.c.bf16 %v2100_v45, %v2091_v63  ;;  %v2110_v35 = vld [vmem:[#allocation4 + $0x300] sm:$0xff]  ;;  %v2128_v29 = vld [vmem:[#allocation4 + $0x390] sm:$0xff] }
 0x8af   : > { %v6445_v15 = vadd.f32 %v6443_v53, %v6429_v17  ;;  %v9455_v17 = vpack.c.bf16 %v2102_v19, %v2093_v55  ;;  %v2092_v53 = vld [vmem:[#allocation4 + $0x270] sm:$0xff]  ;;  %v9393_v1 = vpack.c.bf16 %v2099_v31, %v2090_v61  ;;  %v2138_v30 = vld [vmem:[#allocation4 + $0x3e0] sm:$0xff]  ;;  %v9461_v40 = vpack.c.bf16 %v2119_v57, %v2110_v35  ;;  %v2137_v8 = vld [vmem:[#allocation4 + $0x3d8] sm:$0xff] }
 0x8b0   : > { %v6446_v46 = vadd.f32 %v6444_v21, %v6430_v60  ;;  %v2101_v60 = vld [vmem:[#allocation4 + $0x2b8] sm:$0xff]  ;;  %v2126_v58 = vld [vmem:[#allocation4 + $0x380] sm:$0xff]  ;;  %v9463_v0 = vpack.c.bf16 %v2138_v30, %v2129_v56  ;;  %v2147_v42 = vld [vmem:[#allocation4 + $0x428] sm:$0xff] }
 0x8b1   : > { %v13381_v16 = vadd.f32 %v6450_v5, %v6445_v15  ;;  %v2109_v21 = vld [vmem:[#allocation4 + $0x2f8] sm:$0xff]  ;;  %v2111_v15 = vld [vmem:[#allocation4 + $0x308] sm:$0xff]  ;;  %v9457_v12 = vpack.c.bf16 %v2101_v60, %v2092_v53  ;;  %v2156_v38 = vld [vmem:[#allocation4 + $0x470] sm:$0xff] }
 0x8b2   : > { %v13379_v9 = vadd.f32 %v6450_v5, %v6446_v46  ;;  %v2108_v46 = vld [vmem:[#allocation4 + $0x2f0] sm:$0xff]  ;;  %v9395_v5 = vpack.c.bf16 %v2118_v14, %v2109_v21  ;;  %v9459_v62 = vpack.c.bf16 %v2120_v32, %v2111_v15  ;;  %v2153_v7 = vld [vmem:[#allocation4 + $0x458] sm:$0xff]  ;;  %v9467_v10 = vpack.c.bf16 %v2156_v38, %v2147_v42  ;;  %v2146_v54 = vld [vmem:[#allocation4 + $0x420] sm:$0xff] }
 0x8b3   : > { %v9397_v47 = vpack.c.bf16 %v2117_v4, %v2108_v46  ;;  %v2144_v27 = vld [vmem:[#allocation4 + $0x410] sm:$0xff]  ;;  %v2155_v28 = vld [vmem:[#allocation4 + $0x468] sm:$0xff]  ;;  %v2165_v41 = vld [vmem:[#allocation4 + $0x4b8] sm:$0xff] }
 0x8b4   : > { %6518 = vmatprep.mubr.f32.mxu0 %v13379_v9  ;;  %6589 = vmatprep.mubr.f32.mxu1 %v13379_v9  ;;  %v2174_v49 = vld [vmem:[#allocation4 + $0x500] sm:$0xff]  ;;  %v2171_v11 = vld [vmem:[#allocation4 + $0x4e8] sm:$0xff]  ;;  %v2164_v55 = vld [vmem:[#allocation4 + $0x4b0] sm:$0xff] }
 0x8b5   : > { %6519 = vmatmul.mubr.f32.vlgmr.msra.gmra.mrb[28].mxu0 %v13381_v16  ;;  %6590 = vmatmul.mubr.f32.vlgmr.msra.gmra.mrb[28].mxu1 %v13381_v16  ;;  %v2162_v52 = vld [vmem:[#allocation4 + $0x4a0] sm:$0xff]  ;;  %v9471_v45 = vpack.c.bf16 %v2174_v49, %v2165_v41  ;;  %v2173_v19 = vld [vmem:[#allocation4 + $0x4f8] sm:$0xff]  ;;  %v2183_v61 = vld [vmem:[#allocation4 + $0x548] sm:$0xff] }
 0x8b6   : > { %9378 = vmatpush1.bf16.msra.mxu0 %v9377_v50  ;;  %9442 = vmatpush1.bf16.msra.mxu1 %v9441_v25  ;;  %v2127_v50 = vld [vmem:[#allocation4 + $0x388] sm:$0xff]  ;;  %v2136_v25 = vld [vmem:[#allocation4 + $0x3d0] sm:$0xff]  ;;  %v2189_v60 = vld [vmem:[#allocation4 + $0x578] sm:$0xff] }
 0x8b7   : > { %6660 = vmatprep.mubr.f32.mxu0 %v13379_v9  ;;  %6731 = vmatprep.mubr.f32.mxu1 %v13379_v9  ;;  %v2192_v31 = vld [vmem:[#allocation4 + $0x590] sm:$0xff]  ;;  %v2182_v15 = vld [vmem:[#allocation4 + $0x540] sm:$0xff]  ;;  %v2191_v32 = vld [vmem:[#allocation4 + $0x588] sm:$0xff] }
 0x8b8   : > { %9380 = vmatprep.subr.bf16.mxu0 %v9379_v34  ;;  %9444 = vmatprep.subr.bf16.mxu1 %v9443_v18  ;;  %v2135_v34 = vld [vmem:[#allocation4 + $0x3c8] sm:$0xff]  ;;  %v9399_v18 = vpack.c.bf16 %v2136_v25, %v2127_v50  ;;  %v2180_v53 = vld [vmem:[#allocation4 + $0x530] sm:$0xff]  ;;  %v9475_v14 = vpack.c.bf16 %v2192_v31, %v2183_v61  ;;  %v2201_v46 = vld [vmem:[#allocation4 + $0x5d8] sm:$0xff] }
 0x8b9   : > { %v2210_v4 = vld [vmem:[#allocation4 + $0x620] sm:$0xff]  ;;  %v2207_v57 = vld [vmem:[#allocation4 + $0x608] sm:$0xff]  ;;  %v2200_v56 = vld [vmem:[#allocation4 + $0x5d0] sm:$0xff] }
 0x8ba   : > { %9382 = vmatpush1.bf16.msra.mxu0 %v9381_v6  ;;  %9446 = vmatpush1.bf16.msra.mxu1 %v9445_v43  ;;  %v2145_v6 = vld [vmem:[#allocation4 + $0x418] sm:$0xff]  ;;  %v2154_v43 = vld [vmem:[#allocation4 + $0x460] sm:$0xff]  ;;  %v9479_v25 = vpack.c.bf16 %v2210_v4, %v2201_v46  ;;  %v2227_v38 = vld [vmem:[#allocation4 + $0x6a8] sm:$0xff] }
 0x8bb   : > { %9384 = vmatprep.subr.bf16.mxu0 %v9383_v24  ;;  %9448 = vmatprep.subr.bf16.mxu1 %v9447_v39  ;;  %v9401_v24 = vpack.c.bf16 %v2135_v34, %v2126_v58  ;;  %v9465_v39 = vpack.c.bf16 %v2137_v8, %v2128_v29  ;;  %v9403_v33 = vpack.c.bf16 %v2154_v43, %v2145_v6  ;;  %v2198_v35 = vld [vmem:[#allocation4 + $0x5c0] sm:$0xff]  ;;  %v2209_v30 = vld [vmem:[#allocation4 + $0x618] sm:$0xff]  ;;  %v2219_v58 = vld [vmem:[#allocation4 + $0x668] sm:$0xff] }
 0x8bc   : > { %v2228_v34 = vld [vmem:[#allocation4 + $0x6b0] sm:$0xff]  ;;  %v2225_v8 = vld [vmem:[#allocation4 + $0x698] sm:$0xff]  ;;  %v2218_v42 = vld [vmem:[#allocation4 + $0x660] sm:$0xff] }
 0x8bd   : > { %v2216_v29 = vld [vmem:[#allocation4 + $0x650] sm:$0xff]  ;;  %v9483_v43 = vpack.c.bf16 %v2228_v34, %v2219_v58  ;;  %v2245_v49 = vld [vmem:[#allocation4 + $0x738] sm:$0xff]  ;;  %v2254_v61 = vld [vmem:[#allocation4 + $0x780] sm:$0xff] }
 0x8be   : > { %9386 = vmatpush1.bf16.msra.mxu0 %v9385_v51  ;;  %9450 = vmatpush1.bf16.msra.mxu1 %v9449_v3  ;;  %v2163_v51 = vld [vmem:[#allocation4 + $0x4a8] sm:$0xff]  ;;  %v2172_v3 = vld [vmem:[#allocation4 + $0x4f0] sm:$0xff]  ;;  %v2281_v4 = vld [vmem:[#allocation4 + $0x858] sm:$0xff] }
 0x8bf   : > { %9388 = vmatprep.subr.bf16.mxu0 %v9387_v36  ;;  %9452 = vmatprep.subr.bf16.mxu1 %v9451_v37  ;;  %v9405_v36 = vpack.c.bf16 %v2153_v7, %v2144_v27  ;;  %v9469_v37 = vpack.c.bf16 %v2155_v28, %v2146_v54  ;;  %v9407_v63 = vpack.c.bf16 %v2172_v3, %v2163_v51  ;;  %v2237_v27 = vld [vmem:[#allocation4 + $0x6f8] sm:$0xff]  ;;  %v2246_v7 = vld [vmem:[#allocation4 + $0x740] sm:$0xff]  ;;  %v2243_v28 = vld [vmem:[#allocation4 + $0x728] sm:$0xff] }
 0x8c0   : > { %v2234_v54 = vld [vmem:[#allocation4 + $0x6e0] sm:$0xff]  ;;  %v9487_v3 = vpack.c.bf16 %v2246_v7, %v2237_v27  ;;  %v2236_v41 = vld [vmem:[#allocation4 + $0x6f0] sm:$0xff]  ;;  %v2263_v31 = vld [vmem:[#allocation4 + $0x7c8] sm:$0xff] }
 0x8c1   : > { %v2272_v46 = vld [vmem:[#allocation4 + $0x810] sm:$0xff]  ;;  %v2290_v58 = vld [vmem:[#allocation4 + $0x8a0] sm:$0xff]  ;;  %v2299_v34 = vld [vmem:[#allocation4 + $0x8e8] sm:$0xff] }
 0x8c2   : > { %9390 = vmatpush1.bf16.msra.mxu0 %v9389_v48  ;;  %9454 = vmatpush1.bf16.msra.mxu1 %v9453_v59  ;;  %v2181_v48 = vld [vmem:[#allocation4 + $0x538] sm:$0xff]  ;;  %v2190_v59 = vld [vmem:[#allocation4 + $0x580] sm:$0xff]  ;;  %v2040_v7 = vld [vmem:[#allocation4 + $0xd0] sm:$0xff] }
 0x8c3   : > { %9392 = vmatprep.subr.bf16.mxu0 %v9391_v22  ;;  %9456 = vmatprep.subr.bf16.mxu1 %v9455_v17  ;;  %v9409_v22 = vpack.c.bf16 %v2171_v11, %v2162_v52  ;;  %v9473_v17 = vpack.c.bf16 %v2173_v19, %v2164_v55  ;;  %v9411_v21 = vpack.c.bf16 %v2190_v59, %v2181_v48  ;;  %v2255_v52 = vld [vmem:[#allocation4 + $0x788] sm:$0xff]  ;;  %v2264_v11 = vld [vmem:[#allocation4 + $0x7d0] sm:$0xff]  ;;  %v2261_v19 = vld [vmem:[#allocation4 + $0x7b8] sm:$0xff] }
 0x8c4   : > { %v2252_v55 = vld [vmem:[#allocation4 + $0x770] sm:$0xff]  ;;  %v9491_v59 = vpack.c.bf16 %v2264_v11, %v2255_v52 }
 0x8c5   : > { %v2076_v11 = vld [vmem:[#allocation4 + $0x1f0] sm:$0xff] }
 0x8c6   : > { %9394 = vmatpush1.bf16.msra.mxu0 %v9393_v1  ;;  %9458 = vmatpush1.bf16.msra.mxu1 %v9457_v12  ;;  %v2199_v1 = vld [vmem:[#allocation4 + $0x5c8] sm:$0xff]  ;;  %v2208_v12 = vld [vmem:[#allocation4 + $0x610] sm:$0xff] }
 0x8c7   : > { %9396 = vmatprep.subr.bf16.mxu0 %v9395_v5  ;;  %9460 = vmatprep.subr.bf16.mxu1 %v9459_v62  ;;  %v9413_v5 = vpack.c.bf16 %v2189_v60, %v2180_v53  ;;  %v9477_v62 = vpack.c.bf16 %v2191_v32, %v2182_v15  ;;  %v9415_v50 = vpack.c.bf16 %v2208_v12, %v2199_v1  ;;  %v2273_v53 = vld [vmem:[#allocation4 + $0x818] sm:$0xff]  ;;  %v2282_v60 = vld [vmem:[#allocation4 + $0x860] sm:$0xff]  ;;  %v2279_v32 = vld [vmem:[#allocation4 + $0x848] sm:$0xff] }
 0x8c8   : > { %v2270_v15 = vld [vmem:[#allocation4 + $0x800] sm:$0xff]  ;;  %v9495_v12 = vpack.c.bf16 %v2282_v60, %v2273_v53  ;;  %v2112_v60 = vld [vmem:[#allocation4 + $0x310] sm:$0xff] }
 0x8ca   : > { %9398 = vmatpush1.bf16.msra.mxu0 %v9397_v47  ;;  %9462 = vmatpush1.bf16.msra.mxu1 %v9461_v40  ;;  %v2217_v47 = vld [vmem:[#allocation4 + $0x658] sm:$0xff]  ;;  %v2226_v40 = vld [vmem:[#allocation4 + $0x6a0] sm:$0xff] }
 0x8cb   : > { %9400 = vmatprep.subr.bf16.mxu0 %v9399_v18  ;;  %9464 = vmatprep.subr.bf16.mxu1 %v9463_v0  ;;  %v9417_v18 = vpack.c.bf16 %v2207_v57, %v2198_v35  ;;  %v9481_v0 = vpack.c.bf16 %v2209_v30, %v2200_v56  ;;  %v9419_v6 = vpack.c.bf16 %v2226_v40, %v2217_v47  ;;  %v2291_v35 = vld [vmem:[#allocation4 + $0x8a8] sm:$0xff]  ;;  %v2300_v57 = vld [vmem:[#allocation4 + $0x8f0] sm:$0xff]  ;;  %v2297_v40 = vld [vmem:[#allocation4 + $0x8d8] sm:$0xff] }
 0x8cc   : > { %v2288_v56 = vld [vmem:[#allocation4 + $0x890] sm:$0xff]  ;;  %v9499_v47 = vpack.c.bf16 %v2300_v57, %v2291_v35 }
 0x8cd   : > { %v2148_v57 = vld [vmem:[#allocation4 + $0x430] sm:$0xff] }
 0x8ce   : > { %9402 = vmatpush1.bf16.msra.mxu0 %v9401_v24  ;;  %9466 = vmatpush1.bf16.msra.mxu1 %v9465_v39  ;;  %v2235_v24 = vld [vmem:[#allocation4 + $0x6e8] sm:$0xff]  ;;  %v2244_v39 = vld [vmem:[#allocation4 + $0x730] sm:$0xff] }
 0x8cf   : > { %9404 = vmatprep.subr.bf16.mxu0 %v9403_v33  ;;  %9468 = vmatprep.subr.bf16.mxu1 %v9467_v10  ;;  %v9421_v33 = vpack.c.bf16 %v2225_v8, %v2216_v29  ;;  %v9485_v10 = vpack.c.bf16 %v2227_v38, %v2218_v42  ;;  %v9423_v51 = vpack.c.bf16 %v2244_v39, %v2235_v24  ;;  %v2031_v42 = vld [vmem:[#allocation4 + $0x88] sm:$0xff]  ;;  %v2184_v38 = vld [vmem:[#allocation4 + $0x550] sm:$0xff]  ;;  %v2193_v24 = vld [vmem:[#allocation4 + $0x598] sm:$0xff] }
 0x8d0   : > { %v9437_v29 = vpack.c.bf16 %v2297_v40, %v2288_v56  ;;  %v9501_v8 = vpack.c.bf16 %v2299_v34, %v2290_v58  ;;  %v9507_v27 = vpack.c.bf16 %v2193_v24, %v2184_v38  ;;  %v6817_v56 = vpop.permute.xlu1 %6816  ;;  %v6811_v40 = vpop.permute.xlu0 %6810 }
 0x8d2   : > { %9406 = vmatpush1.bf16.msra.mxu0 %v9405_v36  ;;  %9470 = vmatpush1.bf16.msra.mxu1 %v9469_v37  ;;  %v2253_v36 = vld [vmem:[#allocation4 + $0x778] sm:$0xff]  ;;  %v2262_v37 = vld [vmem:[#allocation4 + $0x7c0] sm:$0xff] }
 0x8d3   : > { %9408 = vmatprep.subr.bf16.mxu0 %v9407_v63  ;;  %9472 = vmatprep.subr.bf16.mxu1 %v9471_v45  ;;  %v9425_v63 = vpack.c.bf16 %v2243_v28, %v2234_v54  ;;  %v9489_v45 = vpack.c.bf16 %v2245_v49, %v2236_v41  ;;  %v9427_v48 = vpack.c.bf16 %v2262_v37, %v2253_v36  ;;  %v2211_v54 = vld [vmem:[#allocation4 + $0x628] sm:$0xff]  ;;  %v2220_v49 = vld [vmem:[#allocation4 + $0x670] sm:$0xff]  ;;  %v2229_v36 = vld [vmem:[#allocation4 + $0x6b8] sm:$0xff] }
 0x8d4   : > { %v2067_v41 = vld [vmem:[#allocation4 + $0x1a8] sm:$0xff]  ;;  %v9515_v52 = vpack.c.bf16 %v2229_v36, %v2220_v49 }
 0x8d6   : > { %9410 = vmatpush1.bf16.msra.mxu0 %v9409_v22  ;;  %9474 = vmatpush1.bf16.msra.mxu1 %v9473_v17  ;;  %v2271_v22 = vld [vmem:[#allocation4 + $0x808] sm:$0xff]  ;;  %v2280_v17 = vld [vmem:[#allocation4 + $0x850] sm:$0xff] }
 0x8d7   : > { %9412 = vmatprep.subr.bf16.mxu0 %v9411_v21  ;;  %9476 = vmatprep.subr.bf16.mxu1 %v9475_v14  ;;  %v9429_v21 = vpack.c.bf16 %v2261_v19, %v2252_v55  ;;  %v9493_v14 = vpack.c.bf16 %v2263_v31, %v2254_v61  ;;  %v9431_v1 = vpack.c.bf16 %v2280_v17, %v2271_v22  ;;  %v2247_v55 = vld [vmem:[#allocation4 + $0x748] sm:$0xff]  ;;  %v2256_v31 = vld [vmem:[#allocation4 + $0x790] sm:$0xff]  ;;  %v2265_v22 = vld [vmem:[#allocation4 + $0x7d8] sm:$0xff] }
 0x8d8   : > { %v2103_v61 = vld [vmem:[#allocation4 + $0x2c8] sm:$0xff]  ;;  %v9523_v53 = vpack.c.bf16 %v2265_v22, %v2256_v31 }
 0x8da   : > { %9414 = vmatpush1.bf16.msra.mxu0 %v9413_v5  ;;  %9478 = vmatpush1.bf16.msra.mxu1 %v9477_v62  ;;  %v2289_v5 = vld [vmem:[#allocation4 + $0x898] sm:$0xff]  ;;  %v2298_v62 = vld [vmem:[#allocation4 + $0x8e0] sm:$0xff] }
 0x8db   : > { %9416 = vmatprep.subr.bf16.mxu0 %v9415_v50  ;;  %9480 = vmatprep.subr.bf16.mxu1 %v9479_v25  ;;  %v9433_v50 = vpack.c.bf16 %v2279_v32, %v2270_v15  ;;  %v9497_v25 = vpack.c.bf16 %v2281_v4, %v2272_v46  ;;  %v9435_v30 = vpack.c.bf16 %v2298_v62, %v2289_v5  ;;  %v2283_v15 = vld [vmem:[#allocation4 + $0x868] sm:$0xff]  ;;  %v2292_v4 = vld [vmem:[#allocation4 + $0x8b0] sm:$0xff]  ;;  %v2301_v5 = vld [vmem:[#allocation4 + $0x8f8] sm:$0xff] }
 0x8dc   : > { %v2139_v46 = vld [vmem:[#allocation4 + $0x3e8] sm:$0xff]  ;;  %v9531_v35 = vpack.c.bf16 %v2301_v5, %v2292_v4 }
 0x8de   : > { %9418 = vmatpush1.bf16.msra.mxu0 %v9417_v18  ;;  %9482 = vmatpush1.bf16.msra.mxu1 %v9481_v0  ;;  %v2166_v18 = vld [vmem:[#allocation4 + $0x4c0] sm:$0xff]  ;;  %v2175_v0 = vld [vmem:[#allocation4 + $0x508] sm:$0xff] }
 0x8df   : > { %9420 = vmatprep.subr.bf16.mxu0 %v9419_v6  ;;  %9484 = vmatprep.subr.bf16.mxu1 %v9483_v43  ;;  %v9503_v6 = vpack.c.bf16 %v2175_v0, %v2166_v18  ;;  %v2022_v43 = vld [vmem:[#allocation4 + $0x40] sm:$0xff] }
 0x8e0   : > { %v9505_v39 = vpack.c.bf16 %v2031_v42, %v2022_v43 }
 0x8e2   : > { %9422 = vmatpush1.bf16.msra.mxu0 %v9421_v33  ;;  %9486 = vmatpush1.bf16.msra.mxu1 %v9485_v10  ;;  %v2049_v33 = vld [vmem:[#allocation4 + $0x118] sm:$0xff]  ;;  %v2202_v10 = vld [vmem:[#allocation4 + $0x5e0] sm:$0xff] }
 0x8e3   : > { %9424 = vmatprep.subr.bf16.mxu0 %v9423_v51  ;;  %9488 = vmatprep.subr.bf16.mxu1 %v9487_v3  ;;  %v9509_v28 = vpack.c.bf16 %v2049_v33, %v2040_v7  ;;  %v9511_v51 = vpack.c.bf16 %v2211_v54, %v2202_v10  ;;  %v2058_v3 = vld [vmem:[#allocation4 + $0x160] sm:$0xff] }
 0x8e4   : > { %v9513_v37 = vpack.c.bf16 %v2067_v41, %v2058_v3 }
 0x8e6   : > { %9426 = vmatpush1.bf16.msra.mxu0 %v9425_v63  ;;  %9490 = vmatpush1.bf16.msra.mxu1 %v9489_v45  ;;  %v2085_v63 = vld [vmem:[#allocation4 + $0x238] sm:$0xff]  ;;  %v2238_v45 = vld [vmem:[#allocation4 + $0x700] sm:$0xff] }
 0x8e7   : > { %9428 = vmatprep.subr.bf16.mxu0 %v9427_v48  ;;  %9492 = vmatprep.subr.bf16.mxu1 %v9491_v59  ;;  %v9517_v19 = vpack.c.bf16 %v2085_v63, %v2076_v11  ;;  %v9519_v48 = vpack.c.bf16 %v2247_v55, %v2238_v45  ;;  %v2094_v59 = vld [vmem:[#allocation4 + $0x280] sm:$0xff] }
 0x8e8   : > { %v9521_v17 = vpack.c.bf16 %v2103_v61, %v2094_v59 }
 0x8ea   : > { %9430 = vmatpush1.bf16.msra.mxu0 %v9429_v21  ;;  %9494 = vmatpush1.bf16.msra.mxu1 %v9493_v14  ;;  %v2121_v21 = vld [vmem:[#allocation4 + $0x358] sm:$0xff]  ;;  %v2274_v14 = vld [vmem:[#allocation4 + $0x820] sm:$0xff] }
 0x8eb   : > { %9432 = vmatprep.subr.bf16.mxu0 %v9431_v1  ;;  %9496 = vmatprep.subr.bf16.mxu1 %v9495_v12  ;;  %v9525_v32 = vpack.c.bf16 %v2121_v21, %v2112_v60  ;;  %v9527_v1 = vpack.c.bf16 %v2283_v15, %v2274_v14  ;;  %v2130_v12 = vld [vmem:[#allocation4 + $0x3a0] sm:$0xff] }
 0x8ec   : > { %v9529_v62 = vpack.c.bf16 %v2139_v46, %v2130_v12 }
 0x8ee   : > { %9434 = vmatpush1.bf16.msra.mxu0 %v9433_v50  ;;  %9498 = vmatpush1.bf16.msra.mxu1 %v9497_v25  ;;  %v2157_v50 = vld [vmem:[#allocation4 + $0x478] sm:$0xff] }
 0x8ef   : > { %9436 = vmatprep.subr.bf16.mxu0 %v9435_v30  ;;  %9500 = vmatprep.subr.bf16.mxu1 %v9499_v47  ;;  %v9533_v25 = vpack.c.bf16 %v2157_v50, %v2148_v57  ;;  %v6827_v30 = vpop.permute.xlu1 %6826 }
 0x8f2   : > { %9438 = vmatpush1.bf16.msra.mxu0 %v9437_v29  ;;  %9502 = vmatpush1.bf16.msra.mxu1 %v9501_v8 }
 0x8f3   : > { %9504 = vmatprep.subr.bf16.mxu0 %v9503_v6  ;;  %v6837_v47 = vpop.permute.xlu1 %6836 }
 0x8f5   : > { %6661 = vmatmul.mubr.f32.vlgmr.msra.gmra.mrb[30].mxu0 %v13381_v16  ;;  %6732 = vmatmul.mubr.f32.vlgmr.msra.gmra.mrb[30].mxu1 %v13381_v16 }
 0x8f6   : > { %9506 = vmatpush3.bf16.msra.mxu0 %v9505_v39  ;;  %6802 = vmatprep.mubr.f32.mxu0 %v13379_v9 }
 0x8f7   : > { %9508 = vmatprep.subr.bf16.mxu0 %v9507_v27  ;;  %v6857_v6 = vpop.permute.xlu1 %6856  ;;  %v6847_v27 = vpop.permute.xlu0 %6846 }
 0x8fa   : > { %9510 = vmatpush3.bf16.msra.mxu0 %v9509_v28 }
 0x8fb   : > { %9512 = vmatprep.subr.bf16.mxu0 %v9511_v51  ;;  %v6867_v54 = vpop.permute.xlu1 %6866 }
 0x8fe   : > { %9514 = vmatpush3.bf16.msra.mxu0 %v9513_v37  ;;  %v6877_v37 = vpop.permute.xlu0 %6876 }
 0x8ff   : > { %9516 = vmatprep.subr.bf16.mxu0 %v9515_v52  ;;  %v6887_v45 = vpop.permute.xlu1 %6886 }
 0x902   : > { %9518 = vmatpush3.bf16.msra.mxu0 %v9517_v19 }
 0x903   : > { %9520 = vmatprep.subr.bf16.mxu0 %v9519_v48  ;;  %v6897_v31 = vpop.permute.xlu1 %6896 }
 0x906   : > { %9522 = vmatpush3.bf16.msra.mxu0 %v9521_v17 }
 0x907   : > { %9524 = vmatprep.subr.bf16.mxu0 %v9523_v53  ;;  %v6917_v22 = vpop.permute.xlu1 %6916 }
 0x90a   : > { %9526 = vmatpush3.bf16.msra.mxu0 %v9525_v32 }
 0x90b   : > { %9528 = vmatprep.subr.bf16.mxu0 %v9527_v1  ;;  %v6927_v17 = vpop.permute.xlu1 %6926  ;;  %v6907_v1 = vpop.permute.xlu0 %6906 }
 0x90e   : > { %9530 = vmatpush3.bf16.msra.mxu0 %v9529_v62 }
 0x90f   : > { %9532 = vmatprep.subr.bf16.mxu0 %v9531_v35  ;;  %v6947_v35 = vpop.permute.xlu1 %6946 }
 0x912   : > { %9534 = vmatpush3.bf16.msra.mxu0 %v9533_v25 }
 0x915   : > { %6803 = vmatmul.mubr.f32.vlgmr.msra.gmra.mrb[32].mxu0 %v13381_v16 }
 0x988   : > { %v6520_v58 = vpop.f32.mrb[28].mxu0  ;;  %v6591_v34 = vpop.f32.mrb[28].mxu1 }
 0x989   : > { %v6822_v18 = vrot.slane %v6520_v58, %v14469_v23  ;;  %v6832_v0 = vrot.slane %v6520_v58, %v14470_v26  ;;  %v6522_v29 = vpop.f32.mrb[29].mxu0  ;;  %v6593_v8 = vpop.f32.mrb[29].mxu1  ;;  %v6862_v33 = vrot.slane %v6591_v34, %v14469_v23  ;;  %v6872_v28 = vrot.slane %v6591_v34, %v14470_v26 }
 0x98a   : > { %v6842_v42 = vrot.slane %v6522_v29, %v14469_v23  ;;  %v6852_v39 = vrot.slane %v6522_v29, %v14470_v26  ;;  %v6882_v36 = vrot.slane %v6593_v8, %v14469_v23  ;;  %v6892_v11 = vrot.slane %v6593_v8, %v14470_v26 }
 0x98b   : > { %v6823_v43 = vmul.f32 %v6822_v18, %v6817_v56  ;;  %v6833_v24 = vmul.f32 %v6832_v0, %v6827_v30  ;;  %v6863_v41 = vmul.f32 %v6862_v33, %v6857_v6  ;;  %v6873_v52 = vmul.f32 %v6872_v28, %v6867_v54  ;;  %v6937_v56 = vpop.permute.xlu0 %6936  ;;  %v6957_v0 = vpop.permute.xlu1 %6956 }
 0x98c   : > { %v6843_v10 = vmul.f32 %v6842_v42, %v6837_v47  ;;  %v6853_v3 = vmul.f32 %v6852_v39, %v6847_v27  ;;  %v6883_v19 = vmul.f32 %v6882_v36, %v6877_v37  ;;  %v6893_v48 = vmul.f32 %v6892_v11, %v6887_v45  ;;  %v1426_v11 = vld [vmem:[%s15025_s9] sm:$0x3] }
 0x98d   : > { %v6824_v38 = vadd.f32 %v6823_v43, %v6811_v40 }
 0x98f   : > { %v6834_v7 = vadd.f32 %v6833_v24, %v6824_v38  ;;  %v6967_v43 = vpop.permute.xlu0 %6966 }
 0x991   : > { %v6844_v51 = vadd.f32 %v6843_v10, %v6834_v7  ;;  %v6977_v7 = vpop.permute.xlu1 %6976 }
 0x993   : > { %v6854_v49 = vadd.f32 %v6853_v3, %v6844_v51 }
 0x995   : > { %v6864_v63 = vadd.f32 %v6863_v41, %v6854_v49  ;;  %v6987_v3 = vpop.permute.xlu1 %6986 }
 0x997   : > { %v6874_v55 = vadd.f32 %v6873_v52, %v6864_v63 }
 0x999   : > { %v6884_v59 = vadd.f32 %v6883_v19, %v6874_v55 }
 0x99b   : > { %v6894_v61 = vadd.f32 %v6893_v48, %v6884_v59  ;;  %v1427_v59 = vld [vmem:[%s15026_s10] sm:$0x3] }
 0x9c8   : > { %v6662_v53 = vpop.f32.mrb[30].mxu0  ;;  %v6733_v60 = vpop.f32.mrb[30].mxu1 }
 0x9c9   : > { %v6902_v21 = vrot.slane %v6662_v53, %v14469_v23  ;;  %v6912_v14 = vrot.slane %v6662_v53, %v14470_v26  ;;  %v6664_v15 = vpop.f32.mrb[31].mxu0  ;;  %v6735_v32 = vpop.f32.mrb[31].mxu1  ;;  %v6942_v50 = vrot.slane %v6733_v60, %v14469_v23  ;;  %v6952_v30 = vrot.slane %v6733_v60, %v14470_v26  ;;  %v1428_v60 = vld [vmem:[%s15027_s1] sm:$0x3] }
 0x9ca   : > { %v6922_v46 = vrot.slane %v6664_v15, %v14469_v23  ;;  %v6932_v62 = vrot.slane %v6664_v15, %v14470_v26  ;;  %v6962_v18 = vrot.slane %v6735_v32, %v14469_v23  ;;  %v6972_v8 = vrot.slane %v6735_v32, %v14470_v26 }
 0x9cb   : > { %v6903_v12 = vmul.f32 %v6902_v21, %v6897_v31  ;;  %v6913_v5 = vmul.f32 %v6912_v14, %v6907_v1  ;;  %v6943_v58 = vmul.f32 %v6942_v50, %v6937_v56  ;;  %v6953_v29 = vmul.f32 %v6952_v30, %v6947_v35  ;;  %v1429_v1 = vld [vmem:[%s15028_s28] sm:$0x3] }
 0x9cc   : > { %v6923_v25 = vmul.f32 %v6922_v46, %v6917_v22  ;;  %v6933_v40 = vmul.f32 %v6932_v62, %v6927_v17  ;;  %v6963_v38 = vmul.f32 %v6962_v18, %v6957_v0  ;;  %v6973_v39 = vmul.f32 %v6972_v8, %v6967_v43  ;;  %v1430_v35 = vld [vmem:[%s15029_s16] sm:$0x3] }
 0x9cd   : > { %v6904_v4 = vadd.f32 %v6903_v12, %v6894_v61  ;;  %v1433_v56 = vld [vmem:[%s10607_s3] sm:$0x3]  ;;  %v7084_v43 = vrot.slane %v13381_v16, %v14470_v26 }
 0x9ce   : > { %v1434_v30 = vld [vmem:[%s10612_s6] sm:$0xff] }
 0x9cf   : > { %v6914_v57 = vadd.f32 %v6913_v5, %v6904_v4 }
 0x9d1   : > { %v6924_v47 = vadd.f32 %v6923_v25, %v6914_v57  ;;  %v1432_v25 = vld [vmem:[#allocation19] sm:$0x3] }
 0x9d3   : > { %v6934_v34 = vadd.f32 %v6933_v40, %v6924_v47  ;;  %v1435_v47 = vld [vmem:[%s10617_s5] sm:$0xff] }
 0x9d5   : > { %v6944_v6 = vadd.f32 %v6943_v58, %v6934_v34  ;;  %v1431_v34 = vld [vmem:[%s15030_s18] sm:$0x3] }
 0x9d7   : > { %v6954_v42 = vadd.f32 %v6953_v29, %v6944_v6 }
 0x9d9   : > { %v6964_v24 = vadd.f32 %v6963_v38, %v6954_v42  ;;  %v7072_v42 = vrot.slane %v13379_v9, %v14469_v23 }
 0x9db   : > { %v6974_v27 = vadd.f32 %v6973_v39, %v6964_v24 }
 0x9e8   : > { %v7452_v33 = vpop.f32.mrb[32].mxu0 }
 0x9e9   : > { %v7453_v10 = vpop.f32.mrb[33].mxu0 }
 0x9ea   : > { %v7454_v54 = vadd.f32 %v7453_v10, %v7452_v33 }
 0x9ec   : > { %v6982_v28 = vrot.slane %v7454_v54, %v14469_v23  ;;  %v6992_v51 = vrot.slane %v7454_v54, %v14470_v26 }
 0x9ee   : > { %v6983_v41 = vmul.f32 %v6982_v28, %v6977_v7  ;;  %v6993_v36 = vmul.f32 %v6992_v51, %v6987_v3 }
 0x9f0   : > { %v6984_v49 = vadd.f32 %v6983_v41, %v6974_v27 }
 0x9f2   : > { %v6994_v37 = vadd.f32 %v6993_v36, %v6984_v49 }
 0x9f4   : > { %v6996_v52 = vsel %vm6995_vm1, %v6994_v37, -inf }
 0x9f5   : > { %6997 = vmax.xlane.f32.xlu0 %v6996_v52 }
 0xa82   : > { %v6998_v63 = vpop.xlane.xlu0 %6997 }
 0xa83   : > { %v7008_v45 = vrot.slane %v6998_v63, %v14470_v26  ;;  %v7002_v19 = vrot.slane %v6998_v63, %v14469_v23 }
 0xa85   : > { %v7009_v55 = vmul.f32 %v7008_v45, %v1426_v11  ;;  %v7003_v48 = vmul.f32 %v7002_v19, %v1426_v11 }
 0xa87   : > { %7011 = vrot.lane.b32.xlu1 %v7009_v55, %s10381_s11 }
 0xaf9   : > { %v7012_v61 = vpop.permute.xlu1 %7011 }
 0xafa   : > { %v7014_v31 = vadd.f32 %v7012_v61, %v7003_v48 }
 0xafc   : > { %v7015_v22 = vadd.f32 %v7014_v31, %v1427_v59 }
 0xafe   : > { %v7016_v17 = vmax.f32 %v7015_v22, 0.0 }
 0xb00   : > { %v7026_v53 = vrot.slane %v7016_v17, %v14470_v26  ;;  %v7020_v15 = vrot.slane %v7016_v17, %v14469_v23 }
 0xb02   : > { %7028 = vrot.lane.b32.xlu1 %v7026_v53, %s10408_s23  ;;  %v7021_v32 = vmul.f32 %v7020_v15, %v1428_v60 }
 0xb74   : > { %v7029_v21 = vpop.permute.xlu1 %7028 }
 0xb75   : > { %v7031_v14 = vmul.f32 %v7029_v21, %v1428_v60 }
 0xb77   : > { %7033 = vrot.lane.b32.xlu1 %v7031_v14, %s10381_s11 }
 0xbe9   : > { %v7034_v12 = vpop.permute.xlu1 %7033 }
 0xbea   : > { %v7036_v46 = vadd.f32 %v7034_v12, %v7021_v32 }
 0xbec   : > { %v7037_v4 = vadd.f32 %v7036_v46, %v1429_v1  ;;  %v9936_v1 = vld [vmem:[%s11088_s2] sm:$0xff]  ;;  %v9937_v46 = vld [vmem:[%s11088_s2 + $0x8] sm:$0xff] }
 0xbee   : > { %v7038_v5 = vmax.f32 %v7037_v4, 0.0 }
 0xbf0   : > { %v7048_v62 = vrot.slane %v7038_v5, %v14470_v26  ;;  %v7042_v40 = vrot.slane %v7038_v5, %v14469_v23 }
 0xbf2   : > { %7050 = vrot.lane.b32.xlu1 %v7048_v62, %s10408_s23  ;;  %v7043_v58 = vmul.f32 %v7042_v40, %v1430_v35 }
 0xc64   : > { %v7051_v57 = vpop.permute.xlu1 %7050 }
 0xc65   : > { %v7053_v50 = vmul.f32 %v7051_v57, %v1430_v35 }
 0xc67   : > { %7055 = vrot.lane.b32.xlu1 %v7053_v50, %s10381_s11  ;;  %s1397_s11 = scalar_lea.vmem %s10622_s8, %s7409_s26 }
 0xc6b   : > { %7062 = vperm.xlu1 %9905, %v1432_v25  }
 0xc6f   : > { %9906 = vset.pattern.permute.xlu1 %v14478_v44 }
 0xc70   : > { %7078 = vperm.xlu1 %9906, %v1432_v25  }
 0xc74   : > { %9907 = vset.pattern.permute.xlu1 %v14474_v2 }
 0xc75   : > { %7095 = vperm.xlu1 %9907, %v1433_v56  }
 0xc79   : > { %7109 = vperm.xlu1 %9907, %v1434_v30  }
 0xc7d   : > { %9909 = vset.pattern.permute.xlu1 %v14478_v44  ;;  %v7088_v44 = vrot.slane %v13379_v9, %v14470_v26 }
 0xc7e   : > { %7125 = vperm.xlu1 %9909, %v1434_v30  }
 0xc82   : > { %9910 = vset.pattern.permute.xlu1 %v14474_v2  ;;  %v7068_v2 = vrot.slane %v13381_v16, %v14469_v23 }
 0xc83   : > { %7142 = vperm.xlu1 %9910, %v1435_v47  }
 0xcd9   : > { %v7056_v18 = vpop.permute.xlu1 %7055 }
 0xcda   : > { %v7058_v0 = vadd.f32 %v7056_v18, %v7043_v58 }
 0xcdc   : > { %v7059_v29 = vadd.f32 %v7058_v0, %v1431_v34 }
 0xcde   : > { %7102 = vperm.xlu0 %9908, %v7059_v29  }
 0xcea   : > { %v7063_v8 = vpop.permute.xlu1 %7062 }
 0xceb   : > { %v7073_v27 = vmul.f32 %v7068_v2, %v7063_v8  ;;  %v7074_v7 = vmul.f32 %v7072_v42, %v7063_v8 }
 0xcef   : > { %v7079_v6 = vpop.permute.xlu1 %7078 }
 0xcf0   : > { %v7089_v38 = vmul.f32 %v7084_v43, %v7079_v6  ;;  %v7090_v24 = vmul.f32 %v7088_v44, %v7079_v6 }
 0xcf2   : > { %v7091_v33 = vadd.f32 %v7089_v38, %v7073_v27  ;;  %v7092_v10 = vadd.f32 %v7090_v24, %v7074_v7 }
 0xcf4   : > { %v7096_v39 = vpop.permute.xlu1 %7095 }
 0xcf5   : > { %v7098_v28 = vadd.f32 %v7096_v39, %v7091_v33  ;;  %v7099_v51 = vadd.f32 %v7096_v39, %v7092_v10 }
 0xcf8   : > { %v7110_v54 = vpop.permute.xlu1 %7109 }
 0xcfd   : > { %v7126_v41 = vpop.permute.xlu1 %7125 }
 0xd02   : > { %v7143_v19 = vpop.permute.xlu1 %7142 }
 0xd5d   : > { %v7103_v3 = vpop.permute.xlu0 %7102 }
 0xd5e   : > { %v7105_v49 = vadd.f32 %v7103_v3, %v7098_v28  ;;  %v7106_v36 = vadd.f32 %v7103_v3, %v7099_v51 }
 0xd60   : > { %v7115_v37 = vrot.slane %v7105_v49, %v14469_v23  ;;  %v7119_v16 = vrot.slane %v7106_v36, %v14469_v23  ;;  %v7131_v9 = vrot.slane %v7105_v49, %v14470_v26  ;;  %v7135_v52 = vrot.slane %v7106_v36, %v14470_v26 }
 0xd62   : > { %v7136_v11 = vmul.f32 %v7131_v9, %v7126_v41  ;;  %v7137_v63 = vmul.f32 %v7135_v52, %v7126_v41  ;;  %v7120_v45 = vmul.f32 %v7115_v37, %v7110_v54  ;;  %v7121_v55 = vmul.f32 %v7119_v16, %v7110_v54 }
 0xd64   : > { %v7138_v48 = vadd.f32 %v7136_v11, %v7120_v45  ;;  %v7139_v59 = vadd.f32 %v7137_v63, %v7121_v55 }
 0xd66   : > { %v7145_v61 = vadd.f32 %v7143_v19, %v7138_v48  ;;  %v7146_v31 = vadd.f32 %v7143_v19, %v7139_v59 }
 0xd68   : > { %v7416_v22 = vmul.f32 -1.442695, %v7145_v61  ;;  %v7417_v17 = vmul.f32 -1.442695, %v7146_v31 }
 0xd6a   : > { %9927 = vpow2.f32 %v7416_v22 }
 0xd6b   : > { %9929 = vpow2.f32 %v7417_v17 }
 0xd74   : > { %v9928_v23 = vpop.eup %9927 }
 0xd75   : > { %v9930_v53 = vpop.eup %9929  ;;  %v7153_v26 = vadd.f32 1.0, %v9928_v23 }
 0xd76   : > { %v7154_v60 = vadd.f32 1.0, %v9930_v53 }
 0xd77   : > { %9931 = vrcp.f32 %v7153_v26 }
 0xd78   : > { %9933 = vrcp.f32 %v7154_v60 }
 0xd81   : > { %v9932_v21 = vpop.eup %9931 }
 0xd82   : > { %v9934_v14 = vpop.eup %9933  ;;  %v7159_v15 = vmul.f32 %v9932_v21, %v13341_v20 }
 0xd83   : > { %v7160_v32 = vmul.f32 %v9934_v14, %v13344_v13 }
 0xd84   : > { %v7161_v12 = vadd.f32 %v9936_v1, %v7159_v15 }
 0xd85   : > { %v7162_v4 = vadd.f32 %v9937_v46, %v7160_v32 }
 0xd86   : > { %7163 = vst [vmem:[%s1397_s11] sm:$0xff] %v7161_v12 }
 0xd87   : > { %7164 = vst [vmem:[%s1397_s11 + $0x8] sm:$0xff] %v7162_v4 }
 0xd88 PF: > { %s100_s7 = sadd.s32 1, %s10308_s7  }
 0xd89   : > { %p97_p7 = scmp.ge.s32.totalorder %s100_s7, 4  }
 0xd8b   :  { %99 = sbr.rel (!%p97_p7) target bundleno = 76 (0x4c), region = 304 }
 0xd92   :  { %7187 = vsyncpa [#allocation3], 1 }
 0xd93   :  { %7189 = vsyncpa [#allocation3 + $0x1], 1 }
 0xd94   :  { %7190 = vsyncpa [#allocation5], 1 }
 0xd95   :  { %7191 = vsyncpa [#allocation8], 1 }
 0xd96   :  { %7192 = vsyncpa [#allocation11], 1 }
 0xd97   :  { %7193 = vsyncpa [#allocation14], 1 }
 0xd98   :  { %7194 = vsyncpa [#allocation17], 1 }
 0xd99   :  { %7195 = vsyncpa [#allocation20], 1 }

</bundles_post_ra>
